<compile_context>
chip_gen: v7x
topology: tpu7x:2x2x1
jax: 0.10.0
libtpu: 0.0.40
codegen_flags: <defaults>
</compile_context>

<pallas_src>
import functools

import jax
import jax.numpy as jnp
from jax.experimental import pallas as pl
from jax.experimental.pallas import tpu as pltpu

NC = 1
YDIM = 10
DF = 64
DFC = 1024
BN_EPS = 1e-5
LEAK = 0.2


# ----------------------------------------------------------------------------
# Fused Pallas kernel:
#   out = act( bn( A @ B [+ Y @ Wy] [+ bias] ) )
# A/B/Y/Wy enter as bf16 (native MXU pass), accumulation + BN + activation in
# f32. Row axis may be tiled only when use_bn is False; column axis may always
# be tiled (BN stats are per column over the full row extent of each block).
# ----------------------------------------------------------------------------
def _fused_kernel(*refs, use_y, use_bias, use_bn, act):
    it = iter(refs)
    a_ref = next(it)
    b_ref = next(it)
    y_ref = wy_ref = bias_ref = None
    if use_y:
        y_ref = next(it)
        wy_ref = next(it)
    if use_bias:
        bias_ref = next(it)
    o_ref = next(it)

    acc = jnp.dot(a_ref[...], b_ref[...], preferred_element_type=jnp.float32)
    if use_y:
        acc = acc + jnp.dot(y_ref[...], wy_ref[...],
                            preferred_element_type=jnp.float32)
    if use_bias:
        acc = acc + bias_ref[...]
    if use_bn:
        # Rows enumerate batch (and spatial positions for the conv layers),
        # columns enumerate channels/features -> per-column batch statistics.
        mean = jnp.mean(acc, axis=0, keepdims=True)
        var = jnp.mean((acc - mean) ** 2, axis=0, keepdims=True)
        acc = (acc - mean) * jax.lax.rsqrt(var + BN_EPS)
    if act == "leaky":
        acc = jnp.where(acc > 0, acc, LEAK * acc)
    elif act == "sigmoid":
        acc = jax.nn.sigmoid(acc)
    o_ref[...] = acc.astype(o_ref.dtype)


def fused_matmul(a, b, *, y=None, wy=None, bias=None, use_bn=False, act="none",
                 block_m=None, block_n=None, out_dtype=jnp.float32):
    m, k = a.shape
    kb, n = b.shape
    assert k == kb
    use_y = y is not None
    use_bias = bias is not None

    bm = m if block_m is None else min(block_m, m)
    bn_ = n if block_n is None else min(block_n, n)
    if use_bn:
        # Batch-statistic BN needs the full row extent in one block; only the
        # feature (column) axis may be tiled.
        assert bm == m

    grid = (pl.cdiv(m, bm), pl.cdiv(n, bn_))

    in_specs = [
        pl.BlockSpec((bm, k), lambda i, j: (i, 0)),
        pl.BlockSpec((k, bn_), lambda i, j: (0, j)),
    ]
    args = [a.astype(jnp.bfloat16), b.astype(jnp.bfloat16)]
    if use_y:
        ky = y.shape[1]
        in_specs += [
            pl.BlockSpec((bm, ky), lambda i, j: (i, 0)),
            pl.BlockSpec((ky, bn_), lambda i, j: (0, j)),
        ]
        args += [y.astype(jnp.bfloat16), wy.astype(jnp.bfloat16)]
    if use_bias:
        in_specs += [pl.BlockSpec((1, bn_), lambda i, j: (0, j))]
        args += [bias.reshape(1, n).astype(jnp.float32)]

    kernel = functools.partial(_fused_kernel, use_y=use_y, use_bias=use_bias,
                               use_bn=use_bn, act=act)
    return pl.pallas_call(
        kernel,
        out_shape=jax.ShapeDtypeStruct((m, n), out_dtype),
        grid=grid,
        in_specs=in_specs,
        out_specs=pl.BlockSpec((bm, bn_), lambda i, j: (i, j)),
        compiler_params=pltpu.CompilerParams(
            dimension_semantics=("parallel", "parallel"),
            vmem_limit_bytes=48 * 1024 * 1024,   # fits v7x's 64 MiB VMEM
        ),
    )(*args)


# ----------------------------------------------------------------------------
# Glue: im2col (NHWC) so a stride-2 conv becomes a matmul.
# TODO(synk): the im2col inflation (9x/16x) could be removed with an in-kernel
# shifted-window conv decomposition, and the spatially-constant y channels
# could be folded into a precomputed per-position rank-10 bias term.
# ----------------------------------------------------------------------------
def _im2col(x_nhwc, k, stride, pad):
    n, h, w, c = x_nhwc.shape
    xp = jnp.pad(x_nhwc, ((0, 0), (pad, pad), (pad, pad), (0, 0)))
    ho = (h + 2 * pad - k) // stride + 1
    wo = (w + 2 * pad - k) // stride + 1
    patches = []
    for di in range(k):
        for dj in range(k):
            patches.append(
                xp[:, di: di + ho * stride: stride, dj: dj + wo * stride: stride, :]
            )
    cols = jnp.stack(patches, axis=3)  # (n, ho, wo, k*k, c) -- order (kh, kw, cin)
    return cols.reshape(n, ho, wo, k * k * c), ho, wo


# ----------------------------------------------------------------------------
# One-time weight re-layout (outside the per-call hot path).
# ----------------------------------------------------------------------------
def prepare_params(params):
    cout2 = DF + YDIM     # 74
    s = 8                 # s_h4 = s_w4
    # conv weights: (Cout, Cin, kh, kw) -> (kh*kw*Cin, Cout), matching im2col.
    w1m = jnp.transpose(params["w1"], (2, 3, 1, 0)).reshape(-1, params["w1"].shape[0])
    w2m = jnp.transpose(params["w2"], (2, 3, 1, 0)).reshape(-1, params["w2"].shape[0])
    # d_l1 consumes cat(NCHW-flattened h1, y). Fold the NHWC->NCHW flatten
    # permutation into the weight and split off the y columns so the kernel
    # consumes the NHWC-flattened activation + raw y directly.
    wx = params["l1_w"][:, : cout2 * s * s].reshape(DFC, cout2, s, s)
    wx = jnp.transpose(wx, (2, 3, 1, 0)).reshape(s * s * cout2, DFC)
    wy = params["l1_w"][:, cout2 * s * s:].T
    w2x = params["l2_w"][:, :DFC].T
    w2y = params["l2_w"][:, DFC:].T
    # NOTE: l1_b is intentionally dropped: BatchNorm1d (gamma=1, beta=0)
    # cancels any pre-BN per-feature bias, so the forward output is identical.
    return {
        "w1_mat": w1m.astype(jnp.bfloat16),
        "w2_mat": w2m.astype(jnp.bfloat16),
        "l1_wx": wx.astype(jnp.bfloat16),
        "l1_wy": wy.astype(jnp.bfloat16),
        "l2_wx": w2x.astype(jnp.bfloat16),
        "l2_wy": w2y.astype(jnp.bfloat16),
        "l2_b": params["l2_b"].astype(jnp.float32),
    }


# ----------------------------------------------------------------------------
# Forward pass (Pallas kernels for all matmul/conv/BN/activation hot paths).
# ----------------------------------------------------------------------------
def discriminator_forward(x_nchw, y, prep):
    n = x_nchw.shape[0]
    x = jnp.transpose(x_nchw, (0, 2, 3, 1)).astype(jnp.bfloat16)   # -> NHWC
    yb = y.astype(jnp.bfloat16)
    h, w = x.shape[1], x.shape[2]

    # cat((x, yb * ones), channel)
    ymap = jnp.broadcast_to(yb[:, None, None, :], (n, h, w, YDIM))
    x = jnp.concatenate([x, ymap], axis=-1)                        # (N,28,28,11)

    # h0 = LeakyReLU(conv1(x));  conv1: k=3, s=2, p=3, no bias
    cols, ho, wo = _im2col(x, 3, 2, 3)                             # 16x16
    a = cols.reshape(n * ho * wo, -1)                              # (N*256, 99)
    h0 = fused_matmul(a, prep["w1_mat"], act="leaky",
                      block_m=512, out_dtype=jnp.bfloat16)
    h0 = h0.reshape(n, ho, wo, -1)                                 # (N,16,16,11)

    # cat((h0, yb * ones), channel)
    ymap = jnp.broadcast_to(yb[:, None, None, :], (n, ho, wo, YDIM))
    h0 = jnp.concatenate([h0, ymap], axis=-1)                      # (N,16,16,21)

    # h1 = LeakyReLU(BN2d(conv2(h0)));  conv2: k=4, s=2, p=1, no bias
    cols, ho2, wo2 = _im2col(h0, 4, 2, 1)                          # 8x8
    a = cols.reshape(n * ho2 * wo2, -1)                            # (N*64, 336)
    h1 = fused_matmul(a, prep["w2_mat"], use_bn=True, act="leaky",
                      out_dtype=jnp.bfloat16)                      # (N*64, 74)

    # Rows are already ordered (n, h, w) so the NHWC flatten is a free
    # row-major reshape; the NCHW permutation lives in prep["l1_wx"].
    h1 = h1.reshape(n, ho2 * wo2 * h1.shape[-1])                   # (N, 4736)

    # h2 = LeakyReLU(BN1d(Linear(cat(h1, y)))) -- y folded into second matmul.
    h2 = fused_matmul(h1, prep["l1_wx"], y=yb, wy=prep["l1_wy"],
                      use_bn=True, act="leaky", block_n=256,
                      out_dtype=jnp.bfloat16)                      # (N, 1024)

    # h3 = Sigmoid(Linear(cat(h2, y)))
    # TODO(synk): the 1-wide output wastes an MXU column tile; could become a
    # VPU multiply + row-reduce once all stages are fused into one kernel.
    h3 = fused_matmul(h2, prep["l2_wx"], y=yb, wy=prep["l2_wy"],
                      bias=prep["l2_b"], act="sigmoid")            # (N, 1)
    return h3


# ----------------------------------------------------------------------------
# Pure-JAX reference (f32 HIGHEST, exact module math) for validation.
# ----------------------------------------------------------------------------
def reference_forward(x, y, params):
    hp = jax.lax.Precision.HIGHEST
    n = x.shape[0]
    yb = y.reshape(n, YDIM, 1, 1)

    xx = jnp.concatenate(
        [x, jnp.broadcast_to(yb, (n, YDIM, x.shape[2], x.shape[3]))], axis=1)
    h0 = jax.lax.conv_general_dilated(
        xx, params["w1"], (2, 2), ((3, 3), (3, 3)),
        dimension_numbers=("NCHW", "OIHW", "NCHW"), precision=hp)
    h0 = jnp.where(h0 > 0, h0, LEAK * h0)
    h0 = jnp.concatenate(
        [h0, jnp.broadcast_to(yb, (n, YDIM, h0.shape[2], h0.shape[3]))], axis=1)

    h1 = jax.lax.conv_general_dilated(
        h0, params["w2"], (2, 2), ((1, 1), (1, 1)),
        dimension_numbers=("NCHW", "OIHW", "NCHW"), precision=hp)
    m1 = jnp.mean(h1, axis=(0, 2, 3), keepdims=True)
    v1 = jnp.mean((h1 - m1) ** 2, axis=(0, 2, 3), keepdims=True)
    h1 = (h1 - m1) * jax.lax.rsqrt(v1 + BN_EPS)
    h1 = jnp.where(h1 > 0, h1, LEAK * h1)
    h1 = h1.reshape(n, -1)
    h1 = jnp.concatenate([h1, y], axis=1)

    h2 = jnp.dot(h1, params["l1_w"].T, precision=hp) + params["l1_b"]
    m2 = jnp.mean(h2, axis=0, keepdims=True)
    v2 = jnp.mean((h2 - m2) ** 2, axis=0, keepdims=True)
    h2 = (h2 - m2) * jax.lax.rsqrt(v2 + BN_EPS)
    h2 = jnp.where(h2 > 0, h2, LEAK * h2)
    h2 = jnp.concatenate([h2, y], axis=1)

    h3 = jax.nn.sigmoid(jnp.dot(h2, params["l2_w"].T, precision=hp) + params["l2_b"])
    return h3


def init_params(key):
    k1, k2, k3, k4, k5, k6 = jax.random.split(key, 6)
    cin1 = NC + YDIM                      # 11
    cin2 = NC + 2 * YDIM                  # 21
    cout2 = DF + YDIM                     # 74
    in_l1 = 8 * 8 * cout2 + YDIM          # 4746
    return {
        "w1": 0.02 * jax.random.normal(k1, (cin1, cin1, 3, 3), jnp.float32),
        "w2": 0.02 * jax.random.normal(k2, (cout2, cin2, 4, 4), jnp.float32),
        "l1_w": 0.05 * jax.random.normal(k3, (DFC, in_l1), jnp.float32),
        "l1_b": 0.01 * jax.random.normal(k4, (DFC,), jnp.float32),
        "l2_w": 0.05 * jax.random.normal(k5, (1, DFC + YDIM), jnp.float32),
        "l2_b": 0.01 * jax.random.normal(k6, (1,), jnp.float32),
    }


if __name__ == "__main__":
    key = jax.random.PRNGKey(0)
    kx, ky, kp = jax.random.split(key, 3)

    # 28x28 input is forced by the module: conv1 (k3,s2,p3) -> 16, conv2
    # (k4,s2,p1) -> 8, and d_l1 expects 8*8*74 flattened features.
    # batch=8: still small, but keeps the batch-statistic BatchNorms
    # numerically non-degenerate for the bf16-vs-f32 comparison.
    batch = 8
    x = jax.random.normal(kx, (batch, NC, 28, 28), jnp.float32)
    y = jax.nn.one_hot(
        jax.random.randint(ky, (batch,), 0, YDIM), YDIM, dtype=jnp.float32)
    params = init_params(kp)
    prep = prepare_params(params)   # one-time weight re-layout / bf16 cast

    out = jax.block_until_ready(jax.jit(discriminator_forward)(x, y, prep))
    ref = jax.block_until_ready(jax.jit(reference_forward)(x, y, params))

    assert out.shape == (batch, 1), out.shape
    assert bool(jnp.all(jnp.isfinite(out)))
    # bf16 MXU matmuls (per perf review) vs. f32-HIGHEST reference through
    # batch-statistic BatchNorm -> slightly looser tolerance than pure f32.
    assert bool(jnp.allclose(out, ref, atol=2e-2)), (out, ref)
    print("KERNEL_OK")
</pallas_src>

<mosaic_0001>
module attributes {stable_mosaic.version = 11 : i64} {
  func.func @_fused_kernel(%arg0: i32, %arg1: i32, %arg2: memref<512x99xbf16, #tpu.memory_space<vmem>>, %arg3: memref<99x11xbf16, #tpu.memory_space<vmem>>, %arg4: memref<512x11xbf16, #tpu.memory_space<vmem>>) attributes {dimension_semantics = [#tpu.dimension_semantics<parallel>, #tpu.dimension_semantics<parallel>], iteration_bounds = array<i64: 4, 1>, scalar_prefetch = 0 : i64, scratch_operands = 0 : i64, tpu.core_type = #tpu.core_type<tc>, window_params = [{transform_indices = @transform_0, window_bounds = array<i64: 512, 99>}, {transform_indices = @transform_1, window_bounds = array<i64: 99, 11>}, {transform_indices = @transform_2, window_bounds = array<i64: 512, 11>}]} {
    %c0 = arith.constant 0 : index
    %c0_0 = arith.constant 0 : index
    %0 = vector.load %arg2[%c0, %c0_0] : memref<512x99xbf16, #tpu.memory_space<vmem>>, vector<512x99xbf16>
    %c0_1 = arith.constant 0 : index
    %c0_2 = arith.constant 0 : index
    %1 = vector.load %arg3[%c0_1, %c0_2] : memref<99x11xbf16, #tpu.memory_space<vmem>>, vector<99x11xbf16>
    %cst = arith.constant dense<0.000000e+00> : vector<512x11xf32>
    %2 = tpu.matmul %0, %1, %cst {dimension_numbers = #tpu.dot_dimension_numbers<[1], [0], [0], [1], [0, 0, 1, 1], [], []>} : vector<512x99xbf16>, vector<99x11xbf16>, vector<512x11xf32> -> vector<512x11xf32>
    %cst_3 = arith.constant 0.000000e+00 : f32
    %3 = vector.broadcast %cst_3 : f32 to vector<512x11xf32>
    %4 = arith.cmpf ogt, %2, %3 : vector<512x11xf32>
    %cst_4 = arith.constant 2.000000e-01 : f32
    %5 = vector.broadcast %cst_4 : f32 to vector<512x11xf32>
    %6 = arith.mulf %5, %2 : vector<512x11xf32>
    %7 = arith.select %4, %2, %6 : vector<512x11xi1>, vector<512x11xf32>
    %8 = arith.truncf %7 : vector<512x11xf32> to vector<512x11xbf16>
    %c0_5 = arith.constant 0 : index
    %c0_6 = arith.constant 0 : index
    %9 = vector.load %arg4[%c0_5, %c0_6] : memref<512x11xbf16, #tpu.memory_space<vmem>>, vector<512x11xbf16>
    tpu.vector_store %arg4[%c0_5, %c0_6], %8 {strides = array<i32>} : memref<512x11xbf16, #tpu.memory_space<vmem>>, vector<512x11xbf16>,
    return
  }
  func.func @transform_0(%arg0: i32, %arg1: i32) -> (i32, i32) {
    %c0_i32 = arith.constant 0 : i32
    %c0_i32_0 = arith.constant 0 : i32
    return %arg0, %c0_i32 : i32, i32
  }
  func.func @transform_1(%arg0: i32, %arg1: i32) -> (i32, i32) {
    %c0_i32 = arith.constant 0 : i32
    %c0_i32_0 = arith.constant 0 : i32
    return %c0_i32, %arg1 : i32, i32
  }
  func.func @transform_2(%arg0: i32, %arg1: i32) -> (i32, i32) {
    %c0_i32 = arith.constant 0 : i32
    return %arg0, %arg1 : i32, i32
  }
}

module attributes {stable_mosaic.version = 11 : i64} {
  func.func @_fused_kernel(%arg0: i32, %arg1: i32, %arg2: memref<512x336xbf16, #tpu.memory_space<vmem>>, %arg3: memref<336x74xbf16, #tpu.memory_space<vmem>>, %arg4: memref<512x74xbf16, #tpu.memory_space<vmem>>) attributes {dimension_semantics = [#tpu.dimension_semantics<parallel>, #tpu.dimension_semantics<parallel>], iteration_bounds = array<i64: 1, 1>, scalar_prefetch = 0 : i64, scratch_operands = 0 : i64, tpu.core_type = #tpu.core_type<tc>, window_params = [{transform_indices = @transform_0, window_bounds = array<i64: 512, 336>}, {transform_indices = @transform_1, window_bounds = array<i64: 336, 74>}, {transform_indices = @transform_2, window_bounds = array<i64: 512, 74>}]} {
    %c0 = arith.constant 0 : index
    %c0_0 = arith.constant 0 : index
    %0 = vector.load %arg2[%c0, %c0_0] : memref<512x336xbf16, #tpu.memory_space<vmem>>, vector<512x336xbf16>
    %c0_1 = arith.constant 0 : index
    %c0_2 = arith.constant 0 : index
    %1 = vector.load %arg3[%c0_1, %c0_2] : memref<336x74xbf16, #tpu.memory_space<vmem>>, vector<336x74xbf16>
    %cst = arith.constant dense<0.000000e+00> : vector<512x74xf32>
    %2 = tpu.matmul %0, %1, %cst {dimension_numbers = #tpu.dot_dimension_numbers<[1], [0], [0], [1], [0, 0, 1, 1], [], []>} : vector<512x336xbf16>, vector<336x74xbf16>, vector<512x74xf32> -> vector<512x74xf32>
    %cst_3 = arith.constant dense<0.000000e+00> : vector<74xf32>
    %3 = vector.multi_reduction <add>, %2, %cst_3 [0] : vector<512x74xf32> to vector<74xf32>
    %4 = vector.shape_cast %3 : vector<74xf32> to vector<1x74xf32>
    %cst_4 = arith.constant 5.120000e+02 : f32
    %5 = vector.broadcast %cst_4 : f32 to vector<1x74xf32>
    %6 = arith.divf %4, %5 : vector<1x74xf32>
    %7 = vector.broadcast %6 : vector<1x74xf32> to vector<512x74xf32>
    %8 = arith.subf %2, %7 : vector<512x74xf32>
    %9 = arith.mulf %8, %8 : vector<512x74xf32>
    %cst_5 = arith.constant dense<0.000000e+00> : vector<74xf32>
    %10 = vector.multi_reduction <add>, %9, %cst_5 [0] : vector<512x74xf32> to vector<74xf32>
    %11 = vector.shape_cast %10 : vector<74xf32> to vector<1x74xf32>
    %cst_6 = arith.constant 5.120000e+02 : f32
    %12 = vector.broadcast %cst_6 : f32 to vector<1x74xf32>
    %13 = arith.divf %11, %12 : vector<1x74xf32>
    %14 = vector.broadcast %6 : vector<1x74xf32> to vector<512x74xf32>
    %15 = arith.subf %2, %14 : vector<512x74xf32>
    %cst_7 = arith.constant 9.99999974E-6 : f32
    %16 = vector.broadcast %cst_7 : f32 to vector<1x74xf32>
    %17 = arith.addf %13, %16 : vector<1x74xf32>
    %18 = math.rsqrt %17 : vector<1x74xf32>
    %19 = vector.broadcast %18 : vector<1x74xf32> to vector<512x74xf32>
    %20 = arith.mulf %15, %19 : vector<512x74xf32>
    %cst_8 = arith.constant 0.000000e+00 : f32
    %21 = vector.broadcast %cst_8 : f32 to vector<512x74xf32>
    %22 = arith.cmpf ogt, %20, %21 : vector<512x74xf32>
    %cst_9 = arith.constant 2.000000e-01 : f32
    %23 = vector.broadcast %cst_9 : f32 to vector<512x74xf32>
    %24 = arith.mulf %23, %20 : vector<512x74xf32>
    %25 = arith.select %22, %20, %24 : vector<512x74xi1>, vector<512x74xf32>
    %26 = arith.truncf %25 : vector<512x74xf32> to vector<512x74xbf16>
    %c0_10 = arith.constant 0 : index
    %c0_11 = arith.constant 0 : index
    %27 = vector.load %arg4[%c0_10, %c0_11] : memref<512x74xbf16, #tpu.memory_space<vmem>>, vector<512x74xbf16>
    tpu.vector_store %arg4[%c0_10, %c0_11], %26 {strides = array<i32>} : memref<512x74xbf16, #tpu.memory_space<vmem>>, vector<512x74xbf16>,
    return
  }
  func.func @transform_0(%arg0: i32, %arg1: i32) -> (i32, i32) {
    %c0_i32 = arith.constant 0 : i32
    %c0_i32_0 = arith.constant 0 : i32
    return %arg0, %c0_i32 : i32, i32
  }
  func.func @transform_1(%arg0: i32, %arg1: i32) -> (i32, i32) {
    %c0_i32 = arith.constant 0 : i32
    %c0_i32_0 = arith.constant 0 : i32
    return %c0_i32, %arg1 : i32, i32
  }
  func.func @transform_2(%arg0: i32, %arg1: i32) -> (i32, i32) {
    %c0_i32 = arith.constant 0 : i32
    return %arg0, %arg1 : i32, i32
  }
}

module attributes {stable_mosaic.version = 11 : i64} {
  func.func @_fused_kernel(%arg0: i32, %arg1: i32, %arg2: memref<8x4736xbf16, #tpu.memory_space<vmem>>, %arg3: memref<4736x256xbf16, #tpu.memory_space<vmem>>, %arg4: memref<8x10xbf16, #tpu.memory_space<vmem>>, %arg5: memref<10x256xbf16, #tpu.memory_space<vmem>>, %arg6: memref<8x256xbf16, #tpu.memory_space<vmem>>) attributes {dimension_semantics = [#tpu.dimension_semantics<parallel>, #tpu.dimension_semantics<parallel>], iteration_bounds = array<i64: 1, 4>, scalar_prefetch = 0 : i64, scratch_operands = 0 : i64, tpu.core_type = #tpu.core_type<tc>, window_params = [{transform_indices = @transform_0, window_bounds = array<i64: 8, 4736>}, {transform_indices = @transform_1, window_bounds = array<i64: 4736, 256>}, {transform_indices = @transform_2, window_bounds = array<i64: 8, 10>}, {transform_indices = @transform_3, window_bounds = array<i64: 10, 256>}, {transform_indices = @transform_4, window_bounds = array<i64: 8, 256>}]} {
    %c0 = arith.constant 0 : index
    %c0_0 = arith.constant 0 : index
    %0 = vector.load %arg2[%c0, %c0_0] : memref<8x4736xbf16, #tpu.memory_space<vmem>>, vector<8x4736xbf16>
    %c0_1 = arith.constant 0 : index
    %c0_2 = arith.constant 0 : index
    %1 = vector.load %arg3[%c0_1, %c0_2] : memref<4736x256xbf16, #tpu.memory_space<vmem>>, vector<4736x256xbf16>
    %cst = arith.constant dense<0.000000e+00> : vector<8x256xf32>
    %2 = tpu.matmul %0, %1, %cst {dimension_numbers = #tpu.dot_dimension_numbers<[1], [0], [0], [1], [0, 0, 1, 1], [], []>} : vector<8x4736xbf16>, vector<4736x256xbf16>, vector<8x256xf32> -> vector<8x256xf32>
    %c0_3 = arith.constant 0 : index
    %c0_4 = arith.constant 0 : index
    %3 = vector.load %arg4[%c0_3, %c0_4] : memref<8x10xbf16, #tpu.memory_space<vmem>>, vector<8x10xbf16>
    %c0_5 = arith.constant 0 : index
    %c0_6 = arith.constant 0 : index
    %4 = vector.load %arg5[%c0_5, %c0_6] : memref<10x256xbf16, #tpu.memory_space<vmem>>, vector<10x256xbf16>
    %cst_7 = arith.constant dense<0.000000e+00> : vector<8x256xf32>
    %5 = tpu.matmul %3, %4, %cst_7 {dimension_numbers = #tpu.dot_dimension_numbers<[1], [0], [0], [1], [0, 0, 1, 1], [], []>} : vector<8x10xbf16>, vector<10x256xbf16>, vector<8x256xf32> -> vector<8x256xf32>
    %6 = arith.addf %2, %5 : vector<8x256xf32>
    %cst_8 = arith.constant dense<0.000000e+00> : vector<256xf32>
    %7 = vector.multi_reduction <add>, %6, %cst_8 [0] : vector<8x256xf32> to vector<256xf32>
    %8 = vector.shape_cast %7 : vector<256xf32> to vector<1x256xf32>
    %cst_9 = arith.constant 8.000000e+00 : f32
    %9 = vector.broadcast %cst_9 : f32 to vector<1x256xf32>
    %10 = arith.divf %8, %9 : vector<1x256xf32>
    %11 = vector.broadcast %10 : vector<1x256xf32> to vector<8x256xf32>
    %12 = arith.subf %6, %11 : vector<8x256xf32>
    %13 = arith.mulf %12, %12 : vector<8x256xf32>
    %cst_10 = arith.constant dense<0.000000e+00> : vector<256xf32>
    %14 = vector.multi_reduction <add>, %13, %cst_10 [0] : vector<8x256xf32> to vector<256xf32>
    %15 = vector.shape_cast %14 : vector<256xf32> to vector<1x256xf32>
    %cst_11 = arith.constant 8.000000e+00 : f32
    %16 = vector.broadcast %cst_11 : f32 to vector<1x256xf32>
    %17 = arith.divf %15, %16 : vector<1x256xf32>
    %18 = vector.broadcast %10 : vector<1x256xf32> to vector<8x256xf32>
    %19 = arith.subf %6, %18 : vector<8x256xf32>
    %cst_12 = arith.constant 9.99999974E-6 : f32
    %20 = vector.broadcast %cst_12 : f32 to vector<1x256xf32>
    %21 = arith.addf %17, %20 : vector<1x256xf32>
    %22 = math.rsqrt %21 : vector<1x256xf32>
    %23 = vector.broadcast %22 : vector<1x256xf32> to vector<8x256xf32>
    %24 = arith.mulf %19, %23 : vector<8x256xf32>
    %cst_13 = arith.constant 0.000000e+00 : f32
    %25 = vector.broadcast %cst_13 : f32 to vector<8x256xf32>
    %26 = arith.cmpf ogt, %24, %25 : vector<8x256xf32>
    %cst_14 = arith.constant 2.000000e-01 : f32
    %27 = vector.broadcast %cst_14 : f32 to vector<8x256xf32>
    %28 = arith.mulf %27, %24 : vector<8x256xf32>
    %29 = arith.select %26, %24, %28 : vector<8x256xi1>, vector<8x256xf32>
    %30 = arith.truncf %29 : vector<8x256xf32> to vector<8x256xbf16>
    %c0_15 = arith.constant 0 : index
    %c0_16 = arith.constant 0 : index
    %31 = vector.load %arg6[%c0_15, %c0_16] : memref<8x256xbf16, #tpu.memory_space<vmem>>, vector<8x256xbf16>
    tpu.vector_store %arg6[%c0_15, %c0_16], %30 {strides = array<i32>} : memref<8x256xbf16, #tpu.memory_space<vmem>>, vector<8x256xbf16>,
    return
  }
  func.func @transform_0(%arg0: i32, %arg1: i32) -> (i32, i32) {
    %c0_i32 = arith.constant 0 : i32
    %c0_i32_0 = arith.constant 0 : i32
    return %arg0, %c0_i32 : i32, i32
  }
  func.func @transform_1(%arg0: i32, %arg1: i32) -> (i32, i32) {
    %c0_i32 = arith.constant 0 : i32
    %c0_i32_0 = arith.constant 0 : i32
    return %c0_i32, %arg1 : i32, i32
  }
  func.func @transform_2(%arg0: i32, %arg1: i32) -> (i32, i32) {
    %c0_i32 = arith.constant 0 : i32
    %c0_i32_0 = arith.constant 0 : i32
    return %arg0, %c0_i32 : i32, i32
  }
  func.func @transform_3(%arg0: i32, %arg1: i32) -> (i32, i32) {
    %c0_i32 = arith.constant 0 : i32
    %c0_i32_0 = arith.constant 0 : i32
    return %c0_i32, %arg1 : i32, i32
  }
  func.func @transform_4(%arg0: i32, %arg1: i32) -> (i32, i32) {
    %c0_i32 = arith.constant 0 : i32
    return %arg0, %arg1 : i32, i32
  }
}

module attributes {stable_mosaic.version = 11 : i64} {
  func.func @_fused_kernel(%arg0: i32, %arg1: i32, %arg2: memref<8x1024xbf16, #tpu.memory_space<vmem>>, %arg3: memref<1024x1xbf16, #tpu.memory_space<vmem>>, %arg4: memref<8x10xbf16, #tpu.memory_space<vmem>>, %arg5: memref<10x1xbf16, #tpu.memory_space<vmem>>, %arg6: memref<1x1xf32, #tpu.memory_space<vmem>>, %arg7: memref<8x1xf32, #tpu.memory_space<vmem>>) attributes {dimension_semantics = [#tpu.dimension_semantics<parallel>, #tpu.dimension_semantics<parallel>], iteration_bounds = array<i64: 1, 1>, scalar_prefetch = 0 : i64, scratch_operands = 0 : i64, tpu.core_type = #tpu.core_type<tc>, window_params = [{transform_indices = @transform_0, window_bounds = array<i64: 8, 1024>}, {transform_indices = @transform_1, window_bounds = array<i64: 1024, 1>}, {transform_indices = @transform_2, window_bounds = array<i64: 8, 10>}, {transform_indices = @transform_3, window_bounds = array<i64: 10, 1>}, {transform_indices = @transform_4, window_bounds = array<i64: 1, 1>}, {transform_indices = @transform_5, window_bounds = array<i64: 8, 1>}]} {
    %c0 = arith.constant 0 : index
    %c0_0 = arith.constant 0 : index
    %0 = vector.load %arg2[%c0, %c0_0] : memref<8x1024xbf16, #tpu.memory_space<vmem>>, vector<8x1024xbf16>
    %c0_1 = arith.constant 0 : index
    %c0_2 = arith.constant 0 : index
    %1 = vector.load %arg3[%c0_1, %c0_2] : memref<1024x1xbf16, #tpu.memory_space<vmem>>, vector<1024x1xbf16>
    %cst = arith.constant dense<0.000000e+00> : vector<8x1xf32>
    %2 = tpu.matmul %0, %1, %cst {dimension_numbers = #tpu.dot_dimension_numbers<[1], [0], [0], [1], [0, 0, 1, 1], [], []>} : vector<8x1024xbf16>, vector<1024x1xbf16>, vector<8x1xf32> -> vector<8x1xf32>
    %c0_3 = arith.constant 0 : index
    %c0_4 = arith.constant 0 : index
    %3 = vector.load %arg4[%c0_3, %c0_4] : memref<8x10xbf16, #tpu.memory_space<vmem>>, vector<8x10xbf16>
    %c0_5 = arith.constant 0 : index
    %c0_6 = arith.constant 0 : index
    %4 = vector.load %arg5[%c0_5, %c0_6] : memref<10x1xbf16, #tpu.memory_space<vmem>>, vector<10x1xbf16>
    %cst_7 = arith.constant dense<0.000000e+00> : vector<8x1xf32>
    %5 = tpu.matmul %3, %4, %cst_7 {dimension_numbers = #tpu.dot_dimension_numbers<[1], [0], [0], [1], [0, 0, 1, 1], [], []>} : vector<8x10xbf16>, vector<10x1xbf16>, vector<8x1xf32> -> vector<8x1xf32>
    %6 = arith.addf %2, %5 : vector<8x1xf32>
    %c0_8 = arith.constant 0 : index
    %c0_9 = arith.constant 0 : index
    %7 = vector.load %arg6[%c0_8, %c0_9] : memref<1x1xf32, #tpu.memory_space<vmem>>, vector<1x1xf32>
    %8 = vector.broadcast %7 : vector<1x1xf32> to vector<8x1xf32>
    %9 = arith.addf %6, %8 : vector<8x1xf32>
    %10 = arith.negf %9 : vector<8x1xf32>
    %11 = math.exp %10 : vector<8x1xf32>
    %cst_10 = arith.constant 1.000000e+00 : f32
    %12 = vector.broadcast %cst_10 : f32 to vector<8x1xf32>
    %13 = arith.addf %12, %11 : vector<8x1xf32>
    %14 = arith.divf %12, %13 : vector<8x1xf32>
    %c0_11 = arith.constant 0 : index
    %c0_12 = arith.constant 0 : index
    %15 = vector.load %arg7[%c0_11, %c0_12] : memref<8x1xf32, #tpu.memory_space<vmem>>, vector<8x1xf32>
    tpu.vector_store %arg7[%c0_11, %c0_12], %14 {strides = array<i32>} : memref<8x1xf32, #tpu.memory_space<vmem>>, vector<8x1xf32>,
    return
  }
  func.func @transform_0(%arg0: i32, %arg1: i32) -> (i32, i32) {
    %c0_i32 = arith.constant 0 : i32
    %c0_i32_0 = arith.constant 0 : i32
    return %arg0, %c0_i32 : i32, i32
  }
  func.func @transform_1(%arg0: i32, %arg1: i32) -> (i32, i32) {
    %c0_i32 = arith.constant 0 : i32
    %c0_i32_0 = arith.constant 0 : i32
    return %c0_i32, %arg1 : i32, i32
  }
  func.func @transform_2(%arg0: i32, %arg1: i32) -> (i32, i32) {
    %c0_i32 = arith.constant 0 : i32
    %c0_i32_0 = arith.constant 0 : i32
    return %arg0, %c0_i32 : i32, i32
  }
  func.func @transform_3(%arg0: i32, %arg1: i32) -> (i32, i32) {
    %c0_i32 = arith.constant 0 : i32
    %c0_i32_0 = arith.constant 0 : i32
    return %c0_i32, %arg1 : i32, i32
  }
  func.func @transform_4(%arg0: i32, %arg1: i32) -> (i32, i32) {
    %c0_i32 = arith.constant 0 : i32
    %c0_i32_0 = arith.constant 0 : i32
    return %c0_i32, %arg1 : i32, i32
  }
  func.func @transform_5(%arg0: i32, %arg1: i32) -> (i32, i32) {
    %c0_i32 = arith.constant 0 : i32
    return %arg0, %arg1 : i32, i32
  }
}

</mosaic_0001>

<bundles_post_ra>
// kernel: discriminator_forward.4
= control target key start
LH: loop header
LB: loop body
LE: loop exit
PB: predicated region body
PF: predicated region fallthrough
CT: control target
= control target key end

     0   :  { %s1903_s9 = smov 0   ;;  %s1905_s10 = smov 0   ;;  %s2161_s0 = inlined_call_operand.vmem [shape: bf16[2048,99], index: 0, kind: input, shape index: {}]   ;;  %s2162_s1 = inlined_call_operand.vmem [shape: bf16[99,11], index: 1, kind: input, shape index: {}]   ;;  %s2163_s2 = inlined_call_operand.vmem [shape: bf16[2048,11], index: 2, kind: output, shape index: {}]  }
   0x1   :  { %s1907_s11 = smov 0  }
   0x2 LB: > { %s24_s12 = sadd.s32 1, %s1881_s10  ;;  %p1462_p0 = scmp.ge.s32.totalorder %s1885_s11, 1  ;;  %s1885_s11 = sphi %s1907_s11, %s12_s11   ;;  %s1881_s10 = sphi %s1905_s10, %s2165_s10   ;;  %s1877_s9 = sphi %s1903_s9, %s2164_s9  }
   0x3   : > { %p26_p1 = scmp.ge.s32.totalorder %s24_s12, 4  ;;  %p136_p2 = scmp.lt.s32.totalorder %s1885_s11, 5 }
   0x5   : > { %s2167_s12 = smov (%p26_p1, %s24_s12), 0  ;;  %p137_p3 = pnand %p1462_p0, %p136_p2 }
   0x6   : > { %v1824_v0 = vld [vmem:[%s2162_s1] sm:$0xff] (!%p137_p3)   ;;  %v1825_v1 = vld [vmem:[%s2162_s1 + $0x8] sm:$0xff] (!%p137_p3)   ;;  %v1826_v2 = vld [vmem:[%s2162_s1 + $0x10] sm:$0xff] (!%p137_p3)   ;;  %s1463_s19 = sshll.u32 (!%p137_p3), %s1877_s9, 6  ;;  %vm558_vm0 = vcmask (!%p137_p3), 1040384   ;;  %vm461_vm1 = vcmask (!%p137_p3), 809984  }
   0x7   : > { %140 = sbr.rel (%p137_p3) target bundleno = 319 (0x13f), region = 28  ;;  %1707 = vmatprep.subr.bf16.mxu0 (!%p137_p3), %v1824_v0  ;;  %1785 = vmatprep.subr.bf16.mxu1 (!%p137_p3), %v1824_v0  ;;  %p166_p4 = scmp.lt.s32.totalorder (!%p137_p3), %s1463_s19, 255  ;;  %v1827_v3 = vld [vmem:[%s2162_s1 + $0x18] sm:$0xff] (!%p137_p3)   ;;  %v1828_v4 = vld [vmem:[%s2162_s1 + $0x20] sm:$0xff] (!%p137_p3)   ;;  %vm559_vm2 = vcmask (!%p137_p3), 1041408   ;;  %v1887_v8 = vmov (!%p137_p3), 65535  }
   0x8   : > { %1708 = vmatpush3.bf16.msra.mxu0 (!%p137_p3), %v1824_v0  ;;  %1792 = vmatpush3.bf16.msra.mxu1 (!%p137_p3), %v1824_v0  ;;  %v1830_v7 = vld [vmem:[%s2162_s1 + $0x30] ss:$0 sps:$4 sm:$0x33] (!%p137_p3)   ;;  %v560_v9 = vsel (!%p137_p3), %vm558_vm0, 4294967295, %v1887_v8  ;;  %v1829_v10 = vld [vmem:[%s2162_s1 + $0x28] sm:$0xff] (!%p137_p3)   ;;  %vm1302_vm5 = vcmask (!%p137_p3), 84992  }
   0x9   : > { %1709 = vmatprep.subr.bf16.mxu0 (!%p137_p3), %v1825_v1  ;;  %1786 = vmatprep.subr.bf16.mxu1 (!%p137_p3), %v1825_v1  ;;  %v561_v11 = vsel (!%p137_p3), %vm559_vm2, %v560_v9, 0 }
   0xa   : > { %v563_v12 = vand.u32 (!%p137_p3), %v1830_v7, %v561_v11 }
   0xc   : > { %1710 = vmatpush3.bf16.msra.mxu0 (!%p137_p3), %v1825_v1  ;;  %1793 = vmatpush3.bf16.msra.mxu1 (!%p137_p3), %v1825_v1 }
   0xd   : > { %1711 = vmatprep.subr.bf16.mxu0 (!%p137_p3), %v1826_v2  ;;  %1787 = vmatprep.subr.bf16.mxu1 (!%p137_p3), %v1826_v2 }
   0xe   : > { %s2169_s19 = smov (!%p166_p4, %s1463_s19), 255 }
   0xf   : > { %s1464_s22 = sshll.u32 %s2169_s19, 2 }
  0x10   : > { %1712 = vmatpush3.bf16.msra.mxu0 %v1826_v2  ;;  %1794 = vmatpush3.bf16.msra.mxu1 %v1826_v2  ;;  %s1944_s27 = scalar_lea.vmem %s2161_s0, %s1464_s22  ;;  %s2021_s6 = scalar_lea.vmem %s2163_s2, %s1464_s22 }
  0x11   : > { %1713 = vmatprep.subr.bf16.mxu0 %v1827_v3  ;;  %1788 = vmatprep.subr.bf16.mxu1 %v1827_v3  ;;  %v1831_v5 = vld [vmem:[%s1944_s27] sm:$0xff]   ;;  %v1833_v13 = vld [vmem:[%s1944_s27 + $0x8] sm:$0xff]   ;;  %v1835_v15 = vld [vmem:[%s1944_s27 + $0x10] sm:$0xff]  }
  0x12   : > { %v1832_v6 = vld [vmem:[%s1944_s27 + $0x80] sm:$0xff]   ;;  %1721 = vmatprep.mubr.msk.bf16.mxu0 %vm461_vm1, %v1831_v5  ;;  %v1834_v14 = vld [vmem:[%s1944_s27 + $0x88] sm:$0xff]   ;;  %v1836_v16 = vld [vmem:[%s1944_s27 + $0x90] sm:$0xff]  }
  0x13   : > { %1753 = vmatprep.mubr.msk.bf16.mxu1 %vm461_vm1, %v1832_v6  ;;  %v1837_v17 = vld [vmem:[%s1944_s27 + $0x18] sm:$0xff]   ;;  %v1839_v19 = vld [vmem:[%s1944_s27 + $0x20] sm:$0xff]   ;;  %v1841_v21 = vld [vmem:[%s1944_s27 + $0x28] sm:$0xff]  }
  0x14   : > { %1714 = vmatpush3.bf16.msra.mxu0 %v1827_v3  ;;  %1795 = vmatpush3.bf16.msra.mxu1 %v1827_v3  ;;  %v1838_v18 = vld [vmem:[%s1944_s27 + $0x98] sm:$0xff]   ;;  %v1840_v20 = vld [vmem:[%s1944_s27 + $0xa0] sm:$0xff]   ;;  %v1842_v22 = vld [vmem:[%s1944_s27 + $0xa8] sm:$0xff]  }
  0x15   : > { %1715 = vmatprep.subr.bf16.mxu0 %v1828_v4  ;;  %1789 = vmatprep.subr.bf16.mxu1 %v1828_v4  ;;  %v1843_v23 = vld [vmem:[%s1944_s27 + $0x30] sm:$0xff]   ;;  %v1845_v25 = vld [vmem:[%s1944_s27 + $0x38] sm:$0xff]   ;;  %v1847_v27 = vld [vmem:[%s1944_s27 + $0x40] sm:$0xff]  }
  0x16   : > { %v1844_v24 = vld [vmem:[%s1944_s27 + $0xb0] sm:$0xff]   ;;  %v1846_v26 = vld [vmem:[%s1944_s27 + $0xb8] sm:$0xff]   ;;  %v1848_v28 = vld [vmem:[%s1944_s27 + $0xc0] sm:$0xff]  }
  0x17   : > { %v1849_v29 = vld [vmem:[%s1944_s27 + $0x48] sm:$0xff]   ;;  %v1851_v31 = vld [vmem:[%s1944_s27 + $0x50] sm:$0xff]   ;;  %v1853_v33 = vld [vmem:[%s1944_s27 + $0x58] sm:$0xff]  }
  0x18   : > { %1716 = vmatpush3.bf16.msra.mxu0 %v1828_v4  ;;  %1796 = vmatpush3.bf16.msra.mxu1 %v1828_v4  ;;  %v1850_v30 = vld [vmem:[%s1944_s27 + $0xc8] sm:$0xff]   ;;  %v1852_v32 = vld [vmem:[%s1944_s27 + $0xd0] sm:$0xff]   ;;  %v1854_v34 = vld [vmem:[%s1944_s27 + $0xd8] sm:$0xff]  }
  0x19   : > { %1717 = vmatprep.subr.bf16.mxu0 %v1829_v10  ;;  %1790 = vmatprep.subr.bf16.mxu1 %v1829_v10  ;;  %v1855_v35 = vld [vmem:[%s1944_s27 + $0x60] sm:$0xff]   ;;  %v1857_v37 = vld [vmem:[%s1944_s27 + $0x68] sm:$0xff]   ;;  %v1859_v39 = vld [vmem:[%s1944_s27 + $0x70] sm:$0xff]  }
  0x1a   : > { %v1856_v36 = vld [vmem:[%s1944_s27 + $0xe0] sm:$0xff]   ;;  %v1858_v38 = vld [vmem:[%s1944_s27 + $0xe8] sm:$0xff]   ;;  %v1860_v40 = vld [vmem:[%s1944_s27 + $0xf0] sm:$0xff]  }
  0x1b   : > { %v1861_v41 = vld [vmem:[%s1944_s27 + $0x78] sm:$0xff]  }
  0x1c   : > { %1718 = vmatpush3.bf16.msra.mxu0 %v1829_v10  ;;  %1797 = vmatpush3.bf16.msra.mxu1 %v1829_v10  ;;  %v1862_v42 = vld [vmem:[%s1944_s27 + $0xf8] sm:$0xff]  }
  0x1d   : > { %1719 = vmatprep.subr.bf16.mxu0 %v563_v12  ;;  %1791 = vmatprep.subr.bf16.mxu1 %v563_v12 }
  0x20   : > { %1720 = vmatpush3.bf16.msra.mxu0 %v563_v12  ;;  %1798 = vmatpush3.bf16.msra.mxu1 %v563_v12 }
  0x23   : > { %1722 = vmatmul.mubr.msk.bf16.vlgmr.msra.gmra.mrb[0].mxu0 %vm461_vm1, %v1833_v13  ;;  %1754 = vmatmul.mubr.msk.bf16.vlgmr.msra.gmra.mrb[0].mxu1 %vm461_vm1, %v1834_v14 }
  0x24   : > { %1725 = vmatprep.mubr.msk.bf16.mxu0 %vm461_vm1, %v1835_v15  ;;  %1757 = vmatprep.mubr.msk.bf16.mxu1 %vm461_vm1, %v1836_v16 }
  0x2b   : > { %1726 = vmatmul.mubr.msk.bf16.gmra.mrb[4].mxu0 %vm461_vm1, %v1837_v17  ;;  %1758 = vmatmul.mubr.msk.bf16.gmra.mrb[4].mxu1 %vm461_vm1, %v1838_v18 }
  0x2c   : > { %1729 = vmatprep.mubr.msk.bf16.mxu0 %vm461_vm1, %v1839_v19  ;;  %1761 = vmatprep.mubr.msk.bf16.mxu1 %vm461_vm1, %v1840_v20 }
  0x33   : > { %1730 = vmatmul.mubr.msk.bf16.gmra.mrb[8].mxu0 %vm461_vm1, %v1841_v21  ;;  %1762 = vmatmul.mubr.msk.bf16.gmra.mrb[8].mxu1 %vm461_vm1, %v1842_v22 }
  0x34   : > { %1733 = vmatprep.mubr.msk.bf16.mxu0 %vm461_vm1, %v1843_v23  ;;  %1765 = vmatprep.mubr.msk.bf16.mxu1 %vm461_vm1, %v1844_v24 }
  0x3b   : > { %1734 = vmatmul.mubr.msk.bf16.gmra.mrb[12].mxu0 %vm461_vm1, %v1845_v25  ;;  %1766 = vmatmul.mubr.msk.bf16.gmra.mrb[12].mxu1 %vm461_vm1, %v1846_v26 }
  0x3c   : > { %1737 = vmatprep.mubr.msk.bf16.mxu0 %vm461_vm1, %v1847_v27  ;;  %1769 = vmatprep.mubr.msk.bf16.mxu1 %vm461_vm1, %v1848_v28 }
  0x43   : > { %1738 = vmatmul.mubr.msk.bf16.gmra.mrb[16].mxu0 %vm461_vm1, %v1849_v29  ;;  %1770 = vmatmul.mubr.msk.bf16.gmra.mrb[16].mxu1 %vm461_vm1, %v1850_v30 }
  0x44   : > { %1741 = vmatprep.mubr.msk.bf16.mxu0 %vm461_vm1, %v1851_v31  ;;  %1773 = vmatprep.mubr.msk.bf16.mxu1 %vm461_vm1, %v1852_v32 }
  0x4b   : > { %1742 = vmatmul.mubr.msk.bf16.gmra.mrb[20].mxu0 %vm461_vm1, %v1853_v33  ;;  %1774 = vmatmul.mubr.msk.bf16.gmra.mrb[20].mxu1 %vm461_vm1, %v1854_v34 }
  0x4c   : > { %1745 = vmatprep.mubr.msk.bf16.mxu0 %vm461_vm1, %v1855_v35  ;;  %1777 = vmatprep.mubr.msk.bf16.mxu1 %vm461_vm1, %v1856_v36 }
  0x53   : > { %1746 = vmatmul.mubr.msk.bf16.gmra.mrb[24].mxu0 %vm461_vm1, %v1857_v37  ;;  %1778 = vmatmul.mubr.msk.bf16.gmra.mrb[24].mxu1 %vm461_vm1, %v1858_v38 }
  0x54   : > { %1749 = vmatprep.mubr.msk.bf16.mxu0 %vm461_vm1, %v1859_v39  ;;  %1781 = vmatprep.mubr.msk.bf16.mxu1 %vm461_vm1, %v1860_v40 }
  0x5b   : > { %1750 = vmatmul.mubr.msk.bf16.gmra.mrb[28].mxu0 %vm461_vm1, %v1861_v41  ;;  %1782 = vmatmul.mubr.msk.bf16.gmra.mrb[28].mxu1 %vm461_vm1, %v1862_v42 }
  0xf6   : > { %v1723_v43 = vpop.f32.mrb[0].mxu0  ;;  %v1755_v44 = vpop.f32.mrb[0].mxu1 }
  0xf7   : > { %vm856_vm3 = vcmp.gt.f32.partialorder %v1723_v43, 0.0  ;;  %v920_v45 = vmul.f32 0.2, %v1723_v43  ;;  %vm888_vm4 = vcmp.gt.f32.partialorder %v1755_v44, 0.0  ;;  %v952_v46 = vmul.f32 0.2, %v1755_v44 }
  0xf8   : > { %v599_v47 = vpop.f32.mrb[1].mxu0  ;;  %v727_v48 = vpop.f32.mrb[1].mxu1 }
  0xf9   : > { %v984_v49 = vsel %vm856_vm3, %v1723_v43, %v920_v45  ;;  %v1016_v50 = vsel %vm888_vm4, %v1755_v44, %v952_v46  ;;  %vm854_vm6 = vcmp.gt.f32.partialorder %v599_v47, 0.0  ;;  %v918_v51 = vmul.f32 0.2, %v599_v47  ;;  %v1724_v52 = vpop.f32.mrb[2].mxu0  ;;  %v1756_v53 = vpop.f32.mrb[2].mxu1 }
  0xfa   : > { %v1606_v54 = vpack.c.bf16 %v984_v49, %v984_v49  ;;  %v1638_v55 = vpack.c.bf16 %v1016_v50, %v1016_v50  ;;  %vm886_vm7 = vcmp.gt.f32.partialorder %v727_v48, 0.0  ;;  %v950_v56 = vmul.f32 0.2, %v727_v48  ;;  %v602_v57 = vpop.f32.mrb[3].mxu0  ;;  %v730_v58 = vpop.f32.mrb[3].mxu1 }
  0xfb   : > { %v982_v59 = vsel %vm854_vm6, %v599_v47, %v918_v51  ;;  %vm857_vm8 = vcmp.gt.f32.partialorder %v1724_v52, 0.0  ;;  %v921_v60 = vmul.f32 0.2, %v1724_v52  ;;  %vm889_vm9 = vcmp.gt.f32.partialorder %v1756_v53, 0.0 }
  0xfc   : > { %1305 = vst.msk [vmem:[%s2021_s6 + $0x8] sm:$0xf] %vm1302_vm5, %v1606_v54  ;;  %1337 = vst.msk [vmem:[%s2021_s6 + $0x88] sm:$0xf] %vm1302_vm5, %v1638_v55  ;;  %v1604_v61 = vpack.c.bf16 %v982_v59, %v982_v59  ;;  %v1014_v62 = vsel %vm886_vm7, %v727_v48, %v950_v56  ;;  %v953_v63 = vmul.f32 0.2, %v1756_v53 }
  0xfd   : > { %vm855_vm10 = vcmp.gt.f32.partialorder %v602_v57, 0.0  ;;  %v1636_v0 = vpack.c.bf16 %v1014_v62, %v1014_v62  ;;  %v985_v1 = vsel %vm857_vm8, %v1724_v52, %v921_v60  ;;  %v919_v2 = vmul.f32 0.2, %v602_v57 }
  0xfe   : > { %vm887_vm11 = vcmp.gt.f32.partialorder %v730_v58, 0.0  ;;  %1303 = vst.msk [vmem:[%s2021_s6] sm:$0xf] %vm1302_vm5, %v1604_v61  ;;  %v1607_v3 = vpack.c.bf16 %v985_v1, %v985_v1  ;;  %v1017_v4 = vsel %vm889_vm9, %v1756_v53, %v953_v63  ;;  %v951_v5 = vmul.f32 0.2, %v730_v58  ;;  %v1727_v6 = vpop.f32.mrb[4].mxu0 }
  0xff   : > { %v1759_v7 = vpop.f32.mrb[4].mxu1  ;;  %1335 = vst.msk [vmem:[%s2021_s6 + $0x80] sm:$0xf] %vm1302_vm5, %v1636_v0  ;;  %v1639_v8 = vpack.c.bf16 %v1017_v4, %v1017_v4  ;;  %v983_v9 = vsel %vm855_vm10, %v602_v57, %v919_v2  ;;  %vm860_vm12 = vcmp.gt.f32.partialorder %v1727_v6, 0.0  ;;  %v924_v10 = vmul.f32 0.2, %v1727_v6 }
 0x100   : > { %v615_v11 = vpop.f32.mrb[5].mxu0  ;;  %v743_v12 = vpop.f32.mrb[5].mxu1  ;;  %1306 = vst.msk [vmem:[%s2021_s6 + $0xc] sm:$0xf] %vm1302_vm5, %v1607_v3  ;;  %v1605_v13 = vpack.c.bf16 %v983_v9, %v983_v9  ;;  %v1015_v14 = vsel %vm887_vm11, %v730_v58, %v951_v5  ;;  %vm892_vm13 = vcmp.gt.f32.partialorder %v1759_v7, 0.0 }
 0x101   : > { %v956_v15 = vmul.f32 0.2, %v1759_v7  ;;  %v1728_v16 = vpop.f32.mrb[6].mxu0  ;;  %v1760_v17 = vpop.f32.mrb[6].mxu1  ;;  %1338 = vst.msk [vmem:[%s2021_s6 + $0x8c] sm:$0xf] %vm1302_vm5, %v1639_v8  ;;  %v1637_v18 = vpack.c.bf16 %v1015_v14, %v1015_v14  ;;  %v988_v19 = vsel %vm860_vm12, %v1727_v6, %v924_v10 }
 0x102   : > { %vm858_vm14 = vcmp.gt.f32.partialorder %v615_v11, 0.0  ;;  %v922_v20 = vmul.f32 0.2, %v615_v11  ;;  %v618_v21 = vpop.f32.mrb[7].mxu0  ;;  %v746_v22 = vpop.f32.mrb[7].mxu1  ;;  %v1610_v23 = vpack.c.bf16 %v988_v19, %v988_v19  ;;  %vm890_vm15 = vcmp.gt.f32.partialorder %v743_v12, 0.0 }
 0x103   : > { %1304 = vst.msk [vmem:[%s2021_s6 + $0x4] sm:$0xf] %vm1302_vm5, %v1605_v13  ;;  %v1020_v24 = vsel %vm892_vm13, %v1759_v7, %v956_v15  ;;  %v954_v25 = vmul.f32 0.2, %v743_v12  ;;  %1336 = vst.msk [vmem:[%s2021_s6 + $0x84] sm:$0xf] %vm1302_vm5, %v1637_v18 }
 0x104   : > { %v1642_v26 = vpack.c.bf16 %v1020_v24, %v1020_v24  ;;  %v986_v27 = vsel %vm858_vm14, %v615_v11, %v922_v20  ;;  %vm861_vm0 = vcmp.gt.f32.partialorder %v1728_v16, 0.0  ;;  %v925_v28 = vmul.f32 0.2, %v1728_v16  ;;  %1309 = vst.msk [vmem:[%s2021_s6 + $0x18] sm:$0xf] %vm1302_vm5, %v1610_v23 }
 0x105   : > { %v1608_v29 = vpack.c.bf16 %v986_v27, %v986_v27  ;;  %v1018_v30 = vsel %vm890_vm15, %v743_v12, %v954_v25  ;;  %vm893_vm1 = vcmp.gt.f32.partialorder %v1760_v17, 0.0  ;;  %v957_v31 = vmul.f32 0.2, %v1760_v17 }
 0x106   : > { %1341 = vst.msk [vmem:[%s2021_s6 + $0x98] sm:$0xf] %vm1302_vm5, %v1642_v26  ;;  %v1640_v32 = vpack.c.bf16 %v1018_v30, %v1018_v30  ;;  %v989_v33 = vsel %vm861_vm0, %v1728_v16, %v925_v28  ;;  %vm859_vm2 = vcmp.gt.f32.partialorder %v618_v21, 0.0  ;;  %v923_v34 = vmul.f32 0.2, %v618_v21  ;;  %v1731_v38 = vpop.f32.mrb[8].mxu0 }
 0x107   : > { %1307 = vst.msk [vmem:[%s2021_s6 + $0x10] sm:$0xf] %vm1302_vm5, %v1608_v29  ;;  %v1611_v35 = vpack.c.bf16 %v989_v33, %v989_v33  ;;  %v1021_v36 = vsel %vm893_vm1, %v1760_v17, %v957_v31  ;;  %vm891_vm3 = vcmp.gt.f32.partialorder %v746_v22, 0.0  ;;  %v955_v37 = vmul.f32 0.2, %v746_v22  ;;  %v1763_v39 = vpop.f32.mrb[8].mxu1 }
 0x108   : > { %1339 = vst.msk [vmem:[%s2021_s6 + $0x90] sm:$0xf] %vm1302_vm5, %v1640_v32  ;;  %v1643_v40 = vpack.c.bf16 %v1021_v36, %v1021_v36  ;;  %v987_v41 = vsel %vm859_vm2, %v618_v21, %v923_v34  ;;  %vm864_vm4 = vcmp.gt.f32.partialorder %v1731_v38, 0.0  ;;  %v928_v42 = vmul.f32 0.2, %v1731_v38  ;;  %v631_v43 = vpop.f32.mrb[9].mxu0 }
 0x109   : > { %v759_v44 = vpop.f32.mrb[9].mxu1  ;;  %1310 = vst.msk [vmem:[%s2021_s6 + $0x1c] sm:$0xf] %vm1302_vm5, %v1611_v35  ;;  %v1609_v45 = vpack.c.bf16 %v987_v41, %v987_v41  ;;  %v1019_v46 = vsel %vm891_vm3, %v746_v22, %v955_v37  ;;  %vm896_vm6 = vcmp.gt.f32.partialorder %v1763_v39, 0.0  ;;  %v960_v47 = vmul.f32 0.2, %v1763_v39 }
 0x10a   : > { %v1732_v48 = vpop.f32.mrb[10].mxu0  ;;  %v1764_v49 = vpop.f32.mrb[10].mxu1  ;;  %1342 = vst.msk [vmem:[%s2021_s6 + $0x9c] sm:$0xf] %vm1302_vm5, %v1643_v40  ;;  %v1641_v50 = vpack.c.bf16 %v1019_v46, %v1019_v46  ;;  %v992_v51 = vsel %vm864_vm4, %v1731_v38, %v928_v42  ;;  %vm862_vm7 = vcmp.gt.f32.partialorder %v631_v43, 0.0  ;;  %vm894_vm8 = vcmp.gt.f32.partialorder %v759_v44, 0.0 }
 0x10b   : > { %v926_v52 = vmul.f32 0.2, %v631_v43  ;;  %v634_v53 = vpop.f32.mrb[11].mxu0  ;;  %v762_v54 = vpop.f32.mrb[11].mxu1  ;;  %1308 = vst.msk [vmem:[%s2021_s6 + $0x14] sm:$0xf] %vm1302_vm5, %v1609_v45  ;;  %v1614_v55 = vpack.c.bf16 %v992_v51, %v992_v51  ;;  %v1024_v56 = vsel %vm896_vm6, %v1763_v39, %v960_v47 }
 0x10c   : > { %v958_v57 = vmul.f32 0.2, %v759_v44  ;;  %1340 = vst.msk [vmem:[%s2021_s6 + $0x94] sm:$0xf] %vm1302_vm5, %v1641_v50  ;;  %v1646_v58 = vpack.c.bf16 %v1024_v56, %v1024_v56  ;;  %vm865_vm9 = vcmp.gt.f32.partialorder %v1732_v48, 0.0  ;;  %vm897_vm10 = vcmp.gt.f32.partialorder %v1764_v49, 0.0 }
 0x10d   : > { %v990_v59 = vsel %vm862_vm7, %v631_v43, %v926_v52  ;;  %v929_v60 = vmul.f32 0.2, %v1732_v48  ;;  %1313 = vst.msk [vmem:[%s2021_s6 + $0x28] sm:$0xf] %vm1302_vm5, %v1614_v55  ;;  %v961_v63 = vmul.f32 0.2, %v1764_v49 }
 0x10e   : > { %v1612_v61 = vpack.c.bf16 %v990_v59, %v990_v59  ;;  %v1022_v62 = vsel %vm894_vm8, %v759_v44, %v958_v57  ;;  %1345 = vst.msk [vmem:[%s2021_s6 + $0xa8] sm:$0xf] %vm1302_vm5, %v1646_v58  ;;  %vm863_vm11 = vcmp.gt.f32.partialorder %v634_v53, 0.0  ;;  %v927_v2 = vmul.f32 0.2, %v634_v53  ;;  %v1735_v6 = vpop.f32.mrb[12].mxu0 }
 0x10f   : > { %v1644_v0 = vpack.c.bf16 %v1022_v62, %v1022_v62  ;;  %v993_v1 = vsel %vm865_vm9, %v1732_v48, %v929_v60  ;;  %v1025_v4 = vsel %vm897_vm10, %v1764_v49, %v961_v63  ;;  %vm895_vm12 = vcmp.gt.f32.partialorder %v762_v54, 0.0  ;;  %v1767_v7 = vpop.f32.mrb[12].mxu1  ;;  %v647_v11 = vpop.f32.mrb[13].mxu0 }
 0x110   : > { %1311 = vst.msk [vmem:[%s2021_s6 + $0x20] sm:$0xf] %vm1302_vm5, %v1612_v61  ;;  %v1615_v3 = vpack.c.bf16 %v993_v1, %v993_v1  ;;  %v959_v5 = vmul.f32 0.2, %v762_v54  ;;  %v1647_v8 = vpack.c.bf16 %v1025_v4, %v1025_v4  ;;  %v991_v9 = vsel %vm863_vm11, %v634_v53, %v927_v2  ;;  %v775_v12 = vpop.f32.mrb[13].mxu1  ;;  %v1736_v16 = vpop.f32.mrb[14].mxu0 }
 0x111   : > { %1343 = vst.msk [vmem:[%s2021_s6 + $0xa0] sm:$0xf] %vm1302_vm5, %v1644_v0  ;;  %vm868_vm13 = vcmp.gt.f32.partialorder %v1735_v6, 0.0  ;;  %v932_v10 = vmul.f32 0.2, %v1735_v6  ;;  %v1613_v13 = vpack.c.bf16 %v991_v9, %v991_v9  ;;  %vm900_vm14 = vcmp.gt.f32.partialorder %v1767_v7, 0.0 }
 0x112   : > { %1314 = vst.msk [vmem:[%s2021_s6 + $0x2c] sm:$0xf] %vm1302_vm5, %v1615_v3  ;;  %v1023_v14 = vsel %vm895_vm12, %v762_v54, %v959_v5  ;;  %v964_v15 = vmul.f32 0.2, %v1767_v7  ;;  %v1768_v17 = vpop.f32.mrb[14].mxu1  ;;  %vm866_vm15 = vcmp.gt.f32.partialorder %v647_v11, 0.0 }
 0x113   : > { %1346 = vst.msk [vmem:[%s2021_s6 + $0xac] sm:$0xf] %vm1302_vm5, %v1647_v8  ;;  %v1645_v18 = vpack.c.bf16 %v1023_v14, %v1023_v14  ;;  %v996_v19 = vsel %vm868_vm13, %v1735_v6, %v932_v10  ;;  %v930_v20 = vmul.f32 0.2, %v647_v11  ;;  %v650_v21 = vpop.f32.mrb[15].mxu0  ;;  %v778_v22 = vpop.f32.mrb[15].mxu1 }
 0x114   : > { %1312 = vst.msk [vmem:[%s2021_s6 + $0x24] sm:$0xf] %vm1302_vm5, %v1613_v13  ;;  %v1618_v23 = vpack.c.bf16 %v996_v19, %v996_v19  ;;  %v1028_v24 = vsel %vm900_vm14, %v1767_v7, %v964_v15  ;;  %vm898_vm0 = vcmp.gt.f32.partialorder %v775_v12, 0.0  ;;  %v962_v25 = vmul.f32 0.2, %v775_v12 }
 0x115   : > { %1344 = vst.msk [vmem:[%s2021_s6 + $0xa4] sm:$0xf] %vm1302_vm5, %v1645_v18  ;;  %v1650_v26 = vpack.c.bf16 %v1028_v24, %v1028_v24  ;;  %v994_v27 = vsel %vm866_vm15, %v647_v11, %v930_v20  ;;  %vm869_vm1 = vcmp.gt.f32.partialorder %v1736_v16, 0.0  ;;  %v933_v28 = vmul.f32 0.2, %v1736_v16 }
 0x116   : > { %1317 = vst.msk [vmem:[%s2021_s6 + $0x38] sm:$0xf] %vm1302_vm5, %v1618_v23  ;;  %v1616_v29 = vpack.c.bf16 %v994_v27, %v994_v27  ;;  %v1026_v30 = vsel %vm898_vm0, %v775_v12, %v962_v25  ;;  %vm901_vm2 = vcmp.gt.f32.partialorder %v1768_v17, 0.0  ;;  %v965_v31 = vmul.f32 0.2, %v1768_v17  ;;  %v1739_v38 = vpop.f32.mrb[16].mxu0 }
 0x117   : > { %1349 = vst.msk [vmem:[%s2021_s6 + $0xb8] sm:$0xf] %vm1302_vm5, %v1650_v26  ;;  %v1648_v32 = vpack.c.bf16 %v1026_v30, %v1026_v30  ;;  %v997_v33 = vsel %vm869_vm1, %v1736_v16, %v933_v28  ;;  %vm867_vm3 = vcmp.gt.f32.partialorder %v650_v21, 0.0  ;;  %v931_v34 = vmul.f32 0.2, %v650_v21  ;;  %v1771_v39 = vpop.f32.mrb[16].mxu1 }
 0x118   : > { %1315 = vst.msk [vmem:[%s2021_s6 + $0x30] sm:$0xf] %vm1302_vm5, %v1616_v29  ;;  %v1619_v35 = vpack.c.bf16 %v997_v33, %v997_v33  ;;  %v1029_v36 = vsel %vm901_vm2, %v1768_v17, %v965_v31  ;;  %vm899_vm4 = vcmp.gt.f32.partialorder %v778_v22, 0.0  ;;  %v963_v37 = vmul.f32 0.2, %v778_v22  ;;  %v663_v43 = vpop.f32.mrb[17].mxu0 }
 0x119   : > { %1347 = vst.msk [vmem:[%s2021_s6 + $0xb0] sm:$0xf] %vm1302_vm5, %v1648_v32  ;;  %v1651_v40 = vpack.c.bf16 %v1029_v36, %v1029_v36  ;;  %v995_v41 = vsel %vm867_vm3, %v650_v21, %v931_v34  ;;  %vm872_vm6 = vcmp.gt.f32.partialorder %v1739_v38, 0.0  ;;  %v936_v42 = vmul.f32 0.2, %v1739_v38  ;;  %v791_v44 = vpop.f32.mrb[17].mxu1 }
 0x11a   : > { %1318 = vst.msk [vmem:[%s2021_s6 + $0x3c] sm:$0xf] %vm1302_vm5, %v1619_v35  ;;  %v1617_v45 = vpack.c.bf16 %v995_v41, %v995_v41  ;;  %v1027_v46 = vsel %vm899_vm4, %v778_v22, %v963_v37  ;;  %vm904_vm7 = vcmp.gt.f32.partialorder %v1771_v39, 0.0  ;;  %v968_v47 = vmul.f32 0.2, %v1771_v39  ;;  %v1740_v48 = vpop.f32.mrb[18].mxu0 }
 0x11b   : > { %v1772_v49 = vpop.f32.mrb[18].mxu1  ;;  %1350 = vst.msk [vmem:[%s2021_s6 + $0xbc] sm:$0xf] %vm1302_vm5, %v1651_v40  ;;  %v1649_v50 = vpack.c.bf16 %v1027_v46, %v1027_v46  ;;  %v1000_v51 = vsel %vm872_vm6, %v1739_v38, %v936_v42  ;;  %vm870_vm8 = vcmp.gt.f32.partialorder %v663_v43, 0.0  ;;  %v934_v52 = vmul.f32 0.2, %v663_v43 }
 0x11c   : > { %v666_v53 = vpop.f32.mrb[19].mxu0  ;;  %v794_v54 = vpop.f32.mrb[19].mxu1  ;;  %1316 = vst.msk [vmem:[%s2021_s6 + $0x34] sm:$0xf] %vm1302_vm5, %v1617_v45  ;;  %v1622_v55 = vpack.c.bf16 %v1000_v51, %v1000_v51  ;;  %v1032_v56 = vsel %vm904_vm7, %v1771_v39, %v968_v47  ;;  %vm902_vm9 = vcmp.gt.f32.partialorder %v791_v44, 0.0  ;;  %vm873_vm10 = vcmp.gt.f32.partialorder %v1740_v48, 0.0 }
 0x11d   : > { %v966_v57 = vmul.f32 0.2, %v791_v44  ;;  %1348 = vst.msk [vmem:[%s2021_s6 + $0xb4] sm:$0xf] %vm1302_vm5, %v1649_v50  ;;  %v1654_v58 = vpack.c.bf16 %v1032_v56, %v1032_v56  ;;  %v998_v59 = vsel %vm870_vm8, %v663_v43, %v934_v52  ;;  %v937_v60 = vmul.f32 0.2, %v1740_v48 }
 0x11e   : > { %1321 = vst.msk [vmem:[%s2021_s6 + $0x48] sm:$0xf] %vm1302_vm5, %v1622_v55  ;;  %v1620_v61 = vpack.c.bf16 %v998_v59, %v998_v59  ;;  %vm905_vm11 = vcmp.gt.f32.partialorder %v1772_v49, 0.0  ;;  %v969_v63 = vmul.f32 0.2, %v1772_v49  ;;  %vm871_vm12 = vcmp.gt.f32.partialorder %v666_v53, 0.0 }
 0x11f   : > { %v1030_v62 = vsel %vm902_vm9, %v791_v44, %v966_v57  ;;  %1353 = vst.msk [vmem:[%s2021_s6 + $0xc8] sm:$0xf] %vm1302_vm5, %v1654_v58  ;;  %v1001_v1 = vsel %vm873_vm10, %v1740_v48, %v937_v60  ;;  %v935_v2 = vmul.f32 0.2, %v666_v53  ;;  %vm903_vm13 = vcmp.gt.f32.partialorder %v794_v54, 0.0  ;;  %v1743_v6 = vpop.f32.mrb[20].mxu0 }
 0x120   : > { %v1652_v0 = vpack.c.bf16 %v1030_v62, %v1030_v62  ;;  %1319 = vst.msk [vmem:[%s2021_s6 + $0x40] sm:$0xf] %vm1302_vm5, %v1620_v61  ;;  %v1623_v3 = vpack.c.bf16 %v1001_v1, %v1001_v1  ;;  %v1033_v4 = vsel %vm905_vm11, %v1772_v49, %v969_v63  ;;  %v967_v5 = vmul.f32 0.2, %v794_v54  ;;  %v1775_v7 = vpop.f32.mrb[20].mxu1  ;;  %v679_v11 = vpop.f32.mrb[21].mxu0 }
 0x121   : > { %v1655_v8 = vpack.c.bf16 %v1033_v4, %v1033_v4  ;;  %v999_v9 = vsel %vm871_vm12, %v666_v53, %v935_v2  ;;  %vm876_vm14 = vcmp.gt.f32.partialorder %v1743_v6, 0.0  ;;  %v940_v10 = vmul.f32 0.2, %v1743_v6  ;;  %v807_v12 = vpop.f32.mrb[21].mxu1  ;;  %v1744_v16 = vpop.f32.mrb[22].mxu0 }
 0x122   : > { %1351 = vst.msk [vmem:[%s2021_s6 + $0xc0] sm:$0xf] %vm1302_vm5, %v1652_v0  ;;  %1322 = vst.msk [vmem:[%s2021_s6 + $0x4c] sm:$0xf] %vm1302_vm5, %v1623_v3  ;;  %v1621_v13 = vpack.c.bf16 %v999_v9, %v999_v9  ;;  %v1031_v14 = vsel %vm903_vm13, %v794_v54, %v967_v5  ;;  %vm908_vm15 = vcmp.gt.f32.partialorder %v1775_v7, 0.0  ;;  %v1776_v17 = vpop.f32.mrb[22].mxu1 }
 0x123   : > { %v972_v15 = vmul.f32 0.2, %v1775_v7  ;;  %1354 = vst.msk [vmem:[%s2021_s6 + $0xcc] sm:$0xf] %vm1302_vm5, %v1655_v8  ;;  %v1653_v18 = vpack.c.bf16 %v1031_v14, %v1031_v14  ;;  %v1004_v19 = vsel %vm876_vm14, %v1743_v6, %v940_v10  ;;  %vm874_vm0 = vcmp.gt.f32.partialorder %v679_v11, 0.0  ;;  %v682_v21 = vpop.f32.mrb[23].mxu0 }
 0x124   : > { %v938_v20 = vmul.f32 0.2, %v679_v11  ;;  %v810_v22 = vpop.f32.mrb[23].mxu1  ;;  %1320 = vst.msk [vmem:[%s2021_s6 + $0x44] sm:$0xf] %vm1302_vm5, %v1621_v13  ;;  %v1626_v23 = vpack.c.bf16 %v1004_v19, %v1004_v19  ;;  %vm906_vm1 = vcmp.gt.f32.partialorder %v807_v12, 0.0 }
 0x125   : > { %v1036_v24 = vsel %vm908_vm15, %v1775_v7, %v972_v15  ;;  %v970_v25 = vmul.f32 0.2, %v807_v12  ;;  %1352 = vst.msk [vmem:[%s2021_s6 + $0xc4] sm:$0xf] %vm1302_vm5, %v1653_v18  ;;  %vm877_vm2 = vcmp.gt.f32.partialorder %v1744_v16, 0.0  ;;  %vm909_vm3 = vcmp.gt.f32.partialorder %v1776_v17, 0.0 }
 0x126   : > { %v1658_v26 = vpack.c.bf16 %v1036_v24, %v1036_v24  ;;  %v1002_v27 = vsel %vm874_vm0, %v679_v11, %v938_v20  ;;  %v941_v28 = vmul.f32 0.2, %v1744_v16  ;;  %1325 = vst.msk [vmem:[%s2021_s6 + $0x58] sm:$0xf] %vm1302_vm5, %v1626_v23  ;;  %v973_v31 = vmul.f32 0.2, %v1776_v17 }
 0x127   : > { %v1624_v29 = vpack.c.bf16 %v1002_v27, %v1002_v27  ;;  %v1034_v30 = vsel %vm906_vm1, %v807_v12, %v970_v25  ;;  %vm875_vm4 = vcmp.gt.f32.partialorder %v682_v21, 0.0  ;;  %v939_v34 = vmul.f32 0.2, %v682_v21  ;;  %v1747_v38 = vpop.f32.mrb[24].mxu0  ;;  %v1779_v39 = vpop.f32.mrb[24].mxu1 }
 0x128   : > { %1357 = vst.msk [vmem:[%s2021_s6 + $0xd8] sm:$0xf] %vm1302_vm5, %v1658_v26  ;;  %v1656_v32 = vpack.c.bf16 %v1034_v30, %v1034_v30  ;;  %v1005_v33 = vsel %vm877_vm2, %v1744_v16, %v941_v28  ;;  %v1037_v36 = vsel %vm909_vm3, %v1776_v17, %v973_v31  ;;  %vm907_vm6 = vcmp.gt.f32.partialorder %v810_v22, 0.0  ;;  %v695_v43 = vpop.f32.mrb[25].mxu0  ;;  %v823_v44 = vpop.f32.mrb[25].mxu1 }
 0x129   : > { %1323 = vst.msk [vmem:[%s2021_s6 + $0x50] sm:$0xf] %vm1302_vm5, %v1624_v29  ;;  %v1627_v35 = vpack.c.bf16 %v1005_v33, %v1005_v33  ;;  %v971_v37 = vmul.f32 0.2, %v810_v22  ;;  %v1659_v40 = vpack.c.bf16 %v1037_v36, %v1037_v36  ;;  %v1003_v41 = vsel %vm875_vm4, %v682_v21, %v939_v34  ;;  %v1748_v48 = vpop.f32.mrb[26].mxu0  ;;  %v1780_v49 = vpop.f32.mrb[26].mxu1 }
 0x12a   : > { %1355 = vst.msk [vmem:[%s2021_s6 + $0xd0] sm:$0xf] %vm1302_vm5, %v1656_v32  ;;  %vm880_vm7 = vcmp.gt.f32.partialorder %v1747_v38, 0.0  ;;  %v944_v42 = vmul.f32 0.2, %v1747_v38  ;;  %v1625_v45 = vpack.c.bf16 %v1003_v41, %v1003_v41  ;;  %vm912_vm8 = vcmp.gt.f32.partialorder %v1779_v39, 0.0 }
 0x12b   : > { %1326 = vst.msk [vmem:[%s2021_s6 + $0x5c] sm:$0xf] %vm1302_vm5, %v1627_v35  ;;  %v1035_v46 = vsel %vm907_vm6, %v810_v22, %v971_v37  ;;  %v976_v47 = vmul.f32 0.2, %v1779_v39  ;;  %1358 = vst.msk [vmem:[%s2021_s6 + $0xdc] sm:$0xf] %vm1302_vm5, %v1659_v40 }
 0x12c   : > { %v1657_v50 = vpack.c.bf16 %v1035_v46, %v1035_v46  ;;  %v1008_v51 = vsel %vm880_vm7, %v1747_v38, %v944_v42  ;;  %vm878_vm9 = vcmp.gt.f32.partialorder %v695_v43, 0.0  ;;  %v942_v52 = vmul.f32 0.2, %v695_v43  ;;  %v698_v53 = vpop.f32.mrb[27].mxu0  ;;  %v826_v54 = vpop.f32.mrb[27].mxu1 }
 0x12d   : > { %1324 = vst.msk [vmem:[%s2021_s6 + $0x54] sm:$0xf] %vm1302_vm5, %v1625_v45  ;;  %v1630_v55 = vpack.c.bf16 %v1008_v51, %v1008_v51  ;;  %v1040_v56 = vsel %vm912_vm8, %v1779_v39, %v976_v47  ;;  %vm910_vm10 = vcmp.gt.f32.partialorder %v823_v44, 0.0  ;;  %v974_v57 = vmul.f32 0.2, %v823_v44 }
 0x12e   : > { %1356 = vst.msk [vmem:[%s2021_s6 + $0xd4] sm:$0xf] %vm1302_vm5, %v1657_v50  ;;  %v1662_v58 = vpack.c.bf16 %v1040_v56, %v1040_v56  ;;  %v1006_v59 = vsel %vm878_vm9, %v695_v43, %v942_v52  ;;  %vm881_vm11 = vcmp.gt.f32.partialorder %v1748_v48, 0.0  ;;  %v945_v60 = vmul.f32 0.2, %v1748_v48  ;;  %v1751_v6 = vpop.f32.mrb[28].mxu0 }
 0x12f   : > { %1329 = vst.msk [vmem:[%s2021_s6 + $0x68] sm:$0xf] %vm1302_vm5, %v1630_v55  ;;  %v1628_v61 = vpack.c.bf16 %v1006_v59, %v1006_v59  ;;  %v1038_v62 = vsel %vm910_vm10, %v823_v44, %v974_v57  ;;  %vm913_vm12 = vcmp.gt.f32.partialorder %v1780_v49, 0.0  ;;  %v977_v63 = vmul.f32 0.2, %v1780_v49  ;;  %v1783_v7 = vpop.f32.mrb[28].mxu1 }
 0x130   : > { %1361 = vst.msk [vmem:[%s2021_s6 + $0xe8] sm:$0xf] %vm1302_vm5, %v1662_v58  ;;  %v1660_v0 = vpack.c.bf16 %v1038_v62, %v1038_v62  ;;  %v1009_v1 = vsel %vm881_vm11, %v1748_v48, %v945_v60  ;;  %vm879_vm13 = vcmp.gt.f32.partialorder %v698_v53, 0.0  ;;  %v943_v2 = vmul.f32 0.2, %v698_v53  ;;  %v711_v11 = vpop.f32.mrb[29].mxu0 }
 0x131   : > { %1327 = vst.msk [vmem:[%s2021_s6 + $0x60] sm:$0xf] %vm1302_vm5, %v1628_v61  ;;  %v1631_v3 = vpack.c.bf16 %v1009_v1, %v1009_v1  ;;  %v1041_v4 = vsel %vm913_vm12, %v1780_v49, %v977_v63  ;;  %vm911_vm14 = vcmp.gt.f32.partialorder %v826_v54, 0.0  ;;  %v975_v5 = vmul.f32 0.2, %v826_v54  ;;  %v839_v12 = vpop.f32.mrb[29].mxu1 }
 0x132   : > { %1359 = vst.msk [vmem:[%s2021_s6 + $0xe0] sm:$0xf] %vm1302_vm5, %v1660_v0  ;;  %v1663_v8 = vpack.c.bf16 %v1041_v4, %v1041_v4  ;;  %v1007_v9 = vsel %vm879_vm13, %v698_v53, %v943_v2  ;;  %vm884_vm15 = vcmp.gt.f32.partialorder %v1751_v6, 0.0  ;;  %v948_v10 = vmul.f32 0.2, %v1751_v6  ;;  %v1752_v16 = vpop.f32.mrb[30].mxu0 }
 0x133   : > { %1330 = vst.msk [vmem:[%s2021_s6 + $0x6c] sm:$0xf] %vm1302_vm5, %v1631_v3  ;;  %v1629_v13 = vpack.c.bf16 %v1007_v9, %v1007_v9  ;;  %v1039_v14 = vsel %vm911_vm14, %v826_v54, %v975_v5  ;;  %vm916_vm0 = vcmp.gt.f32.partialorder %v1783_v7, 0.0  ;;  %v980_v15 = vmul.f32 0.2, %v1783_v7  ;;  %v1784_v17 = vpop.f32.mrb[30].mxu1 }
 0x134   : > { %1362 = vst.msk [vmem:[%s2021_s6 + $0xec] sm:$0xf] %vm1302_vm5, %v1663_v8  ;;  %v1661_v18 = vpack.c.bf16 %v1039_v14, %v1039_v14  ;;  %v1012_v19 = vsel %vm884_vm15, %v1751_v6, %v948_v10  ;;  %vm882_vm1 = vcmp.gt.f32.partialorder %v711_v11, 0.0  ;;  %v946_v20 = vmul.f32 0.2, %v711_v11  ;;  %v714_v21 = vpop.f32.mrb[31].mxu0 }
 0x135   : > { %v842_v22 = vpop.f32.mrb[31].mxu1  ;;  %1328 = vst.msk [vmem:[%s2021_s6 + $0x64] sm:$0xf] %vm1302_vm5, %v1629_v13  ;;  %v1634_v23 = vpack.c.bf16 %v1012_v19, %v1012_v19  ;;  %v1044_v24 = vsel %vm916_vm0, %v1783_v7, %v980_v15  ;;  %vm914_vm2 = vcmp.gt.f32.partialorder %v839_v12, 0.0  ;;  %v978_v25 = vmul.f32 0.2, %v839_v12 }
 0x136   : > { %1360 = vst.msk [vmem:[%s2021_s6 + $0xe4] sm:$0xf] %vm1302_vm5, %v1661_v18  ;;  %v1666_v26 = vpack.c.bf16 %v1044_v24, %v1044_v24  ;;  %v1010_v27 = vsel %vm882_vm1, %v711_v11, %v946_v20  ;;  %vm885_vm3 = vcmp.gt.f32.partialorder %v1752_v16, 0.0  ;;  %v949_v28 = vmul.f32 0.2, %v1752_v16 }
 0x137   : > { %1333 = vst.msk [vmem:[%s2021_s6 + $0x78] sm:$0xf] %vm1302_vm5, %v1634_v23  ;;  %v1632_v29 = vpack.c.bf16 %v1010_v27, %v1010_v27  ;;  %v1042_v30 = vsel %vm914_vm2, %v839_v12, %v978_v25  ;;  %vm917_vm4 = vcmp.gt.f32.partialorder %v1784_v17, 0.0  ;;  %v981_v31 = vmul.f32 0.2, %v1784_v17 }
 0x138   : > { %1365 = vst.msk [vmem:[%s2021_s6 + $0xf8] sm:$0xf] %vm1302_vm5, %v1666_v26  ;;  %v1664_v32 = vpack.c.bf16 %v1042_v30, %v1042_v30  ;;  %v1013_v33 = vsel %vm885_vm3, %v1752_v16, %v949_v28  ;;  %vm883_vm6 = vcmp.gt.f32.partialorder %v714_v21, 0.0  ;;  %v947_v34 = vmul.f32 0.2, %v714_v21 }
 0x139   : > { %1331 = vst.msk [vmem:[%s2021_s6 + $0x70] sm:$0xf] %vm1302_vm5, %v1632_v29  ;;  %v1635_v35 = vpack.c.bf16 %v1013_v33, %v1013_v33  ;;  %v1045_v36 = vsel %vm917_vm4, %v1784_v17, %v981_v31  ;;  %vm915_vm7 = vcmp.gt.f32.partialorder %v842_v22, 0.0  ;;  %v979_v37 = vmul.f32 0.2, %v842_v22 }
 0x13a   : > { %1363 = vst.msk [vmem:[%s2021_s6 + $0xf0] sm:$0xf] %vm1302_vm5, %v1664_v32  ;;  %v1667_v38 = vpack.c.bf16 %v1045_v36, %v1045_v36  ;;  %v1011_v39 = vsel %vm883_vm6, %v714_v21, %v947_v34 }
 0x13b   : > { %1334 = vst.msk [vmem:[%s2021_s6 + $0x7c] sm:$0xf] %vm1302_vm5, %v1635_v35  ;;  %v1633_v40 = vpack.c.bf16 %v1011_v39, %v1011_v39  ;;  %v1043_v41 = vsel %vm915_vm7, %v842_v22, %v979_v37 }
 0x13c   : > { %1366 = vst.msk [vmem:[%s2021_s6 + $0xfc] sm:$0xf] %vm1302_vm5, %v1667_v38  ;;  %v1665_v42 = vpack.c.bf16 %v1043_v41, %v1043_v41 }
 0x13d   : > { %1332 = vst.msk [vmem:[%s2021_s6 + $0x74] sm:$0xf] %vm1302_vm5, %v1633_v40 }
 0x13e   : > { %1364 = vst.msk [vmem:[%s2021_s6 + $0xf4] sm:$0xf] %vm1302_vm5, %v1665_v42 }
 0x13f PF: > { %s12_s11 = sadd.s32 1, %s1885_s11   ;;  %s2164_s9 = smov %s1881_s10 }
 0x140   : > { %p9_p5 = scmp.ge.s32.totalorder %s12_s11, 6   ;;  %s2165_s10 = smov %s2167_s12 }
 0x142   :  { %11 = sbr.rel (!%p9_p5) target bundleno = 2 (0x2), region = 61 }

// kernel: discriminator_forward.5
= control target key start
LH: loop header
LB: loop body
LE: loop exit
PB: predicated region body
PF: predicated region fallthrough
CT: control target
= control target key end

     0   :  { %v3016_v0 = vmov 0   ;;  %vm788_vm0 = vcmask 654336   ;;  %vm1463_vm1 = vcmask 605184   ;;  %s5427_s1 = inlined_call_operand.vmem [shape: bf16[336,74], index: 1, kind: input, shape index: {}]   ;;  %s5428_s0 = inlined_call_operand.vmem [shape: bf16[512,336], index: 0, kind: input, shape index: {}]   ;;  %s5429_s2 = inlined_call_operand.vmem [shape: bf16[512,74], index: 2, kind: output, shape index: {}]  }
   0x1   :  { %885 = vmatprep.subr.bf16.mxu0 %v3016_v0  ;;  %2832 = vmatprep.subr.bf16.mxu1 %v3016_v0  ;;  %v2865_v1 = vld [vmem:[%s5427_s1] sm:$0xff]   ;;  %v2866_v2 = vld [vmem:[%s5427_s1 + $0x8] sm:$0xff]   ;;  %v2867_v3 = vld [vmem:[%s5427_s1 + $0x10] sm:$0xff]  }
   0x2   :  { %886 = vmatpush1.bf16.msra.mxu0 %v2865_v1  ;;  %2848 = vmatpush1.bf16.msra.mxu1 %v2865_v1  ;;  %v2868_v4 = vld [vmem:[%s5427_s1 + $0x18] sm:$0xff]   ;;  %v2869_v5 = vld [vmem:[%s5427_s1 + $0x20] sm:$0xff]   ;;  %v2870_v7 = vld [vmem:[%s5427_s1 + $0x28] sm:$0xff]  }
   0x3   :  { %887 = vmatprep.subr.bf16.mxu0 %v3016_v0  ;;  %2833 = vmatprep.subr.bf16.mxu1 %v3016_v0  ;;  %v2883_v6 = vld [vmem:[%s5428_s0 + $0x4] ss:$12 sps:$4 sm:$0xff]   ;;  %v2872_v10 = vld [vmem:[%s5427_s1 + $0x38] sm:$0xff]   ;;  %v2874_v12 = vld [vmem:[%s5427_s1 + $0x48] sm:$0xff]  }
   0x4   :  { %v2886_v8 = vld [vmem:[%s5428_s0 + $0x244] ss:$12 sps:$4 sm:$0xff]   ;;  %917 = vmatprep.mubr.bf16.mxu0 %v2883_v6  ;;  %v2876_v14 = vld [vmem:[%s5427_s1 + $0x58] sm:$0xff]   ;;  %v2878_v16 = vld [vmem:[%s5427_s1 + $0x68] sm:$0xff]  }
   0x5   :  { %1109 = vmatprep.mubr.bf16.mxu1 %v2886_v8  ;;  %v2871_v9 = vld [vmem:[%s5427_s1 + $0x30] sm:$0xff]   ;;  %v2873_v11 = vld [vmem:[%s5427_s1 + $0x40] sm:$0xff]   ;;  %v2880_v18 = vld [vmem:[%s5427_s1 + $0x78] sm:$0xff]  }
   0x6   :  { %888 = vmatpush1.bf16.msra.mxu0 %v2866_v2  ;;  %2849 = vmatpush1.bf16.msra.mxu1 %v2866_v2  ;;  %v2875_v13 = vld [vmem:[%s5427_s1 + $0x50] sm:$0xff]   ;;  %v2877_v15 = vld [vmem:[%s5427_s1 + $0x60] sm:$0xff]   ;;  %v2887_v22 = vld [vmem:[%s5428_s0 + $0x1c] ss:$12 sps:$4 sm:$0xff]  }
   0x7   :  { %889 = vmatprep.subr.bf16.mxu0 %v3016_v0  ;;  %2834 = vmatprep.subr.bf16.mxu1 %v3016_v0  ;;  %v2879_v17 = vld [vmem:[%s5427_s1 + $0x70] sm:$0xff]   ;;  %v2881_v19 = vld [vmem:[%s5428_s0] ss:$12 sps:$4 sm:$0xff]   ;;  %v2889_v23 = vld [vmem:[%s5428_s0 + $0x25c] ss:$12 sps:$4 sm:$0xff]  }
   0x8   :  { %v2905_v20 = vld [vmem:[%s5427_s1 + $0x80] sm:$0xff]   ;;  %v2916_v24 = vld [vmem:[%s5427_s1 + $0x88] sm:$0xff]   ;;  %v2925_v27 = vld [vmem:[%s5427_s1 + $0x90] sm:$0xff]  }
   0x9   :  { %v2884_v21 = vld [vmem:[%s5428_s0 + $0x240] ss:$12 sps:$4 sm:$0xff]   ;;  %v2891_v25 = vld [vmem:[%s5428_s0 + $0x18] ss:$12 sps:$4 sm:$0xff]   ;;  %v2897_v31 = vld [vmem:[%s5428_s0 + $0x30] ss:$12 sps:$4 sm:$0xff]  }
   0xa   :  { %890 = vmatpush1.bf16.msra.mxu0 %v2867_v3  ;;  %2850 = vmatpush1.bf16.msra.mxu1 %v2867_v3  ;;  %v2892_v26 = vld [vmem:[%s5428_s0 + $0x258] ss:$12 sps:$4 sm:$0xff]   ;;  %v2893_v28 = vld [vmem:[%s5428_s0 + $0x34] ss:$12 sps:$4 sm:$0xff]   ;;  %v2898_v32 = vld [vmem:[%s5428_s0 + $0x270] ss:$12 sps:$4 sm:$0xff]  }
   0xb   :  { %891 = vmatprep.subr.bf16.mxu0 %v3016_v0  ;;  %2835 = vmatprep.subr.bf16.mxu1 %v3016_v0  ;;  %v2895_v29 = vld [vmem:[%s5428_s0 + $0x274] ss:$12 sps:$4 sm:$0xff]   ;;  %v2932_v30 = vld [vmem:[%s5427_s1 + $0x98] sm:$0xff]   ;;  %v2906_v38 = vld [vmem:[%s5428_s0 + $0x64] ss:$12 sps:$4 sm:$0xff]  }
   0xc   :  { %v2933_v33 = vld [vmem:[%s5427_s1 + $0xa0] sm:$0xff]   ;;  %v2899_v34 = vld [vmem:[%s5428_s0 + $0x4c] ss:$12 sps:$4 sm:$0xff]   ;;  %v2903_v36 = vld [vmem:[%s5428_s0 + $0x48] ss:$12 sps:$4 sm:$0xff]  }
   0xd   :  { %v2901_v35 = vld [vmem:[%s5428_s0 + $0x28c] ss:$12 sps:$4 sm:$0xff]   ;;  %v2904_v37 = vld [vmem:[%s5428_s0 + $0x288] ss:$12 sps:$4 sm:$0xff]   ;;  %v2908_v39 = vld [vmem:[%s5428_s0 + $0x2a4] ss:$12 sps:$4 sm:$0xff]  }
   0xe   :  { %892 = vmatpush1.bf16.msra.mxu0 %v2868_v4  ;;  %2851 = vmatpush1.bf16.msra.mxu1 %v2868_v4  ;;  %v2910_v40 = vld [vmem:[%s5428_s0 + $0x60] ss:$12 sps:$4 sm:$0xff]   ;;  %v2912_v42 = vld [vmem:[%s5428_s0 + $0x7c] ss:$12 sps:$4 sm:$0xff]   ;;  %v2917_v44 = vld [vmem:[%s5428_s0 + $0x78] ss:$12 sps:$4 sm:$0xff]  }
   0xf   :  { %893 = vmatprep.subr.bf16.mxu0 %v3016_v0  ;;  %2836 = vmatprep.subr.bf16.mxu1 %v3016_v0  ;;  %v2911_v41 = vld [vmem:[%s5428_s0 + $0x2a0] ss:$12 sps:$4 sm:$0xff]   ;;  %v2914_v43 = vld [vmem:[%s5428_s0 + $0x2bc] ss:$12 sps:$4 sm:$0xff]   ;;  %v2918_v45 = vld [vmem:[%s5428_s0 + $0x2b8] ss:$12 sps:$4 sm:$0xff]  }
  0x10   :  { %v2919_v46 = vld [vmem:[%s5428_s0 + $0x94] ss:$12 sps:$4 sm:$0xff]   ;;  %v2923_v48 = vld [vmem:[%s5428_s0 + $0x90] ss:$12 sps:$4 sm:$0xff]   ;;  %v2926_v50 = vld [vmem:[%s5428_s0 + $0xac] ss:$12 sps:$4 sm:$0xff]  }
  0x11   :  { %v2921_v47 = vld [vmem:[%s5428_s0 + $0x2d4] ss:$12 sps:$4 sm:$0xff]   ;;  %v2924_v49 = vld [vmem:[%s5428_s0 + $0x2d0] ss:$12 sps:$4 sm:$0xff]   ;;  %v2928_v51 = vld [vmem:[%s5428_s0 + $0x2ec] ss:$12 sps:$4 sm:$0xff]  }
  0x12   :  { %894 = vmatpush1.bf16.msra.mxu0 %v2869_v5  ;;  %2852 = vmatpush1.bf16.msra.mxu1 %v2869_v5  ;;  %v2930_v52 = vld [vmem:[%s5428_s0 + $0xa8] ss:$12 sps:$4 sm:$0xff]   ;;  %v2934_v54 = vld [vmem:[%s5428_s0 + $0xc4] ss:$12 sps:$4 sm:$0xff]   ;;  %v2937_v56 = vld [vmem:[%s5428_s0 + $0xc0] ss:$12 sps:$4 sm:$0xff]  }
  0x13   :  { %895 = vmatprep.subr.bf16.mxu0 %v3016_v0  ;;  %2837 = vmatprep.subr.bf16.mxu1 %v3016_v0  ;;  %v2931_v53 = vld [vmem:[%s5428_s0 + $0x2e8] ss:$12 sps:$4 sm:$0xff]   ;;  %v2938_v57 = vld [vmem:[%s5428_s0 + $0x20] ss:$12 sps:$4 sm:$0xff]   ;;  %v2941_v59 = vld [vmem:[%s5428_s0 + $0x38] ss:$12 sps:$4 sm:$0xff]  }
  0x14   :  { %v2936_v55 = vld [vmem:[%s5428_s0 + $0x8] ss:$12 sps:$4 sm:$0xff]   ;;  %v2942_v60 = vld [vmem:[%s5428_s0 + $0xd8] ss:$12 sps:$4 sm:$0xff]   ;;  %v2943_v61 = vld [vmem:[%s5428_s0 + $0x50] ss:$12 sps:$4 sm:$0xff]  }
  0x15   :  { %v2939_v58 = vld [vmem:[%s5428_s0 + $0xdc] ss:$12 sps:$4 sm:$0xff]   ;;  %v2944_v62 = vld [vmem:[%s5428_s0 + $0xf4] ss:$12 sps:$4 sm:$0xff]   ;;  %v2949_v2 = vld [vmem:[%s5428_s0 + $0x10c] ss:$12 sps:$4 sm:$0xff]  }
  0x16   :  { %896 = vmatpush1.bf16.msra.mxu0 %v2870_v7  ;;  %2853 = vmatpush1.bf16.msra.mxu1 %v2870_v7  ;;  %v2946_v63 = vld [vmem:[%s5428_s0 + $0x68] ss:$12 sps:$4 sm:$0xff]   ;;  %v2948_v1 = vld [vmem:[%s5428_s0 + $0x80] ss:$12 sps:$4 sm:$0xff]   ;;  %v2951_v3 = vld [vmem:[%s5428_s0 + $0x98] ss:$12 sps:$4 sm:$0xff]  }
  0x17   :  { %897 = vmatprep.subr.bf16.mxu0 %v3016_v0  ;;  %2838 = vmatprep.subr.bf16.mxu1 %v3016_v0  ;;  %v2952_v4 = vld [vmem:[%s5428_s0 + $0x108] ss:$12 sps:$4 sm:$0xff]   ;;  %v2953_v5 = vld [vmem:[%s5428_s0 + $0xb0] ss:$12 sps:$4 sm:$0xff]   ;;  %v2957_v8 = vld [vmem:[%s5428_s0 + $0x120] ss:$12 sps:$4 sm:$0xff]  }
  0x18   :  { %v2954_v6 = vld [vmem:[%s5428_s0 + $0x124] ss:$12 sps:$4 sm:$0xff]   ;;  %v2956_v7 = vld [vmem:[%s5428_s0 + $0xc8] ss:$12 sps:$4 sm:$0xff]  }
  0x1a   :  { %898 = vmatpush1.bf16.msra.mxu0 %v2871_v9  ;;  %2854 = vmatpush1.bf16.msra.mxu1 %v2871_v9  ;;  %v2958_v9 = vld [vmem:[%s5428_s0 + $0xe0] ss:$12 sps:$4 sm:$0xff]  }
  0x1b   :  { %899 = vmatprep.subr.bf16.mxu0 %v3016_v0  ;;  %2839 = vmatprep.subr.bf16.mxu1 %v3016_v0 }
  0x1e   :  { %900 = vmatpush1.bf16.msra.mxu0 %v2872_v10  ;;  %2855 = vmatpush1.bf16.msra.mxu1 %v2872_v10  ;;  %v2959_v10 = vld [vmem:[%s5428_s0 + $0x13c] ss:$12 sps:$4 sm:$0xff]  }
  0x1f   :  { %901 = vmatprep.subr.bf16.mxu0 %v3016_v0  ;;  %2840 = vmatprep.subr.bf16.mxu1 %v3016_v0 }
  0x22   :  { %902 = vmatpush1.bf16.msra.mxu0 %v2873_v11  ;;  %2856 = vmatpush1.bf16.msra.mxu1 %v2873_v11  ;;  %v2961_v11 = vld [vmem:[%s5428_s0 + $0xf8] ss:$12 sps:$4 sm:$0xff]  }
  0x23   :  { %903 = vmatprep.subr.bf16.mxu0 %v3016_v0  ;;  %2841 = vmatprep.subr.bf16.mxu1 %v3016_v0 }
  0x26   :  { %904 = vmatpush1.bf16.msra.mxu0 %v2874_v12  ;;  %2857 = vmatpush1.bf16.msra.mxu1 %v2874_v12  ;;  %v2962_v12 = vld [vmem:[%s5428_s0 + $0x138] ss:$12 sps:$4 sm:$0xff]  }
  0x27   :  { %905 = vmatprep.subr.bf16.mxu0 %v3016_v0  ;;  %2842 = vmatprep.subr.bf16.mxu1 %v3016_v0 }
  0x2a   :  { %906 = vmatpush1.bf16.msra.mxu0 %v2875_v13  ;;  %2858 = vmatpush1.bf16.msra.mxu1 %v2875_v13  ;;  %v2963_v13 = vld [vmem:[%s5428_s0 + $0x110] ss:$12 sps:$4 sm:$0xff]  }
  0x2b   :  { %907 = vmatprep.subr.bf16.mxu0 %v3016_v0  ;;  %2843 = vmatprep.subr.bf16.mxu1 %v3016_v0 }
  0x2e   :  { %908 = vmatpush1.bf16.msra.mxu0 %v2876_v14  ;;  %2859 = vmatpush1.bf16.msra.mxu1 %v2876_v14  ;;  %v2964_v14 = vld [vmem:[%s5428_s0 + $0x154] ss:$12 sps:$4 sm:$0xff]  }
  0x2f   :  { %909 = vmatprep.subr.bf16.mxu0 %v3016_v0  ;;  %2844 = vmatprep.subr.bf16.mxu1 %v3016_v0 }
  0x32   :  { %910 = vmatpush1.bf16.msra.mxu0 %v2877_v15  ;;  %2860 = vmatpush1.bf16.msra.mxu1 %v2877_v15  ;;  %v2966_v15 = vld [vmem:[%s5428_s0 + $0x128] ss:$12 sps:$4 sm:$0xff]  }
  0x33   :  { %911 = vmatprep.subr.bf16.mxu0 %v3016_v0  ;;  %2845 = vmatprep.subr.bf16.mxu1 %v3016_v0 }
  0x36   :  { %912 = vmatpush1.bf16.msra.mxu0 %v2878_v16  ;;  %2861 = vmatpush1.bf16.msra.mxu1 %v2878_v16  ;;  %v2967_v16 = vld [vmem:[%s5428_s0 + $0x150] ss:$12 sps:$4 sm:$0xff]  }
  0x37   :  { %913 = vmatprep.subr.bf16.mxu0 %v3016_v0  ;;  %2846 = vmatprep.subr.bf16.mxu1 %v3016_v0 }
  0x3a   :  { %914 = vmatpush1.bf16.msra.mxu0 %v2879_v17  ;;  %2862 = vmatpush1.bf16.msra.mxu1 %v2879_v17  ;;  %v2968_v17 = vld [vmem:[%s5428_s0 + $0x140] ss:$12 sps:$4 sm:$0xff]  }
  0x3b   :  { %915 = vmatprep.subr.bf16.mxu0 %v3016_v0  ;;  %2847 = vmatprep.subr.bf16.mxu1 %v3016_v0  ;;  %v2947_v0 = vld [vmem:[%s5428_s0 + $0xf0] ss:$12 sps:$4 sm:$0xff]  }
  0x3e   :  { %916 = vmatpush1.bf16.msra.mxu0 %v2880_v18  ;;  %2863 = vmatpush1.bf16.msra.mxu1 %v2880_v18  ;;  %v2969_v18 = vld [vmem:[%s5428_s0 + $0x16c] ss:$12 sps:$4 sm:$0xff]  }
  0x3f   :  { %2758 = vmatprep.subr.bf16.mxu1 %v2905_v20 }
  0x41   :  { %918 = vmatmul.mubr.bf16.vlgmr.msra.gmra.mrb[0].mxu0 %v2881_v19  ;;  %1110 = vmatmul.mubr.bf16.vlgmr.msra.gmra.mrb[0].mxu1 %v2884_v21  ;;  %v2971_v19 = vld [vmem:[%s5428_s0 + $0x158] ss:$12 sps:$4 sm:$0xff]   ;;  %v2973_v21 = vld [vmem:[%s5428_s0 + $0x170] ss:$12 sps:$4 sm:$0xff]  }
  0x42   :  { %925 = vmatprep.mubr.bf16.mxu0 %v2887_v22  ;;  %1117 = vmatprep.mubr.bf16.mxu1 %v2889_v23  ;;  %v2974_v22 = vld [vmem:[%s5428_s0 + $0x184] ss:$12 sps:$4 sm:$0xff]   ;;  %v2976_v23 = vld [vmem:[%s5428_s0 + $0x188] ss:$12 sps:$4 sm:$0xff]  }
  0x43   :  { %2759 = vmatpush3.bf16.msra.mxu1 %v2905_v20  ;;  %v2972_v20 = vld [vmem:[%s5428_s0 + $0x168] ss:$12 sps:$4 sm:$0xff]  }
  0x44   :  { %2760 = vmatprep.subr.bf16.mxu1 %v2916_v24 }
  0x47   :  { %2761 = vmatpush3.bf16.msra.mxu1 %v2916_v24  ;;  %v2977_v24 = vld [vmem:[%s5428_s0 + $0x180] ss:$12 sps:$4 sm:$0xff]  }
  0x48   :  { %2762 = vmatprep.subr.bf16.mxu1 %v2925_v27 }
  0x49   :  { %926 = vmatmul.mubr.bf16.gmra.mrb[4].mxu0 %v2891_v25  ;;  %1118 = vmatmul.mubr.bf16.gmra.mrb[4].mxu1 %v2892_v26  ;;  %v2978_v25 = vld [vmem:[%s5428_s0 + $0x1a0] ss:$12 sps:$4 sm:$0xff]   ;;  %v2979_v26 = vld [vmem:[%s5428_s0 + $0x19c] ss:$12 sps:$4 sm:$0xff]  }
  0x4a   :  { %933 = vmatprep.mubr.bf16.mxu0 %v2893_v28  ;;  %1125 = vmatprep.mubr.bf16.mxu1 %v2895_v29  ;;  %v2982_v28 = vld [vmem:[%s5428_s0 + $0x198] ss:$12 sps:$4 sm:$0xff]   ;;  %v2983_v29 = vld [vmem:[%s5428_s0 + $0x1d0] ss:$12 sps:$4 sm:$0xff]  }
  0x4b   :  { %2763 = vmatpush3.bf16.msra.mxu1 %v2925_v27  ;;  %v2981_v27 = vld [vmem:[%s5428_s0 + $0x1b8] ss:$12 sps:$4 sm:$0xff]  }
  0x4c   :  { %2764 = vmatprep.subr.bf16.mxu1 %v2932_v30 }
  0x4f   :  { %2765 = vmatpush3.bf16.msra.mxu1 %v2932_v30  ;;  %v2984_v30 = vld [vmem:[%s5428_s0 + $0x1b4] ss:$12 sps:$4 sm:$0xff]  }
  0x50   :  { %2766 = vmatprep.subr.bf16.mxu1 %v2933_v33 }
  0x51   :  { %934 = vmatmul.mubr.bf16.gmra.mrb[8].mxu0 %v2897_v31  ;;  %1126 = vmatmul.mubr.bf16.gmra.mrb[8].mxu1 %v2898_v32  ;;  %v2986_v31 = vld [vmem:[%s5428_s0 + $0x1e8] ss:$12 sps:$4 sm:$0xff]   ;;  %v2987_v32 = vld [vmem:[%s5428_s0 + $0x1b0] ss:$12 sps:$4 sm:$0xff]  }
  0x52   :  { %941 = vmatprep.mubr.bf16.mxu0 %v2899_v34  ;;  %1133 = vmatprep.mubr.bf16.mxu1 %v2901_v35  ;;  %v2989_v34 = vld [vmem:[%s5428_s0 + $0x1cc] ss:$12 sps:$4 sm:$0xff]  }
  0x53   :  { %2767 = vmatpush3.bf16.msra.mxu1 %v2933_v33  ;;  %v2988_v33 = vld [vmem:[%s5428_s0 + $0x200] ss:$12 sps:$4 sm:$0xff]   ;;  %v2991_v35 = vld [vmem:[%s5428_s0 + $0x218] ss:$12 sps:$4 sm:$0xff]  }
  0x59   :  { %942 = vmatmul.mubr.bf16.gmra.mrb[12].mxu0 %v2903_v36  ;;  %1134 = vmatmul.mubr.bf16.gmra.mrb[12].mxu1 %v2904_v37  ;;  %v2992_v36 = vld [vmem:[%s5428_s0 + $0x1c8] ss:$12 sps:$4 sm:$0xff]   ;;  %v2993_v37 = vld [vmem:[%s5428_s0 + $0x230] ss:$12 sps:$4 sm:$0xff]  }
  0x5a   :  { %949 = vmatprep.mubr.bf16.mxu0 %v2906_v38  ;;  %1141 = vmatprep.mubr.bf16.mxu1 %v2908_v39  ;;  %v2994_v38 = vld [vmem:[%s5428_s0 + $0x1e4] ss:$12 sps:$4 sm:$0xff]   ;;  %v2996_v39 = vld [vmem:[%s5428_s0 + $0x248] ss:$12 sps:$4 sm:$0xff]  }
  0x61   :  { %950 = vmatmul.mubr.bf16.gmra.mrb[16].mxu0 %v2910_v40  ;;  %1142 = vmatmul.mubr.bf16.gmra.mrb[16].mxu1 %v2911_v41  ;;  %v2997_v40 = vld [vmem:[%s5428_s0 + $0x1e0] ss:$12 sps:$4 sm:$0xff]  }
  0x62   :  { %957 = vmatprep.mubr.bf16.mxu0 %v2912_v42  ;;  %1149 = vmatprep.mubr.bf16.mxu1 %v2914_v43  ;;  %v2998_v41 = vld [vmem:[%s5428_s0 + $0x260] ss:$12 sps:$4 sm:$0xff]   ;;  %v2999_v42 = vld [vmem:[%s5428_s0 + $0x1fc] ss:$12 sps:$4 sm:$0xff]   ;;  %v3001_v43 = vld [vmem:[%s5428_s0 + $0x278] ss:$12 sps:$4 sm:$0xff]  }
  0x69   :  { %958 = vmatmul.mubr.bf16.gmra.mrb[20].mxu0 %v2917_v44  ;;  %1150 = vmatmul.mubr.bf16.gmra.mrb[20].mxu1 %v2918_v45  ;;  %v3002_v44 = vld [vmem:[%s5428_s0 + $0x1f8] ss:$12 sps:$4 sm:$0xff]   ;;  %v3003_v45 = vld [vmem:[%s5428_s0 + $0x290] ss:$12 sps:$4 sm:$0xff]  }
  0x6a   :  { %965 = vmatprep.mubr.bf16.mxu0 %v2919_v46  ;;  %1157 = vmatprep.mubr.bf16.mxu1 %v2921_v47  ;;  %v3004_v46 = vld [vmem:[%s5428_s0 + $0x214] ss:$12 sps:$4 sm:$0xff]  }
  0x6b   :  { %v3006_v47 = vld [vmem:[%s5428_s0 + $0x2a8] ss:$12 sps:$4 sm:$0xff]  }
  0x71   :  { %966 = vmatmul.mubr.bf16.gmra.mrb[24].mxu0 %v2923_v48  ;;  %1158 = vmatmul.mubr.bf16.gmra.mrb[24].mxu1 %v2924_v49  ;;  %v3007_v48 = vld [vmem:[%s5428_s0 + $0x210] ss:$12 sps:$4 sm:$0xff]   ;;  %v3008_v49 = vld [vmem:[%s5428_s0 + $0x2c0] ss:$12 sps:$4 sm:$0xff]  }
  0x72   :  { %973 = vmatprep.mubr.bf16.mxu0 %v2926_v50  ;;  %1165 = vmatprep.mubr.bf16.mxu1 %v2928_v51  ;;  %v3009_v50 = vld [vmem:[%s5428_s0 + $0x22c] ss:$12 sps:$4 sm:$0xff]  }
  0x73   :  { %v3011_v51 = vld [vmem:[%s5428_s0 + $0x2d8] ss:$12 sps:$4 sm:$0xff]  }
  0x79   :  { %974 = vmatmul.mubr.bf16.gmra.mrb[28].mxu0 %v2930_v52  ;;  %1166 = vmatmul.mubr.bf16.gmra.mrb[28].mxu1 %v2931_v53  ;;  %v3012_v52 = vld [vmem:[%s5428_s0 + $0x228] ss:$12 sps:$4 sm:$0xff]   ;;  %v3013_v53 = vld [vmem:[%s5428_s0 + $0x2f0] ss:$12 sps:$4 sm:$0xff]  }
  0x7a   :  { %981 = vmatprep.mubr.bf16.mxu0 %v2934_v54  ;;  %2768 = vmatprep.mubr.msk.bf16.mxu1 %vm788_vm0, %v2936_v55 }
  0x81   :  { %982 = vmatmul.mubr.bf16.gmra.mrb[32].mxu0 %v2937_v56  ;;  %2769 = vmatmul.mubr.msk.bf16.vlgmr.msra.gmra.mrb[32].mxu1 %vm788_vm0, %v2938_v57 }
  0x82   :  { %989 = vmatprep.mubr.bf16.mxu0 %v2939_v58  ;;  %2772 = vmatprep.mubr.msk.bf16.mxu1 %vm788_vm0, %v2941_v59 }
  0x89   :  { %990 = vmatmul.mubr.bf16.gmra.mrb[36].mxu0 %v2942_v60  ;;  %2773 = vmatmul.mubr.msk.bf16.gmra.mrb[36].mxu1 %vm788_vm0, %v2943_v61 }
  0x8a   :  { %997 = vmatprep.mubr.bf16.mxu0 %v2944_v62  ;;  %2776 = vmatprep.mubr.msk.bf16.mxu1 %vm788_vm0, %v2946_v63 }
  0x91   :  { %998 = vmatmul.mubr.bf16.gmra.mrb[40].mxu0 %v2947_v0  ;;  %2777 = vmatmul.mubr.msk.bf16.gmra.mrb[40].mxu1 %vm788_vm0, %v2948_v1 }
  0x92   :  { %1005 = vmatprep.mubr.bf16.mxu0 %v2949_v2  ;;  %2780 = vmatprep.mubr.msk.bf16.mxu1 %vm788_vm0, %v2951_v3 }
  0x99   :  { %1006 = vmatmul.mubr.bf16.gmra.mrb[44].mxu0 %v2952_v4  ;;  %2781 = vmatmul.mubr.msk.bf16.gmra.mrb[44].mxu1 %vm788_vm0, %v2953_v5 }
  0x9a   :  { %1013 = vmatprep.mubr.bf16.mxu0 %v2954_v6  ;;  %2784 = vmatprep.mubr.msk.bf16.mxu1 %vm788_vm0, %v2956_v7 }
  0xa1   :  { %1014 = vmatmul.mubr.bf16.gmra.mrb[48].mxu0 %v2957_v8  ;;  %2785 = vmatmul.mubr.msk.bf16.gmra.mrb[48].mxu1 %vm788_vm0, %v2958_v9 }
  0xa2   :  { %1021 = vmatprep.mubr.bf16.mxu0 %v2959_v10  ;;  %2788 = vmatprep.mubr.msk.bf16.mxu1 %vm788_vm0, %v2961_v11 }
  0xa9   :  { %1022 = vmatmul.mubr.bf16.gmra.mrb[52].mxu0 %v2962_v12  ;;  %2789 = vmatmul.mubr.msk.bf16.gmra.mrb[52].mxu1 %vm788_vm0, %v2963_v13 }
  0xaa   :  { %1029 = vmatprep.mubr.bf16.mxu0 %v2964_v14  ;;  %2792 = vmatprep.mubr.msk.bf16.mxu1 %vm788_vm0, %v2966_v15 }
  0xb1   :  { %1030 = vmatmul.mubr.bf16.gmra.mrb[56].mxu0 %v2967_v16  ;;  %2793 = vmatmul.mubr.msk.bf16.gmra.mrb[56].mxu1 %vm788_vm0, %v2968_v17 }
  0xb2   :  { %1037 = vmatprep.mubr.bf16.mxu0 %v2969_v18  ;;  %2796 = vmatprep.mubr.msk.bf16.mxu1 %vm788_vm0, %v2971_v19 }
  0xb9   :  { %1038 = vmatmul.mubr.bf16.gmra.mrb[60].mxu0 %v2972_v20  ;;  %2797 = vmatmul.mubr.msk.bf16.gmra.mrb[60].mxu1 %vm788_vm0, %v2973_v21 }
  0xba   :  { %1045 = vmatprep.mubr.bf16.mxu0 %v2974_v22  ;;  %2800 = vmatprep.mubr.msk.bf16.mxu1 %vm788_vm0, %v2976_v23 }
  0xc1   :  { %1046 = vmatmul.mubr.bf16.gmra.mrb[64].mxu0 %v2977_v24  ;;  %2801 = vmatmul.mubr.msk.bf16.gmra.mrb[64].mxu1 %vm788_vm0, %v2978_v25 }
  0xc2   :  { %1053 = vmatprep.mubr.bf16.mxu0 %v2979_v26  ;;  %2804 = vmatprep.mubr.msk.bf16.mxu1 %vm788_vm0, %v2981_v27 }
  0xc9   :  { %1054 = vmatmul.mubr.bf16.gmra.mrb[68].mxu0 %v2982_v28  ;;  %2805 = vmatmul.mubr.msk.bf16.gmra.mrb[68].mxu1 %vm788_vm0, %v2983_v29 }
  0xca   :  { %1061 = vmatprep.mubr.bf16.mxu0 %v2984_v30  ;;  %2808 = vmatprep.mubr.msk.bf16.mxu1 %vm788_vm0, %v2986_v31 }
  0xd1   :  { %1062 = vmatmul.mubr.bf16.gmra.mrb[72].mxu0 %v2987_v32  ;;  %2809 = vmatmul.mubr.msk.bf16.gmra.mrb[72].mxu1 %vm788_vm0, %v2988_v33 }
  0xd2   :  { %1069 = vmatprep.mubr.bf16.mxu0 %v2989_v34  ;;  %2812 = vmatprep.mubr.msk.bf16.mxu1 %vm788_vm0, %v2991_v35 }
  0xd9   :  { %1070 = vmatmul.mubr.bf16.gmra.mrb[76].mxu0 %v2992_v36  ;;  %2813 = vmatmul.mubr.msk.bf16.gmra.mrb[76].mxu1 %vm788_vm0, %v2993_v37 }
  0xda   :  { %1077 = vmatprep.mubr.bf16.mxu0 %v2994_v38  ;;  %2816 = vmatprep.mubr.msk.bf16.mxu1 %vm788_vm0, %v2996_v39 }
  0xe1   :  { %1078 = vmatmul.mubr.bf16.gmra.mrb[80].mxu0 %v2997_v40  ;;  %2817 = vmatmul.mubr.msk.bf16.gmra.mrb[80].mxu1 %vm788_vm0, %v2998_v41 }
  0xe2   :  { %1085 = vmatprep.mubr.bf16.mxu0 %v2999_v42  ;;  %2820 = vmatprep.mubr.msk.bf16.mxu1 %vm788_vm0, %v3001_v43 }
  0xe9   :  { %1086 = vmatmul.mubr.bf16.gmra.mrb[84].mxu0 %v3002_v44  ;;  %2821 = vmatmul.mubr.msk.bf16.gmra.mrb[84].mxu1 %vm788_vm0, %v3003_v45 }
  0xea   :  { %1093 = vmatprep.mubr.bf16.mxu0 %v3004_v46  ;;  %2824 = vmatprep.mubr.msk.bf16.mxu1 %vm788_vm0, %v3006_v47 }
  0xf1   :  { %1094 = vmatmul.mubr.bf16.gmra.mrb[88].mxu0 %v3007_v48  ;;  %2825 = vmatmul.mubr.msk.bf16.gmra.mrb[88].mxu1 %vm788_vm0, %v3008_v49 }
  0xf2   :  { %1101 = vmatprep.mubr.bf16.mxu0 %v3009_v50  ;;  %2828 = vmatprep.mubr.msk.bf16.mxu1 %vm788_vm0, %v3011_v51 }
  0xf9   :  { %1102 = vmatmul.mubr.bf16.gmra.mrb[92].mxu0 %v3012_v52  ;;  %2829 = vmatmul.mubr.msk.bf16.gmra.mrb[92].mxu1 %vm788_vm0, %v3013_v53 }
 0x114   :  { %v3447_v54 = vpop.f32.mrb[0].mxu0  ;;  %v3449_v55 = vpop.f32.mrb[0].mxu1 }
 0x115   :  { %v921_v56 = vpop.f32.mrb[1].mxu0  ;;  %v1113_v57 = vpop.f32.mrb[1].mxu1 }
 0x116   :  { %v3451_v58 = vpop.f32.mrb[2].mxu0  ;;  %v3453_v59 = vpop.f32.mrb[2].mxu1 }
 0x117   :  { %v924_v60 = vpop.f32.mrb[3].mxu0  ;;  %v1116_v61 = vpop.f32.mrb[3].mxu1 }
 0x11c   :  { %v927_v62 = vpop.f32.mrb[4].mxu0  ;;  %v3455_v63 = vpop.f32.mrb[4].mxu1 }
 0x11d   :  { %v929_v0 = vpop.f32.mrb[5].mxu0  ;;  %v1121_v1 = vpop.f32.mrb[5].mxu1 }
 0x11e   :  { %v930_v2 = vpop.f32.mrb[6].mxu0  ;;  %v3457_v3 = vpop.f32.mrb[6].mxu1 }
 0x11f   :  { %v932_v4 = vpop.f32.mrb[7].mxu0  ;;  %v1124_v5 = vpop.f32.mrb[7].mxu1 }
 0x124   :  { %v3459_v6 = vpop.f32.mrb[8].mxu0  ;;  %v3461_v7 = vpop.f32.mrb[8].mxu1 }
 0x125   :  { %v937_v8 = vpop.f32.mrb[9].mxu0  ;;  %v1129_v9 = vpop.f32.mrb[9].mxu1 }
 0x126   :  { %v3463_v10 = vpop.f32.mrb[10].mxu0  ;;  %v3465_v11 = vpop.f32.mrb[10].mxu1 }
 0x127   :  { %v940_v12 = vpop.f32.mrb[11].mxu0  ;;  %v1132_v13 = vpop.f32.mrb[11].mxu1 }
 0x12c   :  { %v943_v14 = vpop.f32.mrb[12].mxu0  ;;  %v3467_v15 = vpop.f32.mrb[12].mxu1 }
 0x12d   :  { %v945_v16 = vpop.f32.mrb[13].mxu0  ;;  %v1137_v17 = vpop.f32.mrb[13].mxu1 }
 0x12e   :  { %v3469_v18 = vpop.f32.mrb[14].mxu0  ;;  %v3471_v19 = vpop.f32.mrb[14].mxu1 }
 0x12f   :  { %v948_v20 = vpop.f32.mrb[15].mxu0  ;;  %v1140_v21 = vpop.f32.mrb[15].mxu1 }
 0x134   :  { %v3473_v22 = vpop.f32.mrb[16].mxu0  ;;  %v3475_v23 = vpop.f32.mrb[16].mxu1 }
 0x135   :  { %v953_v24 = vpop.f32.mrb[17].mxu0  ;;  %v1145_v25 = vpop.f32.mrb[17].mxu1 }
 0x136   :  { %v3477_v26 = vpop.f32.mrb[18].mxu0  ;;  %v3479_v27 = vpop.f32.mrb[18].mxu1 }
 0x137   :  { %v956_v28 = vpop.f32.mrb[19].mxu0  ;;  %v1148_v29 = vpop.f32.mrb[19].mxu1 }
 0x13c   :  { %v3481_v30 = vpop.f32.mrb[20].mxu0  ;;  %v3483_v31 = vpop.f32.mrb[20].mxu1 }
 0x13d   :  { %v961_v32 = vpop.f32.mrb[21].mxu0  ;;  %v1153_v33 = vpop.f32.mrb[21].mxu1 }
 0x13e   :  { %v3485_v34 = vpop.f32.mrb[22].mxu0  ;;  %v3487_v35 = vpop.f32.mrb[22].mxu1 }
 0x13f   :  { %v964_v36 = vpop.f32.mrb[23].mxu0  ;;  %v1156_v37 = vpop.f32.mrb[23].mxu1 }
 0x144   :  { %v3489_v38 = vpop.f32.mrb[24].mxu0  ;;  %v3491_v39 = vpop.f32.mrb[24].mxu1 }
 0x145   :  { %v969_v40 = vpop.f32.mrb[25].mxu0  ;;  %v1161_v41 = vpop.f32.mrb[25].mxu1 }
 0x146   :  { %v3493_v42 = vpop.f32.mrb[26].mxu0  ;;  %v3495_v43 = vpop.f32.mrb[26].mxu1 }
 0x147   :  { %v972_v44 = vpop.f32.mrb[27].mxu0  ;;  %v1164_v45 = vpop.f32.mrb[27].mxu1 }
 0x14c   :  { %v3497_v46 = vpop.f32.mrb[28].mxu0  ;;  %v3499_v47 = vpop.f32.mrb[28].mxu1 }
 0x14d   :  { %v977_v48 = vpop.f32.mrb[29].mxu0  ;;  %v1169_v49 = vpop.f32.mrb[29].mxu1 }
 0x14e   :  { %v3501_v50 = vpop.f32.mrb[30].mxu0  ;;  %v3503_v51 = vpop.f32.mrb[30].mxu1 }
 0x14f   :  { %v980_v52 = vpop.f32.mrb[31].mxu0  ;;  %v1172_v53 = vpop.f32.mrb[31].mxu1 }
 0x154   :  { %v3505_v56 = vpop.f32.mrb[32].mxu0  ;;  %v2770_v57 = vpop.f32.mrb[32].mxu1 }
 0x155   :  { %v3507_v60 = vadd.f32 %v2770_v57, %v927_v62  ;;  %v985_v61 = vpop.f32.mrb[33].mxu0  ;;  %v1208_v0 = vpop.f32.mrb[33].mxu1 }
 0x156   :  { %v3510_v1 = vadd.f32 %v1208_v0, %v3447_v54  ;;  %v3512_v4 = vpop.f32.mrb[34].mxu0  ;;  %v2771_v5 = vpop.f32.mrb[34].mxu1 }
 0x157   :  { %v3514_v8 = vadd.f32 %v2771_v5, %v930_v2  ;;  %v988_v9 = vpop.f32.mrb[35].mxu0  ;;  %v1211_v12 = vpop.f32.mrb[35].mxu1  ;;  %v1467_v54 = vsel %vm1463_vm1, %v3507_v60, 0.0 }
 0x158   :  { %v3517_v13 = vadd.f32 %v1211_v12, %v3451_v58  ;;  %v1464_v62 = vsel %vm1463_vm1, %v3510_v1, 0.0 }
 0x159   :  { %v1469_v58 = vsel %vm1463_vm1, %v3514_v8, 0.0 }
 0x15a   :  { %v1465_v16 = vsel %vm1463_vm1, %v3517_v13, 0.0 }
 0x15b   :  { %v1466_v17 = vadd.f32 %v1465_v16, %v1464_v62 }
 0x15c   :  { %v3525_v20 = vpop.f32.mrb[36].mxu0  ;;  %v2774_v21 = vpop.f32.mrb[36].mxu1 }
 0x15d   :  { %v1468_v2 = vadd.f32 %v1467_v54, %v1466_v17  ;;  %v3527_v24 = vadd.f32 %v2774_v21, %v943_v14  ;;  %v993_v25 = vpop.f32.mrb[37].mxu0  ;;  %v1224_v28 = vpop.f32.mrb[37].mxu1 }
 0x15e   :  { %v3532_v29 = vadd.f32 %v1224_v28, %v3459_v6  ;;  %v3534_v32 = vpop.f32.mrb[38].mxu0  ;;  %v2775_v33 = vpop.f32.mrb[38].mxu1 }
 0x15f   :  { %v1470_v36 = vadd.f32 %v1469_v58, %v1468_v2  ;;  %v3537_v37 = vadd.f32 %v2775_v33, %v3469_v18  ;;  %v996_v40 = vpop.f32.mrb[39].mxu0  ;;  %v1227_v41 = vpop.f32.mrb[39].mxu1  ;;  %v1475_v49 = vsel %vm1463_vm1, %v3527_v24, 0.0 }
 0x160   :  { %v1471_v14 = vsel %vm1463_vm1, %v3532_v29, 0.0  ;;  %v3542_v44 = vadd.f32 %v1227_v41, %v3463_v10 }
 0x161   :  { %v1472_v45 = vadd.f32 %v1471_v14, %v1470_v36  ;;  %v1477_v10 = vsel %vm1463_vm1, %v3537_v37, 0.0 }
 0x162   :  { %v1473_v6 = vsel %vm1463_vm1, %v3542_v44, 0.0 }
 0x163   :  { %v1474_v48 = vadd.f32 %v1473_v6, %v1472_v45 }
 0x164   :  { %v3548_v52 = vpop.f32.mrb[40].mxu0  ;;  %v2778_v18 = vpop.f32.mrb[40].mxu1 }
 0x165   :  { %v1476_v53 = vadd.f32 %v1475_v49, %v1474_v48  ;;  %v3551_v57 = vadd.f32 %v2778_v18, %v3481_v30  ;;  %v1001_v61 = vpop.f32.mrb[41].mxu0  ;;  %v1240_v0 = vpop.f32.mrb[41].mxu1 }
 0x166   :  { %v3556_v5 = vadd.f32 %v1240_v0, %v3473_v22  ;;  %v3558_v9 = vpop.f32.mrb[42].mxu0  ;;  %v2779_v12 = vpop.f32.mrb[42].mxu1 }
 0x167   :  { %v1478_v62 = vadd.f32 %v1477_v10, %v1476_v53  ;;  %v3561_v16 = vadd.f32 %v2779_v12, %v3485_v34  ;;  %v1004_v17 = vpop.f32.mrb[43].mxu0  ;;  %v1243_v54 = vpop.f32.mrb[43].mxu1  ;;  %v1483_v28 = vsel %vm1463_vm1, %v3551_v57, 0.0 }
 0x168   :  { %v1479_v30 = vsel %vm1463_vm1, %v3556_v5, 0.0  ;;  %v3566_v21 = vadd.f32 %v1243_v54, %v3477_v26 }
 0x169   :  { %v1480_v2 = vadd.f32 %v1479_v30, %v1478_v62  ;;  %v1485_v26 = vsel %vm1463_vm1, %v3561_v16, 0.0 }
 0x16a   :  { %v1481_v22 = vsel %vm1463_vm1, %v3566_v21, 0.0 }
 0x16b   :  { %v1482_v25 = vadd.f32 %v1481_v22, %v1480_v2 }
 0x16c   :  { %v1007_v58 = vpop.f32.mrb[44].mxu0  ;;  %v2782_v33 = vpop.f32.mrb[44].mxu1 }
 0x16d   :  { %v1484_v34 = vadd.f32 %v1483_v28, %v1482_v25  ;;  %v3573_v36 = vadd.f32 %v2782_v33, %v3497_v46  ;;  %v1009_v40 = vpop.f32.mrb[45].mxu0  ;;  %v1256_v41 = vpop.f32.mrb[45].mxu1 }
 0x16e   :  { %v3578_v14 = vadd.f32 %v1256_v41, %v3489_v38  ;;  %v1010_v45 = vpop.f32.mrb[46].mxu0  ;;  %v2783_v6 = vpop.f32.mrb[46].mxu1 }
 0x16f   :  { %v1486_v48 = vadd.f32 %v1485_v26, %v1484_v34  ;;  %v3581_v49 = vadd.f32 %v2783_v6, %v3501_v50  ;;  %v1012_v18 = vpop.f32.mrb[47].mxu0  ;;  %v1259_v53 = vpop.f32.mrb[47].mxu1  ;;  %v1491_v12 = vsel %vm1463_vm1, %v3573_v36, 0.0 }
 0x170   :  { %v1487_v46 = vsel %vm1463_vm1, %v3578_v14, 0.0  ;;  %v3586_v61 = vadd.f32 %v1259_v53, %v3493_v42 }
 0x171   :  { %v1488_v0 = vadd.f32 %v1487_v46, %v1486_v48  ;;  %v1493_v42 = vsel %vm1463_vm1, %v3581_v49, 0.0 }
 0x172   :  { %v1489_v10 = vsel %vm1463_vm1, %v3586_v61, 0.0 }
 0x173   :  { %v1490_v38 = vadd.f32 %v1489_v10, %v1488_v0 }
 0x174   :  { %v1015_v62 = vpop.f32.mrb[48].mxu0  ;;  %v2786_v17 = vpop.f32.mrb[48].mxu1 }
 0x175   :  { %v1492_v50 = vadd.f32 %v1491_v12, %v1490_v38  ;;  %v3593_v54 = vadd.f32 %v2786_v17, %v3525_v20  ;;  %v1017_v30 = vpop.f32.mrb[49].mxu0  ;;  %v1272_v2 = vpop.f32.mrb[49].mxu1 }
 0x176   :  { %v3598_v22 = vadd.f32 %v1272_v2, %v3505_v56  ;;  %v1018_v25 = vpop.f32.mrb[50].mxu0  ;;  %v2787_v28 = vpop.f32.mrb[50].mxu1 }
 0x177   :  { %v1494_v33 = vadd.f32 %v1493_v42, %v1492_v50  ;;  %v3601_v34 = vadd.f32 %v2787_v28, %v3534_v32  ;;  %v1020_v40 = vpop.f32.mrb[51].mxu0  ;;  %v1275_v41 = vpop.f32.mrb[51].mxu1  ;;  %v1499_v18 = vsel %vm1463_vm1, %v3593_v54, 0.0 }
 0x178   :  { %v1495_v20 = vsel %vm1463_vm1, %v3598_v22, 0.0  ;;  %v3606_v26 = vadd.f32 %v1275_v41, %v3512_v4 }
 0x179   :  { %v1496_v6 = vadd.f32 %v1495_v20, %v1494_v33  ;;  %v1501_v12 = vsel %vm1463_vm1, %v3601_v34, 0.0 }
 0x17a   :  { %v1497_v48 = vsel %vm1463_vm1, %v3606_v26, 0.0 }
 0x17b   :  { %v1498_v56 = vadd.f32 %v1497_v48, %v1496_v6 }
 0x17c   :  { %v1023_v53 = vpop.f32.mrb[52].mxu0  ;;  %v2790_v46 = vpop.f32.mrb[52].mxu1 }
 0x17d   :  { %v1500_v32 = vadd.f32 %v1499_v18, %v1498_v56  ;;  %v3612_v0 = vadd.f32 %v2790_v46, %v1007_v58  ;;  %v1025_v10 = vpop.f32.mrb[53].mxu0  ;;  %v1288_v38 = vpop.f32.mrb[53].mxu1 }
 0x17e   :  { %v3617_v4 = vadd.f32 %v1288_v38, %v3548_v52  ;;  %v1026_v17 = vpop.f32.mrb[54].mxu0  ;;  %v2791_v50 = vpop.f32.mrb[54].mxu1 }
 0x17f   :  { %5497 = vst [vmem:[#allocation2_spill] sm:$0xff] %v3612_v0  ;;  %v1502_v30 = vadd.f32 %v1501_v12, %v1500_v32  ;;  %v3619_v2 = vadd.f32 %v2791_v50, %v1010_v45  ;;  %v1028_v42 = vpop.f32.mrb[55].mxu0  ;;  %v1291_v28 = vpop.f32.mrb[55].mxu1  ;;  %v1507_v52 = vsel %vm1463_vm1, %v3612_v0, 0.0 }
 0x180   :  { %v1503_v33 = vsel %vm1463_vm1, %v3617_v4, 0.0  ;;  %v3624_v58 = vadd.f32 %v1291_v28, %v3558_v9 }
 0x181   :  { %5498 = vst [vmem:[#allocation3_spill] sm:$0xff] %v3619_v2  ;;  %v1504_v40 = vadd.f32 %v1503_v33, %v1502_v30  ;;  %v1509_v32 = vsel %vm1463_vm1, %v3619_v2, 0.0 }
 0x182   :  { %v1505_v41 = vsel %vm1463_vm1, %v3624_v58, 0.0 }
 0x183   :  { %v1506_v20 = vadd.f32 %v1505_v41, %v1504_v40 }
 0x184   :  { %v1031_v6 = vpop.f32.mrb[56].mxu0  ;;  %v2794_v48 = vpop.f32.mrb[56].mxu1 }
 0x185   :  { %v1508_v45 = vadd.f32 %v1507_v52, %v1506_v20  ;;  %v3630_v56 = vadd.f32 %v2794_v48, %v1023_v53  ;;  %v1033_v18 = vpop.f32.mrb[57].mxu0  ;;  %v1304_v46 = vpop.f32.mrb[57].mxu1 }
 0x186   :  { %v3634_v9 = vadd.f32 %v1304_v46, %v1015_v62  ;;  %v1034_v10 = vpop.f32.mrb[58].mxu0  ;;  %v2795_v38 = vpop.f32.mrb[58].mxu1 }
 0x187   :  { %5499 = vst [vmem:[#allocation4_spill] sm:$0xff] %v3630_v56  ;;  %v1510_v12 = vadd.f32 %v1509_v32, %v1508_v45  ;;  %v3636_v50 = vadd.f32 %v2795_v38, %v1026_v17  ;;  %v1036_v30 = vpop.f32.mrb[59].mxu0  ;;  %v1307_v42 = vpop.f32.mrb[59].mxu1  ;;  %v1515_v52 = vsel %vm1463_vm1, %v3630_v56, 0.0 }
 0x188   :  { %5500 = vst [vmem:[#allocation5_spill] sm:$0xff] %v3634_v9  ;;  %v1511_v28 = vsel %vm1463_vm1, %v3634_v9, 0.0  ;;  %v3640_v33 = vadd.f32 %v1307_v42, %v1018_v25 }
 0x189   :  { %5501 = vst [vmem:[#allocation6_spill] sm:$0xff] %v3636_v50  ;;  %v1512_v53 = vadd.f32 %v1511_v28, %v1510_v12  ;;  %v1517_v28 = vsel %vm1463_vm1, %v3636_v50, 0.0 }
 0x18a   :  { %5502 = vst [vmem:[#allocation7_spill] sm:$0xff] %v3640_v33  ;;  %v1513_v40 = vsel %vm1463_vm1, %v3640_v33, 0.0 }
 0x18b   :  { %v1514_v41 = vadd.f32 %v1513_v40, %v1512_v53 }
 0x18c   :  { %v1039_v20 = vpop.f32.mrb[60].mxu0  ;;  %v2798_v62 = vpop.f32.mrb[60].mxu1 }
 0x18d   :  { %v3646_v48 = vadd.f32 %v2798_v62, %v1039_v20  ;;  %v1041_v17 = vpop.f32.mrb[61].mxu0  ;;  %v1320_v45 = vpop.f32.mrb[61].mxu1  ;;  %v1516_v18 = vadd.f32 %v1515_v52, %v1514_v41 }
 0x18e   :  { %v3648_v46 = vadd.f32 %v1320_v45, %v1031_v6  ;;  %v1042_v32 = vpop.f32.mrb[62].mxu0  ;;  %v2799_v25 = vpop.f32.mrb[62].mxu1 }
 0x18f   :  { %5503 = vst [vmem:[#allocation8_spill] sm:$0xff] %v3646_v48  ;;  %v3650_v38 = vadd.f32 %v2799_v25, %v1042_v32  ;;  %v1044_v12 = vpop.f32.mrb[63].mxu0  ;;  %v1323_v30 = vpop.f32.mrb[63].mxu1  ;;  %v1518_v53 = vadd.f32 %v1517_v28, %v1516_v18 }
 0x190   :  { %5504 = vst [vmem:[#allocation9_spill] sm:$0xff] %v3648_v46  ;;  %v3652_v42 = vadd.f32 %v1323_v30, %v1034_v10  ;;  %v1519_v40 = vsel %vm1463_vm1, %v3648_v46, 0.0  ;;  %v1523_v46 = vsel %vm1463_vm1, %v3646_v48, 0.0 }
 0x191   :  { %5505 = vst [vmem:[#allocation10_spill] sm:$0xff] %v3650_v38  ;;  %v1520_v52 = vadd.f32 %v1519_v40, %v1518_v53 }
 0x192   :  { %5506 = vst [vmem:[#allocation11_spill] sm:$0xff] %v3652_v42  ;;  %v1521_v10 = vsel %vm1463_vm1, %v3652_v42, 0.0 }
 0x193   :  { %v1522_v18 = vadd.f32 %v1521_v10, %v1520_v52 }
 0x194   :  { %v1047_v20 = vpop.f32.mrb[64].mxu0  ;;  %v2802_v62 = vpop.f32.mrb[64].mxu1 }
 0x195   :  { %v1049_v41 = vpop.f32.mrb[65].mxu0  ;;  %v1336_v6 = vpop.f32.mrb[65].mxu1 }
 0x196   :  { %v3658_v17 = vadd.f32 %v1336_v6, %v1047_v20  ;;  %v1050_v45 = vpop.f32.mrb[66].mxu0  ;;  %v2803_v32 = vpop.f32.mrb[66].mxu1  ;;  %v1524_v20 = vadd.f32 %v1523_v46, %v1522_v18 }
 0x197   :  { %v1052_v25 = vpop.f32.mrb[67].mxu0  ;;  %v1339_v12 = vpop.f32.mrb[67].mxu1 }
 0x198   :  { %5507 = vst [vmem:[#allocation12_spill] sm:$0xff] %v3658_v17  ;;  %v3662_v30 = vadd.f32 %v1339_v12, %v1050_v45  ;;  %v1525_v45 = vsel %vm1463_vm1, %v3650_v38, 0.0  ;;  %v1527_v10 = vsel %vm1463_vm1, %v3658_v17, 0.0 }
 0x199   :  { %v1526_v52 = vadd.f32 %v1525_v45, %v1524_v20 }
 0x19a   :  { %5508 = vst [vmem:[#allocation13_spill] sm:$0xff] %v3662_v30 }
 0x19b   :  { %v1528_v46 = vadd.f32 %v1527_v10, %v1526_v52 }
 0x19c   :  { %v1055_v28 = vpop.f32.mrb[68].mxu0  ;;  %v2806_v50 = vpop.f32.mrb[68].mxu1 }
 0x19d   :  { %v3666_v41 = vadd.f32 %v2802_v62, %v1055_v28  ;;  %v1057_v53 = vpop.f32.mrb[69].mxu0  ;;  %v1352_v40 = vpop.f32.mrb[69].mxu1 }
 0x19e   :  { %v1058_v6 = vpop.f32.mrb[70].mxu0  ;;  %v2807_v56 = vpop.f32.mrb[70].mxu1 }
 0x19f   :  { %5509 = vst [vmem:[#allocation14_spill] sm:$0xff] %v3666_v41  ;;  %v3668_v33 = vadd.f32 %v2803_v32, %v1058_v6  ;;  %v1060_v42 = vpop.f32.mrb[71].mxu0  ;;  %v1355_v25 = vpop.f32.mrb[71].mxu1  ;;  %v1531_v20 = vsel %vm1463_vm1, %v3666_v41, 0.0 }
 0x1a0   :  { %v1529_v42 = vsel %vm1463_vm1, %v3662_v30, 0.0 }
 0x1a1   :  { %5510 = vst [vmem:[#allocation15_spill] sm:$0xff] %v3668_v33  ;;  %v1530_v45 = vadd.f32 %v1529_v42, %v1528_v46  ;;  %v1533_v52 = vsel %vm1463_vm1, %v3668_v33, 0.0 }
 0x1a3   :  { %v1532_v17 = vadd.f32 %v1531_v20, %v1530_v45 }
 0x1a4   :  { %v1063_v12 = vpop.f32.mrb[72].mxu0  ;;  %v2810_v48 = vpop.f32.mrb[72].mxu1 }
 0x1a5   :  { %v3674_v62 = vadd.f32 %v1352_v40, %v1063_v12  ;;  %v1065_v28 = vpop.f32.mrb[73].mxu0  ;;  %v1368_v53 = vpop.f32.mrb[73].mxu1  ;;  %v1534_v20 = vadd.f32 %v1533_v52, %v1532_v17 }
 0x1a6   :  { %v1066_v18 = vpop.f32.mrb[74].mxu0  ;;  %v2811_v9 = vpop.f32.mrb[74].mxu1 }
 0x1a7   :  { %5511 = vst [vmem:[#allocation16_spill] sm:$0xff] %v3674_v62  ;;  %v3678_v32 = vadd.f32 %v1355_v25, %v1066_v18  ;;  %v1068_v6 = vpop.f32.mrb[75].mxu0  ;;  %v1371_v38 = vpop.f32.mrb[75].mxu1  ;;  %v1535_v18 = vsel %vm1463_vm1, %v3674_v62, 0.0 }
 0x1a8   :  { %v1536_v45 = vadd.f32 %v1535_v18, %v1534_v20 }
 0x1a9   :  { %5512 = vst [vmem:[#allocation17_spill] sm:$0xff] %v3678_v32  ;;  %v1537_v41 = vsel %vm1463_vm1, %v3678_v32, 0.0 }
 0x1ac   :  { %v1071_v2 = vpop.f32.mrb[76].mxu0  ;;  %v3682_v40 = vpop.f32.mrb[76].mxu1 }
 0x1ad   :  { %v3686_v10 = vadd.f32 %v2806_v50, %v1071_v2  ;;  %v1073_v12 = vpop.f32.mrb[77].mxu0  ;;  %v1384_v28 = vpop.f32.mrb[77].mxu1 }
 0x1ae   :  { %v1074_v30 = vpop.f32.mrb[78].mxu0  ;;  %v3688_v25 = vpop.f32.mrb[78].mxu1 }
 0x1af   :  { %5513 = vst [vmem:[#allocation18_spill] sm:$0xff] %v3686_v10  ;;  %v3692_v6 = vadd.f32 %v2807_v56, %v1074_v30  ;;  %v1076_v46 = vpop.f32.mrb[79].mxu0  ;;  %v1387_v42 = vpop.f32.mrb[79].mxu1  ;;  %v1539_v50 = vsel %vm1463_vm1, %v3686_v10, 0.0  ;;  %v1538_v30 = vadd.f32 %v1537_v41, %v1536_v45 }
 0x1b4   :  { %v1079_v33 = vpop.f32.mrb[80].mxu0  ;;  %v2818_v2 = vpop.f32.mrb[80].mxu1 }
 0x1b5   :  { %v3698_v12 = vadd.f32 %v1368_v53, %v1079_v33  ;;  %v3701_v0 = vadd.f32 %v2818_v2, %v3455_v63  ;;  %v1081_v62 = vpop.f32.mrb[81].mxu0  ;;  %v1400_v56 = vpop.f32.mrb[81].mxu1  ;;  %v1540_v33 = vadd.f32 %v1539_v50, %v1538_v30  ;;  %v1541_v63 = vsel %vm1463_vm1, %v3692_v6, 0.0 }
 0x1b6   :  { %v3704_v46 = vadd.f32 %v1400_v56, %v3449_v55  ;;  %v1082_v17 = vpop.f32.mrb[82].mxu0  ;;  %v2819_v52 = vpop.f32.mrb[82].mxu1 }
 0x1b7   :  { %v3706_v18 = vadd.f32 %v1371_v38, %v1082_v17  ;;  %v3709_v20 = vadd.f32 %v2819_v52, %v3457_v3  ;;  %v1084_v32 = vpop.f32.mrb[83].mxu0  ;;  %v1403_v10 = vpop.f32.mrb[83].mxu1  ;;  %v1543_v55 = vsel %vm1463_vm1, %v3698_v12, 0.0  ;;  %v1542_v41 = vadd.f32 %v1541_v63, %v1540_v33 }
 0x1b8   :  { %v3712_v53 = vadd.f32 %v1403_v10, %v3453_v59 }
 0x1b9   :  { %v1544_v50 = vadd.f32 %v1543_v55, %v1542_v41  ;;  %v1545_v30 = vsel %vm1463_vm1, %v3706_v18, 0.0 }
 0x1bc   :  { %v1087_v62 = vpop.f32.mrb[84].mxu0  ;;  %v2822_v45 = vpop.f32.mrb[84].mxu1 }
 0x1bd   :  { %v3718_v38 = vadd.f32 %v2810_v48, %v1087_v62  ;;  %v3721_v3 = vadd.f32 %v2822_v45, %v3467_v15  ;;  %v1089_v32 = vpop.f32.mrb[85].mxu0  ;;  %v1416_v2 = vpop.f32.mrb[85].mxu1 }
 0x1be   :  { %v3724_v59 = vadd.f32 %v1416_v2, %v3461_v7  ;;  %v1090_v10 = vpop.f32.mrb[86].mxu0  ;;  %v2823_v56 = vpop.f32.mrb[86].mxu1  ;;  %v1546_v7 = vadd.f32 %v1545_v30, %v1544_v50 }
 0x1bf   :  { %v3728_v17 = vadd.f32 %v2811_v9, %v1090_v10  ;;  %v3731_v52 = vadd.f32 %v2823_v56, %v3471_v19  ;;  %v1092_v48 = vpop.f32.mrb[87].mxu0  ;;  %v1419_v33 = vpop.f32.mrb[87].mxu1  ;;  %v1547_v63 = vsel %vm1463_vm1, %v3718_v38, 0.0 }
 0x1c0   :  { %v3734_v15 = vadd.f32 %v1419_v33, %v3465_v11  ;;  %v1548_v55 = vadd.f32 %v1547_v63, %v1546_v7 }
 0x1c1   :  { %v1549_v45 = vsel %vm1463_vm1, %v3728_v17, 0.0 }
 0x1c2   :  { %v1550_v63 = vadd.f32 %v1549_v45, %v1548_v55 }
 0x1c4   :  { %v1095_v41 = vpop.f32.mrb[88].mxu0  ;;  %v2826_v62 = vpop.f32.mrb[88].mxu1 }
 0x1c5   :  { %v3740_v9 = vadd.f32 %v1384_v28, %v1095_v41  ;;  %v3743_v19 = vadd.f32 %v2826_v62, %v3483_v31  ;;  %v1097_v32 = vpop.f32.mrb[89].mxu0  ;;  %v1432_v2 = vpop.f32.mrb[89].mxu1 }
 0x1c6   :  { %v3746_v11 = vadd.f32 %v1432_v2, %v3475_v23  ;;  %v1098_v10 = vpop.f32.mrb[90].mxu0  ;;  %v2827_v56 = vpop.f32.mrb[90].mxu1 }
 0x1c7   :  { %v1551_v50 = vsel %vm1463_vm1, %v3740_v9, 0.0  ;;  %v3750_v30 = vadd.f32 %v1387_v42, %v1098_v10  ;;  %v3753_v48 = vadd.f32 %v2827_v56, %v3487_v35  ;;  %v1100_v28 = vpop.f32.mrb[91].mxu0  ;;  %v1435_v33 = vpop.f32.mrb[91].mxu1 }
 0x1c8   :  { %v3756_v31 = vadd.f32 %v1435_v33, %v3479_v27  ;;  %v1552_v7 = vadd.f32 %v1551_v50, %v1550_v63 }
 0x1c9   :  { %v1553_v23 = vsel %vm1463_vm1, %v3750_v30, 0.0 }
 0x1ca   :  { %v1554_v10 = vadd.f32 %v1553_v23, %v1552_v7  ;;  %v1561_v23 = vsel %vm1463_vm1, %v3712_v53, 0.0 }
 0x1cc   :  { %v1103_v41 = vpop.f32.mrb[92].mxu0  ;;  %v2830_v62 = vpop.f32.mrb[92].mxu1 }
 0x1cd   :  { %v1393_v32 = vadd.f32 %v3682_v40, %v1103_v41  ;;  %v3762_v42 = vadd.f32 %v2830_v62, %v3499_v47  ;;  %v1105_v2 = vpop.f32.mrb[93].mxu0  ;;  %v1448_v35 = vpop.f32.mrb[93].mxu1 }
 0x1ce   :  { %v3765_v56 = vadd.f32 %v1448_v35, %v3491_v39  ;;  %v1106_v55 = vpop.f32.mrb[94].mxu0  ;;  %v2831_v27 = vpop.f32.mrb[94].mxu1  ;;  %v1559_v39 = vsel %vm1463_vm1, %v3704_v46, 0.0  ;;  %v1565_v35 = vsel %vm1463_vm1, %v3709_v20, 0.0 }
 0x1cf   :  { %v1555_v45 = vsel %vm1463_vm1, %v1393_v32, 0.0  ;;  %v1396_v50 = vadd.f32 %v3688_v25, %v1106_v55  ;;  %v1460_v28 = vadd.f32 %v2831_v27, %v3503_v51  ;;  %v1108_v33 = vpop.f32.mrb[95].mxu0  ;;  %v1451_v63 = vpop.f32.mrb[95].mxu1  ;;  %v1563_v25 = vsel %vm1463_vm1, %v3701_v0, 0.0 }
 0x1d0   :  { %v1556_v40 = vadd.f32 %v1555_v45, %v1554_v10  ;;  %v1452_v47 = vadd.f32 %v1451_v63, %v3495_v43  ;;  %v1567_v43 = vsel %vm1463_vm1, %v3724_v59, 0.0  ;;  %v1569_v27 = vsel %vm1463_vm1, %v3734_v15, 0.0 }
 0x1d1   :  { %v1557_v41 = vsel %vm1463_vm1, %v1396_v50, 0.0  ;;  %v1571_v33 = vsel %vm1463_vm1, %v3721_v3, 0.0 }
 0x1d2   :  { %v1558_v62 = vadd.f32 %v1557_v41, %v1556_v40  ;;  %v1573_v40 = vsel %vm1463_vm1, %v3731_v52, 0.0 }
 0x1d4   :  { %v1560_v7 = vadd.f32 %v1559_v39, %v1558_v62  ;;  %v1575_v62 = vsel %vm1463_vm1, %v3746_v11, 0.0 }
 0x1d6   :  { %v1562_v2 = vadd.f32 %v1561_v23, %v1560_v7  ;;  %v1577_v7 = vsel %vm1463_vm1, %v3756_v31, 0.0 }
 0x1d8   :  { %v1564_v51 = vadd.f32 %v1563_v25, %v1562_v2  ;;  %v1579_v2 = vsel %vm1463_vm1, %v3743_v19, 0.0 }
 0x1da   :  { %v1566_v10 = vadd.f32 %v1565_v35, %v1564_v51  ;;  %v1581_v51 = vsel %vm1463_vm1, %v3753_v48, 0.0 }
 0x1dc   :  { %v1568_v55 = vadd.f32 %v1567_v43, %v1566_v10  ;;  %v1583_v10 = vsel %vm1463_vm1, %v3765_v56, 0.0 }
 0x1de   :  { %v1570_v45 = vadd.f32 %v1569_v27, %v1568_v55  ;;  %v1585_v55 = vsel %vm1463_vm1, %v1452_v47, 0.0 }
 0x1e0   :  { %v1572_v63 = vadd.f32 %v1571_v33, %v1570_v45  ;;  %v1587_v45 = vsel %vm1463_vm1, %v3762_v42, 0.0 }
 0x1e2   :  { %v1574_v41 = vadd.f32 %v1573_v40, %v1572_v63  ;;  %v1589_v63 = vsel %vm1463_vm1, %v1460_v28, 0.0 }
 0x1e4   :  { %v1576_v39 = vadd.f32 %v1575_v62, %v1574_v41 }
 0x1e6   :  { %v1578_v23 = vadd.f32 %v1577_v7, %v1576_v39 }
 0x1e8   :  { %v1580_v25 = vadd.f32 %v1579_v2, %v1578_v23 }
 0x1ea   :  { %v1582_v35 = vadd.f32 %v1581_v51, %v1580_v25 }
 0x1ec   :  { %v1584_v43 = vadd.f32 %v1583_v10, %v1582_v35 }
 0x1ee   :  { %v1586_v27 = vadd.f32 %v1585_v55, %v1584_v43 }
 0x1f0   :  { %v1588_v33 = vadd.f32 %v1587_v45, %v1586_v27 }
 0x1f2   :  { %v1590_v40 = vadd.f32 %v1589_v63, %v1588_v33 }
 0x1f4   :  { %v1591_v41 = vrot.slane %v1590_v40, 4 }
 0x1f6   :  { %v1592_v62 = vadd.f32 %v1591_v41, %v1590_v40 }
 0x1f8   :  { %v1593_v39 = vrot.slane %v1592_v62, 2 }
 0x1fa   :  { %v1594_v7 = vadd.f32 %v1593_v39, %v1592_v62 }
 0x1fc   :  { %v1595_v23 = vrot.slane %v1594_v7, 1 }
 0x1fe   :  { %v1596_v2 = vadd.f32 %v1595_v23, %v1594_v7 }
 0x200   :  { %v3802_v25 = vmul.f32 0.001953125, %v1596_v2 }
 0x202   :  { %v3805_v51 = vsub.f32 %v1393_v32, %v3802_v25  ;;  %v3808_v35 = vsub.f32 %v1396_v50, %v3802_v25  ;;  %v3811_v10 = vsub.f32 %v1452_v47, %v3802_v25  ;;  %v3814_v43 = vsub.f32 %v1460_v28, %v3802_v25 }
 0x203   :  { %v3818_v55 = vsub.f32 %v3510_v1, %v3802_v25  ;;  %v3822_v27 = vsub.f32 %v3517_v13, %v3802_v25  ;;  %v3826_v32 = vsub.f32 %v3507_v60, %v3802_v25  ;;  %v3830_v50 = vsub.f32 %v3514_v8, %v3802_v25 }
 0x204   :  { %v3838_v1 = vsub.f32 %v3532_v29, %v3802_v25  ;;  %v3844_v60 = vsub.f32 %v3542_v44, %v3802_v25  ;;  %v3852_v40 = vsub.f32 %v3527_v24, %v3802_v25  ;;  %v3859_v44 = vsub.f32 %v3537_v37, %v3802_v25 }
 0x205   :  { %v1663_v28 = vmul.f32 %v3818_v55, %v3818_v55  ;;  %v1664_v47 = vmul.f32 %v3822_v27, %v3822_v27  ;;  %v1665_v13 = vmul.f32 %v3826_v32, %v3826_v32  ;;  %v1666_v8 = vmul.f32 %v3830_v50, %v3830_v50 }
 0x206   :  { %v1667_v29 = vmul.f32 %v3838_v1, %v3838_v1  ;;  %v1668_v39 = vmul.f32 %v3844_v60, %v3844_v60  ;;  %v3866_v24 = vsub.f32 %v3556_v5, %v3802_v25  ;;  %v1669_v2 = vmul.f32 %v3852_v40, %v3852_v40 }
 0x207   :  { %v1727_v45 = vsel %vm1463_vm1, %v1663_v28, 0.0  ;;  %v1728_v33 = vsel %vm1463_vm1, %v1664_v47, 0.0  ;;  %v1730_v41 = vsel %vm1463_vm1, %v1665_v13, 0.0  ;;  %v1732_v7 = vsel %vm1463_vm1, %v1666_v8, 0.0 }
 0x208   :  { %v1729_v63 = vadd.f32 %v1728_v33, %v1727_v45  ;;  %v1734_v28 = vsel %vm1463_vm1, %v1667_v29, 0.0  ;;  %v3873_v37 = vsub.f32 %v3566_v21, %v3802_v25  ;;  %v1670_v13 = vmul.f32 %v3859_v44, %v3859_v44 }
 0x209   :  { %v1736_v8 = vsel %vm1463_vm1, %v1668_v39, 0.0  ;;  %v3880_v5 = vsub.f32 %v3551_v57, %v3802_v25  ;;  %v1671_v33 = vmul.f32 %v3866_v24, %v3866_v24  ;;  %v3887_v21 = vsub.f32 %v3561_v16, %v3802_v25 }
 0x20a   :  { %v1731_v62 = vadd.f32 %v1730_v41, %v1729_v63  ;;  %v1738_v63 = vsel %vm1463_vm1, %v1669_v2, 0.0  ;;  %v1672_v41 = vmul.f32 %v3873_v37, %v3873_v37  ;;  %v3894_v57 = vsub.f32 %v3578_v14, %v3802_v25 }
 0x20b   :  { %v3901_v16 = vsub.f32 %v3586_v61, %v3802_v25  ;;  %v3908_v14 = vsub.f32 %v3573_v36, %v3802_v25  ;;  %v3915_v61 = vsub.f32 %v3581_v49, %v3802_v25  ;;  %v3922_v36 = vsub.f32 %v3598_v22, %v3802_v25 }
 0x20c   :  { %v1733_v23 = vadd.f32 %v1732_v7, %v1731_v62  ;;  %v1740_v62 = vsel %vm1463_vm1, %v1670_v13, 0.0  ;;  %v1673_v7 = vmul.f32 %v3880_v5, %v3880_v5  ;;  %v3929_v49 = vsub.f32 %v3606_v26, %v3802_v25 }
 0x20d   :  { %v3936_v22 = vsub.f32 %v3593_v54, %v3802_v25  ;;  %v3943_v26 = vsub.f32 %v3601_v34, %v3802_v25  ;;  %v3950_v54 = vsub.f32 %v3617_v4, %v3802_v25  ;;  %v3957_v34 = vsub.f32 %v3624_v58, %v3802_v25 }
 0x20e   :  { %v1735_v47 = vadd.f32 %v1734_v28, %v1733_v23  ;;  %v1742_v23 = vsel %vm1463_vm1, %v1671_v33, 0.0  ;;  %v1674_v28 = vmul.f32 %v3887_v21, %v3887_v21 }
 0x210   :  { %v1737_v45 = vadd.f32 %v1736_v8, %v1735_v47  ;;  %v1744_v47 = vsel %vm1463_vm1, %v1672_v41, 0.0  ;;  %v1675_v8 = vmul.f32 %v3894_v57, %v3894_v57 }
 0x212   :  { %v1739_v29 = vadd.f32 %v1738_v63, %v1737_v45  ;;  %v1746_v45 = vsel %vm1463_vm1, %v1673_v7, 0.0  ;;  %v1676_v63 = vmul.f32 %v3901_v16, %v3901_v16 }
 0x214   :  { %v1741_v39 = vadd.f32 %v1740_v62, %v1739_v29  ;;  %v1748_v29 = vsel %vm1463_vm1, %v1674_v28, 0.0  ;;  %v1677_v62 = vmul.f32 %v3908_v14, %v3908_v14 }
 0x216   :  { %v1743_v2 = vadd.f32 %v1742_v23, %v1741_v39  ;;  %v1750_v39 = vsel %vm1463_vm1, %v1675_v8, 0.0  ;;  %v1678_v23 = vmul.f32 %v3915_v61, %v3915_v61 }
 0x218   :  { %v1745_v13 = vadd.f32 %v1744_v47, %v1743_v2  ;;  %v1752_v2 = vsel %vm1463_vm1, %v1676_v63, 0.0  ;;  %v1679_v47 = vmul.f32 %v3922_v36, %v3922_v36 }
 0x21a   :  { %v1747_v33 = vadd.f32 %v1746_v45, %v1745_v13  ;;  %v1754_v13 = vsel %vm1463_vm1, %v1677_v62, 0.0  ;;  %v1680_v45 = vmul.f32 %v3929_v49, %v3929_v49 }
 0x21c   :  { %v1749_v41 = vadd.f32 %v1748_v29, %v1747_v33  ;;  %v1756_v33 = vsel %vm1463_vm1, %v1678_v23, 0.0  ;;  %v1681_v29 = vmul.f32 %v3936_v22, %v3936_v22 }
 0x21e   :  { %v1751_v7 = vadd.f32 %v1750_v39, %v1749_v41  ;;  %v1758_v41 = vsel %vm1463_vm1, %v1679_v47, 0.0  ;;  %v1682_v39 = vmul.f32 %v3943_v26, %v3943_v26  ;;  %v1762_v47 = vsel %vm1463_vm1, %v1681_v29, 0.0 }
 0x220   :  { %v1753_v28 = vadd.f32 %v1752_v2, %v1751_v7  ;;  %v1760_v7 = vsel %vm1463_vm1, %v1680_v45, 0.0  ;;  %v5514_v2 = vld [vmem:[#allocation2_spill] sm:$0xff]  ;;  %v1764_v45 = vsel %vm1463_vm1, %v1682_v39, 0.0 }
 0x221   :  { %v3964_v4 = vsub.f32 %v5514_v2, %v3802_v25  ;;  %v5520_v2 = vld [vmem:[#allocation7_spill] sm:$0xff] }
 0x222   :  { %v1755_v8 = vadd.f32 %v1754_v13, %v1753_v28  ;;  %v1683_v28 = vmul.f32 %v3950_v54, %v3950_v54 }
 0x223   :  { %5515 = vst [vmem:[#allocation2_spill] sm:$0xff] %v3964_v4 }
 0x224   :  { %v1757_v63 = vadd.f32 %v1756_v33, %v1755_v8  ;;  %v5516_v8 = vld [vmem:[#allocation3_spill] sm:$0xff]  ;;  %v1684_v33 = vmul.f32 %v3957_v34, %v3957_v34  ;;  %v1766_v29 = vsel %vm1463_vm1, %v1683_v28, 0.0 }
 0x225   :  { %v3971_v58 = vsub.f32 %v5516_v8, %v3802_v25 }
 0x226   :  { %v1759_v62 = vadd.f32 %v1758_v41, %v1757_v63  ;;  %v5518_v41 = vld [vmem:[#allocation5_spill] sm:$0xff]  ;;  %v1768_v39 = vsel %vm1463_vm1, %v1684_v33, 0.0 }
 0x227   :  { %5517 = vst [vmem:[#allocation3_spill] sm:$0xff] %v3971_v58  ;;  %v1686_v8 = vmul.f32 %v3971_v58, %v3971_v58 }
 0x228   :  { %v1761_v23 = vadd.f32 %v1760_v7, %v1759_v62  ;;  %v3978_v62 = vsub.f32 %v5518_v41, %v3802_v25  ;;  %v1685_v7 = vmul.f32 %v3964_v4, %v3964_v4 }
 0x229   :  { %v1772_v33 = vsel %vm1463_vm1, %v1686_v8, 0.0 }
 0x22a   :  { %v1763_v13 = vadd.f32 %v1762_v47, %v1761_v23  ;;  %5519 = vst [vmem:[#allocation5_spill] sm:$0xff] %v3978_v62  ;;  %v3985_v47 = vsub.f32 %v5520_v2, %v3802_v25  ;;  %v1687_v4 = vmul.f32 %v3978_v62, %v3978_v62  ;;  %v1770_v28 = vsel %vm1463_vm1, %v1685_v7, 0.0 }
 0x22c   :  { %v1765_v63 = vadd.f32 %v1764_v45, %v1763_v13  ;;  %5521 = vst [vmem:[#allocation7_spill] sm:$0xff] %v3985_v47  ;;  %v5522_v45 = vld [vmem:[#allocation4_spill] sm:$0xff]  ;;  %v1688_v58 = vmul.f32 %v3985_v47, %v3985_v47  ;;  %v1774_v7 = vsel %vm1463_vm1, %v1687_v4, 0.0 }
 0x22d   :  { %v3992_v41 = vsub.f32 %v5522_v45, %v3802_v25 }
 0x22e   :  { %v1767_v23 = vadd.f32 %v1766_v29, %v1765_v63  ;;  %v5524_v29 = vld [vmem:[#allocation6_spill] sm:$0xff]  ;;  %v1776_v8 = vsel %vm1463_vm1, %v1688_v58, 0.0 }
 0x22f   :  { %5523 = vst [vmem:[#allocation4_spill] sm:$0xff] %v3992_v41  ;;  %v3999_v2 = vsub.f32 %v5524_v29, %v3802_v25  ;;  %v1689_v62 = vmul.f32 %v3992_v41, %v3992_v41 }
 0x230   :  { %v1769_v13 = vadd.f32 %v1768_v39, %v1767_v23  ;;  %v5526_v39 = vld [vmem:[#allocation9_spill] sm:$0xff] }
 0x231   :  { %5525 = vst [vmem:[#allocation6_spill] sm:$0xff] %v3999_v2  ;;  %v4006_v45 = vsub.f32 %v5526_v39, %v3802_v25  ;;  %v1690_v47 = vmul.f32 %v3999_v2, %v3999_v2  ;;  %v1778_v4 = vsel %vm1463_vm1, %v1689_v62, 0.0 }
 0x232   :  { %v1771_v63 = vadd.f32 %v1770_v28, %v1769_v13  ;;  %v5528_v28 = vld [vmem:[#allocation11_spill] sm:$0xff] }
 0x233   :  { %5527 = vst [vmem:[#allocation9_spill] sm:$0xff] %v4006_v45  ;;  %v4013_v29 = vsub.f32 %v5528_v28, %v3802_v25  ;;  %v1691_v41 = vmul.f32 %v4006_v45, %v4006_v45  ;;  %v1780_v58 = vsel %vm1463_vm1, %v1690_v47, 0.0 }
 0x234   :  { %v1773_v23 = vadd.f32 %v1772_v33, %v1771_v63  ;;  %v5530_v33 = vld [vmem:[#allocation8_spill] sm:$0xff] }
 0x235   :  { %5529 = vst [vmem:[#allocation11_spill] sm:$0xff] %v4013_v29  ;;  %v4020_v39 = vsub.f32 %v5530_v33, %v3802_v25  ;;  %v1692_v2 = vmul.f32 %v4013_v29, %v4013_v29  ;;  %v1782_v62 = vsel %vm1463_vm1, %v1691_v41, 0.0 }
 0x236   :  { %v1775_v13 = vadd.f32 %v1774_v7, %v1773_v23  ;;  %v5532_v7 = vld [vmem:[#allocation10_spill] sm:$0xff] }
 0x237   :  { %5531 = vst [vmem:[#allocation8_spill] sm:$0xff] %v4020_v39  ;;  %v4027_v28 = vsub.f32 %v5532_v7, %v3802_v25  ;;  %v1693_v45 = vmul.f32 %v4020_v39, %v4020_v39  ;;  %v1784_v47 = vsel %vm1463_vm1, %v1692_v2, 0.0 }
 0x238   :  { %v1777_v63 = vadd.f32 %v1776_v8, %v1775_v13  ;;  %v5534_v8 = vld [vmem:[#allocation12_spill] sm:$0xff] }
 0x239   :  { %5533 = vst [vmem:[#allocation10_spill] sm:$0xff] %v4027_v28  ;;  %v4034_v33 = vsub.f32 %v5534_v8, %v3802_v25  ;;  %v1694_v29 = vmul.f32 %v4027_v28, %v4027_v28  ;;  %v1786_v41 = vsel %vm1463_vm1, %v1693_v45, 0.0 }
 0x23a   :  { %v1779_v23 = vadd.f32 %v1778_v4, %v1777_v63  ;;  %v5536_v4 = vld [vmem:[#allocation13_spill] sm:$0xff] }
 0x23b   :  { %5535 = vst [vmem:[#allocation12_spill] sm:$0xff] %v4034_v33  ;;  %v4041_v7 = vsub.f32 %v5536_v4, %v3802_v25  ;;  %v1695_v39 = vmul.f32 %v4034_v33, %v4034_v33  ;;  %v1788_v2 = vsel %vm1463_vm1, %v1694_v29, 0.0 }
 0x23c   :  { %v1781_v13 = vadd.f32 %v1780_v58, %v1779_v23  ;;  %v5538_v58 = vld [vmem:[#allocation14_spill] sm:$0xff] }
 0x23d   :  { %5537 = vst [vmem:[#allocation13_spill] sm:$0xff] %v4041_v7  ;;  %v4048_v8 = vsub.f32 %v5538_v58, %v3802_v25  ;;  %v1696_v28 = vmul.f32 %v4041_v7, %v4041_v7  ;;  %v1790_v45 = vsel %vm1463_vm1, %v1695_v39, 0.0 }
 0x23e   :  { %v1783_v63 = vadd.f32 %v1782_v62, %v1781_v13  ;;  %v5540_v62 = vld [vmem:[#allocation15_spill] sm:$0xff] }
 0x23f   :  { %5539 = vst [vmem:[#allocation14_spill] sm:$0xff] %v4048_v8  ;;  %v4055_v4 = vsub.f32 %v5540_v62, %v3802_v25  ;;  %v1697_v33 = vmul.f32 %v4048_v8, %v4048_v8  ;;  %v1792_v29 = vsel %vm1463_vm1, %v1696_v28, 0.0 }
 0x240   :  { %v1785_v23 = vadd.f32 %v1784_v47, %v1783_v63  ;;  %v5541_v47 = vld [vmem:[#allocation16_spill] sm:$0xff] }
 0x241   :  { %v4062_v58 = vsub.f32 %v5541_v47, %v3802_v25  ;;  %v1698_v7 = vmul.f32 %v4055_v4, %v4055_v4  ;;  %v1794_v39 = vsel %vm1463_vm1, %v1697_v33, 0.0 }
 0x242   :  { %v1787_v13 = vadd.f32 %v1786_v41, %v1785_v23  ;;  %v5542_v41 = vld [vmem:[#allocation17_spill] sm:$0xff] }
 0x243   :  { %v4069_v62 = vsub.f32 %v5542_v41, %v3802_v25  ;;  %v1699_v8 = vmul.f32 %v4062_v58, %v4062_v58  ;;  %v1796_v28 = vsel %vm1463_vm1, %v1698_v7, 0.0 }
 0x244   :  { %v1789_v63 = vadd.f32 %v1788_v2, %v1787_v13  ;;  %v5543_v2 = vld [vmem:[#allocation18_spill] sm:$0xff] }
 0x245   :  { %v4076_v47 = vsub.f32 %v5543_v2, %v3802_v25  ;;  %v1700_v41 = vmul.f32 %v4069_v62, %v4069_v62  ;;  %v1798_v33 = vsel %vm1463_vm1, %v1699_v8, 0.0 }
 0x246   :  { %v1791_v23 = vadd.f32 %v1790_v45, %v1789_v63  ;;  %v4083_v45 = vsub.f32 %v3692_v6, %v3802_v25  ;;  %v4097_v6 = vsub.f32 %v3706_v18, %v3802_v25  ;;  %v4111_v18 = vsub.f32 %v3728_v17, %v3802_v25 }
 0x247   :  { %v1701_v2 = vmul.f32 %v4076_v47, %v4076_v47  ;;  %v1800_v7 = vsel %vm1463_vm1, %v1700_v41, 0.0  ;;  %v4125_v17 = vsub.f32 %v3750_v30, %v3802_v25  ;;  %v4138_v30 = vsub.f32 %v3704_v46, %v3802_v25 }
 0x248   :  { %v1793_v13 = vadd.f32 %v1792_v29, %v1791_v23  ;;  %v4090_v29 = vsub.f32 %v3698_v12, %v3802_v25  ;;  %5544 = vst [vmem:[#allocation15_spill] sm:$0xff] %v4097_v6  ;;  %v4104_v12 = vsub.f32 %v3718_v38, %v3802_v25  ;;  %v4118_v38 = vsub.f32 %v3740_v9, %v3802_v25 }
 0x249   :  { %v1802_v8 = vsel %vm1463_vm1, %v1701_v2, 0.0  ;;  %v4152_v46 = vsub.f32 %v3701_v0, %v3802_v25  ;;  %v4166_v0 = vsub.f32 %v3724_v59, %v3802_v25  ;;  %v1653_v59 = vsub.f32 %v3721_v3, %v3802_v25 }
 0x24a   :  { %v1795_v63 = vadd.f32 %v1794_v39, %v1793_v13  ;;  %v1702_v39 = vmul.f32 %v4083_v45, %v4083_v45  ;;  %v1707_v9 = vmul.f32 %v4118_v38, %v4118_v38 }
 0x24b   :  { %5546 = vst [vmem:[#allocation17_spill] sm:$0xff] %v4152_v46  ;;  %5548 = vst [vmem:[#allocation19_spill] sm:$0xff] %v4166_v0 }
 0x24c   :  { %v1797_v23 = vadd.f32 %v1796_v28, %v1795_v63  ;;  %v1703_v28 = vmul.f32 %v4090_v29, %v4090_v29  ;;  %v1804_v41 = vsel %vm1463_vm1, %v1702_v39, 0.0 }
 0x24e   :  { %v1799_v13 = vadd.f32 %v1798_v33, %v1797_v23  ;;  %v1704_v33 = vmul.f32 %v4097_v6, %v4097_v6  ;;  %v1806_v2 = vsel %vm1463_vm1, %v1703_v28, 0.0  ;;  %v1708_v28 = vmul.f32 %v4125_v17, %v4125_v17 }
 0x250   :  { %v1801_v63 = vadd.f32 %v1800_v7, %v1799_v13  ;;  %v1705_v7 = vmul.f32 %v4104_v12, %v4104_v12  ;;  %v1808_v39 = vsel %vm1463_vm1, %v1704_v33, 0.0  ;;  %v1709_v33 = vmul.f32 %v3805_v51, %v3805_v51 }
 0x252   :  { %v1803_v23 = vadd.f32 %v1802_v8, %v1801_v63  ;;  %v1706_v8 = vmul.f32 %v4111_v18, %v4111_v18 }
 0x254   :  { %v1805_v13 = vadd.f32 %v1804_v41, %v1803_v23  ;;  %v1810_v41 = vsel %vm1463_vm1, %v1705_v7, 0.0  ;;  %v4145_v7 = vsub.f32 %v3712_v53, %v3802_v25  ;;  %v4159_v53 = vsub.f32 %v3709_v20, %v3802_v25 }
 0x255   :  { %v4173_v20 = vsub.f32 %v3734_v15, %v3802_v25 }
 0x256   :  { %v1807_v63 = vadd.f32 %v1806_v2, %v1805_v13  ;;  %v1812_v13 = vsel %vm1463_vm1, %v1706_v8, 0.0  ;;  %5545 = vst [vmem:[#allocation16_spill] sm:$0xff] %v4145_v7  ;;  %v1816_v8 = vsel %vm1463_vm1, %v1708_v28, 0.0  ;;  %5547 = vst [vmem:[#allocation18_spill] sm:$0xff] %v4159_v53 }
 0x257   :  { %5549 = vst [vmem:[#allocation20_spill] sm:$0xff] %v4173_v20  ;;  %v1716_v15 = vmul.f32 %v4173_v20, %v4173_v20  ;;  %v1657_v20 = vsub.f32 %v3743_v19, %v3802_v25 }
 0x258   :  { %v1809_v23 = vadd.f32 %v1808_v39, %v1807_v63  ;;  %v1814_v63 = vsel %vm1463_vm1, %v1707_v9, 0.0  ;;  %v1818_v9 = vsel %vm1463_vm1, %v1709_v33, 0.0 }
 0x25a   :  { %v1811_v6 = vadd.f32 %v1810_v41, %v1809_v23  ;;  %v1710_v23 = vmul.f32 %v3808_v35, %v3808_v35  ;;  %v1711_v41 = vmul.f32 %v4138_v30, %v4138_v30 }
 0x25c   :  { %v1813_v2 = vadd.f32 %v1812_v13, %v1811_v6  ;;  %v1820_v28 = vsel %vm1463_vm1, %v1710_v23, 0.0  ;;  %v1822_v33 = vsel %vm1463_vm1, %v1711_v41, 0.0 }
 0x25e   :  { %v1815_v39 = vadd.f32 %v1814_v63, %v1813_v2  ;;  %v1712_v2 = vmul.f32 %v4145_v7, %v4145_v7 }
 0x260   :  { %v1817_v6 = vadd.f32 %v1816_v8, %v1815_v39  ;;  %v1713_v39 = vmul.f32 %v4152_v46, %v4152_v46  ;;  %v1824_v23 = vsel %vm1463_vm1, %v1712_v2, 0.0  ;;  %v1655_v2 = vsub.f32 %v3746_v11, %v3802_v25 }
 0x261   :  { %v1658_v11 = vsub.f32 %v3753_v48, %v3802_v25 }
 0x262   :  { %v1819_v13 = vadd.f32 %v1818_v9, %v1817_v6  ;;  %v1714_v6 = vmul.f32 %v4159_v53, %v4159_v53 }
 0x264   :  { %v1821_v63 = vadd.f32 %v1820_v28, %v1819_v13  ;;  %v1715_v13 = vmul.f32 %v4166_v0, %v4166_v0  ;;  %v1826_v28 = vsel %vm1463_vm1, %v1713_v39, 0.0  ;;  %v1656_v39 = vsub.f32 %v3756_v31, %v3802_v25 }
 0x265   :  { %v1719_v0 = vmul.f32 %v1655_v2, %v1655_v2  ;;  %v1659_v31 = vsub.f32 %v3765_v56, %v3802_v25 }
 0x266   :  { %v1823_v8 = vadd.f32 %v1822_v33, %v1821_v63  ;;  %v1654_v63 = vsub.f32 %v3731_v52, %v3802_v25  ;;  %v1828_v33 = vsel %vm1463_vm1, %v1714_v6, 0.0  ;;  %v1830_v3 = vsel %vm1463_vm1, %v1715_v13, 0.0 }
 0x268   :  { %v1825_v9 = vadd.f32 %v1824_v23, %v1823_v8  ;;  %v1717_v8 = vmul.f32 %v1653_v59, %v1653_v59 }
 0x26a   :  { %v1827_v41 = vadd.f32 %v1826_v28, %v1825_v9  ;;  %v1718_v9 = vmul.f32 %v1654_v63, %v1654_v63  ;;  %v1832_v28 = vsel %vm1463_vm1, %v1716_v15, 0.0  ;;  %v1834_v6 = vsel %vm1463_vm1, %v1717_v8, 0.0 }
 0x26b   :  { %v1838_v15 = vsel %vm1463_vm1, %v1719_v0, 0.0  ;;  %v1661_v8 = vsub.f32 %v3762_v42, %v3802_v25 }
 0x26c   :  { %v1829_v53 = vadd.f32 %v1828_v33, %v1827_v41  ;;  %v1720_v33 = vmul.f32 %v1656_v39, %v1656_v39 }
 0x26e   :  { %v1831_v23 = vadd.f32 %v1830_v3, %v1829_v53  ;;  %v1836_v53 = vsel %vm1463_vm1, %v1718_v9, 0.0  ;;  %v1721_v3 = vmul.f32 %v1657_v20, %v1657_v20  ;;  %v1840_v19 = vsel %vm1463_vm1, %v1720_v33, 0.0 }
 0x26f   :  { %v1724_v9 = vmul.f32 %v3811_v10, %v3811_v10  ;;  %v1726_v33 = vmul.f32 %v3814_v43, %v3814_v43 }
 0x270   :  { %v1833_v52 = vadd.f32 %v1832_v28, %v1831_v23  ;;  %v1722_v28 = vmul.f32 %v1658_v11, %v1658_v11  ;;  %v1842_v48 = vsel %vm1463_vm1, %v1721_v3, 0.0 }
 0x272   :  { %v1835_v41 = vadd.f32 %v1834_v6, %v1833_v52  ;;  %v1723_v52 = vmul.f32 %v1659_v31, %v1659_v31  ;;  %v1844_v56 = vsel %vm1463_vm1, %v1722_v28, 0.0 }
 0x274   :  { %v1837_v13 = vadd.f32 %v1836_v53, %v1835_v41  ;;  %v1725_v53 = vmul.f32 %v1661_v8, %v1661_v8  ;;  %v1846_v0 = vsel %vm1463_vm1, %v1723_v52, 0.0 }
 0x276   :  { %v1839_v23 = vadd.f32 %v1838_v15, %v1837_v13  ;;  %v1848_v15 = vsel %vm1463_vm1, %v1724_v9, 0.0  ;;  %v1850_v25 = vsel %vm1463_vm1, %v1725_v53, 0.0 }
 0x278   :  { %v1841_v46 = vadd.f32 %v1840_v19, %v1839_v23 }
 0x27a   :  { %v1843_v6 = vadd.f32 %v1842_v48, %v1841_v46  ;;  %v1852_v46 = vsel %vm1463_vm1, %v1726_v33, 0.0 }
 0x27c   :  { %v1845_v41 = vadd.f32 %v1844_v56, %v1843_v6 }
 0x27e   :  { %v1847_v13 = vadd.f32 %v1846_v0, %v1845_v41 }
 0x280   :  { %v1849_v42 = vadd.f32 %v1848_v15, %v1847_v13 }
 0x282   :  { %v1851_v3 = vadd.f32 %v1850_v25, %v1849_v42  ;;  %v5562_v25 = vld [vmem:[#allocation5_spill] sm:$0xff] }
 0x284   :  { %v1853_v23 = vadd.f32 %v1852_v46, %v1851_v3  ;;  %v5563_v3 = vld [vmem:[#allocation7_spill] sm:$0xff]  ;;  %v5564_v46 = vld [vmem:[#allocation4_spill] sm:$0xff] }
 0x286   :  { %v1854_v19 = vrot.slane %v1853_v23, 4 }
 0x288   :  { %v1855_v48 = vadd.f32 %v1854_v19, %v1853_v23  ;;  %v5565_v23 = vld [vmem:[#allocation6_spill] sm:$0xff] }
 0x28a   :  { %v1856_v28 = vrot.slane %v1855_v48, 2 }
 0x28c   :  { %v1857_v6 = vadd.f32 %v1856_v28, %v1855_v48  ;;  %v5566_v48 = vld [vmem:[#allocation9_spill] sm:$0xff] }
 0x28e   :  { %v1858_v56 = vrot.slane %v1857_v6, 1 }
 0x290   :  { %v1859_v7 = vadd.f32 %v1858_v56, %v1857_v6  ;;  %v5567_v6 = vld [vmem:[#allocation11_spill] sm:$0xff] }
 0x292   :  { %v1860_v52 = vmul.f32 0.001953125, %v1859_v7 }
 0x294   :  { %v1861_v41 = vadd.f32 1e-05, %v1860_v52  ;;  %v5568_v52 = vld [vmem:[#allocation8_spill] sm:$0xff] }
 0x296   :  { %3014 = vrsqrt.f32 %v1861_v41 }
 0x2a0   :  { %v4216_v0 = vpop.eup %3014 }
 0x2a1   :  { %v4219_v9 = vmul.f32 %v4216_v0, %v1653_v59  ;;  %v4222_v53 = vmul.f32 %v4216_v0, %v1654_v63  ;;  %v4225_v13 = vmul.f32 %v4216_v0, %v1655_v2  ;;  %v4228_v33 = vmul.f32 %v4216_v0, %v1656_v39 }
 0x2a2   :  { %v4231_v15 = vmul.f32 %v4216_v0, %v1657_v20  ;;  %v4234_v7 = vmul.f32 %v4216_v0, %v1658_v11  ;;  %v4237_v42 = vmul.f32 %v4216_v0, %v1659_v31  ;;  %v4241_v59 = vmul.f32 %v4216_v0, %v3811_v10  ;;  %v5560_v31 = vld [vmem:[#allocation2_spill] sm:$0xff] }
 0x2a3   :  { %5550 = vst [vmem:[#allocation21_spill] sm:$0xff] %v4219_v9  ;;  %5551 = vst [vmem:[#allocation22_spill] sm:$0xff] %v4222_v53  ;;  %v4244_v63 = vmul.f32 %v4216_v0, %v1661_v8  ;;  %v4248_v2 = vmul.f32 %v4216_v0, %v3814_v43  ;;  %v4252_v20 = vmul.f32 %v4216_v0, %v3818_v55  ;;  %v5561_v8 = vld [vmem:[#allocation3_spill] sm:$0xff] }
 0x2a4   :  { %5552 = vst [vmem:[#allocation23_spill] sm:$0xff] %v4225_v13  ;;  %5553 = vst [vmem:[#allocation24_spill] sm:$0xff] %v4228_v33  ;;  %v4256_v39 = vmul.f32 %v4216_v0, %v3822_v27  ;;  %v4260_v11 = vmul.f32 %v4216_v0, %v3826_v32  ;;  %v4264_v10 = vmul.f32 %v4216_v0, %v3830_v50 }
 0x2a5   :  { %5554 = vst [vmem:[#allocation25_spill] sm:$0xff] %v4231_v15  ;;  %5555 = vst [vmem:[#allocation26_spill] sm:$0xff] %v4234_v7  ;;  %v4268_v43 = vmul.f32 %v4216_v0, %v3838_v1  ;;  %v4272_v55 = vmul.f32 %v4216_v0, %v3844_v60  ;;  %v4276_v27 = vmul.f32 %v4216_v0, %v3852_v40  ;;  %vm1927_vm2 = vcmp.gt.f32.partialorder %v4252_v20, 0.0  ;;  %v5584_v7 = vld [vmem:[#allocation20_spill] sm:$0xff] }
 0x2a6   :  { %5556 = vst [vmem:[#allocation27_spill] sm:$0xff] %v4237_v42  ;;  %5557 = vst [vmem:[#allocation28_spill] sm:$0xff] %v4241_v59  ;;  %v4280_v32 = vmul.f32 %v4216_v0, %v3859_v44  ;;  %v4284_v50 = vmul.f32 %v4216_v0, %v3866_v24  ;;  %v4288_v1 = vmul.f32 %v4216_v0, %v3873_v37  ;;  %v5578_v59 = vld [vmem:[#allocation17_spill] sm:$0xff]  ;;  %v5580_v42 = vld [vmem:[#allocation18_spill] sm:$0xff]  ;;  %vm1928_vm3 = vcmp.gt.f32.partialorder %v4256_v39, 0.0 }
 0x2a7   :  { %5558 = vst [vmem:[#allocation29_spill] sm:$0xff] %v4244_v63  ;;  %5559 = vst [vmem:[#allocation30_spill] sm:$0xff] %v4248_v2  ;;  %v4292_v60 = vmul.f32 %v4216_v0, %v3880_v5  ;;  %v4296_v40 = vmul.f32 %v4216_v0, %v3887_v21  ;;  %v4300_v44 = vmul.f32 %v4216_v0, %v3894_v57  ;;  %v5573_v2 = vld [vmem:[#allocation15_spill] sm:$0xff]  ;;  %v5576_v63 = vld [vmem:[#allocation16_spill] sm:$0xff]  ;;  %vm1929_vm4 = vcmp.gt.f32.partialorder %v4260_v11, 0.0 }
 0x2a8   :  { %v4304_v24 = vmul.f32 %v4216_v0, %v3901_v16  ;;  %v4308_v37 = vmul.f32 %v4216_v0, %v3908_v14  ;;  %v4312_v5 = vmul.f32 %v4216_v0, %v3915_v61  ;;  %v4316_v21 = vmul.f32 %v4216_v0, %v3922_v36 }
 0x2a9   :  { %v4320_v57 = vmul.f32 %v4216_v0, %v3929_v49  ;;  %v4324_v16 = vmul.f32 %v4216_v0, %v3936_v22  ;;  %v4328_v14 = vmul.f32 %v4216_v0, %v3943_v26  ;;  %v4332_v61 = vmul.f32 %v4216_v0, %v3950_v54 }
 0x2aa   :  { %v4336_v36 = vmul.f32 %v4216_v0, %v3957_v34  ;;  %v4340_v49 = vmul.f32 %v4216_v0, %v5560_v31  ;;  %v4344_v22 = vmul.f32 %v4216_v0, %v5561_v8  ;;  %v4348_v26 = vmul.f32 %v4216_v0, %v5562_v25  ;;  %v5569_v31 = vld [vmem:[#allocation10_spill] sm:$0xff]  ;;  %v5570_v25 = vld [vmem:[#allocation12_spill] sm:$0xff] }
 0x2ab   :  { %v4352_v54 = vmul.f32 %v4216_v0, %v5563_v3  ;;  %v4356_v34 = vmul.f32 %v4216_v0, %v5564_v46  ;;  %v4360_v19 = vmul.f32 %v4216_v0, %v5565_v23  ;;  %v4364_v28 = vmul.f32 %v4216_v0, %v5566_v48  ;;  %v5571_v46 = vld [vmem:[#allocation13_spill] sm:$0xff]  ;;  %v5572_v48 = vld [vmem:[#allocation14_spill] sm:$0xff] }
 0x2ac   :  { %v4368_v56 = vmul.f32 %v4216_v0, %v5567_v6  ;;  %v4372_v41 = vmul.f32 %v4216_v0, %v5568_v52  ;;  %v4376_v8 = vmul.f32 %v4216_v0, %v5569_v31  ;;  %v4380_v3 = vmul.f32 %v4216_v0, %v5570_v25 }
 0x2ad   :  { %v4384_v23 = vmul.f32 %v4216_v0, %v5571_v46  ;;  %v4388_v6 = vmul.f32 %v4216_v0, %v5572_v48  ;;  %v4392_v52 = vmul.f32 %v4216_v0, %v4055_v4  ;;  %v4396_v31 = vmul.f32 %v4216_v0, %v4062_v58 }
 0x2ae   :  { %v4400_v25 = vmul.f32 %v4216_v0, %v4069_v62  ;;  %v4404_v46 = vmul.f32 %v4216_v0, %v4076_v47  ;;  %v4408_v48 = vmul.f32 %v4216_v0, %v4083_v45  ;;  %v4412_v4 = vmul.f32 %v4216_v0, %v4090_v29 }
 0x2af   :  { %v4416_v58 = vmul.f32 %v4216_v0, %v5573_v2  ;;  %v4420_v62 = vmul.f32 %v4216_v0, %v4104_v12  ;;  %v4424_v47 = vmul.f32 %v4216_v0, %v4111_v18  ;;  %v4428_v45 = vmul.f32 %v4216_v0, %v4118_v38 }
 0x2b0   :  { %v4432_v29 = vmul.f32 %v4216_v0, %v4125_v17  ;;  %v4436_v2 = vmul.f32 %v4216_v0, %v3805_v51  ;;  %v4440_v12 = vmul.f32 %v4216_v0, %v3808_v35  ;;  %v4444_v18 = vmul.f32 %v4216_v0, %v4138_v30  ;;  %v5582_v35 = vld [vmem:[#allocation19_spill] sm:$0xff] }
 0x2b1   :  { %v4448_v38 = vmul.f32 %v4216_v0, %v5576_v63  ;;  %v4452_v17 = vmul.f32 %v4216_v0, %v5578_v59  ;;  %v4456_v51 = vmul.f32 %v4216_v0, %v5580_v42  ;;  %vm1930_vm5 = vcmp.gt.f32.partialorder %v4264_v10, 0.0 }
 0x2b2   :  { %5574 = vst [vmem:[#allocation2_spill] sm:$0xff] %v4432_v29  ;;  %5575 = vst [vmem:[#allocation3_spill] sm:$0xff] %v4444_v18  ;;  %vm1931_vm6 = vcmp.gt.f32.partialorder %v4268_v43, 0.0  ;;  %vm1932_vm7 = vcmp.gt.f32.partialorder %v4272_v55, 0.0  ;;  %vm1933_vm8 = vcmp.gt.f32.partialorder %v4276_v27, 0.0  ;;  %vm1934_vm9 = vcmp.gt.f32.partialorder %v4280_v32, 0.0 }
 0x2b3   :  { %5577 = vst [vmem:[#allocation5_spill] sm:$0xff] %v4448_v38  ;;  %5579 = vst [vmem:[#allocation7_spill] sm:$0xff] %v4452_v17  ;;  %vm1935_vm10 = vcmp.gt.f32.partialorder %v4284_v50, 0.0  ;;  %v4469_v30 = vmul.f32 %v4216_v0, %v5582_v35  ;;  %vm1936_vm11 = vcmp.gt.f32.partialorder %v4288_v1, 0.0  ;;  %v1991_v42 = vmul.f32 0.2, %v4252_v20 }
 0x2b4   :  { %5581 = vst [vmem:[#allocation4_spill] sm:$0xff] %v4456_v51  ;;  %v1992_v59 = vmul.f32 0.2, %v4256_v39  ;;  %v1993_v63 = vmul.f32 0.2, %v4260_v11  ;;  %v4477_v15 = vmul.f32 %v4216_v0, %v5584_v7  ;;  %vm1937_vm12 = vcmp.gt.f32.partialorder %v4292_v60, 0.0 }
 0x2b5   :  { %5583 = vst [vmem:[#allocation6_spill] sm:$0xff] %v4469_v30  ;;  %v1994_v33 = vmul.f32 0.2, %v4264_v10  ;;  %v1995_v13 = vmul.f32 0.2, %v4268_v43  ;;  %vm1938_vm13 = vcmp.gt.f32.partialorder %v4296_v40, 0.0  ;;  %v4490_v0 = vsel %vm1927_vm2, %v4252_v20, %v1991_v42 }
 0x2b6   :  { %5585 = vst [vmem:[#allocation9_spill] sm:$0xff] %v4477_v15  ;;  %v1996_v35 = vmul.f32 0.2, %v4272_v55  ;;  %v1997_v53 = vmul.f32 0.2, %v4276_v27  ;;  %5586 = vst [vmem:[#allocation11_spill] sm:$0xff] %v4490_v0  ;;  %v4501_v17 = vsel %vm1928_vm3, %v4256_v39, %v1992_v59  ;;  %v4516_v0 = vsel %vm1929_vm4, %v4260_v11, %v1993_v63 }
 0x2b7   :  { %v1998_v9 = vmul.f32 0.2, %v4280_v32  ;;  %v1999_v30 = vmul.f32 0.2, %v4284_v50  ;;  %vm1939_vm14 = vcmp.gt.f32.partialorder %v4300_v44, 0.0  ;;  %5587 = vst [vmem:[#allocation8_spill] sm:$0xff] %v4501_v17 }
 0x2b8   :  { %v2000_v7 = vmul.f32 0.2, %v4288_v1  ;;  %v2001_v15 = vmul.f32 0.2, %v4292_v60  ;;  %v4496_v51 = vmul.f32 0.2, %v4296_v40 }
 0x2b9   :  { %vm1940_vm15 = vcmp.gt.f32.partialorder %v4304_v24, 0.0  ;;  %v4505_v38 = vmul.f32 0.2, %v4300_v44  ;;  %v4508_v20 = vmul.f32 0.2, %v4304_v24  ;;  %5589 = vst [vmem:[#allocation12_spill] sm:$0xff] %v4516_v0 }
 0x2ba   :  { %v4511_v42 = vmul.f32 0.2, %v4308_v37  ;;  %vm1941_vm0 = vcmp.gt.f32.partialorder %v4308_v37, 0.0  ;;  %v4520_v39 = vmul.f32 0.2, %v4312_v5  ;;  %vm1942_vm1 = vcmp.gt.f32.partialorder %v4312_v5, 0.0 }
 0x2bb   :  { %v4523_v59 = vmul.f32 0.2, %v4316_v21  ;;  %v4526_v17 = vmul.f32 0.2, %v4320_v57  ;;  %v4535_v11 = vmul.f32 0.2, %v4324_v16 }
 0x2bc   :  { %5588 = vst [vmem:[#allocation10_spill] sm:$0xff] %v4511_v42  ;;  %v4531_v42 = vsel %vm1930_vm5, %v4264_v10, %v1994_v33  ;;  %v4538_v63 = vmul.f32 0.2, %v4328_v14  ;;  %v4541_v0 = vmul.f32 0.2, %v4332_v61  ;;  %vm1943_vm2 = vcmp.gt.f32.partialorder %v4316_v21, 0.0 }
 0x2bd   :  { %5590 = vst [vmem:[#allocation13_spill] sm:$0xff] %v4526_v17  ;;  %5591 = vst [vmem:[#allocation14_spill] sm:$0xff] %v4531_v42  ;;  %v4546_v17 = vsel %vm1931_vm6, %v4268_v43, %v1995_v13  ;;  %v4550_v33 = vmul.f32 0.2, %v4336_v36  ;;  %v4553_v10 = vmul.f32 0.2, %v4340_v49 }
 0x2be   :  { %5592 = vst [vmem:[#allocation15_spill] sm:$0xff] %v4541_v0  ;;  %5593 = vst [vmem:[#allocation16_spill] sm:$0xff] %v4546_v17  ;;  %v4556_v42 = vmul.f32 0.2, %v4344_v22  ;;  %v4561_v0 = vsel %vm1932_vm7, %v4272_v55, %v1996_v35  ;;  %vm1944_vm3 = vcmp.gt.f32.partialorder %v4320_v57, 0.0  ;;  %vm1945_vm4 = vcmp.gt.f32.partialorder %v4324_v16, 0.0 }
 0x2bf   :  { %5595 = vst [vmem:[#allocation18_spill] sm:$0xff] %v4561_v0  ;;  %v4565_v13 = vmul.f32 0.2, %v4348_v26  ;;  %v4568_v43 = vmul.f32 0.2, %v4352_v54  ;;  %vm1946_vm5 = vcmp.gt.f32.partialorder %v4328_v14, 0.0 }
 0x2c0   :  { %5594 = vst [vmem:[#allocation17_spill] sm:$0xff] %v4556_v42  ;;  %v4571_v17 = vmul.f32 0.2, %v4356_v34  ;;  %v4576_v42 = vsel %vm1933_vm8, %v4276_v27, %v1997_v53  ;;  %v4580_v55 = vmul.f32 0.2, %v4360_v19  ;;  %vm1949_vm8 = vcmp.gt.f32.partialorder %v4340_v49, 0.0 }
 0x2c1   :  { %5597 = vst [vmem:[#allocation20_spill] sm:$0xff] %v4576_v42  ;;  %v4583_v35 = vmul.f32 0.2, %v4364_v28  ;;  %v4586_v0 = vmul.f32 0.2, %v4368_v56 }
 0x2c2   :  { %5596 = vst [vmem:[#allocation19_spill] sm:$0xff] %v4571_v17  ;;  %v4591_v17 = vsel %vm1934_vm9, %v4280_v32, %v1998_v9  ;;  %v4597_v53 = vmul.f32 0.2, %v4372_v41  ;;  %v4600_v27 = vmul.f32 0.2, %v4376_v8  ;;  %v4608_v9 = vsel %vm1935_vm10, %v4284_v50, %v1999_v30 }
 0x2c3   :  { %5598 = vst [vmem:[#allocation31_spill] sm:$0xff] %v4591_v17  ;;  %v4603_v42 = vmul.f32 0.2, %v4380_v3  ;;  %5600 = vst [vmem:[#allocation33_spill] sm:$0xff] %v4608_v9  ;;  %v4615_v32 = vmul.f32 0.2, %v4384_v23  ;;  %v4626_v50 = vsel %vm1936_vm11, %v4288_v1, %v2000_v7  ;;  %v4644_v1 = vsel %vm1937_vm12, %v4292_v60, %v2001_v15 }
 0x2c4   :  { %v4618_v17 = vmul.f32 0.2, %v4388_v6  ;;  %5602 = vst [vmem:[#allocation35_spill] sm:$0xff] %v4626_v50  ;;  %vm1953_vm10 = vcmp.gt.f32.partialorder %v4356_v34, 0.0  ;;  %v4633_v30 = vmul.f32 0.2, %v4396_v31  ;;  %v4663_v15 = vsel %vm1938_vm13, %v4296_v40, %v4496_v51 }
 0x2c5   :  { %5599 = vst [vmem:[#allocation32_spill] sm:$0xff] %v4603_v42  ;;  %v4621_v42 = vmul.f32 0.2, %v4392_v52  ;;  %v4636_v9 = vmul.f32 0.2, %v4400_v25  ;;  %5604 = vst [vmem:[#allocation37_spill] sm:$0xff] %v4644_v1  ;;  %v4682_v40 = vsel %vm1939_vm14, %v4300_v44, %v4505_v38  ;;  %v4701_v44 = vsel %vm1940_vm15, %v4304_v24, %v4508_v20 }
 0x2c6   :  { %vm1957_vm11 = vcmp.gt.f32.partialorder %v4372_v41, 0.0  ;;  %v4651_v7 = vmul.f32 0.2, %v4408_v48  ;;  %v4654_v50 = vmul.f32 0.2, %v4412_v4  ;;  %5606 = vst [vmem:[#allocation39_spill] sm:$0xff] %v4663_v15 }
 0x2c7   :  { %5601 = vst [vmem:[#allocation34_spill] sm:$0xff] %v4621_v42  ;;  %v4639_v42 = vmul.f32 0.2, %v4404_v46  ;;  %vm1961_vm12 = vcmp.gt.f32.partialorder %v4388_v6, 0.0  ;;  %v4670_v60 = vmul.f32 0.2, %v4420_v62 }
 0x2c8   :  { %v4673_v1 = vmul.f32 0.2, %v4424_v47  ;;  %5609 = vst [vmem:[#allocation42_spill] sm:$0xff] %v4682_v40  ;;  %vm1965_vm13 = vcmp.gt.f32.partialorder %v4404_v46, 0.0  ;;  %v4689_v51 = vmul.f32 0.2, %v4432_v29 }
 0x2c9   :  { %5603 = vst [vmem:[#allocation36_spill] sm:$0xff] %v4639_v42  ;;  %v4657_v42 = vmul.f32 0.2, %v4416_v58  ;;  %v4692_v15 = vmul.f32 0.2, %v4436_v2  ;;  %5613 = vst [vmem:[#allocation46_spill] sm:$0xff] %v4701_v44 }
 0x2ca   :  { %5607 = vst [vmem:[#allocation40_spill] sm:$0xff] %v4673_v1  ;;  %5610 = vst [vmem:[#allocation43_spill] sm:$0xff] %v4689_v51  ;;  %vm1969_vm14 = vcmp.gt.f32.partialorder %v4420_v62, 0.0  ;;  %v4708_v38 = vmul.f32 0.2, %v4444_v18  ;;  %v5615_v40 = vld [vmem:[#allocation5_spill] sm:$0xff] }
 0x2cb   :  { %5605 = vst [vmem:[#allocation38_spill] sm:$0xff] %v4657_v42  ;;  %v4676_v42 = vmul.f32 0.2, %v4428_v45  ;;  %5611 = vst [vmem:[#allocation44_spill] sm:$0xff] %v4692_v15  ;;  %v4711_v15 = vmul.f32 0.2, %v5615_v40 }
 0x2cc   :  { %5614 = vst [vmem:[#allocation47_spill] sm:$0xff] %v4708_v38  ;;  %v5619_v1 = vld [vmem:[#allocation10_spill] sm:$0xff]  ;;  %vm1973_vm15 = vcmp.gt.f32.partialorder %v4436_v2, 0.0  ;;  %v5621_v20 = vld [vmem:[#allocation4_spill] sm:$0xff]  ;;  %v5630_v40 = vld [vmem:[#allocation23_spill] sm:$0xff]  ;;  %vm5642_vm9 = vcmp.gt.f32.partialorder %v4332_v61, 0.0 }
 0x2cd   :  { %5608 = vst [vmem:[#allocation41_spill] sm:$0xff] %v4676_v42  ;;  %v4695_v42 = vmul.f32 0.2, %v4440_v12  ;;  %5616 = vst [vmem:[#allocation48_spill] sm:$0xff] %v4711_v15  ;;  %v4720_v24 = vsel %vm1941_vm0, %v4308_v37, %v5619_v1  ;;  %v4727_v44 = vmul.f32 0.2, %v5621_v20  ;;  %v4739_v37 = vsel %vm1942_vm1, %v4312_v5, %v4520_v39 }
 0x2ce   :  { %5620 = vst [vmem:[#allocation10_spill] sm:$0xff] %v4720_v24  ;;  %v5623_v15 = vld [vmem:[#allocation6_spill] sm:$0xff]  ;;  %5627 = vst [vmem:[#allocation53_spill] sm:$0xff] %v4739_v37  ;;  %v5628_v1 = vld [vmem:[#allocation21_spill] sm:$0xff]  ;;  %v4752_v5 = vsel %vm1943_vm2, %v4316_v21, %v4523_v59 }
 0x2cf   :  { %5612 = vst [vmem:[#allocation45_spill] sm:$0xff] %v4695_v42  ;;  %v5617_v42 = vld [vmem:[#allocation7_spill] sm:$0xff]  ;;  %5622 = vst [vmem:[#allocation50_spill] sm:$0xff] %v4727_v44  ;;  %v4730_v38 = vmul.f32 0.2, %v5623_v15  ;;  %vm1981_vm1 = vcmp.gt.f32.partialorder %v5628_v1, 0.0 }
 0x2d0   :  { %v4714_v51 = vmul.f32 0.2, %v5617_v42  ;;  %vm1977_vm0 = vcmp.gt.f32.partialorder %v5617_v42, 0.0  ;;  %v2045_v24 = vmul.f32 0.2, %v5628_v1  ;;  %5631 = vst [vmem:[#allocation54_spill] sm:$0xff] %v4752_v5 }
 0x2d1   :  { %5624 = vst [vmem:[#allocation51_spill] sm:$0xff] %v4730_v38  ;;  %v5629_v38 = vld [vmem:[#allocation22_spill] sm:$0xff]  ;;  %v5632_v39 = vld [vmem:[#allocation24_spill] sm:$0xff]  ;;  %v5635_v18 = vld [vmem:[#allocation13_spill] sm:$0xff] }
 0x2d2   :  { %5618 = vst [vmem:[#allocation49_spill] sm:$0xff] %v4714_v51  ;;  %v5625_v51 = vld [vmem:[#allocation9_spill] sm:$0xff]  ;;  %v2046_v44 = vmul.f32 0.2, %v5629_v38  ;;  %v2048_v37 = vmul.f32 0.2, %v5632_v39  ;;  %v4765_v21 = vsel %vm1944_vm3, %v4320_v57, %v5635_v18  ;;  %v4778_v57 = vsel %vm1945_vm4, %v4324_v16, %v4535_v11 }
 0x2d3   :  { %v4733_v29 = vmul.f32 0.2, %v5625_v51  ;;  %v5633_v51 = vld [vmem:[#allocation25_spill] sm:$0xff]  ;;  %v5634_v20 = vld [vmem:[#allocation26_spill] sm:$0xff]  ;;  %v5637_v59 = vld [vmem:[#allocation27_spill] sm:$0xff]  ;;  %vm5643_vm4 = vcmp.gt.f32.partialorder %v4336_v36, 0.0  ;;  %v4805_v11 = vsel %vm1949_vm8, %v4340_v49, %v4553_v10 }
 0x2d4   :  { %v2049_v15 = vmul.f32 0.2, %v5633_v51  ;;  %v2050_v42 = vmul.f32 0.2, %v5634_v20  ;;  %5636 = vst [vmem:[#allocation25_spill] sm:$0xff] %v4765_v21  ;;  %vm1985_vm2 = vcmp.gt.f32.partialorder %v5633_v51, 0.0  ;;  %v4799_v16 = vsel %vm5643_vm4, %v4336_v36, %v4550_v33 }
 0x2d5   :  { %5626 = vst [vmem:[#allocation52_spill] sm:$0xff] %v4733_v29  ;;  %v2047_v29 = vmul.f32 0.2, %v5630_v40  ;;  %vm1987_vm6 = vcmp.gt.f32.partialorder %v5637_v59, 0.0  ;;  %v5638_v5 = vld [vmem:[#allocation28_spill] sm:$0xff]  ;;  %v5639_v38 = vld [vmem:[#allocation29_spill] sm:$0xff] }
 0x2d6   :  { %v2051_v39 = vmul.f32 0.2, %v5637_v59  ;;  %v2052_v40 = vmul.f32 0.2, %v5638_v5  ;;  %v2053_v1 = vmul.f32 0.2, %v5639_v38  ;;  %v4787_v59 = vsel %vm1946_vm5, %v4328_v14, %v4538_v63 }
 0x2d7   :  { %vm1989_vm3 = vcmp.gt.f32.partialorder %v5639_v38, 0.0  ;;  %v5640_v18 = vld [vmem:[#allocation30_spill] sm:$0xff]  ;;  %v5641_v5 = vld [vmem:[#allocation15_spill] sm:$0xff]  ;;  %v5644_v14 = vld [vmem:[#allocation17_spill] sm:$0xff]  ;;  %vm5645_vm5 = vcmp.gt.f32.partialorder %v4344_v22, 0.0  ;;  %vm5647_vm4 = vcmp.gt.f32.partialorder %v4352_v54, 0.0 }
 0x2d8   :  { %vm1990_vm7 = vcmp.gt.f32.partialorder %v5640_v18, 0.0  ;;  %v2054_v21 = vmul.f32 0.2, %v5640_v18  ;;  %v4793_v20 = vsel %vm5642_vm9, %v4332_v61, %v5641_v5  ;;  %v4811_v63 = vsel %vm5645_vm5, %v4344_v22, %v5644_v14  ;;  %v5648_v49 = vld [vmem:[#allocation19_spill] sm:$0xff] }
 0x2d9   :  { %vm5646_vm9 = vcmp.gt.f32.partialorder %v4348_v26, 0.0  ;;  %v4823_v36 = vsel %vm5647_vm4, %v4352_v54, %v4568_v43  ;;  %v4829_v33 = vsel %vm1953_vm10, %v4356_v34, %v5648_v49  ;;  %vm5649_vm8 = vcmp.gt.f32.partialorder %v4360_v19, 0.0  ;;  %v5682_v5 = vld [vmem:[#allocation7_spill] sm:$0xff]  ;;  %v5684_v49 = vld [vmem:[#allocation4_spill] sm:$0xff] }
 0x2da   :  { %v4817_v61 = vsel %vm5646_vm9, %v4348_v26, %v4565_v13  ;;  %v4835_v22 = vsel %vm5649_vm8, %v4360_v19, %v4580_v55  ;;  %vm5650_vm5 = vcmp.gt.f32.partialorder %v4364_v28, 0.0  ;;  %vm5651_vm9 = vcmp.gt.f32.partialorder %v4368_v56, 0.0 }
 0x2db   :  { %v4841_v26 = vsel %vm5650_vm5, %v4364_v28, %v4583_v35  ;;  %v4847_v54 = vsel %vm5651_vm9, %v4368_v56, %v4586_v0  ;;  %vm2375_vm10 = vcmask 601088   ;;  %v4853_v34 = vsel %vm1957_vm11, %v4372_v41, %v4597_v53  ;;  %v5653_v28 = vld [vmem:[#allocation32_spill] sm:$0xff]  ;;  %v5670_v35 = vld [vmem:[#allocation2_spill] sm:$0xff] }
 0x2dc   :  { %vm5652_vm4 = vcmp.gt.f32.partialorder %v4376_v8, 0.0  ;;  %vm5654_vm8 = vcmp.gt.f32.partialorder %v4380_v3, 0.0  ;;  %vm5655_vm5 = vcmp.gt.f32.partialorder %v4384_v23, 0.0  ;;  %v4877_v41 = vsel %vm1961_vm12, %v4388_v6, %v4618_v17  ;;  %v5660_v6 = vld [vmem:[#allocation36_spill] sm:$0xff] }
 0x2dd   :  { %v4859_v19 = vsel %vm5652_vm4, %v4376_v8, %v4600_v27  ;;  %v4865_v10 = vsel %vm5654_vm8, %v4380_v3, %v5653_v28  ;;  %v4871_v56 = vsel %vm5655_vm5, %v4384_v23, %v4615_v32  ;;  %v5656_v8 = vld [vmem:[#allocation34_spill] sm:$0xff]  ;;  %vm5657_vm11 = vcmp.gt.f32.partialorder %v4392_v52, 0.0  ;;  %v5676_v32 = vld [vmem:[#allocation3_spill] sm:$0xff] }
 0x2de   :  { %v4883_v0 = vsel %vm5657_vm11, %v4392_v52, %v5656_v8  ;;  %vm5658_vm9 = vcmp.gt.f32.partialorder %v4396_v31, 0.0  ;;  %vm5659_vm4 = vcmp.gt.f32.partialorder %v4400_v25, 0.0  ;;  %v4901_v17 = vsel %vm1965_vm13, %v4404_v46, %v5660_v6  ;;  %v5686_v8 = vld [vmem:[#allocation51_spill] sm:$0xff]  ;;  %v5687_v6 = vld [vmem:[#allocation6_spill] sm:$0xff] }
 0x2df   :  { %v4889_v3 = vsel %vm5658_vm9, %v4396_v31, %v4633_v30  ;;  %v4895_v23 = vsel %vm5659_vm4, %v4400_v25, %v4636_v9  ;;  %vm5661_vm12 = vcmp.gt.f32.partialorder %v4408_v48, 0.0  ;;  %vm5662_vm8 = vcmp.gt.f32.partialorder %v4412_v4, 0.0  ;;  %v5663_v25 = vld [vmem:[#allocation38_spill] sm:$0xff]  ;;  %v5678_v30 = vld [vmem:[#allocation48_spill] sm:$0xff] }
 0x2e0   :  { %v4907_v52 = vsel %vm5661_vm12, %v4408_v48, %v4651_v7  ;;  %v4913_v31 = vsel %vm5662_vm8, %v4412_v4, %v4654_v50  ;;  %vm5664_vm5 = vcmp.gt.f32.partialorder %v4416_v58, 0.0  ;;  %v4925_v46 = vsel %vm1969_vm14, %v4420_v62, %v4670_v60  ;;  %v5665_v48 = vld [vmem:[#allocation40_spill] sm:$0xff]  ;;  %v5667_v4 = vld [vmem:[#allocation41_spill] sm:$0xff] }
 0x2e1   :  { %v4919_v13 = vsel %vm5664_vm5, %v4416_v58, %v5663_v25  ;;  %vm5666_vm13 = vcmp.gt.f32.partialorder %v4424_v47, 0.0  ;;  %vm5668_vm11 = vcmp.gt.f32.partialorder %v4428_v45, 0.0  ;;  %v5669_v58 = vld [vmem:[#allocation43_spill] sm:$0xff]  ;;  %vm5671_vm9 = vcmp.gt.f32.partialorder %v5670_v35, 0.0  ;;  %v5672_v62 = vld [vmem:[#allocation44_spill] sm:$0xff]  ;;  %v5679_v7 = vld [vmem:[#allocation5_spill] sm:$0xff] }
 0x2e2   :  { %v4931_v43 = vsel %vm5666_vm13, %v4424_v47, %v5665_v48  ;;  %v4937_v55 = vsel %vm5668_vm11, %v4428_v45, %v5667_v4  ;;  %v4943_v53 = vsel %vm5671_vm9, %v5670_v35, %v5669_v58  ;;  %v4949_v27 = vsel %vm1973_vm15, %v4436_v2, %v5672_v62  ;;  %v5673_v47 = vld [vmem:[#allocation45_spill] sm:$0xff]  ;;  %v5675_v45 = vld [vmem:[#allocation47_spill] sm:$0xff]  ;;  %v5689_v48 = vld [vmem:[#allocation52_spill] sm:$0xff] }
 0x2e3   :  { %vm5674_vm14 = vcmp.gt.f32.partialorder %v4440_v12, 0.0  ;;  %vm5677_vm4 = vcmp.gt.f32.partialorder %v5676_v32, 0.0  ;;  %vm5680_vm12 = vcmp.gt.f32.partialorder %v5679_v7, 0.0  ;;  %v5681_v2 = vld [vmem:[#allocation49_spill] sm:$0xff]  ;;  %vm5685_vm15 = vcmp.gt.f32.partialorder %v5684_v49, 0.0 }
 0x2e4   :  { %v4955_v9 = vsel %vm5674_vm14, %v4440_v12, %v5673_v47  ;;  %v4961_v50 = vsel %vm5677_vm4, %v5676_v32, %v5675_v45  ;;  %v4967_v60 = vsel %vm5680_vm12, %v5679_v7, %v5678_v30  ;;  %v4973_v14 = vsel %vm1977_vm0, %v5682_v5, %v5681_v2  ;;  %v5683_v12 = vld [vmem:[#allocation50_spill] sm:$0xff]  ;;  %v5690_v4 = vld [vmem:[#allocation9_spill] sm:$0xff]  ;;  %v5695_v32 = vld [vmem:[#allocation23_spill] sm:$0xff] }
 0x2e5   :  { %v4979_v28 = vsel %vm5685_vm15, %v5684_v49, %v5683_v12  ;;  %vm5688_vm8 = vcmp.gt.f32.partialorder %v5687_v6, 0.0  ;;  %vm5691_vm5 = vcmp.gt.f32.partialorder %v5690_v4, 0.0  ;;  %v5692_v35 = vld [vmem:[#allocation21_spill] sm:$0xff]  ;;  %v5693_v47 = vld [vmem:[#allocation22_spill] sm:$0xff]  ;;  %vm5696_vm13 = vcmp.gt.f32.partialorder %v5695_v32, 0.0  ;;  %v5697_v7 = vld [vmem:[#allocation24_spill] sm:$0xff] }
 0x2e6   :  { %v4985_v25 = vsel %vm5688_vm8, %v5687_v6, %v5686_v8  ;;  %v4991_v58 = vsel %vm5691_vm5, %v5690_v4, %v5689_v48  ;;  %v4996_v62 = vsel %vm1981_vm1, %v5692_v35, %v2045_v24  ;;  %vm5694_vm0 = vcmp.gt.f32.partialorder %v5693_v47, 0.0  ;;  %v5699_v5 = vld [vmem:[#allocation26_spill] sm:$0xff]  ;;  %v5701_v12 = vld [vmem:[#allocation27_spill] sm:$0xff]  ;;  %v5702_v49 = vld [vmem:[#allocation28_spill] sm:$0xff] }
 0x2e7   :  { %v5001_v45 = vsel %vm5694_vm0, %v5693_v47, %v2046_v44  ;;  %v5006_v30 = vsel %vm5696_vm13, %v5695_v32, %v2047_v29  ;;  %vm5698_vm11 = vcmp.gt.f32.partialorder %v5697_v7, 0.0  ;;  %v5016_v24 = vsel %vm1985_vm2, %v5633_v51, %v2049_v15  ;;  %v5704_v51 = vld [vmem:[#allocation11_spill] sm:$0xff]  ;;  %v5706_v48 = vld [vmem:[#allocation12_spill] sm:$0xff]  ;;  %v5707_v4 = vld [vmem:[#allocation14_spill] sm:$0xff] }
 0x2e8   :  { %v5011_v2 = vsel %vm5698_vm11, %v5697_v7, %v2048_v37  ;;  %vm5700_vm1 = vcmp.gt.f32.partialorder %v5699_v5, 0.0  ;;  %v5026_v29 = vsel %vm1987_vm6, %v5701_v12, %v2051_v39  ;;  %vm5703_vm9 = vcmp.gt.f32.partialorder %v5702_v49, 0.0  ;;  %v5705_v39 = vld [vmem:[#allocation8_spill] sm:$0xff]  ;;  %v5711_v7 = vld [vmem:[#allocation31_spill] sm:$0xff]  ;;  %v5712_v12 = vld [vmem:[#allocation33_spill] sm:$0xff] }
 0x2e9   :  { %v5021_v44 = vsel %vm5700_vm1, %v5699_v5, %v2050_v42  ;;  %v5031_v37 = vsel %vm5703_vm9, %v5702_v49, %v2052_v40  ;;  %v5036_v15 = vsel %vm1989_vm3, %v5639_v38, %v2053_v1  ;;  %v5041_v42 = vsel %vm1990_vm7, %v5640_v18, %v2054_v21  ;;  %v5708_v47 = vld [vmem:[#allocation16_spill] sm:$0xff]  ;;  %v5709_v1 = vld [vmem:[#allocation18_spill] sm:$0xff] }
 0x2ea   :  { %v2657_v8 = vpack.c.bf16 %v5704_v51, %v5704_v51  ;;  %v2658_v6 = vpack.c.bf16 %v5705_v39, %v5705_v39  ;;  %v2659_v40 = vpack.c.bf16 %v5706_v48, %v5706_v48  ;;  %v2660_v35 = vpack.c.bf16 %v5707_v4, %v5707_v4  ;;  %v5710_v21 = vld [vmem:[#allocation20_spill] sm:$0xff]  ;;  %v5713_v51 = vld [vmem:[#allocation35_spill] sm:$0xff]  ;;  %v5714_v48 = vld [vmem:[#allocation37_spill] sm:$0xff] }
 0x2eb   :  { %v2661_v38 = vpack.c.bf16 %v5708_v47, %v5708_v47  ;;  %v2662_v32 = vpack.c.bf16 %v5709_v1, %v5709_v1  ;;  %v2663_v18 = vpack.c.bf16 %v5710_v21, %v5710_v21  ;;  %v2664_v5 = vpack.c.bf16 %v5711_v7, %v5711_v7  ;;  %v5715_v47 = vld [vmem:[#allocation39_spill] sm:$0xff]  ;;  %v5716_v21 = vld [vmem:[#allocation42_spill] sm:$0xff] }
 0x2ec   :  { %v2665_v49 = vpack.c.bf16 %v5712_v12, %v5712_v12  ;;  %v2666_v39 = vpack.c.bf16 %v5713_v51, %v5713_v51  ;;  %2376 = vst.msk [vmem:[%s5429_s2] sm:$0xf] %vm2375_vm10, %v2657_v8  ;;  %2377 = vst.msk [vmem:[%s5429_s2 + $0x4] sm:$0xf] %vm2375_vm10, %v2658_v6  ;;  %v2667_v4 = vpack.c.bf16 %v5714_v48, %v5714_v48  ;;  %v5717_v12 = vld [vmem:[#allocation46_spill] sm:$0xff]  ;;  %v5719_v48 = vld [vmem:[#allocation53_spill] sm:$0xff] }
 0x2ed   :  { %v2668_v1 = vpack.c.bf16 %v5715_v47, %v5715_v47  ;;  %v2669_v7 = vpack.c.bf16 %v5716_v21, %v5716_v21  ;;  %v2670_v51 = vpack.c.bf16 %v5717_v12, %v5717_v12  ;;  %2378 = vst.msk [vmem:[%s5429_s2 + $0x8] sm:$0xf] %vm2375_vm10, %v2659_v40  ;;  %2379 = vst.msk [vmem:[%s5429_s2 + $0xc] sm:$0xf] %vm2375_vm10, %v2660_v35  ;;  %v5718_v8 = vld [vmem:[#allocation10_spill] sm:$0xff]  ;;  %v5721_v35 = vld [vmem:[#allocation25_spill] sm:$0xff] }
 0x2ee   :  { %2380 = vst.msk [vmem:[%s5429_s2 + $0x10] sm:$0xf] %vm2375_vm10, %v2661_v38  ;;  %2381 = vst.msk [vmem:[%s5429_s2 + $0x14] sm:$0xf] %vm2375_vm10, %v2662_v32  ;;  %v2671_v6 = vpack.c.bf16 %v5718_v8, %v5718_v8  ;;  %v2672_v40 = vpack.c.bf16 %v5719_v48, %v5719_v48  ;;  %v5720_v47 = vld [vmem:[#allocation54_spill] sm:$0xff]  ;;  %v2674_v12 = vpack.c.bf16 %v5721_v35, %v5721_v35 }
 0x2ef   :  { %v2673_v21 = vpack.c.bf16 %v5720_v47, %v5720_v47  ;;  %2382 = vst.msk [vmem:[%s5429_s2 + $0x18] sm:$0xf] %vm2375_vm10, %v2663_v18  ;;  %2383 = vst.msk [vmem:[%s5429_s2 + $0x1c] sm:$0xf] %vm2375_vm10, %v2664_v5  ;;  %v2675_v38 = vpack.c.bf16 %v4778_v57, %v4778_v57  ;;  %v2676_v32 = vpack.c.bf16 %v4787_v59, %v4787_v59 }
 0x2f0   :  { %2384 = vst.msk [vmem:[%s5429_s2 + $0x20] sm:$0xf] %vm2375_vm10, %v2665_v49  ;;  %2385 = vst.msk [vmem:[%s5429_s2 + $0x24] sm:$0xf] %vm2375_vm10, %v2666_v39  ;;  %v2677_v18 = vpack.c.bf16 %v4793_v20, %v4793_v20  ;;  %v2678_v5 = vpack.c.bf16 %v4799_v16, %v4799_v16  ;;  %v2679_v20 = vpack.c.bf16 %v4805_v11, %v4805_v11 }
 0x2f1   :  { %2386 = vst.msk [vmem:[%s5429_s2 + $0x28] sm:$0xf] %vm2375_vm10, %v2667_v4  ;;  %2387 = vst.msk [vmem:[%s5429_s2 + $0x2c] sm:$0xf] %vm2375_vm10, %v2668_v1  ;;  %v2680_v59 = vpack.c.bf16 %v4811_v63, %v4811_v63  ;;  %v2681_v57 = vpack.c.bf16 %v4817_v61, %v4817_v61  ;;  %v2682_v16 = vpack.c.bf16 %v4823_v36, %v4823_v36 }
 0x2f2   :  { %2388 = vst.msk [vmem:[%s5429_s2 + $0x30] sm:$0xf] %vm2375_vm10, %v2669_v7  ;;  %2389 = vst.msk [vmem:[%s5429_s2 + $0x34] sm:$0xf] %vm2375_vm10, %v2670_v51  ;;  %v2683_v11 = vpack.c.bf16 %v4829_v33, %v4829_v33  ;;  %v2684_v63 = vpack.c.bf16 %v4835_v22, %v4835_v22  ;;  %v2685_v61 = vpack.c.bf16 %v4841_v26, %v4841_v26 }
 0x2f3   :  { %2390 = vst.msk [vmem:[%s5429_s2 + $0x38] sm:$0xf] %vm2375_vm10, %v2671_v6  ;;  %2391 = vst.msk [vmem:[%s5429_s2 + $0x3c] sm:$0xf] %vm2375_vm10, %v2672_v40  ;;  %v2686_v36 = vpack.c.bf16 %v4847_v54, %v4847_v54  ;;  %v2687_v33 = vpack.c.bf16 %v4853_v34, %v4853_v34  ;;  %v2688_v22 = vpack.c.bf16 %v4859_v19, %v4859_v19 }
 0x2f4   :  { %2392 = vst.msk [vmem:[%s5429_s2 + $0x40] sm:$0xf] %vm2375_vm10, %v2673_v21  ;;  %2393 = vst.msk [vmem:[%s5429_s2 + $0x44] sm:$0xf] %vm2375_vm10, %v2674_v12  ;;  %v2689_v26 = vpack.c.bf16 %v4865_v10, %v4865_v10  ;;  %v2690_v54 = vpack.c.bf16 %v4871_v56, %v4871_v56  ;;  %v2691_v34 = vpack.c.bf16 %v4877_v41, %v4877_v41 }
 0x2f5   :  { %2394 = vst.msk [vmem:[%s5429_s2 + $0x48] sm:$0xf] %vm2375_vm10, %v2675_v38  ;;  %2395 = vst.msk [vmem:[%s5429_s2 + $0x4c] sm:$0xf] %vm2375_vm10, %v2676_v32  ;;  %v2692_v19 = vpack.c.bf16 %v4883_v0, %v4883_v0  ;;  %v2693_v10 = vpack.c.bf16 %v4889_v3, %v4889_v3  ;;  %v2694_v56 = vpack.c.bf16 %v4895_v23, %v4895_v23 }
 0x2f6   :  { %2396 = vst.msk [vmem:[%s5429_s2 + $0x50] sm:$0xf] %vm2375_vm10, %v2677_v18  ;;  %2397 = vst.msk [vmem:[%s5429_s2 + $0x54] sm:$0xf] %vm2375_vm10, %v2678_v5  ;;  %v2695_v41 = vpack.c.bf16 %v4901_v17, %v4901_v17  ;;  %v2696_v0 = vpack.c.bf16 %v4907_v52, %v4907_v52  ;;  %v2697_v3 = vpack.c.bf16 %v4913_v31, %v4913_v31 }
 0x2f7   :  { %2398 = vst.msk [vmem:[%s5429_s2 + $0x58] sm:$0xf] %vm2375_vm10, %v2679_v20  ;;  %2399 = vst.msk [vmem:[%s5429_s2 + $0x5c] sm:$0xf] %vm2375_vm10, %v2680_v59  ;;  %v2698_v23 = vpack.c.bf16 %v4919_v13, %v4919_v13  ;;  %v2699_v17 = vpack.c.bf16 %v4925_v46, %v4925_v46  ;;  %v2700_v52 = vpack.c.bf16 %v4931_v43, %v4931_v43 }
 0x2f8   :  { %2400 = vst.msk [vmem:[%s5429_s2 + $0x60] sm:$0xf] %vm2375_vm10, %v2681_v57  ;;  %2401 = vst.msk [vmem:[%s5429_s2 + $0x64] sm:$0xf] %vm2375_vm10, %v2682_v16  ;;  %v2701_v31 = vpack.c.bf16 %v4937_v55, %v4937_v55  ;;  %v2702_v13 = vpack.c.bf16 %v4943_v53, %v4943_v53  ;;  %v2703_v46 = vpack.c.bf16 %v4949_v27, %v4949_v27 }
 0x2f9   :  { %2402 = vst.msk [vmem:[%s5429_s2 + $0x68] sm:$0xf] %vm2375_vm10, %v2683_v11  ;;  %2403 = vst.msk [vmem:[%s5429_s2 + $0x6c] sm:$0xf] %vm2375_vm10, %v2684_v63  ;;  %v2704_v43 = vpack.c.bf16 %v4955_v9, %v4955_v9  ;;  %v2705_v55 = vpack.c.bf16 %v4961_v50, %v4961_v50  ;;  %v2706_v53 = vpack.c.bf16 %v4967_v60, %v4967_v60 }
 0x2fa   :  { %2404 = vst.msk [vmem:[%s5429_s2 + $0x70] sm:$0xf] %vm2375_vm10, %v2685_v61  ;;  %2405 = vst.msk [vmem:[%s5429_s2 + $0x74] sm:$0xf] %vm2375_vm10, %v2686_v36  ;;  %v2707_v27 = vpack.c.bf16 %v4973_v14, %v4973_v14  ;;  %v2708_v9 = vpack.c.bf16 %v4979_v28, %v4979_v28  ;;  %v2709_v50 = vpack.c.bf16 %v4985_v25, %v4985_v25 }
 0x2fb   :  { %2406 = vst.msk [vmem:[%s5429_s2 + $0x78] sm:$0xf] %vm2375_vm10, %v2687_v33  ;;  %2407 = vst.msk [vmem:[%s5429_s2 + $0x7c] sm:$0xf] %vm2375_vm10, %v2688_v22  ;;  %v2710_v60 = vpack.c.bf16 %v4991_v58, %v4991_v58  ;;  %v2711_v14 = vpack.c.bf16 %v4996_v62, %v4996_v62  ;;  %v2712_v28 = vpack.c.bf16 %v5001_v45, %v5001_v45 }
 0x2fc   :  { %2408 = vst.msk [vmem:[%s5429_s2 + $0x80] sm:$0xf] %vm2375_vm10, %v2689_v26  ;;  %2409 = vst.msk [vmem:[%s5429_s2 + $0x84] sm:$0xf] %vm2375_vm10, %v2690_v54  ;;  %v2713_v25 = vpack.c.bf16 %v5006_v30, %v5006_v30  ;;  %v2714_v58 = vpack.c.bf16 %v5011_v2, %v5011_v2  ;;  %v2715_v62 = vpack.c.bf16 %v5016_v24, %v5016_v24 }
 0x2fd   :  { %2410 = vst.msk [vmem:[%s5429_s2 + $0x88] sm:$0xf] %vm2375_vm10, %v2691_v34  ;;  %2411 = vst.msk [vmem:[%s5429_s2 + $0x8c] sm:$0xf] %vm2375_vm10, %v2692_v19  ;;  %v2716_v45 = vpack.c.bf16 %v5021_v44, %v5021_v44  ;;  %v2717_v30 = vpack.c.bf16 %v5026_v29, %v5026_v29  ;;  %v2718_v2 = vpack.c.bf16 %v5031_v37, %v5031_v37 }
 0x2fe   :  { %2412 = vst.msk [vmem:[%s5429_s2 + $0x90] sm:$0xf] %vm2375_vm10, %v2693_v10  ;;  %2413 = vst.msk [vmem:[%s5429_s2 + $0x94] sm:$0xf] %vm2375_vm10, %v2694_v56  ;;  %v2719_v24 = vpack.c.bf16 %v5036_v15, %v5036_v15  ;;  %v2720_v44 = vpack.c.bf16 %v5041_v42, %v5041_v42 }
 0x2ff   :  { %2414 = vst.msk [vmem:[%s5429_s2 + $0x98] sm:$0xf] %vm2375_vm10, %v2695_v41  ;;  %2415 = vst.msk [vmem:[%s5429_s2 + $0x9c] sm:$0xf] %vm2375_vm10, %v2696_v0 }
 0x300   :  { %2416 = vst.msk [vmem:[%s5429_s2 + $0xa0] sm:$0xf] %vm2375_vm10, %v2697_v3  ;;  %2417 = vst.msk [vmem:[%s5429_s2 + $0xa4] sm:$0xf] %vm2375_vm10, %v2698_v23 }
 0x301   :  { %2418 = vst.msk [vmem:[%s5429_s2 + $0xa8] sm:$0xf] %vm2375_vm10, %v2699_v17  ;;  %2419 = vst.msk [vmem:[%s5429_s2 + $0xac] sm:$0xf] %vm2375_vm10, %v2700_v52 }
 0x302   :  { %2420 = vst.msk [vmem:[%s5429_s2 + $0xb0] sm:$0xf] %vm2375_vm10, %v2701_v31  ;;  %2421 = vst.msk [vmem:[%s5429_s2 + $0xb4] sm:$0xf] %vm2375_vm10, %v2702_v13 }
 0x303   :  { %2422 = vst.msk [vmem:[%s5429_s2 + $0xb8] sm:$0xf] %vm2375_vm10, %v2703_v46  ;;  %2423 = vst.msk [vmem:[%s5429_s2 + $0xbc] sm:$0xf] %vm2375_vm10, %v2704_v43 }
 0x304   :  { %2424 = vst.msk [vmem:[%s5429_s2 + $0xc0] sm:$0xf] %vm2375_vm10, %v2705_v55  ;;  %2425 = vst.msk [vmem:[%s5429_s2 + $0xc4] sm:$0xf] %vm2375_vm10, %v2706_v53 }
 0x305   :  { %2426 = vst.msk [vmem:[%s5429_s2 + $0xc8] sm:$0xf] %vm2375_vm10, %v2707_v27  ;;  %2427 = vst.msk [vmem:[%s5429_s2 + $0xcc] sm:$0xf] %vm2375_vm10, %v2708_v9 }
 0x306   :  { %2428 = vst.msk [vmem:[%s5429_s2 + $0xd0] sm:$0xf] %vm2375_vm10, %v2709_v50  ;;  %2429 = vst.msk [vmem:[%s5429_s2 + $0xd4] sm:$0xf] %vm2375_vm10, %v2710_v60 }
 0x307   :  { %2430 = vst.msk [vmem:[%s5429_s2 + $0xd8] sm:$0xf] %vm2375_vm10, %v2711_v14  ;;  %2431 = vst.msk [vmem:[%s5429_s2 + $0xdc] sm:$0xf] %vm2375_vm10, %v2712_v28 }
 0x308   :  { %2432 = vst.msk [vmem:[%s5429_s2 + $0xe0] sm:$0xf] %vm2375_vm10, %v2713_v25  ;;  %2433 = vst.msk [vmem:[%s5429_s2 + $0xe4] sm:$0xf] %vm2375_vm10, %v2714_v58 }
 0x309   :  { %2434 = vst.msk [vmem:[%s5429_s2 + $0xe8] sm:$0xf] %vm2375_vm10, %v2715_v62  ;;  %2435 = vst.msk [vmem:[%s5429_s2 + $0xec] sm:$0xf] %vm2375_vm10, %v2716_v45 }
 0x30a   :  { %2436 = vst.msk [vmem:[%s5429_s2 + $0xf0] sm:$0xf] %vm2375_vm10, %v2717_v30  ;;  %2437 = vst.msk [vmem:[%s5429_s2 + $0xf4] sm:$0xf] %vm2375_vm10, %v2718_v2 }
 0x30b   :  { %2438 = vst.msk [vmem:[%s5429_s2 + $0xf8] sm:$0xf] %vm2375_vm10, %v2719_v24  ;;  %2439 = vst.msk [vmem:[%s5429_s2 + $0xfc] sm:$0xf] %vm2375_vm10, %v2720_v44 }

// kernel: discriminator_forward.6
= control target key start
LH: loop header
LB: loop body
LE: loop exit
PB: predicated region body
PF: predicated region fallthrough
CT: control target
= control target key end

     0   :  { %s11636_s15 = smov 0   ;;  %s11638_s16 = smov 0   ;;  %s13666_s0 = inlined_call_operand.vmem [shape: bf16[8,4736], index: 0, kind: input, shape index: {}]   ;;  %s13667_s1 = inlined_call_operand.vmem [shape: bf16[4736,1024], index: 1, kind: input, shape index: {}]   ;;  %s13668_s2 = inlined_call_operand.vmem [shape: bf16[8,10], index: 2, kind: input, shape index: {}]   ;;  %s13669_s3 = inlined_call_operand.vmem [shape: bf16[10,1024], index: 3, kind: input, shape index: {}]   ;;  %s13670_s4 = inlined_call_operand.vmem [shape: bf16[8,1024], index: 4, kind: output, shape index: {}]  }
   0x1   :  { %s11640_s17 = smov 0   ;;  %s11642_s18 = smov 0  }
   0x2   :  { %s11644_s19 = smov 0  }
   0x3 LB: > { %s23_s20 = sadd.s32 1, %s11604_s18  ;;  %p66_p1 = scmp.ne.s32.totalorder %s11596_s16, %s11592_s15  ;;  %s11608_s19 = sphi %s11644_s19, %s14_s19   ;;  %s11604_s18 = sphi %s11642_s18, %s13675_s18   ;;  %s11600_s17 = sphi %s11640_s17, %s13674_s17   ;;  %s11596_s16 = sphi %s11638_s16, %s13673_s16   ;;  %s11592_s15 = sphi %s11636_s15, %s13672_s15  }
   0x4   : > { %p24_p0 = scmp.ge.s32.totalorder %s23_s20, 4  ;;  %p67_p2 = scmp.eq.s32.totalorder %s11608_s19, 0 }
   0x5   : > { %s59_s23 = sadd.s32 1, %s11596_s16  ;;  %p9872_p5 = scmp.ge.s32.totalorder %s11608_s19, 4 }
   0x6   : > { %s13677_s20 = smov (%p24_p0, %s23_s20), 0  ;;  %p11667_p3 = por %p67_p2, %p66_p1 }
   0x7   : > { %s56_s22 = ssub.s32 %s11604_s18, %s13677_s20  ;;  %187 = sbr.rel (%p9872_p5) target bundleno = 617 (0x269), region = 24 }
   0x8   : > { %p57_p4 = scmp.eq.s32.totalorder %s56_s22, 0 }
   0xa   : > { %s11675_s24 = scalar_select %p57_p4, %s11596_s16, %s59_s23  }
   0xe   : > { %190 = sbr.rel (!%p11667_p3) target bundleno = 610 (0x262), region = 28  ;;  %s192_s25 = sand.u32 (%p11667_p3), 1, %s11596_s16  }
   0xf   : > { %s10518_s26 = sshll.u32 (%p11667_p3), %s11604_s18, 3  ;;  %s10595_s27 = smul.u32 (%p11667_p3), 4736, %s192_s25 }
  0x10   : > { %s11685_s30 = scalar_lea.vmem (%p11667_p3), %s13667_s1, %s10518_s26 }
  0x11   : > { %v1410_v0 = vld [vmem:[%s11685_s30] sm:$0xff] (%p11667_p3)  ;;  %s11693_s5 = scalar_lea.vmem (%p11667_p3), [#allocation2], %s10595_s27 }
  0x12   : > { %v1412_v1 = vld [vmem:[%s11685_s30 + $0x20] sm:$0xff] (%p11667_p3)  ;;  %1411 = vst [vmem:[%s11693_s5] sm:$0xff] (%p11667_p3), %v1410_v0 }
  0x13   : > { %v1414_v2 = vld [vmem:[%s11685_s30 + $0x40] sm:$0xff] (%p11667_p3)  ;;  %1413 = vst [vmem:[%s11693_s5 + $0x8] sm:$0xff] (%p11667_p3), %v1412_v1 }
  0x14   : > { %v1416_v3 = vld [vmem:[%s11685_s30 + $0x60] sm:$0xff] (%p11667_p3)  ;;  %1415 = vst [vmem:[%s11693_s5 + $0x10] sm:$0xff] (%p11667_p3), %v1414_v2 }
  0x15   : > { %v1418_v4 = vld [vmem:[%s11685_s30 + $0x80] sm:$0xff]  ;;  %1417 = vst [vmem:[%s11693_s5 + $0x18] sm:$0xff] %v1416_v3 }
  0x16   : > { %v1420_v5 = vld [vmem:[%s11685_s30 + $0xa0] sm:$0xff]  ;;  %1419 = vst [vmem:[%s11693_s5 + $0x20] sm:$0xff] %v1418_v4 }
  0x17   : > { %1421 = vst [vmem:[%s11693_s5 + $0x28] sm:$0xff] %v1420_v5  ;;  %v1422_v6 = vld [vmem:[%s11685_s30 + $0xc0] sm:$0xff] }
  0x18   : > { %v1424_v7 = vld [vmem:[%s11685_s30 + $0xe0] sm:$0xff]  ;;  %1423 = vst [vmem:[%s11693_s5 + $0x30] sm:$0xff] %v1422_v6 }
  0x19   : > { %v1426_v8 = vld [vmem:[%s11685_s30 + $0x100] sm:$0xff]  ;;  %1425 = vst [vmem:[%s11693_s5 + $0x38] sm:$0xff] %v1424_v7 }
  0x1a   : > { %1427 = vst [vmem:[%s11693_s5 + $0x40] sm:$0xff] %v1426_v8  ;;  %v1428_v9 = vld [vmem:[%s11685_s30 + $0x120] sm:$0xff] }
  0x1b   : > { %v1430_v10 = vld [vmem:[%s11685_s30 + $0x140] sm:$0xff]  ;;  %1429 = vst [vmem:[%s11693_s5 + $0x48] sm:$0xff] %v1428_v9 }
  0x1c   : > { %v1432_v11 = vld [vmem:[%s11685_s30 + $0x160] sm:$0xff]  ;;  %1431 = vst [vmem:[%s11693_s5 + $0x50] sm:$0xff] %v1430_v10 }
  0x1d   : > { %1433 = vst [vmem:[%s11693_s5 + $0x58] sm:$0xff] %v1432_v11  ;;  %v1434_v12 = vld [vmem:[%s11685_s30 + $0x180] sm:$0xff] }
  0x1e   : > { %v1436_v13 = vld [vmem:[%s11685_s30 + $0x1a0] sm:$0xff]  ;;  %1435 = vst [vmem:[%s11693_s5 + $0x60] sm:$0xff] %v1434_v12 }
  0x1f   : > { %v1438_v14 = vld [vmem:[%s11685_s30 + $0x1c0] sm:$0xff]  ;;  %1437 = vst [vmem:[%s11693_s5 + $0x68] sm:$0xff] %v1436_v13 }
  0x20   : > { %1439 = vst [vmem:[%s11693_s5 + $0x70] sm:$0xff] %v1438_v14  ;;  %v1440_v15 = vld [vmem:[%s11685_s30 + $0x1e0] sm:$0xff] }
  0x21   : > { %v1442_v16 = vld [vmem:[%s11685_s30 + $0x200] sm:$0xff]  ;;  %1441 = vst [vmem:[%s11693_s5 + $0x78] sm:$0xff] %v1440_v15 }
  0x22   : > { %v1444_v17 = vld [vmem:[%s11685_s30 + $0x220] sm:$0xff]  ;;  %1443 = vst [vmem:[%s11693_s5 + $0x80] sm:$0xff] %v1442_v16 }
  0x23   : > { %1445 = vst [vmem:[%s11693_s5 + $0x88] sm:$0xff] %v1444_v17  ;;  %v1446_v18 = vld [vmem:[%s11685_s30 + $0x240] sm:$0xff] }
  0x24   : > { %v1448_v19 = vld [vmem:[%s11685_s30 + $0x260] sm:$0xff]  ;;  %1447 = vst [vmem:[%s11693_s5 + $0x90] sm:$0xff] %v1446_v18 }
  0x25   : > { %v1450_v20 = vld [vmem:[%s11685_s30 + $0x280] sm:$0xff]  ;;  %1449 = vst [vmem:[%s11693_s5 + $0x98] sm:$0xff] %v1448_v19 }
  0x26   : > { %1451 = vst [vmem:[%s11693_s5 + $0xa0] sm:$0xff] %v1450_v20  ;;  %v1452_v21 = vld [vmem:[%s11685_s30 + $0x2a0] sm:$0xff] }
  0x27   : > { %v1454_v22 = vld [vmem:[%s11685_s30 + $0x2c0] sm:$0xff]  ;;  %1453 = vst [vmem:[%s11693_s5 + $0xa8] sm:$0xff] %v1452_v21 }
  0x28   : > { %v1456_v23 = vld [vmem:[%s11685_s30 + $0x2e0] sm:$0xff]  ;;  %1455 = vst [vmem:[%s11693_s5 + $0xb0] sm:$0xff] %v1454_v22 }
  0x29   : > { %1457 = vst [vmem:[%s11693_s5 + $0xb8] sm:$0xff] %v1456_v23  ;;  %v1458_v24 = vld [vmem:[%s11685_s30 + $0x300] sm:$0xff] }
  0x2a   : > { %v1460_v25 = vld [vmem:[%s11685_s30 + $0x320] sm:$0xff]  ;;  %1459 = vst [vmem:[%s11693_s5 + $0xc0] sm:$0xff] %v1458_v24 }
  0x2b   : > { %v1462_v26 = vld [vmem:[%s11685_s30 + $0x340] sm:$0xff]  ;;  %1461 = vst [vmem:[%s11693_s5 + $0xc8] sm:$0xff] %v1460_v25 }
  0x2c   : > { %1463 = vst [vmem:[%s11693_s5 + $0xd0] sm:$0xff] %v1462_v26  ;;  %v1464_v27 = vld [vmem:[%s11685_s30 + $0x360] sm:$0xff] }
  0x2d   : > { %v1466_v28 = vld [vmem:[%s11685_s30 + $0x380] sm:$0xff]  ;;  %1465 = vst [vmem:[%s11693_s5 + $0xd8] sm:$0xff] %v1464_v27 }
  0x2e   : > { %v1468_v29 = vld [vmem:[%s11685_s30 + $0x3a0] sm:$0xff]  ;;  %1467 = vst [vmem:[%s11693_s5 + $0xe0] sm:$0xff] %v1466_v28 }
  0x2f   : > { %1469 = vst [vmem:[%s11693_s5 + $0xe8] sm:$0xff] %v1468_v29  ;;  %v1470_v30 = vld [vmem:[%s11685_s30 + $0x3c0] sm:$0xff] }
  0x30   : > { %v1472_v31 = vld [vmem:[%s11685_s30 + $0x3e0] sm:$0xff]  ;;  %1471 = vst [vmem:[%s11693_s5 + $0xf0] sm:$0xff] %v1470_v30 }
  0x31   : > { %v1474_v32 = vld [vmem:[%s11685_s30 + $0x400] sm:$0xff]  ;;  %1473 = vst [vmem:[%s11693_s5 + $0xf8] sm:$0xff] %v1472_v31 }
  0x32   : > { %1475 = vst [vmem:[%s11693_s5 + $0x100] sm:$0xff] %v1474_v32  ;;  %v1476_v33 = vld [vmem:[%s11685_s30 + $0x420] sm:$0xff] }
  0x33   : > { %v1478_v34 = vld [vmem:[%s11685_s30 + $0x440] sm:$0xff]  ;;  %1477 = vst [vmem:[%s11693_s5 + $0x108] sm:$0xff] %v1476_v33 }
  0x34   : > { %v1480_v35 = vld [vmem:[%s11685_s30 + $0x460] sm:$0xff]  ;;  %1479 = vst [vmem:[%s11693_s5 + $0x110] sm:$0xff] %v1478_v34 }
  0x35   : > { %1481 = vst [vmem:[%s11693_s5 + $0x118] sm:$0xff] %v1480_v35  ;;  %v1482_v36 = vld [vmem:[%s11685_s30 + $0x480] sm:$0xff] }
  0x36   : > { %v1484_v37 = vld [vmem:[%s11685_s30 + $0x4a0] sm:$0xff]  ;;  %1483 = vst [vmem:[%s11693_s5 + $0x120] sm:$0xff] %v1482_v36 }
  0x37   : > { %v1486_v38 = vld [vmem:[%s11685_s30 + $0x4c0] sm:$0xff]  ;;  %1485 = vst [vmem:[%s11693_s5 + $0x128] sm:$0xff] %v1484_v37 }
  0x38   : > { %1487 = vst [vmem:[%s11693_s5 + $0x130] sm:$0xff] %v1486_v38  ;;  %v1488_v39 = vld [vmem:[%s11685_s30 + $0x4e0] sm:$0xff] }
  0x39   : > { %v1490_v40 = vld [vmem:[%s11685_s30 + $0x500] sm:$0xff]  ;;  %1489 = vst [vmem:[%s11693_s5 + $0x138] sm:$0xff] %v1488_v39 }
  0x3a   : > { %v1492_v41 = vld [vmem:[%s11685_s30 + $0x520] sm:$0xff]  ;;  %1491 = vst [vmem:[%s11693_s5 + $0x140] sm:$0xff] %v1490_v40 }
  0x3b   : > { %1493 = vst [vmem:[%s11693_s5 + $0x148] sm:$0xff] %v1492_v41  ;;  %v1494_v42 = vld [vmem:[%s11685_s30 + $0x540] sm:$0xff] }
  0x3c   : > { %v1496_v43 = vld [vmem:[%s11685_s30 + $0x560] sm:$0xff]  ;;  %1495 = vst [vmem:[%s11693_s5 + $0x150] sm:$0xff] %v1494_v42 }
  0x3d   : > { %v1498_v44 = vld [vmem:[%s11685_s30 + $0x580] sm:$0xff]  ;;  %1497 = vst [vmem:[%s11693_s5 + $0x158] sm:$0xff] %v1496_v43 }
  0x3e   : > { %1499 = vst [vmem:[%s11693_s5 + $0x160] sm:$0xff] %v1498_v44  ;;  %v1500_v45 = vld [vmem:[%s11685_s30 + $0x5a0] sm:$0xff] }
  0x3f   : > { %v1502_v46 = vld [vmem:[%s11685_s30 + $0x5c0] sm:$0xff]  ;;  %1501 = vst [vmem:[%s11693_s5 + $0x168] sm:$0xff] %v1500_v45 }
  0x40   : > { %v1504_v47 = vld [vmem:[%s11685_s30 + $0x5e0] sm:$0xff]  ;;  %1503 = vst [vmem:[%s11693_s5 + $0x170] sm:$0xff] %v1502_v46 }
  0x41   : > { %1505 = vst [vmem:[%s11693_s5 + $0x178] sm:$0xff] %v1504_v47  ;;  %v1506_v48 = vld [vmem:[%s11685_s30 + $0x600] sm:$0xff] }
  0x42   : > { %v1508_v49 = vld [vmem:[%s11685_s30 + $0x620] sm:$0xff]  ;;  %1507 = vst [vmem:[%s11693_s5 + $0x180] sm:$0xff] %v1506_v48 }
  0x43   : > { %v1510_v50 = vld [vmem:[%s11685_s30 + $0x640] sm:$0xff]  ;;  %1509 = vst [vmem:[%s11693_s5 + $0x188] sm:$0xff] %v1508_v49 }
  0x44   : > { %1511 = vst [vmem:[%s11693_s5 + $0x190] sm:$0xff] %v1510_v50  ;;  %v1512_v51 = vld [vmem:[%s11685_s30 + $0x660] sm:$0xff] }
  0x45   : > { %v1514_v52 = vld [vmem:[%s11685_s30 + $0x680] sm:$0xff]  ;;  %1513 = vst [vmem:[%s11693_s5 + $0x198] sm:$0xff] %v1512_v51 }
  0x46   : > { %v1516_v53 = vld [vmem:[%s11685_s30 + $0x6a0] sm:$0xff]  ;;  %1515 = vst [vmem:[%s11693_s5 + $0x1a0] sm:$0xff] %v1514_v52 }
  0x47   : > { %1517 = vst [vmem:[%s11693_s5 + $0x1a8] sm:$0xff] %v1516_v53  ;;  %v1518_v54 = vld [vmem:[%s11685_s30 + $0x6c0] sm:$0xff] }
  0x48   : > { %v1520_v55 = vld [vmem:[%s11685_s30 + $0x6e0] sm:$0xff]  ;;  %1519 = vst [vmem:[%s11693_s5 + $0x1b0] sm:$0xff] %v1518_v54 }
  0x49   : > { %v1522_v56 = vld [vmem:[%s11685_s30 + $0x700] sm:$0xff]  ;;  %1521 = vst [vmem:[%s11693_s5 + $0x1b8] sm:$0xff] %v1520_v55 }
  0x4a   : > { %1523 = vst [vmem:[%s11693_s5 + $0x1c0] sm:$0xff] %v1522_v56  ;;  %v1524_v57 = vld [vmem:[%s11685_s30 + $0x720] sm:$0xff] }
  0x4b   : > { %v1526_v58 = vld [vmem:[%s11685_s30 + $0x740] sm:$0xff]  ;;  %1525 = vst [vmem:[%s11693_s5 + $0x1c8] sm:$0xff] %v1524_v57 }
  0x4c   : > { %v1528_v59 = vld [vmem:[%s11685_s30 + $0x760] sm:$0xff]  ;;  %1527 = vst [vmem:[%s11693_s5 + $0x1d0] sm:$0xff] %v1526_v58 }
  0x4d   : > { %1529 = vst [vmem:[%s11693_s5 + $0x1d8] sm:$0xff] %v1528_v59  ;;  %v1530_v60 = vld [vmem:[%s11685_s30 + $0x780] sm:$0xff] }
  0x4e   : > { %v1532_v61 = vld [vmem:[%s11685_s30 + $0x7a0] sm:$0xff]  ;;  %1531 = vst [vmem:[%s11693_s5 + $0x1e0] sm:$0xff] %v1530_v60 }
  0x4f   : > { %v1534_v62 = vld [vmem:[%s11685_s30 + $0x7c0] sm:$0xff]  ;;  %1533 = vst [vmem:[%s11693_s5 + $0x1e8] sm:$0xff] %v1532_v61 }
  0x50   : > { %1535 = vst [vmem:[%s11693_s5 + $0x1f0] sm:$0xff] %v1534_v62  ;;  %v1536_v63 = vld [vmem:[%s11685_s30 + $0x7e0] sm:$0xff] }
  0x51   : > { %v1538_v0 = vld [vmem:[%s11685_s30 + $0x800] sm:$0xff]  ;;  %1537 = vst [vmem:[%s11693_s5 + $0x1f8] sm:$0xff] %v1536_v63 }
  0x52   : > { %v1540_v1 = vld [vmem:[%s11685_s30 + $0x820] sm:$0xff]  ;;  %1539 = vst [vmem:[%s11693_s5 + $0x200] sm:$0xff] %v1538_v0 }
  0x53   : > { %1541 = vst [vmem:[%s11693_s5 + $0x208] sm:$0xff] %v1540_v1  ;;  %v1542_v2 = vld [vmem:[%s11685_s30 + $0x840] sm:$0xff] }
  0x54   : > { %v1544_v3 = vld [vmem:[%s11685_s30 + $0x860] sm:$0xff]  ;;  %1543 = vst [vmem:[%s11693_s5 + $0x210] sm:$0xff] %v1542_v2 }
  0x55   : > { %v1546_v4 = vld [vmem:[%s11685_s30 + $0x880] sm:$0xff]  ;;  %1545 = vst [vmem:[%s11693_s5 + $0x218] sm:$0xff] %v1544_v3 }
  0x56   : > { %1547 = vst [vmem:[%s11693_s5 + $0x220] sm:$0xff] %v1546_v4  ;;  %v1548_v5 = vld [vmem:[%s11685_s30 + $0x8a0] sm:$0xff] }
  0x57   : > { %v1550_v6 = vld [vmem:[%s11685_s30 + $0x8c0] sm:$0xff]  ;;  %1549 = vst [vmem:[%s11693_s5 + $0x228] sm:$0xff] %v1548_v5 }
  0x58   : > { %v1552_v7 = vld [vmem:[%s11685_s30 + $0x8e0] sm:$0xff]  ;;  %1551 = vst [vmem:[%s11693_s5 + $0x230] sm:$0xff] %v1550_v6 }
  0x59   : > { %1553 = vst [vmem:[%s11693_s5 + $0x238] sm:$0xff] %v1552_v7  ;;  %v1554_v8 = vld [vmem:[%s11685_s30 + $0x900] sm:$0xff] }
  0x5a   : > { %v1556_v9 = vld [vmem:[%s11685_s30 + $0x920] sm:$0xff]  ;;  %1555 = vst [vmem:[%s11693_s5 + $0x240] sm:$0xff] %v1554_v8 }
  0x5b   : > { %v1558_v10 = vld [vmem:[%s11685_s30 + $0x940] sm:$0xff]  ;;  %1557 = vst [vmem:[%s11693_s5 + $0x248] sm:$0xff] %v1556_v9 }
  0x5c   : > { %1559 = vst [vmem:[%s11693_s5 + $0x250] sm:$0xff] %v1558_v10  ;;  %v1560_v11 = vld [vmem:[%s11685_s30 + $0x960] sm:$0xff] }
  0x5d   : > { %v1562_v12 = vld [vmem:[%s11685_s30 + $0x980] sm:$0xff]  ;;  %1561 = vst [vmem:[%s11693_s5 + $0x258] sm:$0xff] %v1560_v11 }
  0x5e   : > { %v1564_v13 = vld [vmem:[%s11685_s30 + $0x9a0] sm:$0xff]  ;;  %1563 = vst [vmem:[%s11693_s5 + $0x260] sm:$0xff] %v1562_v12 }
  0x5f   : > { %1565 = vst [vmem:[%s11693_s5 + $0x268] sm:$0xff] %v1564_v13  ;;  %v1566_v14 = vld [vmem:[%s11685_s30 + $0x9c0] sm:$0xff] }
  0x60   : > { %v1568_v15 = vld [vmem:[%s11685_s30 + $0x9e0] sm:$0xff]  ;;  %1567 = vst [vmem:[%s11693_s5 + $0x270] sm:$0xff] %v1566_v14 }
  0x61   : > { %v1570_v16 = vld [vmem:[%s11685_s30 + $0xa00] sm:$0xff]  ;;  %1569 = vst [vmem:[%s11693_s5 + $0x278] sm:$0xff] %v1568_v15 }
  0x62   : > { %1571 = vst [vmem:[%s11693_s5 + $0x280] sm:$0xff] %v1570_v16  ;;  %v1572_v17 = vld [vmem:[%s11685_s30 + $0xa20] sm:$0xff] }
  0x63   : > { %v1574_v18 = vld [vmem:[%s11685_s30 + $0xa40] sm:$0xff]  ;;  %1573 = vst [vmem:[%s11693_s5 + $0x288] sm:$0xff] %v1572_v17 }
  0x64   : > { %v1576_v19 = vld [vmem:[%s11685_s30 + $0xa60] sm:$0xff]  ;;  %1575 = vst [vmem:[%s11693_s5 + $0x290] sm:$0xff] %v1574_v18 }
  0x65   : > { %1577 = vst [vmem:[%s11693_s5 + $0x298] sm:$0xff] %v1576_v19  ;;  %v1578_v20 = vld [vmem:[%s11685_s30 + $0xa80] sm:$0xff] }
  0x66   : > { %v1580_v21 = vld [vmem:[%s11685_s30 + $0xaa0] sm:$0xff]  ;;  %1579 = vst [vmem:[%s11693_s5 + $0x2a0] sm:$0xff] %v1578_v20 }
  0x67   : > { %v1582_v22 = vld [vmem:[%s11685_s30 + $0xac0] sm:$0xff]  ;;  %1581 = vst [vmem:[%s11693_s5 + $0x2a8] sm:$0xff] %v1580_v21 }
  0x68   : > { %1583 = vst [vmem:[%s11693_s5 + $0x2b0] sm:$0xff] %v1582_v22  ;;  %v1584_v23 = vld [vmem:[%s11685_s30 + $0xae0] sm:$0xff] }
  0x69   : > { %v1586_v24 = vld [vmem:[%s11685_s30 + $0xb00] sm:$0xff]  ;;  %1585 = vst [vmem:[%s11693_s5 + $0x2b8] sm:$0xff] %v1584_v23 }
  0x6a   : > { %v1588_v25 = vld [vmem:[%s11685_s30 + $0xb20] sm:$0xff]  ;;  %1587 = vst [vmem:[%s11693_s5 + $0x2c0] sm:$0xff] %v1586_v24 }
  0x6b   : > { %1589 = vst [vmem:[%s11693_s5 + $0x2c8] sm:$0xff] %v1588_v25  ;;  %v1590_v26 = vld [vmem:[%s11685_s30 + $0xb40] sm:$0xff] }
  0x6c   : > { %v1592_v27 = vld [vmem:[%s11685_s30 + $0xb60] sm:$0xff]  ;;  %1591 = vst [vmem:[%s11693_s5 + $0x2d0] sm:$0xff] %v1590_v26 }
  0x6d   : > { %v1594_v28 = vld [vmem:[%s11685_s30 + $0xb80] sm:$0xff]  ;;  %1593 = vst [vmem:[%s11693_s5 + $0x2d8] sm:$0xff] %v1592_v27 }
  0x6e   : > { %1595 = vst [vmem:[%s11693_s5 + $0x2e0] sm:$0xff] %v1594_v28  ;;  %v1596_v29 = vld [vmem:[%s11685_s30 + $0xba0] sm:$0xff] }
  0x6f   : > { %v1598_v30 = vld [vmem:[%s11685_s30 + $0xbc0] sm:$0xff]  ;;  %1597 = vst [vmem:[%s11693_s5 + $0x2e8] sm:$0xff] %v1596_v29 }
  0x70   : > { %v1600_v31 = vld [vmem:[%s11685_s30 + $0xbe0] sm:$0xff]  ;;  %1599 = vst [vmem:[%s11693_s5 + $0x2f0] sm:$0xff] %v1598_v30 }
  0x71   : > { %1601 = vst [vmem:[%s11693_s5 + $0x2f8] sm:$0xff] %v1600_v31  ;;  %v1602_v32 = vld [vmem:[%s11685_s30 + $0xc00] sm:$0xff] }
  0x72   : > { %v1604_v33 = vld [vmem:[%s11685_s30 + $0xc20] sm:$0xff]  ;;  %1603 = vst [vmem:[%s11693_s5 + $0x300] sm:$0xff] %v1602_v32 }
  0x73   : > { %v1606_v34 = vld [vmem:[%s11685_s30 + $0xc40] sm:$0xff]  ;;  %1605 = vst [vmem:[%s11693_s5 + $0x308] sm:$0xff] %v1604_v33 }
  0x74   : > { %1607 = vst [vmem:[%s11693_s5 + $0x310] sm:$0xff] %v1606_v34  ;;  %v1608_v35 = vld [vmem:[%s11685_s30 + $0xc60] sm:$0xff] }
  0x75   : > { %v1610_v36 = vld [vmem:[%s11685_s30 + $0xc80] sm:$0xff]  ;;  %1609 = vst [vmem:[%s11693_s5 + $0x318] sm:$0xff] %v1608_v35 }
  0x76   : > { %v1612_v37 = vld [vmem:[%s11685_s30 + $0xca0] sm:$0xff]  ;;  %1611 = vst [vmem:[%s11693_s5 + $0x320] sm:$0xff] %v1610_v36 }
  0x77   : > { %1613 = vst [vmem:[%s11693_s5 + $0x328] sm:$0xff] %v1612_v37  ;;  %v1614_v38 = vld [vmem:[%s11685_s30 + $0xcc0] sm:$0xff] }
  0x78   : > { %v1616_v39 = vld [vmem:[%s11685_s30 + $0xce0] sm:$0xff]  ;;  %1615 = vst [vmem:[%s11693_s5 + $0x330] sm:$0xff] %v1614_v38 }
  0x79   : > { %v1618_v40 = vld [vmem:[%s11685_s30 + $0xd00] sm:$0xff]  ;;  %1617 = vst [vmem:[%s11693_s5 + $0x338] sm:$0xff] %v1616_v39 }
  0x7a   : > { %1619 = vst [vmem:[%s11693_s5 + $0x340] sm:$0xff] %v1618_v40  ;;  %v1620_v41 = vld [vmem:[%s11685_s30 + $0xd20] sm:$0xff] }
  0x7b   : > { %v1622_v42 = vld [vmem:[%s11685_s30 + $0xd40] sm:$0xff]  ;;  %1621 = vst [vmem:[%s11693_s5 + $0x348] sm:$0xff] %v1620_v41 }
  0x7c   : > { %v1624_v43 = vld [vmem:[%s11685_s30 + $0xd60] sm:$0xff]  ;;  %1623 = vst [vmem:[%s11693_s5 + $0x350] sm:$0xff] %v1622_v42 }
  0x7d   : > { %1625 = vst [vmem:[%s11693_s5 + $0x358] sm:$0xff] %v1624_v43  ;;  %v1626_v44 = vld [vmem:[%s11685_s30 + $0xd80] sm:$0xff] }
  0x7e   : > { %v1628_v45 = vld [vmem:[%s11685_s30 + $0xda0] sm:$0xff]  ;;  %1627 = vst [vmem:[%s11693_s5 + $0x360] sm:$0xff] %v1626_v44 }
  0x7f   : > { %v1630_v46 = vld [vmem:[%s11685_s30 + $0xdc0] sm:$0xff]  ;;  %1629 = vst [vmem:[%s11693_s5 + $0x368] sm:$0xff] %v1628_v45 }
  0x80   : > { %1631 = vst [vmem:[%s11693_s5 + $0x370] sm:$0xff] %v1630_v46  ;;  %v1632_v47 = vld [vmem:[%s11685_s30 + $0xde0] sm:$0xff] }
  0x81   : > { %v1634_v48 = vld [vmem:[%s11685_s30 + $0xe00] sm:$0xff]  ;;  %1633 = vst [vmem:[%s11693_s5 + $0x378] sm:$0xff] %v1632_v47 }
  0x82   : > { %v1636_v49 = vld [vmem:[%s11685_s30 + $0xe20] sm:$0xff]  ;;  %1635 = vst [vmem:[%s11693_s5 + $0x380] sm:$0xff] %v1634_v48 }
  0x83   : > { %1637 = vst [vmem:[%s11693_s5 + $0x388] sm:$0xff] %v1636_v49  ;;  %v1638_v50 = vld [vmem:[%s11685_s30 + $0xe40] sm:$0xff] }
  0x84   : > { %v1640_v51 = vld [vmem:[%s11685_s30 + $0xe60] sm:$0xff]  ;;  %1639 = vst [vmem:[%s11693_s5 + $0x390] sm:$0xff] %v1638_v50 }
  0x85   : > { %v1642_v52 = vld [vmem:[%s11685_s30 + $0xe80] sm:$0xff]  ;;  %1641 = vst [vmem:[%s11693_s5 + $0x398] sm:$0xff] %v1640_v51 }
  0x86   : > { %1643 = vst [vmem:[%s11693_s5 + $0x3a0] sm:$0xff] %v1642_v52  ;;  %v1644_v53 = vld [vmem:[%s11685_s30 + $0xea0] sm:$0xff] }
  0x87   : > { %v1646_v54 = vld [vmem:[%s11685_s30 + $0xec0] sm:$0xff]  ;;  %1645 = vst [vmem:[%s11693_s5 + $0x3a8] sm:$0xff] %v1644_v53 }
  0x88   : > { %v1648_v55 = vld [vmem:[%s11685_s30 + $0xee0] sm:$0xff]  ;;  %1647 = vst [vmem:[%s11693_s5 + $0x3b0] sm:$0xff] %v1646_v54 }
  0x89   : > { %1649 = vst [vmem:[%s11693_s5 + $0x3b8] sm:$0xff] %v1648_v55  ;;  %v1650_v56 = vld [vmem:[%s11685_s30 + $0xf00] sm:$0xff] }
  0x8a   : > { %v1652_v57 = vld [vmem:[%s11685_s30 + $0xf20] sm:$0xff]  ;;  %1651 = vst [vmem:[%s11693_s5 + $0x3c0] sm:$0xff] %v1650_v56 }
  0x8b   : > { %v1654_v58 = vld [vmem:[%s11685_s30 + $0xf40] sm:$0xff]  ;;  %1653 = vst [vmem:[%s11693_s5 + $0x3c8] sm:$0xff] %v1652_v57 }
  0x8c   : > { %1655 = vst [vmem:[%s11693_s5 + $0x3d0] sm:$0xff] %v1654_v58  ;;  %v1656_v59 = vld [vmem:[%s11685_s30 + $0xf60] sm:$0xff] }
  0x8d   : > { %v1658_v60 = vld [vmem:[%s11685_s30 + $0xf80] sm:$0xff]  ;;  %1657 = vst [vmem:[%s11693_s5 + $0x3d8] sm:$0xff] %v1656_v59 }
  0x8e   : > { %v1660_v61 = vld [vmem:[%s11685_s30 + $0xfa0] sm:$0xff]  ;;  %1659 = vst [vmem:[%s11693_s5 + $0x3e0] sm:$0xff] %v1658_v60 }
  0x8f   : > { %1661 = vst [vmem:[%s11693_s5 + $0x3e8] sm:$0xff] %v1660_v61  ;;  %v1662_v62 = vld [vmem:[%s11685_s30 + $0xfc0] sm:$0xff] }
  0x90   : > { %v1664_v63 = vld [vmem:[%s11685_s30 + $0xfe0] sm:$0xff]  ;;  %1663 = vst [vmem:[%s11693_s5 + $0x3f0] sm:$0xff] %v1662_v62 }
  0x91   : > { %v1666_v0 = vld [vmem:[%s11685_s30 + $0x1000] sm:$0xff]  ;;  %1665 = vst [vmem:[%s11693_s5 + $0x3f8] sm:$0xff] %v1664_v63 }
  0x92   : > { %1667 = vst [vmem:[%s11693_s5 + $0x400] sm:$0xff] %v1666_v0  ;;  %v1668_v1 = vld [vmem:[%s11685_s30 + $0x1020] sm:$0xff] }
  0x93   : > { %v1670_v2 = vld [vmem:[%s11685_s30 + $0x1040] sm:$0xff]  ;;  %1669 = vst [vmem:[%s11693_s5 + $0x408] sm:$0xff] %v1668_v1 }
  0x94   : > { %v1672_v3 = vld [vmem:[%s11685_s30 + $0x1060] sm:$0xff]  ;;  %1671 = vst [vmem:[%s11693_s5 + $0x410] sm:$0xff] %v1670_v2 }
  0x95   : > { %1673 = vst [vmem:[%s11693_s5 + $0x418] sm:$0xff] %v1672_v3  ;;  %v1674_v4 = vld [vmem:[%s11685_s30 + $0x1080] sm:$0xff] }
  0x96   : > { %v1676_v5 = vld [vmem:[%s11685_s30 + $0x10a0] sm:$0xff]  ;;  %1675 = vst [vmem:[%s11693_s5 + $0x420] sm:$0xff] %v1674_v4 }
  0x97   : > { %v1678_v6 = vld [vmem:[%s11685_s30 + $0x10c0] sm:$0xff]  ;;  %1677 = vst [vmem:[%s11693_s5 + $0x428] sm:$0xff] %v1676_v5 }
  0x98   : > { %1679 = vst [vmem:[%s11693_s5 + $0x430] sm:$0xff] %v1678_v6  ;;  %v1680_v7 = vld [vmem:[%s11685_s30 + $0x10e0] sm:$0xff] }
  0x99   : > { %v1682_v8 = vld [vmem:[%s11685_s30 + $0x1100] sm:$0xff]  ;;  %1681 = vst [vmem:[%s11693_s5 + $0x438] sm:$0xff] %v1680_v7 }
  0x9a   : > { %v1684_v9 = vld [vmem:[%s11685_s30 + $0x1120] sm:$0xff]  ;;  %1683 = vst [vmem:[%s11693_s5 + $0x440] sm:$0xff] %v1682_v8 }
  0x9b   : > { %1685 = vst [vmem:[%s11693_s5 + $0x448] sm:$0xff] %v1684_v9  ;;  %v1686_v10 = vld [vmem:[%s11685_s30 + $0x1140] sm:$0xff] }
  0x9c   : > { %v1688_v11 = vld [vmem:[%s11685_s30 + $0x1160] sm:$0xff]  ;;  %1687 = vst [vmem:[%s11693_s5 + $0x450] sm:$0xff] %v1686_v10 }
  0x9d   : > { %v1690_v12 = vld [vmem:[%s11685_s30 + $0x1180] sm:$0xff]  ;;  %1689 = vst [vmem:[%s11693_s5 + $0x458] sm:$0xff] %v1688_v11 }
  0x9e   : > { %1691 = vst [vmem:[%s11693_s5 + $0x460] sm:$0xff] %v1690_v12  ;;  %v1692_v13 = vld [vmem:[%s11685_s30 + $0x11a0] sm:$0xff] }
  0x9f   : > { %v1694_v14 = vld [vmem:[%s11685_s30 + $0x11c0] sm:$0xff]  ;;  %1693 = vst [vmem:[%s11693_s5 + $0x468] sm:$0xff] %v1692_v13 }
  0xa0   : > { %v1696_v15 = vld [vmem:[%s11685_s30 + $0x11e0] sm:$0xff]  ;;  %1695 = vst [vmem:[%s11693_s5 + $0x470] sm:$0xff] %v1694_v14 }
  0xa1   : > { %1697 = vst [vmem:[%s11693_s5 + $0x478] sm:$0xff] %v1696_v15  ;;  %v1698_v16 = vld [vmem:[%s11685_s30 + $0x1200] sm:$0xff] }
  0xa2   : > { %v1700_v17 = vld [vmem:[%s11685_s30 + $0x1220] sm:$0xff]  ;;  %1699 = vst [vmem:[%s11693_s5 + $0x480] sm:$0xff] %v1698_v16 }
  0xa3   : > { %v1702_v18 = vld [vmem:[%s11685_s30 + $0x1240] sm:$0xff]  ;;  %1701 = vst [vmem:[%s11693_s5 + $0x488] sm:$0xff] %v1700_v17 }
  0xa4   : > { %1703 = vst [vmem:[%s11693_s5 + $0x490] sm:$0xff] %v1702_v18  ;;  %v1704_v19 = vld [vmem:[%s11685_s30 + $0x1260] sm:$0xff] }
  0xa5   : > { %v1706_v20 = vld [vmem:[%s11685_s30 + $0x1280] sm:$0xff]  ;;  %1705 = vst [vmem:[%s11693_s5 + $0x498] sm:$0xff] %v1704_v19 }
  0xa6   : > { %v1708_v21 = vld [vmem:[%s11685_s30 + $0x12a0] sm:$0xff]  ;;  %1707 = vst [vmem:[%s11693_s5 + $0x4a0] sm:$0xff] %v1706_v20 }
  0xa7   : > { %1709 = vst [vmem:[%s11693_s5 + $0x4a8] sm:$0xff] %v1708_v21  ;;  %v1710_v22 = vld [vmem:[%s11685_s30 + $0x12c0] sm:$0xff] }
  0xa8   : > { %v1712_v23 = vld [vmem:[%s11685_s30 + $0x12e0] sm:$0xff]  ;;  %1711 = vst [vmem:[%s11693_s5 + $0x4b0] sm:$0xff] %v1710_v22 }
  0xa9   : > { %v1714_v24 = vld [vmem:[%s11685_s30 + $0x1300] sm:$0xff]  ;;  %1713 = vst [vmem:[%s11693_s5 + $0x4b8] sm:$0xff] %v1712_v23 }
  0xaa   : > { %1715 = vst [vmem:[%s11693_s5 + $0x4c0] sm:$0xff] %v1714_v24  ;;  %v1716_v25 = vld [vmem:[%s11685_s30 + $0x1320] sm:$0xff] }
  0xab   : > { %v1718_v26 = vld [vmem:[%s11685_s30 + $0x1340] sm:$0xff]  ;;  %1717 = vst [vmem:[%s11693_s5 + $0x4c8] sm:$0xff] %v1716_v25 }
  0xac   : > { %v1720_v27 = vld [vmem:[%s11685_s30 + $0x1360] sm:$0xff]  ;;  %1719 = vst [vmem:[%s11693_s5 + $0x4d0] sm:$0xff] %v1718_v26 }
  0xad   : > { %1721 = vst [vmem:[%s11693_s5 + $0x4d8] sm:$0xff] %v1720_v27  ;;  %v1722_v28 = vld [vmem:[%s11685_s30 + $0x1380] sm:$0xff] }
  0xae   : > { %v1724_v29 = vld [vmem:[%s11685_s30 + $0x13a0] sm:$0xff]  ;;  %1723 = vst [vmem:[%s11693_s5 + $0x4e0] sm:$0xff] %v1722_v28 }
  0xaf   : > { %v1726_v30 = vld [vmem:[%s11685_s30 + $0x13c0] sm:$0xff]  ;;  %1725 = vst [vmem:[%s11693_s5 + $0x4e8] sm:$0xff] %v1724_v29 }
  0xb0   : > { %1727 = vst [vmem:[%s11693_s5 + $0x4f0] sm:$0xff] %v1726_v30  ;;  %v1728_v31 = vld [vmem:[%s11685_s30 + $0x13e0] sm:$0xff] }
  0xb1   : > { %v1730_v32 = vld [vmem:[%s11685_s30 + $0x1400] sm:$0xff]  ;;  %1729 = vst [vmem:[%s11693_s5 + $0x4f8] sm:$0xff] %v1728_v31 }
  0xb2   : > { %v1732_v33 = vld [vmem:[%s11685_s30 + $0x1420] sm:$0xff]  ;;  %1731 = vst [vmem:[%s11693_s5 + $0x500] sm:$0xff] %v1730_v32 }
  0xb3   : > { %1733 = vst [vmem:[%s11693_s5 + $0x508] sm:$0xff] %v1732_v33  ;;  %v1734_v34 = vld [vmem:[%s11685_s30 + $0x1440] sm:$0xff] }
  0xb4   : > { %v1736_v35 = vld [vmem:[%s11685_s30 + $0x1460] sm:$0xff]  ;;  %1735 = vst [vmem:[%s11693_s5 + $0x510] sm:$0xff] %v1734_v34 }
  0xb5   : > { %v1738_v36 = vld [vmem:[%s11685_s30 + $0x1480] sm:$0xff]  ;;  %1737 = vst [vmem:[%s11693_s5 + $0x518] sm:$0xff] %v1736_v35 }
  0xb6   : > { %1739 = vst [vmem:[%s11693_s5 + $0x520] sm:$0xff] %v1738_v36  ;;  %v1740_v37 = vld [vmem:[%s11685_s30 + $0x14a0] sm:$0xff] }
  0xb7   : > { %v1742_v38 = vld [vmem:[%s11685_s30 + $0x14c0] sm:$0xff]  ;;  %1741 = vst [vmem:[%s11693_s5 + $0x528] sm:$0xff] %v1740_v37 }
  0xb8   : > { %v1744_v39 = vld [vmem:[%s11685_s30 + $0x14e0] sm:$0xff]  ;;  %1743 = vst [vmem:[%s11693_s5 + $0x530] sm:$0xff] %v1742_v38 }
  0xb9   : > { %1745 = vst [vmem:[%s11693_s5 + $0x538] sm:$0xff] %v1744_v39  ;;  %v1746_v40 = vld [vmem:[%s11685_s30 + $0x1500] sm:$0xff] }
  0xba   : > { %v1748_v41 = vld [vmem:[%s11685_s30 + $0x1520] sm:$0xff]  ;;  %1747 = vst [vmem:[%s11693_s5 + $0x540] sm:$0xff] %v1746_v40 }
  0xbb   : > { %v1750_v42 = vld [vmem:[%s11685_s30 + $0x1540] sm:$0xff]  ;;  %1749 = vst [vmem:[%s11693_s5 + $0x548] sm:$0xff] %v1748_v41 }
  0xbc   : > { %1751 = vst [vmem:[%s11693_s5 + $0x550] sm:$0xff] %v1750_v42  ;;  %v1752_v43 = vld [vmem:[%s11685_s30 + $0x1560] sm:$0xff] }
  0xbd   : > { %v1754_v44 = vld [vmem:[%s11685_s30 + $0x1580] sm:$0xff]  ;;  %1753 = vst [vmem:[%s11693_s5 + $0x558] sm:$0xff] %v1752_v43 }
  0xbe   : > { %v1756_v45 = vld [vmem:[%s11685_s30 + $0x15a0] sm:$0xff]  ;;  %1755 = vst [vmem:[%s11693_s5 + $0x560] sm:$0xff] %v1754_v44 }
  0xbf   : > { %1757 = vst [vmem:[%s11693_s5 + $0x568] sm:$0xff] %v1756_v45  ;;  %v1758_v46 = vld [vmem:[%s11685_s30 + $0x15c0] sm:$0xff] }
  0xc0   : > { %v1760_v47 = vld [vmem:[%s11685_s30 + $0x15e0] sm:$0xff]  ;;  %1759 = vst [vmem:[%s11693_s5 + $0x570] sm:$0xff] %v1758_v46 }
  0xc1   : > { %v1762_v48 = vld [vmem:[%s11685_s30 + $0x1600] sm:$0xff]  ;;  %1761 = vst [vmem:[%s11693_s5 + $0x578] sm:$0xff] %v1760_v47 }
  0xc2   : > { %1763 = vst [vmem:[%s11693_s5 + $0x580] sm:$0xff] %v1762_v48  ;;  %v1764_v49 = vld [vmem:[%s11685_s30 + $0x1620] sm:$0xff] }
  0xc3   : > { %v1766_v50 = vld [vmem:[%s11685_s30 + $0x1640] sm:$0xff]  ;;  %1765 = vst [vmem:[%s11693_s5 + $0x588] sm:$0xff] %v1764_v49 }
  0xc4   : > { %v1768_v51 = vld [vmem:[%s11685_s30 + $0x1660] sm:$0xff]  ;;  %1767 = vst [vmem:[%s11693_s5 + $0x590] sm:$0xff] %v1766_v50 }
  0xc5   : > { %1769 = vst [vmem:[%s11693_s5 + $0x598] sm:$0xff] %v1768_v51  ;;  %v1770_v52 = vld [vmem:[%s11685_s30 + $0x1680] sm:$0xff] }
  0xc6   : > { %v1772_v53 = vld [vmem:[%s11685_s30 + $0x16a0] sm:$0xff]  ;;  %1771 = vst [vmem:[%s11693_s5 + $0x5a0] sm:$0xff] %v1770_v52 }
  0xc7   : > { %v1774_v54 = vld [vmem:[%s11685_s30 + $0x16c0] sm:$0xff]  ;;  %1773 = vst [vmem:[%s11693_s5 + $0x5a8] sm:$0xff] %v1772_v53 }
  0xc8   : > { %1775 = vst [vmem:[%s11693_s5 + $0x5b0] sm:$0xff] %v1774_v54  ;;  %v1776_v55 = vld [vmem:[%s11685_s30 + $0x16e0] sm:$0xff] }
  0xc9   : > { %v1778_v56 = vld [vmem:[%s11685_s30 + $0x1700] sm:$0xff]  ;;  %1777 = vst [vmem:[%s11693_s5 + $0x5b8] sm:$0xff] %v1776_v55 }
  0xca   : > { %v1780_v57 = vld [vmem:[%s11685_s30 + $0x1720] sm:$0xff]  ;;  %1779 = vst [vmem:[%s11693_s5 + $0x5c0] sm:$0xff] %v1778_v56 }
  0xcb   : > { %1781 = vst [vmem:[%s11693_s5 + $0x5c8] sm:$0xff] %v1780_v57  ;;  %v1782_v58 = vld [vmem:[%s11685_s30 + $0x1740] sm:$0xff] }
  0xcc   : > { %v1784_v59 = vld [vmem:[%s11685_s30 + $0x1760] sm:$0xff]  ;;  %1783 = vst [vmem:[%s11693_s5 + $0x5d0] sm:$0xff] %v1782_v58 }
  0xcd   : > { %v1786_v60 = vld [vmem:[%s11685_s30 + $0x1780] sm:$0xff]  ;;  %1785 = vst [vmem:[%s11693_s5 + $0x5d8] sm:$0xff] %v1784_v59 }
  0xce   : > { %1787 = vst [vmem:[%s11693_s5 + $0x5e0] sm:$0xff] %v1786_v60  ;;  %v1788_v61 = vld [vmem:[%s11685_s30 + $0x17a0] sm:$0xff] }
  0xcf   : > { %v1790_v62 = vld [vmem:[%s11685_s30 + $0x17c0] sm:$0xff]  ;;  %1789 = vst [vmem:[%s11693_s5 + $0x5e8] sm:$0xff] %v1788_v61 }
  0xd0   : > { %v1792_v63 = vld [vmem:[%s11685_s30 + $0x17e0] sm:$0xff]  ;;  %1791 = vst [vmem:[%s11693_s5 + $0x5f0] sm:$0xff] %v1790_v62 }
  0xd1   : > { %1793 = vst [vmem:[%s11693_s5 + $0x5f8] sm:$0xff] %v1792_v63  ;;  %v1794_v0 = vld [vmem:[%s11685_s30 + $0x1800] sm:$0xff] }
  0xd2   : > { %v1796_v1 = vld [vmem:[%s11685_s30 + $0x1820] sm:$0xff]  ;;  %1795 = vst [vmem:[%s11693_s5 + $0x600] sm:$0xff] %v1794_v0 }
  0xd3   : > { %v1798_v2 = vld [vmem:[%s11685_s30 + $0x1840] sm:$0xff]  ;;  %1797 = vst [vmem:[%s11693_s5 + $0x608] sm:$0xff] %v1796_v1 }
  0xd4   : > { %1799 = vst [vmem:[%s11693_s5 + $0x610] sm:$0xff] %v1798_v2  ;;  %v1800_v3 = vld [vmem:[%s11685_s30 + $0x1860] sm:$0xff] }
  0xd5   : > { %v1802_v4 = vld [vmem:[%s11685_s30 + $0x1880] sm:$0xff]  ;;  %1801 = vst [vmem:[%s11693_s5 + $0x618] sm:$0xff] %v1800_v3 }
  0xd6   : > { %v1804_v5 = vld [vmem:[%s11685_s30 + $0x18a0] sm:$0xff]  ;;  %1803 = vst [vmem:[%s11693_s5 + $0x620] sm:$0xff] %v1802_v4 }
  0xd7   : > { %1805 = vst [vmem:[%s11693_s5 + $0x628] sm:$0xff] %v1804_v5  ;;  %v1806_v6 = vld [vmem:[%s11685_s30 + $0x18c0] sm:$0xff] }
  0xd8   : > { %v1808_v7 = vld [vmem:[%s11685_s30 + $0x18e0] sm:$0xff]  ;;  %1807 = vst [vmem:[%s11693_s5 + $0x630] sm:$0xff] %v1806_v6 }
  0xd9   : > { %v1810_v8 = vld [vmem:[%s11685_s30 + $0x1900] sm:$0xff]  ;;  %1809 = vst [vmem:[%s11693_s5 + $0x638] sm:$0xff] %v1808_v7 }
  0xda   : > { %1811 = vst [vmem:[%s11693_s5 + $0x640] sm:$0xff] %v1810_v8  ;;  %v1812_v9 = vld [vmem:[%s11685_s30 + $0x1920] sm:$0xff] }
  0xdb   : > { %v1814_v10 = vld [vmem:[%s11685_s30 + $0x1940] sm:$0xff]  ;;  %1813 = vst [vmem:[%s11693_s5 + $0x648] sm:$0xff] %v1812_v9 }
  0xdc   : > { %v1816_v11 = vld [vmem:[%s11685_s30 + $0x1960] sm:$0xff]  ;;  %1815 = vst [vmem:[%s11693_s5 + $0x650] sm:$0xff] %v1814_v10 }
  0xdd   : > { %1817 = vst [vmem:[%s11693_s5 + $0x658] sm:$0xff] %v1816_v11  ;;  %v1818_v12 = vld [vmem:[%s11685_s30 + $0x1980] sm:$0xff] }
  0xde   : > { %v1820_v13 = vld [vmem:[%s11685_s30 + $0x19a0] sm:$0xff]  ;;  %1819 = vst [vmem:[%s11693_s5 + $0x660] sm:$0xff] %v1818_v12 }
  0xdf   : > { %v1822_v14 = vld [vmem:[%s11685_s30 + $0x19c0] sm:$0xff]  ;;  %1821 = vst [vmem:[%s11693_s5 + $0x668] sm:$0xff] %v1820_v13 }
  0xe0   : > { %1823 = vst [vmem:[%s11693_s5 + $0x670] sm:$0xff] %v1822_v14  ;;  %v1824_v15 = vld [vmem:[%s11685_s30 + $0x19e0] sm:$0xff] }
  0xe1   : > { %v1826_v16 = vld [vmem:[%s11685_s30 + $0x1a00] sm:$0xff]  ;;  %1825 = vst [vmem:[%s11693_s5 + $0x678] sm:$0xff] %v1824_v15 }
  0xe2   : > { %v1828_v17 = vld [vmem:[%s11685_s30 + $0x1a20] sm:$0xff]  ;;  %1827 = vst [vmem:[%s11693_s5 + $0x680] sm:$0xff] %v1826_v16 }
  0xe3   : > { %1829 = vst [vmem:[%s11693_s5 + $0x688] sm:$0xff] %v1828_v17  ;;  %v1830_v18 = vld [vmem:[%s11685_s30 + $0x1a40] sm:$0xff] }
  0xe4   : > { %v1832_v19 = vld [vmem:[%s11685_s30 + $0x1a60] sm:$0xff]  ;;  %1831 = vst [vmem:[%s11693_s5 + $0x690] sm:$0xff] %v1830_v18 }
  0xe5   : > { %v1834_v20 = vld [vmem:[%s11685_s30 + $0x1a80] sm:$0xff]  ;;  %1833 = vst [vmem:[%s11693_s5 + $0x698] sm:$0xff] %v1832_v19 }
  0xe6   : > { %1835 = vst [vmem:[%s11693_s5 + $0x6a0] sm:$0xff] %v1834_v20  ;;  %v1836_v21 = vld [vmem:[%s11685_s30 + $0x1aa0] sm:$0xff] }
  0xe7   : > { %v1838_v22 = vld [vmem:[%s11685_s30 + $0x1ac0] sm:$0xff]  ;;  %1837 = vst [vmem:[%s11693_s5 + $0x6a8] sm:$0xff] %v1836_v21 }
  0xe8   : > { %v1840_v23 = vld [vmem:[%s11685_s30 + $0x1ae0] sm:$0xff]  ;;  %1839 = vst [vmem:[%s11693_s5 + $0x6b0] sm:$0xff] %v1838_v22 }
  0xe9   : > { %1841 = vst [vmem:[%s11693_s5 + $0x6b8] sm:$0xff] %v1840_v23  ;;  %v1842_v24 = vld [vmem:[%s11685_s30 + $0x1b00] sm:$0xff] }
  0xea   : > { %v1844_v25 = vld [vmem:[%s11685_s30 + $0x1b20] sm:$0xff]  ;;  %1843 = vst [vmem:[%s11693_s5 + $0x6c0] sm:$0xff] %v1842_v24 }
  0xeb   : > { %v1846_v26 = vld [vmem:[%s11685_s30 + $0x1b40] sm:$0xff]  ;;  %1845 = vst [vmem:[%s11693_s5 + $0x6c8] sm:$0xff] %v1844_v25 }
  0xec   : > { %1847 = vst [vmem:[%s11693_s5 + $0x6d0] sm:$0xff] %v1846_v26  ;;  %v1848_v27 = vld [vmem:[%s11685_s30 + $0x1b60] sm:$0xff] }
  0xed   : > { %v1850_v28 = vld [vmem:[%s11685_s30 + $0x1b80] sm:$0xff]  ;;  %1849 = vst [vmem:[%s11693_s5 + $0x6d8] sm:$0xff] %v1848_v27 }
  0xee   : > { %v1852_v29 = vld [vmem:[%s11685_s30 + $0x1ba0] sm:$0xff]  ;;  %1851 = vst [vmem:[%s11693_s5 + $0x6e0] sm:$0xff] %v1850_v28 }
  0xef   : > { %1853 = vst [vmem:[%s11693_s5 + $0x6e8] sm:$0xff] %v1852_v29  ;;  %v1854_v30 = vld [vmem:[%s11685_s30 + $0x1bc0] sm:$0xff] }
  0xf0   : > { %v1856_v31 = vld [vmem:[%s11685_s30 + $0x1be0] sm:$0xff]  ;;  %1855 = vst [vmem:[%s11693_s5 + $0x6f0] sm:$0xff] %v1854_v30 }
  0xf1   : > { %v1858_v32 = vld [vmem:[%s11685_s30 + $0x1c00] sm:$0xff]  ;;  %1857 = vst [vmem:[%s11693_s5 + $0x6f8] sm:$0xff] %v1856_v31 }
  0xf2   : > { %1859 = vst [vmem:[%s11693_s5 + $0x700] sm:$0xff] %v1858_v32  ;;  %v1860_v33 = vld [vmem:[%s11685_s30 + $0x1c20] sm:$0xff] }
  0xf3   : > { %v1862_v34 = vld [vmem:[%s11685_s30 + $0x1c40] sm:$0xff]  ;;  %1861 = vst [vmem:[%s11693_s5 + $0x708] sm:$0xff] %v1860_v33 }
  0xf4   : > { %v1864_v35 = vld [vmem:[%s11685_s30 + $0x1c60] sm:$0xff]  ;;  %1863 = vst [vmem:[%s11693_s5 + $0x710] sm:$0xff] %v1862_v34 }
  0xf5   : > { %1865 = vst [vmem:[%s11693_s5 + $0x718] sm:$0xff] %v1864_v35  ;;  %v1866_v36 = vld [vmem:[%s11685_s30 + $0x1c80] sm:$0xff] }
  0xf6   : > { %v1868_v37 = vld [vmem:[%s11685_s30 + $0x1ca0] sm:$0xff]  ;;  %1867 = vst [vmem:[%s11693_s5 + $0x720] sm:$0xff] %v1866_v36 }
  0xf7   : > { %v1870_v38 = vld [vmem:[%s11685_s30 + $0x1cc0] sm:$0xff]  ;;  %1869 = vst [vmem:[%s11693_s5 + $0x728] sm:$0xff] %v1868_v37 }
  0xf8   : > { %1871 = vst [vmem:[%s11693_s5 + $0x730] sm:$0xff] %v1870_v38  ;;  %v1872_v39 = vld [vmem:[%s11685_s30 + $0x1ce0] sm:$0xff] }
  0xf9   : > { %v1874_v40 = vld [vmem:[%s11685_s30 + $0x1d00] sm:$0xff]  ;;  %1873 = vst [vmem:[%s11693_s5 + $0x738] sm:$0xff] %v1872_v39 }
  0xfa   : > { %v1876_v41 = vld [vmem:[%s11685_s30 + $0x1d20] sm:$0xff]  ;;  %1875 = vst [vmem:[%s11693_s5 + $0x740] sm:$0xff] %v1874_v40 }
  0xfb   : > { %1877 = vst [vmem:[%s11693_s5 + $0x748] sm:$0xff] %v1876_v41  ;;  %v1878_v42 = vld [vmem:[%s11685_s30 + $0x1d40] sm:$0xff] }
  0xfc   : > { %v1880_v43 = vld [vmem:[%s11685_s30 + $0x1d60] sm:$0xff]  ;;  %1879 = vst [vmem:[%s11693_s5 + $0x750] sm:$0xff] %v1878_v42 }
  0xfd   : > { %v1882_v44 = vld [vmem:[%s11685_s30 + $0x1d80] sm:$0xff]  ;;  %1881 = vst [vmem:[%s11693_s5 + $0x758] sm:$0xff] %v1880_v43 }
  0xfe   : > { %1883 = vst [vmem:[%s11693_s5 + $0x760] sm:$0xff] %v1882_v44  ;;  %v1884_v45 = vld [vmem:[%s11685_s30 + $0x1da0] sm:$0xff] }
  0xff   : > { %v1886_v46 = vld [vmem:[%s11685_s30 + $0x1dc0] sm:$0xff]  ;;  %1885 = vst [vmem:[%s11693_s5 + $0x768] sm:$0xff] %v1884_v45 }
 0x100   : > { %v1888_v47 = vld [vmem:[%s11685_s30 + $0x1de0] sm:$0xff]  ;;  %1887 = vst [vmem:[%s11693_s5 + $0x770] sm:$0xff] %v1886_v46 }
 0x101   : > { %1889 = vst [vmem:[%s11693_s5 + $0x778] sm:$0xff] %v1888_v47  ;;  %v1890_v48 = vld [vmem:[%s11685_s30 + $0x1e00] sm:$0xff] }
 0x102   : > { %v1892_v49 = vld [vmem:[%s11685_s30 + $0x1e20] sm:$0xff]  ;;  %1891 = vst [vmem:[%s11693_s5 + $0x780] sm:$0xff] %v1890_v48 }
 0x103   : > { %v1894_v50 = vld [vmem:[%s11685_s30 + $0x1e40] sm:$0xff]  ;;  %1893 = vst [vmem:[%s11693_s5 + $0x788] sm:$0xff] %v1892_v49 }
 0x104   : > { %1895 = vst [vmem:[%s11693_s5 + $0x790] sm:$0xff] %v1894_v50  ;;  %v1896_v51 = vld [vmem:[%s11685_s30 + $0x1e60] sm:$0xff] }
 0x105   : > { %v1898_v52 = vld [vmem:[%s11685_s30 + $0x1e80] sm:$0xff]  ;;  %1897 = vst [vmem:[%s11693_s5 + $0x798] sm:$0xff] %v1896_v51 }
 0x106   : > { %v1900_v53 = vld [vmem:[%s11685_s30 + $0x1ea0] sm:$0xff]  ;;  %1899 = vst [vmem:[%s11693_s5 + $0x7a0] sm:$0xff] %v1898_v52 }
 0x107   : > { %1901 = vst [vmem:[%s11693_s5 + $0x7a8] sm:$0xff] %v1900_v53  ;;  %v1902_v54 = vld [vmem:[%s11685_s30 + $0x1ec0] sm:$0xff] }
 0x108   : > { %v1904_v55 = vld [vmem:[%s11685_s30 + $0x1ee0] sm:$0xff]  ;;  %1903 = vst [vmem:[%s11693_s5 + $0x7b0] sm:$0xff] %v1902_v54 }
 0x109   : > { %v1906_v56 = vld [vmem:[%s11685_s30 + $0x1f00] sm:$0xff]  ;;  %1905 = vst [vmem:[%s11693_s5 + $0x7b8] sm:$0xff] %v1904_v55 }
 0x10a   : > { %1907 = vst [vmem:[%s11693_s5 + $0x7c0] sm:$0xff] %v1906_v56  ;;  %v1908_v57 = vld [vmem:[%s11685_s30 + $0x1f20] sm:$0xff] }
 0x10b   : > { %v1910_v58 = vld [vmem:[%s11685_s30 + $0x1f40] sm:$0xff]  ;;  %1909 = vst [vmem:[%s11693_s5 + $0x7c8] sm:$0xff] %v1908_v57 }
 0x10c   : > { %v1912_v59 = vld [vmem:[%s11685_s30 + $0x1f60] sm:$0xff]  ;;  %1911 = vst [vmem:[%s11693_s5 + $0x7d0] sm:$0xff] %v1910_v58 }
 0x10d   : > { %1913 = vst [vmem:[%s11693_s5 + $0x7d8] sm:$0xff] %v1912_v59  ;;  %v1914_v60 = vld [vmem:[%s11685_s30 + $0x1f80] sm:$0xff] }
 0x10e   : > { %v1916_v61 = vld [vmem:[%s11685_s30 + $0x1fa0] sm:$0xff]  ;;  %1915 = vst [vmem:[%s11693_s5 + $0x7e0] sm:$0xff] %v1914_v60 }
 0x10f   : > { %v1918_v62 = vld [vmem:[%s11685_s30 + $0x1fc0] sm:$0xff]  ;;  %1917 = vst [vmem:[%s11693_s5 + $0x7e8] sm:$0xff] %v1916_v61 }
 0x110   : > { %1919 = vst [vmem:[%s11693_s5 + $0x7f0] sm:$0xff] %v1918_v62  ;;  %v1920_v63 = vld [vmem:[%s11685_s30 + $0x1fe0] sm:$0xff] }
 0x111   : > { %v1922_v0 = vld [vmem:[%s11685_s30 + $0x2000] sm:$0xff]  ;;  %1921 = vst [vmem:[%s11693_s5 + $0x7f8] sm:$0xff] %v1920_v63 }
 0x112   : > { %v1924_v1 = vld [vmem:[%s11685_s30 + $0x2020] sm:$0xff]  ;;  %1923 = vst [vmem:[%s11693_s5 + $0x800] sm:$0xff] %v1922_v0 }
 0x113   : > { %1925 = vst [vmem:[%s11693_s5 + $0x808] sm:$0xff] %v1924_v1  ;;  %v1926_v2 = vld [vmem:[%s11685_s30 + $0x2040] sm:$0xff] }
 0x114   : > { %v1928_v3 = vld [vmem:[%s11685_s30 + $0x2060] sm:$0xff]  ;;  %1927 = vst [vmem:[%s11693_s5 + $0x810] sm:$0xff] %v1926_v2 }
 0x115   : > { %v1930_v4 = vld [vmem:[%s11685_s30 + $0x2080] sm:$0xff]  ;;  %1929 = vst [vmem:[%s11693_s5 + $0x818] sm:$0xff] %v1928_v3 }
 0x116   : > { %1931 = vst [vmem:[%s11693_s5 + $0x820] sm:$0xff] %v1930_v4  ;;  %v1932_v5 = vld [vmem:[%s11685_s30 + $0x20a0] sm:$0xff] }
 0x117   : > { %v1934_v6 = vld [vmem:[%s11685_s30 + $0x20c0] sm:$0xff]  ;;  %1933 = vst [vmem:[%s11693_s5 + $0x828] sm:$0xff] %v1932_v5 }
 0x118   : > { %v1936_v7 = vld [vmem:[%s11685_s30 + $0x20e0] sm:$0xff]  ;;  %1935 = vst [vmem:[%s11693_s5 + $0x830] sm:$0xff] %v1934_v6 }
 0x119   : > { %1937 = vst [vmem:[%s11693_s5 + $0x838] sm:$0xff] %v1936_v7  ;;  %v1938_v8 = vld [vmem:[%s11685_s30 + $0x2100] sm:$0xff] }
 0x11a   : > { %v1940_v9 = vld [vmem:[%s11685_s30 + $0x2120] sm:$0xff]  ;;  %1939 = vst [vmem:[%s11693_s5 + $0x840] sm:$0xff] %v1938_v8 }
 0x11b   : > { %v1942_v10 = vld [vmem:[%s11685_s30 + $0x2140] sm:$0xff]  ;;  %1941 = vst [vmem:[%s11693_s5 + $0x848] sm:$0xff] %v1940_v9 }
 0x11c   : > { %1943 = vst [vmem:[%s11693_s5 + $0x850] sm:$0xff] %v1942_v10  ;;  %v1944_v11 = vld [vmem:[%s11685_s30 + $0x2160] sm:$0xff] }
 0x11d   : > { %v1946_v12 = vld [vmem:[%s11685_s30 + $0x2180] sm:$0xff]  ;;  %1945 = vst [vmem:[%s11693_s5 + $0x858] sm:$0xff] %v1944_v11 }
 0x11e   : > { %v1948_v13 = vld [vmem:[%s11685_s30 + $0x21a0] sm:$0xff]  ;;  %1947 = vst [vmem:[%s11693_s5 + $0x860] sm:$0xff] %v1946_v12 }
 0x11f   : > { %1949 = vst [vmem:[%s11693_s5 + $0x868] sm:$0xff] %v1948_v13  ;;  %v1950_v14 = vld [vmem:[%s11685_s30 + $0x21c0] sm:$0xff] }
 0x120   : > { %v1952_v15 = vld [vmem:[%s11685_s30 + $0x21e0] sm:$0xff]  ;;  %1951 = vst [vmem:[%s11693_s5 + $0x870] sm:$0xff] %v1950_v14 }
 0x121   : > { %v1954_v16 = vld [vmem:[%s11685_s30 + $0x2200] sm:$0xff]  ;;  %1953 = vst [vmem:[%s11693_s5 + $0x878] sm:$0xff] %v1952_v15 }
 0x122   : > { %1955 = vst [vmem:[%s11693_s5 + $0x880] sm:$0xff] %v1954_v16  ;;  %v1956_v17 = vld [vmem:[%s11685_s30 + $0x2220] sm:$0xff] }
 0x123   : > { %v1958_v18 = vld [vmem:[%s11685_s30 + $0x2240] sm:$0xff]  ;;  %1957 = vst [vmem:[%s11693_s5 + $0x888] sm:$0xff] %v1956_v17 }
 0x124   : > { %v1960_v19 = vld [vmem:[%s11685_s30 + $0x2260] sm:$0xff]  ;;  %1959 = vst [vmem:[%s11693_s5 + $0x890] sm:$0xff] %v1958_v18 }
 0x125   : > { %1961 = vst [vmem:[%s11693_s5 + $0x898] sm:$0xff] %v1960_v19  ;;  %v1962_v20 = vld [vmem:[%s11685_s30 + $0x2280] sm:$0xff] }
 0x126   : > { %v1964_v21 = vld [vmem:[%s11685_s30 + $0x22a0] sm:$0xff]  ;;  %1963 = vst [vmem:[%s11693_s5 + $0x8a0] sm:$0xff] %v1962_v20 }
 0x127   : > { %v1966_v22 = vld [vmem:[%s11685_s30 + $0x22c0] sm:$0xff]  ;;  %1965 = vst [vmem:[%s11693_s5 + $0x8a8] sm:$0xff] %v1964_v21 }
 0x128   : > { %1967 = vst [vmem:[%s11693_s5 + $0x8b0] sm:$0xff] %v1966_v22  ;;  %v1968_v23 = vld [vmem:[%s11685_s30 + $0x22e0] sm:$0xff] }
 0x129   : > { %v1970_v24 = vld [vmem:[%s11685_s30 + $0x2300] sm:$0xff]  ;;  %1969 = vst [vmem:[%s11693_s5 + $0x8b8] sm:$0xff] %v1968_v23 }
 0x12a   : > { %v1972_v25 = vld [vmem:[%s11685_s30 + $0x2320] sm:$0xff]  ;;  %1971 = vst [vmem:[%s11693_s5 + $0x8c0] sm:$0xff] %v1970_v24 }
 0x12b   : > { %1973 = vst [vmem:[%s11693_s5 + $0x8c8] sm:$0xff] %v1972_v25  ;;  %v1974_v26 = vld [vmem:[%s11685_s30 + $0x2340] sm:$0xff] }
 0x12c   : > { %v1976_v27 = vld [vmem:[%s11685_s30 + $0x2360] sm:$0xff]  ;;  %1975 = vst [vmem:[%s11693_s5 + $0x8d0] sm:$0xff] %v1974_v26 }
 0x12d   : > { %v1978_v28 = vld [vmem:[%s11685_s30 + $0x2380] sm:$0xff]  ;;  %1977 = vst [vmem:[%s11693_s5 + $0x8d8] sm:$0xff] %v1976_v27 }
 0x12e   : > { %1979 = vst [vmem:[%s11693_s5 + $0x8e0] sm:$0xff] %v1978_v28  ;;  %v1980_v29 = vld [vmem:[%s11685_s30 + $0x23a0] sm:$0xff] }
 0x12f   : > { %v1982_v30 = vld [vmem:[%s11685_s30 + $0x23c0] sm:$0xff]  ;;  %1981 = vst [vmem:[%s11693_s5 + $0x8e8] sm:$0xff] %v1980_v29 }
 0x130   : > { %v1984_v31 = vld [vmem:[%s11685_s30 + $0x23e0] sm:$0xff]  ;;  %1983 = vst [vmem:[%s11693_s5 + $0x8f0] sm:$0xff] %v1982_v30 }
 0x131   : > { %1985 = vst [vmem:[%s11693_s5 + $0x8f8] sm:$0xff] %v1984_v31  ;;  %v1986_v32 = vld [vmem:[%s11685_s30 + $0x2400] sm:$0xff] }
 0x132   : > { %v1988_v33 = vld [vmem:[%s11685_s30 + $0x2420] sm:$0xff]  ;;  %1987 = vst [vmem:[%s11693_s5 + $0x900] sm:$0xff] %v1986_v32 }
 0x133   : > { %v1990_v34 = vld [vmem:[%s11685_s30 + $0x2440] sm:$0xff]  ;;  %1989 = vst [vmem:[%s11693_s5 + $0x908] sm:$0xff] %v1988_v33 }
 0x134   : > { %1991 = vst [vmem:[%s11693_s5 + $0x910] sm:$0xff] %v1990_v34  ;;  %v1992_v35 = vld [vmem:[%s11685_s30 + $0x2460] sm:$0xff] }
 0x135   : > { %v1994_v36 = vld [vmem:[%s11685_s30 + $0x2480] sm:$0xff]  ;;  %1993 = vst [vmem:[%s11693_s5 + $0x918] sm:$0xff] %v1992_v35 }
 0x136   : > { %v1996_v37 = vld [vmem:[%s11685_s30 + $0x24a0] sm:$0xff]  ;;  %1995 = vst [vmem:[%s11693_s5 + $0x920] sm:$0xff] %v1994_v36 }
 0x137   : > { %1997 = vst [vmem:[%s11693_s5 + $0x928] sm:$0xff] %v1996_v37  ;;  %v1998_v38 = vld [vmem:[%s11685_s30 + $0x24c0] sm:$0xff] }
 0x138   : > { %v2000_v39 = vld [vmem:[%s11685_s30 + $0x24e0] sm:$0xff]  ;;  %1999 = vst [vmem:[%s11693_s5 + $0x930] sm:$0xff] %v1998_v38 }
 0x139   : > { %v2002_v40 = vld [vmem:[%s11685_s30 + $0x2500] sm:$0xff]  ;;  %2001 = vst [vmem:[%s11693_s5 + $0x938] sm:$0xff] %v2000_v39 }
 0x13a   : > { %2003 = vst [vmem:[%s11693_s5 + $0x940] sm:$0xff] %v2002_v40  ;;  %v2004_v41 = vld [vmem:[%s11685_s30 + $0x2520] sm:$0xff] }
 0x13b   : > { %v2006_v42 = vld [vmem:[%s11685_s30 + $0x2540] sm:$0xff]  ;;  %2005 = vst [vmem:[%s11693_s5 + $0x948] sm:$0xff] %v2004_v41 }
 0x13c   : > { %v2008_v43 = vld [vmem:[%s11685_s30 + $0x2560] sm:$0xff]  ;;  %2007 = vst [vmem:[%s11693_s5 + $0x950] sm:$0xff] %v2006_v42 }
 0x13d   : > { %2009 = vst [vmem:[%s11693_s5 + $0x958] sm:$0xff] %v2008_v43  ;;  %v2010_v44 = vld [vmem:[%s11685_s30 + $0x2580] sm:$0xff] }
 0x13e   : > { %v2012_v45 = vld [vmem:[%s11685_s30 + $0x25a0] sm:$0xff]  ;;  %2011 = vst [vmem:[%s11693_s5 + $0x960] sm:$0xff] %v2010_v44 }
 0x13f   : > { %v2014_v46 = vld [vmem:[%s11685_s30 + $0x25c0] sm:$0xff]  ;;  %2013 = vst [vmem:[%s11693_s5 + $0x968] sm:$0xff] %v2012_v45 }
 0x140   : > { %2015 = vst [vmem:[%s11693_s5 + $0x970] sm:$0xff] %v2014_v46  ;;  %v2016_v47 = vld [vmem:[%s11685_s30 + $0x25e0] sm:$0xff] }
 0x141   : > { %v2018_v48 = vld [vmem:[%s11685_s30 + $0x2600] sm:$0xff]  ;;  %2017 = vst [vmem:[%s11693_s5 + $0x978] sm:$0xff] %v2016_v47 }
 0x142   : > { %v2020_v49 = vld [vmem:[%s11685_s30 + $0x2620] sm:$0xff]  ;;  %2019 = vst [vmem:[%s11693_s5 + $0x980] sm:$0xff] %v2018_v48 }
 0x143   : > { %2021 = vst [vmem:[%s11693_s5 + $0x988] sm:$0xff] %v2020_v49  ;;  %v2022_v50 = vld [vmem:[%s11685_s30 + $0x2640] sm:$0xff] }
 0x144   : > { %v2024_v51 = vld [vmem:[%s11685_s30 + $0x2660] sm:$0xff]  ;;  %2023 = vst [vmem:[%s11693_s5 + $0x990] sm:$0xff] %v2022_v50 }
 0x145   : > { %v2026_v52 = vld [vmem:[%s11685_s30 + $0x2680] sm:$0xff]  ;;  %2025 = vst [vmem:[%s11693_s5 + $0x998] sm:$0xff] %v2024_v51 }
 0x146   : > { %2027 = vst [vmem:[%s11693_s5 + $0x9a0] sm:$0xff] %v2026_v52  ;;  %v2028_v53 = vld [vmem:[%s11685_s30 + $0x26a0] sm:$0xff] }
 0x147   : > { %v2030_v54 = vld [vmem:[%s11685_s30 + $0x26c0] sm:$0xff]  ;;  %2029 = vst [vmem:[%s11693_s5 + $0x9a8] sm:$0xff] %v2028_v53 }
 0x148   : > { %v2032_v55 = vld [vmem:[%s11685_s30 + $0x26e0] sm:$0xff]  ;;  %2031 = vst [vmem:[%s11693_s5 + $0x9b0] sm:$0xff] %v2030_v54 }
 0x149   : > { %2033 = vst [vmem:[%s11693_s5 + $0x9b8] sm:$0xff] %v2032_v55  ;;  %v2034_v56 = vld [vmem:[%s11685_s30 + $0x2700] sm:$0xff] }
 0x14a   : > { %v2036_v57 = vld [vmem:[%s11685_s30 + $0x2720] sm:$0xff]  ;;  %2035 = vst [vmem:[%s11693_s5 + $0x9c0] sm:$0xff] %v2034_v56 }
 0x14b   : > { %v2038_v58 = vld [vmem:[%s11685_s30 + $0x2740] sm:$0xff]  ;;  %2037 = vst [vmem:[%s11693_s5 + $0x9c8] sm:$0xff] %v2036_v57 }
 0x14c   : > { %2039 = vst [vmem:[%s11693_s5 + $0x9d0] sm:$0xff] %v2038_v58  ;;  %v2040_v59 = vld [vmem:[%s11685_s30 + $0x2760] sm:$0xff] }
 0x14d   : > { %v2042_v60 = vld [vmem:[%s11685_s30 + $0x2780] sm:$0xff]  ;;  %2041 = vst [vmem:[%s11693_s5 + $0x9d8] sm:$0xff] %v2040_v59 }
 0x14e   : > { %v2044_v61 = vld [vmem:[%s11685_s30 + $0x27a0] sm:$0xff]  ;;  %2043 = vst [vmem:[%s11693_s5 + $0x9e0] sm:$0xff] %v2042_v60 }
 0x14f   : > { %2045 = vst [vmem:[%s11693_s5 + $0x9e8] sm:$0xff] %v2044_v61  ;;  %v2046_v62 = vld [vmem:[%s11685_s30 + $0x27c0] sm:$0xff] }
 0x150   : > { %v2048_v63 = vld [vmem:[%s11685_s30 + $0x27e0] sm:$0xff]  ;;  %2047 = vst [vmem:[%s11693_s5 + $0x9f0] sm:$0xff] %v2046_v62 }
 0x151   : > { %v2050_v0 = vld [vmem:[%s11685_s30 + $0x2800] sm:$0xff]  ;;  %2049 = vst [vmem:[%s11693_s5 + $0x9f8] sm:$0xff] %v2048_v63 }
 0x152   : > { %2051 = vst [vmem:[%s11693_s5 + $0xa00] sm:$0xff] %v2050_v0  ;;  %v2052_v1 = vld [vmem:[%s11685_s30 + $0x2820] sm:$0xff] }
 0x153   : > { %v2054_v2 = vld [vmem:[%s11685_s30 + $0x2840] sm:$0xff]  ;;  %2053 = vst [vmem:[%s11693_s5 + $0xa08] sm:$0xff] %v2052_v1 }
 0x154   : > { %v2056_v3 = vld [vmem:[%s11685_s30 + $0x2860] sm:$0xff]  ;;  %2055 = vst [vmem:[%s11693_s5 + $0xa10] sm:$0xff] %v2054_v2 }
 0x155   : > { %2057 = vst [vmem:[%s11693_s5 + $0xa18] sm:$0xff] %v2056_v3  ;;  %v2058_v4 = vld [vmem:[%s11685_s30 + $0x2880] sm:$0xff] }
 0x156   : > { %v2060_v5 = vld [vmem:[%s11685_s30 + $0x28a0] sm:$0xff]  ;;  %2059 = vst [vmem:[%s11693_s5 + $0xa20] sm:$0xff] %v2058_v4 }
 0x157   : > { %v2062_v6 = vld [vmem:[%s11685_s30 + $0x28c0] sm:$0xff]  ;;  %2061 = vst [vmem:[%s11693_s5 + $0xa28] sm:$0xff] %v2060_v5 }
 0x158   : > { %2063 = vst [vmem:[%s11693_s5 + $0xa30] sm:$0xff] %v2062_v6  ;;  %v2064_v7 = vld [vmem:[%s11685_s30 + $0x28e0] sm:$0xff] }
 0x159   : > { %v2066_v8 = vld [vmem:[%s11685_s30 + $0x2900] sm:$0xff]  ;;  %2065 = vst [vmem:[%s11693_s5 + $0xa38] sm:$0xff] %v2064_v7 }
 0x15a   : > { %v2068_v9 = vld [vmem:[%s11685_s30 + $0x2920] sm:$0xff]  ;;  %2067 = vst [vmem:[%s11693_s5 + $0xa40] sm:$0xff] %v2066_v8 }
 0x15b   : > { %2069 = vst [vmem:[%s11693_s5 + $0xa48] sm:$0xff] %v2068_v9  ;;  %v2070_v10 = vld [vmem:[%s11685_s30 + $0x2940] sm:$0xff] }
 0x15c   : > { %v2072_v11 = vld [vmem:[%s11685_s30 + $0x2960] sm:$0xff]  ;;  %2071 = vst [vmem:[%s11693_s5 + $0xa50] sm:$0xff] %v2070_v10 }
 0x15d   : > { %v2074_v12 = vld [vmem:[%s11685_s30 + $0x2980] sm:$0xff]  ;;  %2073 = vst [vmem:[%s11693_s5 + $0xa58] sm:$0xff] %v2072_v11 }
 0x15e   : > { %2075 = vst [vmem:[%s11693_s5 + $0xa60] sm:$0xff] %v2074_v12  ;;  %v2076_v13 = vld [vmem:[%s11685_s30 + $0x29a0] sm:$0xff] }
 0x15f   : > { %v2078_v14 = vld [vmem:[%s11685_s30 + $0x29c0] sm:$0xff]  ;;  %2077 = vst [vmem:[%s11693_s5 + $0xa68] sm:$0xff] %v2076_v13 }
 0x160   : > { %v2080_v15 = vld [vmem:[%s11685_s30 + $0x29e0] sm:$0xff]  ;;  %2079 = vst [vmem:[%s11693_s5 + $0xa70] sm:$0xff] %v2078_v14 }
 0x161   : > { %2081 = vst [vmem:[%s11693_s5 + $0xa78] sm:$0xff] %v2080_v15  ;;  %v2082_v16 = vld [vmem:[%s11685_s30 + $0x2a00] sm:$0xff] }
 0x162   : > { %v2084_v17 = vld [vmem:[%s11685_s30 + $0x2a20] sm:$0xff]  ;;  %2083 = vst [vmem:[%s11693_s5 + $0xa80] sm:$0xff] %v2082_v16 }
 0x163   : > { %v2086_v18 = vld [vmem:[%s11685_s30 + $0x2a40] sm:$0xff]  ;;  %2085 = vst [vmem:[%s11693_s5 + $0xa88] sm:$0xff] %v2084_v17 }
 0x164   : > { %2087 = vst [vmem:[%s11693_s5 + $0xa90] sm:$0xff] %v2086_v18  ;;  %v2088_v19 = vld [vmem:[%s11685_s30 + $0x2a60] sm:$0xff] }
 0x165   : > { %v2090_v20 = vld [vmem:[%s11685_s30 + $0x2a80] sm:$0xff]  ;;  %2089 = vst [vmem:[%s11693_s5 + $0xa98] sm:$0xff] %v2088_v19 }
 0x166   : > { %v2092_v21 = vld [vmem:[%s11685_s30 + $0x2aa0] sm:$0xff]  ;;  %2091 = vst [vmem:[%s11693_s5 + $0xaa0] sm:$0xff] %v2090_v20 }
 0x167   : > { %2093 = vst [vmem:[%s11693_s5 + $0xaa8] sm:$0xff] %v2092_v21  ;;  %v2094_v22 = vld [vmem:[%s11685_s30 + $0x2ac0] sm:$0xff] }
 0x168   : > { %v2096_v23 = vld [vmem:[%s11685_s30 + $0x2ae0] sm:$0xff]  ;;  %2095 = vst [vmem:[%s11693_s5 + $0xab0] sm:$0xff] %v2094_v22 }
 0x169   : > { %v2098_v24 = vld [vmem:[%s11685_s30 + $0x2b00] sm:$0xff]  ;;  %2097 = vst [vmem:[%s11693_s5 + $0xab8] sm:$0xff] %v2096_v23 }
 0x16a   : > { %2099 = vst [vmem:[%s11693_s5 + $0xac0] sm:$0xff] %v2098_v24  ;;  %v2100_v25 = vld [vmem:[%s11685_s30 + $0x2b20] sm:$0xff] }
 0x16b   : > { %v2102_v26 = vld [vmem:[%s11685_s30 + $0x2b40] sm:$0xff]  ;;  %2101 = vst [vmem:[%s11693_s5 + $0xac8] sm:$0xff] %v2100_v25 }
 0x16c   : > { %v2104_v27 = vld [vmem:[%s11685_s30 + $0x2b60] sm:$0xff]  ;;  %2103 = vst [vmem:[%s11693_s5 + $0xad0] sm:$0xff] %v2102_v26 }
 0x16d   : > { %2105 = vst [vmem:[%s11693_s5 + $0xad8] sm:$0xff] %v2104_v27  ;;  %v2106_v28 = vld [vmem:[%s11685_s30 + $0x2b80] sm:$0xff] }
 0x16e   : > { %v2108_v29 = vld [vmem:[%s11685_s30 + $0x2ba0] sm:$0xff]  ;;  %2107 = vst [vmem:[%s11693_s5 + $0xae0] sm:$0xff] %v2106_v28 }
 0x16f   : > { %v2110_v30 = vld [vmem:[%s11685_s30 + $0x2bc0] sm:$0xff]  ;;  %2109 = vst [vmem:[%s11693_s5 + $0xae8] sm:$0xff] %v2108_v29 }
 0x170   : > { %2111 = vst [vmem:[%s11693_s5 + $0xaf0] sm:$0xff] %v2110_v30  ;;  %v2112_v31 = vld [vmem:[%s11685_s30 + $0x2be0] sm:$0xff] }
 0x171   : > { %v2114_v32 = vld [vmem:[%s11685_s30 + $0x2c00] sm:$0xff]  ;;  %2113 = vst [vmem:[%s11693_s5 + $0xaf8] sm:$0xff] %v2112_v31 }
 0x172   : > { %v2116_v33 = vld [vmem:[%s11685_s30 + $0x2c20] sm:$0xff]  ;;  %2115 = vst [vmem:[%s11693_s5 + $0xb00] sm:$0xff] %v2114_v32 }
 0x173   : > { %2117 = vst [vmem:[%s11693_s5 + $0xb08] sm:$0xff] %v2116_v33  ;;  %v2118_v34 = vld [vmem:[%s11685_s30 + $0x2c40] sm:$0xff] }
 0x174   : > { %v2120_v35 = vld [vmem:[%s11685_s30 + $0x2c60] sm:$0xff]  ;;  %2119 = vst [vmem:[%s11693_s5 + $0xb10] sm:$0xff] %v2118_v34 }
 0x175   : > { %v2122_v36 = vld [vmem:[%s11685_s30 + $0x2c80] sm:$0xff]  ;;  %2121 = vst [vmem:[%s11693_s5 + $0xb18] sm:$0xff] %v2120_v35 }
 0x176   : > { %2123 = vst [vmem:[%s11693_s5 + $0xb20] sm:$0xff] %v2122_v36  ;;  %v2124_v37 = vld [vmem:[%s11685_s30 + $0x2ca0] sm:$0xff] }
 0x177   : > { %v2126_v38 = vld [vmem:[%s11685_s30 + $0x2cc0] sm:$0xff]  ;;  %2125 = vst [vmem:[%s11693_s5 + $0xb28] sm:$0xff] %v2124_v37 }
 0x178   : > { %v2128_v39 = vld [vmem:[%s11685_s30 + $0x2ce0] sm:$0xff]  ;;  %2127 = vst [vmem:[%s11693_s5 + $0xb30] sm:$0xff] %v2126_v38 }
 0x179   : > { %2129 = vst [vmem:[%s11693_s5 + $0xb38] sm:$0xff] %v2128_v39  ;;  %v2130_v40 = vld [vmem:[%s11685_s30 + $0x2d00] sm:$0xff] }
 0x17a   : > { %v2132_v41 = vld [vmem:[%s11685_s30 + $0x2d20] sm:$0xff]  ;;  %2131 = vst [vmem:[%s11693_s5 + $0xb40] sm:$0xff] %v2130_v40 }
 0x17b   : > { %v2134_v42 = vld [vmem:[%s11685_s30 + $0x2d40] sm:$0xff]  ;;  %2133 = vst [vmem:[%s11693_s5 + $0xb48] sm:$0xff] %v2132_v41 }
 0x17c   : > { %2135 = vst [vmem:[%s11693_s5 + $0xb50] sm:$0xff] %v2134_v42  ;;  %v2136_v43 = vld [vmem:[%s11685_s30 + $0x2d60] sm:$0xff] }
 0x17d   : > { %v2138_v44 = vld [vmem:[%s11685_s30 + $0x2d80] sm:$0xff]  ;;  %2137 = vst [vmem:[%s11693_s5 + $0xb58] sm:$0xff] %v2136_v43 }
 0x17e   : > { %v2140_v45 = vld [vmem:[%s11685_s30 + $0x2da0] sm:$0xff]  ;;  %2139 = vst [vmem:[%s11693_s5 + $0xb60] sm:$0xff] %v2138_v44 }
 0x17f   : > { %2141 = vst [vmem:[%s11693_s5 + $0xb68] sm:$0xff] %v2140_v45  ;;  %v2142_v46 = vld [vmem:[%s11685_s30 + $0x2dc0] sm:$0xff] }
 0x180   : > { %v2144_v47 = vld [vmem:[%s11685_s30 + $0x2de0] sm:$0xff]  ;;  %2143 = vst [vmem:[%s11693_s5 + $0xb70] sm:$0xff] %v2142_v46 }
 0x181   : > { %v2146_v48 = vld [vmem:[%s11685_s30 + $0x2e00] sm:$0xff]  ;;  %2145 = vst [vmem:[%s11693_s5 + $0xb78] sm:$0xff] %v2144_v47 }
 0x182   : > { %2147 = vst [vmem:[%s11693_s5 + $0xb80] sm:$0xff] %v2146_v48  ;;  %v2148_v49 = vld [vmem:[%s11685_s30 + $0x2e20] sm:$0xff] }
 0x183   : > { %v2150_v50 = vld [vmem:[%s11685_s30 + $0x2e40] sm:$0xff]  ;;  %2149 = vst [vmem:[%s11693_s5 + $0xb88] sm:$0xff] %v2148_v49 }
 0x184   : > { %v2152_v51 = vld [vmem:[%s11685_s30 + $0x2e60] sm:$0xff]  ;;  %2151 = vst [vmem:[%s11693_s5 + $0xb90] sm:$0xff] %v2150_v50 }
 0x185   : > { %2153 = vst [vmem:[%s11693_s5 + $0xb98] sm:$0xff] %v2152_v51  ;;  %v2154_v52 = vld [vmem:[%s11685_s30 + $0x2e80] sm:$0xff] }
 0x186   : > { %v2156_v53 = vld [vmem:[%s11685_s30 + $0x2ea0] sm:$0xff]  ;;  %2155 = vst [vmem:[%s11693_s5 + $0xba0] sm:$0xff] %v2154_v52 }
 0x187   : > { %v2158_v54 = vld [vmem:[%s11685_s30 + $0x2ec0] sm:$0xff]  ;;  %2157 = vst [vmem:[%s11693_s5 + $0xba8] sm:$0xff] %v2156_v53 }
 0x188   : > { %2159 = vst [vmem:[%s11693_s5 + $0xbb0] sm:$0xff] %v2158_v54  ;;  %v2160_v55 = vld [vmem:[%s11685_s30 + $0x2ee0] sm:$0xff] }
 0x189   : > { %v2162_v56 = vld [vmem:[%s11685_s30 + $0x2f00] sm:$0xff]  ;;  %2161 = vst [vmem:[%s11693_s5 + $0xbb8] sm:$0xff] %v2160_v55 }
 0x18a   : > { %v2164_v57 = vld [vmem:[%s11685_s30 + $0x2f20] sm:$0xff]  ;;  %2163 = vst [vmem:[%s11693_s5 + $0xbc0] sm:$0xff] %v2162_v56 }
 0x18b   : > { %2165 = vst [vmem:[%s11693_s5 + $0xbc8] sm:$0xff] %v2164_v57  ;;  %v2166_v58 = vld [vmem:[%s11685_s30 + $0x2f40] sm:$0xff] }
 0x18c   : > { %v2168_v59 = vld [vmem:[%s11685_s30 + $0x2f60] sm:$0xff]  ;;  %2167 = vst [vmem:[%s11693_s5 + $0xbd0] sm:$0xff] %v2166_v58 }
 0x18d   : > { %v2170_v60 = vld [vmem:[%s11685_s30 + $0x2f80] sm:$0xff]  ;;  %2169 = vst [vmem:[%s11693_s5 + $0xbd8] sm:$0xff] %v2168_v59 }
 0x18e   : > { %2171 = vst [vmem:[%s11693_s5 + $0xbe0] sm:$0xff] %v2170_v60  ;;  %v2172_v61 = vld [vmem:[%s11685_s30 + $0x2fa0] sm:$0xff] }
 0x18f   : > { %v2174_v62 = vld [vmem:[%s11685_s30 + $0x2fc0] sm:$0xff]  ;;  %2173 = vst [vmem:[%s11693_s5 + $0xbe8] sm:$0xff] %v2172_v61 }
 0x190   : > { %v2176_v63 = vld [vmem:[%s11685_s30 + $0x2fe0] sm:$0xff]  ;;  %2175 = vst [vmem:[%s11693_s5 + $0xbf0] sm:$0xff] %v2174_v62 }
 0x191   : > { %2177 = vst [vmem:[%s11693_s5 + $0xbf8] sm:$0xff] %v2176_v63  ;;  %v2178_v0 = vld [vmem:[%s11685_s30 + $0x3000] sm:$0xff] }
 0x192   : > { %v2180_v1 = vld [vmem:[%s11685_s30 + $0x3020] sm:$0xff]  ;;  %2179 = vst [vmem:[%s11693_s5 + $0xc00] sm:$0xff] %v2178_v0 }
 0x193   : > { %v2182_v2 = vld [vmem:[%s11685_s30 + $0x3040] sm:$0xff]  ;;  %2181 = vst [vmem:[%s11693_s5 + $0xc08] sm:$0xff] %v2180_v1 }
 0x194   : > { %2183 = vst [vmem:[%s11693_s5 + $0xc10] sm:$0xff] %v2182_v2  ;;  %v2184_v3 = vld [vmem:[%s11685_s30 + $0x3060] sm:$0xff] }
 0x195   : > { %v2186_v4 = vld [vmem:[%s11685_s30 + $0x3080] sm:$0xff]  ;;  %2185 = vst [vmem:[%s11693_s5 + $0xc18] sm:$0xff] %v2184_v3 }
 0x196   : > { %v2188_v5 = vld [vmem:[%s11685_s30 + $0x30a0] sm:$0xff]  ;;  %2187 = vst [vmem:[%s11693_s5 + $0xc20] sm:$0xff] %v2186_v4 }
 0x197   : > { %2189 = vst [vmem:[%s11693_s5 + $0xc28] sm:$0xff] %v2188_v5  ;;  %v2190_v6 = vld [vmem:[%s11685_s30 + $0x30c0] sm:$0xff] }
 0x198   : > { %v2192_v7 = vld [vmem:[%s11685_s30 + $0x30e0] sm:$0xff]  ;;  %2191 = vst [vmem:[%s11693_s5 + $0xc30] sm:$0xff] %v2190_v6 }
 0x199   : > { %v2194_v8 = vld [vmem:[%s11685_s30 + $0x3100] sm:$0xff]  ;;  %2193 = vst [vmem:[%s11693_s5 + $0xc38] sm:$0xff] %v2192_v7 }
 0x19a   : > { %2195 = vst [vmem:[%s11693_s5 + $0xc40] sm:$0xff] %v2194_v8  ;;  %v2196_v9 = vld [vmem:[%s11685_s30 + $0x3120] sm:$0xff] }
 0x19b   : > { %v2198_v10 = vld [vmem:[%s11685_s30 + $0x3140] sm:$0xff]  ;;  %2197 = vst [vmem:[%s11693_s5 + $0xc48] sm:$0xff] %v2196_v9 }
 0x19c   : > { %v2200_v11 = vld [vmem:[%s11685_s30 + $0x3160] sm:$0xff]  ;;  %2199 = vst [vmem:[%s11693_s5 + $0xc50] sm:$0xff] %v2198_v10 }
 0x19d   : > { %2201 = vst [vmem:[%s11693_s5 + $0xc58] sm:$0xff] %v2200_v11  ;;  %v2202_v12 = vld [vmem:[%s11685_s30 + $0x3180] sm:$0xff] }
 0x19e   : > { %v2204_v13 = vld [vmem:[%s11685_s30 + $0x31a0] sm:$0xff]  ;;  %2203 = vst [vmem:[%s11693_s5 + $0xc60] sm:$0xff] %v2202_v12 }
 0x19f   : > { %v2206_v14 = vld [vmem:[%s11685_s30 + $0x31c0] sm:$0xff]  ;;  %2205 = vst [vmem:[%s11693_s5 + $0xc68] sm:$0xff] %v2204_v13 }
 0x1a0   : > { %2207 = vst [vmem:[%s11693_s5 + $0xc70] sm:$0xff] %v2206_v14  ;;  %v2208_v15 = vld [vmem:[%s11685_s30 + $0x31e0] sm:$0xff] }
 0x1a1   : > { %v2210_v16 = vld [vmem:[%s11685_s30 + $0x3200] sm:$0xff]  ;;  %2209 = vst [vmem:[%s11693_s5 + $0xc78] sm:$0xff] %v2208_v15 }
 0x1a2   : > { %v2212_v17 = vld [vmem:[%s11685_s30 + $0x3220] sm:$0xff]  ;;  %2211 = vst [vmem:[%s11693_s5 + $0xc80] sm:$0xff] %v2210_v16 }
 0x1a3   : > { %2213 = vst [vmem:[%s11693_s5 + $0xc88] sm:$0xff] %v2212_v17  ;;  %v2214_v18 = vld [vmem:[%s11685_s30 + $0x3240] sm:$0xff] }
 0x1a4   : > { %v2216_v19 = vld [vmem:[%s11685_s30 + $0x3260] sm:$0xff]  ;;  %2215 = vst [vmem:[%s11693_s5 + $0xc90] sm:$0xff] %v2214_v18 }
 0x1a5   : > { %v2218_v20 = vld [vmem:[%s11685_s30 + $0x3280] sm:$0xff]  ;;  %2217 = vst [vmem:[%s11693_s5 + $0xc98] sm:$0xff] %v2216_v19 }
 0x1a6   : > { %2219 = vst [vmem:[%s11693_s5 + $0xca0] sm:$0xff] %v2218_v20  ;;  %v2220_v21 = vld [vmem:[%s11685_s30 + $0x32a0] sm:$0xff] }
 0x1a7   : > { %v2222_v22 = vld [vmem:[%s11685_s30 + $0x32c0] sm:$0xff]  ;;  %2221 = vst [vmem:[%s11693_s5 + $0xca8] sm:$0xff] %v2220_v21 }
 0x1a8   : > { %v2224_v23 = vld [vmem:[%s11685_s30 + $0x32e0] sm:$0xff]  ;;  %2223 = vst [vmem:[%s11693_s5 + $0xcb0] sm:$0xff] %v2222_v22 }
 0x1a9   : > { %2225 = vst [vmem:[%s11693_s5 + $0xcb8] sm:$0xff] %v2224_v23  ;;  %v2226_v24 = vld [vmem:[%s11685_s30 + $0x3300] sm:$0xff] }
 0x1aa   : > { %v2228_v25 = vld [vmem:[%s11685_s30 + $0x3320] sm:$0xff]  ;;  %2227 = vst [vmem:[%s11693_s5 + $0xcc0] sm:$0xff] %v2226_v24 }
 0x1ab   : > { %v2230_v26 = vld [vmem:[%s11685_s30 + $0x3340] sm:$0xff]  ;;  %2229 = vst [vmem:[%s11693_s5 + $0xcc8] sm:$0xff] %v2228_v25 }
 0x1ac   : > { %2231 = vst [vmem:[%s11693_s5 + $0xcd0] sm:$0xff] %v2230_v26  ;;  %v2232_v27 = vld [vmem:[%s11685_s30 + $0x3360] sm:$0xff] }
 0x1ad   : > { %v2234_v28 = vld [vmem:[%s11685_s30 + $0x3380] sm:$0xff]  ;;  %2233 = vst [vmem:[%s11693_s5 + $0xcd8] sm:$0xff] %v2232_v27 }
 0x1ae   : > { %v2236_v29 = vld [vmem:[%s11685_s30 + $0x33a0] sm:$0xff]  ;;  %2235 = vst [vmem:[%s11693_s5 + $0xce0] sm:$0xff] %v2234_v28 }
 0x1af   : > { %2237 = vst [vmem:[%s11693_s5 + $0xce8] sm:$0xff] %v2236_v29  ;;  %v2238_v30 = vld [vmem:[%s11685_s30 + $0x33c0] sm:$0xff] }
 0x1b0   : > { %v2240_v31 = vld [vmem:[%s11685_s30 + $0x33e0] sm:$0xff]  ;;  %2239 = vst [vmem:[%s11693_s5 + $0xcf0] sm:$0xff] %v2238_v30 }
 0x1b1   : > { %v2242_v32 = vld [vmem:[%s11685_s30 + $0x3400] sm:$0xff]  ;;  %2241 = vst [vmem:[%s11693_s5 + $0xcf8] sm:$0xff] %v2240_v31 }
 0x1b2   : > { %2243 = vst [vmem:[%s11693_s5 + $0xd00] sm:$0xff] %v2242_v32  ;;  %v2244_v33 = vld [vmem:[%s11685_s30 + $0x3420] sm:$0xff] }
 0x1b3   : > { %v2246_v34 = vld [vmem:[%s11685_s30 + $0x3440] sm:$0xff]  ;;  %2245 = vst [vmem:[%s11693_s5 + $0xd08] sm:$0xff] %v2244_v33 }
 0x1b4   : > { %v2248_v35 = vld [vmem:[%s11685_s30 + $0x3460] sm:$0xff]  ;;  %2247 = vst [vmem:[%s11693_s5 + $0xd10] sm:$0xff] %v2246_v34 }
 0x1b5   : > { %2249 = vst [vmem:[%s11693_s5 + $0xd18] sm:$0xff] %v2248_v35  ;;  %v2250_v36 = vld [vmem:[%s11685_s30 + $0x3480] sm:$0xff] }
 0x1b6   : > { %v2252_v37 = vld [vmem:[%s11685_s30 + $0x34a0] sm:$0xff]  ;;  %2251 = vst [vmem:[%s11693_s5 + $0xd20] sm:$0xff] %v2250_v36 }
 0x1b7   : > { %v2254_v38 = vld [vmem:[%s11685_s30 + $0x34c0] sm:$0xff]  ;;  %2253 = vst [vmem:[%s11693_s5 + $0xd28] sm:$0xff] %v2252_v37 }
 0x1b8   : > { %2255 = vst [vmem:[%s11693_s5 + $0xd30] sm:$0xff] %v2254_v38  ;;  %v2256_v39 = vld [vmem:[%s11685_s30 + $0x34e0] sm:$0xff] }
 0x1b9   : > { %v2258_v40 = vld [vmem:[%s11685_s30 + $0x3500] sm:$0xff]  ;;  %2257 = vst [vmem:[%s11693_s5 + $0xd38] sm:$0xff] %v2256_v39 }
 0x1ba   : > { %v2260_v41 = vld [vmem:[%s11685_s30 + $0x3520] sm:$0xff]  ;;  %2259 = vst [vmem:[%s11693_s5 + $0xd40] sm:$0xff] %v2258_v40 }
 0x1bb   : > { %2261 = vst [vmem:[%s11693_s5 + $0xd48] sm:$0xff] %v2260_v41  ;;  %v2262_v42 = vld [vmem:[%s11685_s30 + $0x3540] sm:$0xff] }
 0x1bc   : > { %v2264_v43 = vld [vmem:[%s11685_s30 + $0x3560] sm:$0xff]  ;;  %2263 = vst [vmem:[%s11693_s5 + $0xd50] sm:$0xff] %v2262_v42 }
 0x1bd   : > { %v2266_v44 = vld [vmem:[%s11685_s30 + $0x3580] sm:$0xff]  ;;  %2265 = vst [vmem:[%s11693_s5 + $0xd58] sm:$0xff] %v2264_v43 }
 0x1be   : > { %2267 = vst [vmem:[%s11693_s5 + $0xd60] sm:$0xff] %v2266_v44  ;;  %v2268_v45 = vld [vmem:[%s11685_s30 + $0x35a0] sm:$0xff] }
 0x1bf   : > { %v2270_v46 = vld [vmem:[%s11685_s30 + $0x35c0] sm:$0xff]  ;;  %2269 = vst [vmem:[%s11693_s5 + $0xd68] sm:$0xff] %v2268_v45 }
 0x1c0   : > { %v2272_v47 = vld [vmem:[%s11685_s30 + $0x35e0] sm:$0xff]  ;;  %2271 = vst [vmem:[%s11693_s5 + $0xd70] sm:$0xff] %v2270_v46 }
 0x1c1   : > { %2273 = vst [vmem:[%s11693_s5 + $0xd78] sm:$0xff] %v2272_v47  ;;  %v2274_v48 = vld [vmem:[%s11685_s30 + $0x3600] sm:$0xff] }
 0x1c2   : > { %v2276_v49 = vld [vmem:[%s11685_s30 + $0x3620] sm:$0xff]  ;;  %2275 = vst [vmem:[%s11693_s5 + $0xd80] sm:$0xff] %v2274_v48 }
 0x1c3   : > { %v2278_v50 = vld [vmem:[%s11685_s30 + $0x3640] sm:$0xff]  ;;  %2277 = vst [vmem:[%s11693_s5 + $0xd88] sm:$0xff] %v2276_v49 }
 0x1c4   : > { %2279 = vst [vmem:[%s11693_s5 + $0xd90] sm:$0xff] %v2278_v50  ;;  %v2280_v51 = vld [vmem:[%s11685_s30 + $0x3660] sm:$0xff] }
 0x1c5   : > { %v2282_v52 = vld [vmem:[%s11685_s30 + $0x3680] sm:$0xff]  ;;  %2281 = vst [vmem:[%s11693_s5 + $0xd98] sm:$0xff] %v2280_v51 }
 0x1c6   : > { %v2284_v53 = vld [vmem:[%s11685_s30 + $0x36a0] sm:$0xff]  ;;  %2283 = vst [vmem:[%s11693_s5 + $0xda0] sm:$0xff] %v2282_v52 }
 0x1c7   : > { %2285 = vst [vmem:[%s11693_s5 + $0xda8] sm:$0xff] %v2284_v53  ;;  %v2286_v54 = vld [vmem:[%s11685_s30 + $0x36c0] sm:$0xff] }
 0x1c8   : > { %v2288_v55 = vld [vmem:[%s11685_s30 + $0x36e0] sm:$0xff]  ;;  %2287 = vst [vmem:[%s11693_s5 + $0xdb0] sm:$0xff] %v2286_v54 }
 0x1c9   : > { %v2290_v56 = vld [vmem:[%s11685_s30 + $0x3700] sm:$0xff]  ;;  %2289 = vst [vmem:[%s11693_s5 + $0xdb8] sm:$0xff] %v2288_v55 }
 0x1ca   : > { %2291 = vst [vmem:[%s11693_s5 + $0xdc0] sm:$0xff] %v2290_v56  ;;  %v2292_v57 = vld [vmem:[%s11685_s30 + $0x3720] sm:$0xff] }
 0x1cb   : > { %v2294_v58 = vld [vmem:[%s11685_s30 + $0x3740] sm:$0xff]  ;;  %2293 = vst [vmem:[%s11693_s5 + $0xdc8] sm:$0xff] %v2292_v57 }
 0x1cc   : > { %v2296_v59 = vld [vmem:[%s11685_s30 + $0x3760] sm:$0xff]  ;;  %2295 = vst [vmem:[%s11693_s5 + $0xdd0] sm:$0xff] %v2294_v58 }
 0x1cd   : > { %2297 = vst [vmem:[%s11693_s5 + $0xdd8] sm:$0xff] %v2296_v59  ;;  %v2298_v60 = vld [vmem:[%s11685_s30 + $0x3780] sm:$0xff] }
 0x1ce   : > { %v2300_v61 = vld [vmem:[%s11685_s30 + $0x37a0] sm:$0xff]  ;;  %2299 = vst [vmem:[%s11693_s5 + $0xde0] sm:$0xff] %v2298_v60 }
 0x1cf   : > { %v2302_v62 = vld [vmem:[%s11685_s30 + $0x37c0] sm:$0xff]  ;;  %2301 = vst [vmem:[%s11693_s5 + $0xde8] sm:$0xff] %v2300_v61 }
 0x1d0   : > { %2303 = vst [vmem:[%s11693_s5 + $0xdf0] sm:$0xff] %v2302_v62  ;;  %v2304_v63 = vld [vmem:[%s11685_s30 + $0x37e0] sm:$0xff] }
 0x1d1   : > { %v2306_v0 = vld [vmem:[%s11685_s30 + $0x3800] sm:$0xff]  ;;  %2305 = vst [vmem:[%s11693_s5 + $0xdf8] sm:$0xff] %v2304_v63 }
 0x1d2   : > { %v2308_v1 = vld [vmem:[%s11685_s30 + $0x3820] sm:$0xff]  ;;  %2307 = vst [vmem:[%s11693_s5 + $0xe00] sm:$0xff] %v2306_v0 }
 0x1d3   : > { %2309 = vst [vmem:[%s11693_s5 + $0xe08] sm:$0xff] %v2308_v1  ;;  %v2310_v2 = vld [vmem:[%s11685_s30 + $0x3840] sm:$0xff] }
 0x1d4   : > { %v2312_v3 = vld [vmem:[%s11685_s30 + $0x3860] sm:$0xff]  ;;  %2311 = vst [vmem:[%s11693_s5 + $0xe10] sm:$0xff] %v2310_v2 }
 0x1d5   : > { %v2314_v4 = vld [vmem:[%s11685_s30 + $0x3880] sm:$0xff]  ;;  %2313 = vst [vmem:[%s11693_s5 + $0xe18] sm:$0xff] %v2312_v3 }
 0x1d6   : > { %2315 = vst [vmem:[%s11693_s5 + $0xe20] sm:$0xff] %v2314_v4  ;;  %v2316_v5 = vld [vmem:[%s11685_s30 + $0x38a0] sm:$0xff] }
 0x1d7   : > { %v2318_v6 = vld [vmem:[%s11685_s30 + $0x38c0] sm:$0xff]  ;;  %2317 = vst [vmem:[%s11693_s5 + $0xe28] sm:$0xff] %v2316_v5 }
 0x1d8   : > { %v2320_v7 = vld [vmem:[%s11685_s30 + $0x38e0] sm:$0xff]  ;;  %2319 = vst [vmem:[%s11693_s5 + $0xe30] sm:$0xff] %v2318_v6 }
 0x1d9   : > { %2321 = vst [vmem:[%s11693_s5 + $0xe38] sm:$0xff] %v2320_v7  ;;  %v2322_v8 = vld [vmem:[%s11685_s30 + $0x3900] sm:$0xff] }
 0x1da   : > { %v2324_v9 = vld [vmem:[%s11685_s30 + $0x3920] sm:$0xff]  ;;  %2323 = vst [vmem:[%s11693_s5 + $0xe40] sm:$0xff] %v2322_v8 }
 0x1db   : > { %v2326_v10 = vld [vmem:[%s11685_s30 + $0x3940] sm:$0xff]  ;;  %2325 = vst [vmem:[%s11693_s5 + $0xe48] sm:$0xff] %v2324_v9 }
 0x1dc   : > { %2327 = vst [vmem:[%s11693_s5 + $0xe50] sm:$0xff] %v2326_v10  ;;  %v2328_v11 = vld [vmem:[%s11685_s30 + $0x3960] sm:$0xff] }
 0x1dd   : > { %v2330_v12 = vld [vmem:[%s11685_s30 + $0x3980] sm:$0xff]  ;;  %2329 = vst [vmem:[%s11693_s5 + $0xe58] sm:$0xff] %v2328_v11 }
 0x1de   : > { %v2332_v13 = vld [vmem:[%s11685_s30 + $0x39a0] sm:$0xff]  ;;  %2331 = vst [vmem:[%s11693_s5 + $0xe60] sm:$0xff] %v2330_v12 }
 0x1df   : > { %2333 = vst [vmem:[%s11693_s5 + $0xe68] sm:$0xff] %v2332_v13  ;;  %v2334_v14 = vld [vmem:[%s11685_s30 + $0x39c0] sm:$0xff] }
 0x1e0   : > { %v2336_v15 = vld [vmem:[%s11685_s30 + $0x39e0] sm:$0xff]  ;;  %2335 = vst [vmem:[%s11693_s5 + $0xe70] sm:$0xff] %v2334_v14 }
 0x1e1   : > { %v2338_v16 = vld [vmem:[%s11685_s30 + $0x3a00] sm:$0xff]  ;;  %2337 = vst [vmem:[%s11693_s5 + $0xe78] sm:$0xff] %v2336_v15 }
 0x1e2   : > { %2339 = vst [vmem:[%s11693_s5 + $0xe80] sm:$0xff] %v2338_v16  ;;  %v2340_v17 = vld [vmem:[%s11685_s30 + $0x3a20] sm:$0xff] }
 0x1e3   : > { %v2342_v18 = vld [vmem:[%s11685_s30 + $0x3a40] sm:$0xff]  ;;  %2341 = vst [vmem:[%s11693_s5 + $0xe88] sm:$0xff] %v2340_v17 }
 0x1e4   : > { %v2344_v19 = vld [vmem:[%s11685_s30 + $0x3a60] sm:$0xff]  ;;  %2343 = vst [vmem:[%s11693_s5 + $0xe90] sm:$0xff] %v2342_v18 }
 0x1e5   : > { %2345 = vst [vmem:[%s11693_s5 + $0xe98] sm:$0xff] %v2344_v19  ;;  %v2346_v20 = vld [vmem:[%s11685_s30 + $0x3a80] sm:$0xff] }
 0x1e6   : > { %v2348_v21 = vld [vmem:[%s11685_s30 + $0x3aa0] sm:$0xff]  ;;  %2347 = vst [vmem:[%s11693_s5 + $0xea0] sm:$0xff] %v2346_v20 }
 0x1e7   : > { %v2350_v22 = vld [vmem:[%s11685_s30 + $0x3ac0] sm:$0xff]  ;;  %2349 = vst [vmem:[%s11693_s5 + $0xea8] sm:$0xff] %v2348_v21 }
 0x1e8   : > { %2351 = vst [vmem:[%s11693_s5 + $0xeb0] sm:$0xff] %v2350_v22  ;;  %v2352_v23 = vld [vmem:[%s11685_s30 + $0x3ae0] sm:$0xff] }
 0x1e9   : > { %v2354_v24 = vld [vmem:[%s11685_s30 + $0x3b00] sm:$0xff]  ;;  %2353 = vst [vmem:[%s11693_s5 + $0xeb8] sm:$0xff] %v2352_v23 }
 0x1ea   : > { %v2356_v25 = vld [vmem:[%s11685_s30 + $0x3b20] sm:$0xff]  ;;  %2355 = vst [vmem:[%s11693_s5 + $0xec0] sm:$0xff] %v2354_v24 }
 0x1eb   : > { %2357 = vst [vmem:[%s11693_s5 + $0xec8] sm:$0xff] %v2356_v25  ;;  %v2358_v26 = vld [vmem:[%s11685_s30 + $0x3b40] sm:$0xff] }
 0x1ec   : > { %v2360_v27 = vld [vmem:[%s11685_s30 + $0x3b60] sm:$0xff]  ;;  %2359 = vst [vmem:[%s11693_s5 + $0xed0] sm:$0xff] %v2358_v26 }
 0x1ed   : > { %v2362_v28 = vld [vmem:[%s11685_s30 + $0x3b80] sm:$0xff]  ;;  %2361 = vst [vmem:[%s11693_s5 + $0xed8] sm:$0xff] %v2360_v27 }
 0x1ee   : > { %2363 = vst [vmem:[%s11693_s5 + $0xee0] sm:$0xff] %v2362_v28  ;;  %v2364_v29 = vld [vmem:[%s11685_s30 + $0x3ba0] sm:$0xff] }
 0x1ef   : > { %v2366_v30 = vld [vmem:[%s11685_s30 + $0x3bc0] sm:$0xff]  ;;  %2365 = vst [vmem:[%s11693_s5 + $0xee8] sm:$0xff] %v2364_v29 }
 0x1f0   : > { %v2368_v31 = vld [vmem:[%s11685_s30 + $0x3be0] sm:$0xff]  ;;  %2367 = vst [vmem:[%s11693_s5 + $0xef0] sm:$0xff] %v2366_v30 }
 0x1f1   : > { %2369 = vst [vmem:[%s11693_s5 + $0xef8] sm:$0xff] %v2368_v31  ;;  %v2370_v32 = vld [vmem:[%s11685_s30 + $0x3c00] sm:$0xff] }
 0x1f2   : > { %v2372_v33 = vld [vmem:[%s11685_s30 + $0x3c20] sm:$0xff]  ;;  %2371 = vst [vmem:[%s11693_s5 + $0xf00] sm:$0xff] %v2370_v32 }
 0x1f3   : > { %v2374_v34 = vld [vmem:[%s11685_s30 + $0x3c40] sm:$0xff]  ;;  %2373 = vst [vmem:[%s11693_s5 + $0xf08] sm:$0xff] %v2372_v33 }
 0x1f4   : > { %2375 = vst [vmem:[%s11693_s5 + $0xf10] sm:$0xff] %v2374_v34  ;;  %v2376_v35 = vld [vmem:[%s11685_s30 + $0x3c60] sm:$0xff] }
 0x1f5   : > { %v2378_v36 = vld [vmem:[%s11685_s30 + $0x3c80] sm:$0xff]  ;;  %2377 = vst [vmem:[%s11693_s5 + $0xf18] sm:$0xff] %v2376_v35 }
 0x1f6   : > { %v2380_v37 = vld [vmem:[%s11685_s30 + $0x3ca0] sm:$0xff]  ;;  %2379 = vst [vmem:[%s11693_s5 + $0xf20] sm:$0xff] %v2378_v36 }
 0x1f7   : > { %2381 = vst [vmem:[%s11693_s5 + $0xf28] sm:$0xff] %v2380_v37  ;;  %v2382_v38 = vld [vmem:[%s11685_s30 + $0x3cc0] sm:$0xff] }
 0x1f8   : > { %v2384_v39 = vld [vmem:[%s11685_s30 + $0x3ce0] sm:$0xff]  ;;  %2383 = vst [vmem:[%s11693_s5 + $0xf30] sm:$0xff] %v2382_v38 }
 0x1f9   : > { %v2386_v40 = vld [vmem:[%s11685_s30 + $0x3d00] sm:$0xff]  ;;  %2385 = vst [vmem:[%s11693_s5 + $0xf38] sm:$0xff] %v2384_v39 }
 0x1fa   : > { %2387 = vst [vmem:[%s11693_s5 + $0xf40] sm:$0xff] %v2386_v40  ;;  %v2388_v41 = vld [vmem:[%s11685_s30 + $0x3d20] sm:$0xff] }
 0x1fb   : > { %v2390_v42 = vld [vmem:[%s11685_s30 + $0x3d40] sm:$0xff]  ;;  %2389 = vst [vmem:[%s11693_s5 + $0xf48] sm:$0xff] %v2388_v41 }
 0x1fc   : > { %v2392_v43 = vld [vmem:[%s11685_s30 + $0x3d60] sm:$0xff]  ;;  %2391 = vst [vmem:[%s11693_s5 + $0xf50] sm:$0xff] %v2390_v42 }
 0x1fd   : > { %2393 = vst [vmem:[%s11693_s5 + $0xf58] sm:$0xff] %v2392_v43  ;;  %v2394_v44 = vld [vmem:[%s11685_s30 + $0x3d80] sm:$0xff] }
 0x1fe   : > { %v2396_v45 = vld [vmem:[%s11685_s30 + $0x3da0] sm:$0xff]  ;;  %2395 = vst [vmem:[%s11693_s5 + $0xf60] sm:$0xff] %v2394_v44 }
 0x1ff   : > { %v2398_v46 = vld [vmem:[%s11685_s30 + $0x3dc0] sm:$0xff]  ;;  %2397 = vst [vmem:[%s11693_s5 + $0xf68] sm:$0xff] %v2396_v45 }
 0x200   : > { %2399 = vst [vmem:[%s11693_s5 + $0xf70] sm:$0xff] %v2398_v46  ;;  %v2400_v47 = vld [vmem:[%s11685_s30 + $0x3de0] sm:$0xff] }
 0x201   : > { %v2402_v48 = vld [vmem:[%s11685_s30 + $0x3e00] sm:$0xff]  ;;  %2401 = vst [vmem:[%s11693_s5 + $0xf78] sm:$0xff] %v2400_v47 }
 0x202   : > { %v2404_v49 = vld [vmem:[%s11685_s30 + $0x3e20] sm:$0xff]  ;;  %2403 = vst [vmem:[%s11693_s5 + $0xf80] sm:$0xff] %v2402_v48 }
 0x203   : > { %2405 = vst [vmem:[%s11693_s5 + $0xf88] sm:$0xff] %v2404_v49  ;;  %v2406_v50 = vld [vmem:[%s11685_s30 + $0x3e40] sm:$0xff] }
 0x204   : > { %v2408_v51 = vld [vmem:[%s11685_s30 + $0x3e60] sm:$0xff]  ;;  %2407 = vst [vmem:[%s11693_s5 + $0xf90] sm:$0xff] %v2406_v50 }
 0x205   : > { %v2410_v52 = vld [vmem:[%s11685_s30 + $0x3e80] sm:$0xff]  ;;  %2409 = vst [vmem:[%s11693_s5 + $0xf98] sm:$0xff] %v2408_v51 }
 0x206   : > { %2411 = vst [vmem:[%s11693_s5 + $0xfa0] sm:$0xff] %v2410_v52  ;;  %v2412_v53 = vld [vmem:[%s11685_s30 + $0x3ea0] sm:$0xff] }
 0x207   : > { %v2414_v54 = vld [vmem:[%s11685_s30 + $0x3ec0] sm:$0xff]  ;;  %2413 = vst [vmem:[%s11693_s5 + $0xfa8] sm:$0xff] %v2412_v53 }
 0x208   : > { %v2416_v55 = vld [vmem:[%s11685_s30 + $0x3ee0] sm:$0xff]  ;;  %2415 = vst [vmem:[%s11693_s5 + $0xfb0] sm:$0xff] %v2414_v54 }
 0x209   : > { %2417 = vst [vmem:[%s11693_s5 + $0xfb8] sm:$0xff] %v2416_v55  ;;  %v2418_v56 = vld [vmem:[%s11685_s30 + $0x3f00] sm:$0xff] }
 0x20a   : > { %v2420_v57 = vld [vmem:[%s11685_s30 + $0x3f20] sm:$0xff]  ;;  %2419 = vst [vmem:[%s11693_s5 + $0xfc0] sm:$0xff] %v2418_v56 }
 0x20b   : > { %v2422_v58 = vld [vmem:[%s11685_s30 + $0x3f40] sm:$0xff]  ;;  %2421 = vst [vmem:[%s11693_s5 + $0xfc8] sm:$0xff] %v2420_v57 }
 0x20c   : > { %2423 = vst [vmem:[%s11693_s5 + $0xfd0] sm:$0xff] %v2422_v58  ;;  %v2424_v59 = vld [vmem:[%s11685_s30 + $0x3f60] sm:$0xff] }
 0x20d   : > { %v2426_v60 = vld [vmem:[%s11685_s30 + $0x3f80] sm:$0xff]  ;;  %2425 = vst [vmem:[%s11693_s5 + $0xfd8] sm:$0xff] %v2424_v59 }
 0x20e   : > { %v2428_v61 = vld [vmem:[%s11685_s30 + $0x3fa0] sm:$0xff]  ;;  %2427 = vst [vmem:[%s11693_s5 + $0xfe0] sm:$0xff] %v2426_v60 }
 0x20f   : > { %2429 = vst [vmem:[%s11693_s5 + $0xfe8] sm:$0xff] %v2428_v61  ;;  %v2430_v62 = vld [vmem:[%s11685_s30 + $0x3fc0] sm:$0xff] }
 0x210   : > { %v2432_v63 = vld [vmem:[%s11685_s30 + $0x3fe0] sm:$0xff]  ;;  %2431 = vst [vmem:[%s11693_s5 + $0xff0] sm:$0xff] %v2430_v62 }
 0x211   : > { %v2434_v0 = vld [vmem:[%s11685_s30 + $0x4000] sm:$0xff]  ;;  %2433 = vst [vmem:[%s11693_s5 + $0xff8] sm:$0xff] %v2432_v63 }
 0x212   : > { %2435 = vst [vmem:[%s11693_s5 + $0x1000] sm:$0xff] %v2434_v0  ;;  %v2436_v1 = vld [vmem:[%s11685_s30 + $0x4020] sm:$0xff] }
 0x213   : > { %v2438_v2 = vld [vmem:[%s11685_s30 + $0x4040] sm:$0xff]  ;;  %2437 = vst [vmem:[%s11693_s5 + $0x1008] sm:$0xff] %v2436_v1 }
 0x214   : > { %v2440_v3 = vld [vmem:[%s11685_s30 + $0x4060] sm:$0xff]  ;;  %2439 = vst [vmem:[%s11693_s5 + $0x1010] sm:$0xff] %v2438_v2 }
 0x215   : > { %2441 = vst [vmem:[%s11693_s5 + $0x1018] sm:$0xff] %v2440_v3  ;;  %v2442_v4 = vld [vmem:[%s11685_s30 + $0x4080] sm:$0xff] }
 0x216   : > { %v2444_v5 = vld [vmem:[%s11685_s30 + $0x40a0] sm:$0xff]  ;;  %2443 = vst [vmem:[%s11693_s5 + $0x1020] sm:$0xff] %v2442_v4 }
 0x217   : > { %v2446_v6 = vld [vmem:[%s11685_s30 + $0x40c0] sm:$0xff]  ;;  %2445 = vst [vmem:[%s11693_s5 + $0x1028] sm:$0xff] %v2444_v5 }
 0x218   : > { %2447 = vst [vmem:[%s11693_s5 + $0x1030] sm:$0xff] %v2446_v6  ;;  %v2448_v7 = vld [vmem:[%s11685_s30 + $0x40e0] sm:$0xff] }
 0x219   : > { %v2450_v8 = vld [vmem:[%s11685_s30 + $0x4100] sm:$0xff]  ;;  %2449 = vst [vmem:[%s11693_s5 + $0x1038] sm:$0xff] %v2448_v7 }
 0x21a   : > { %v2452_v9 = vld [vmem:[%s11685_s30 + $0x4120] sm:$0xff]  ;;  %2451 = vst [vmem:[%s11693_s5 + $0x1040] sm:$0xff] %v2450_v8 }
 0x21b   : > { %2453 = vst [vmem:[%s11693_s5 + $0x1048] sm:$0xff] %v2452_v9  ;;  %v2454_v10 = vld [vmem:[%s11685_s30 + $0x4140] sm:$0xff] }
 0x21c   : > { %v2456_v11 = vld [vmem:[%s11685_s30 + $0x4160] sm:$0xff]  ;;  %2455 = vst [vmem:[%s11693_s5 + $0x1050] sm:$0xff] %v2454_v10 }
 0x21d   : > { %v2458_v12 = vld [vmem:[%s11685_s30 + $0x4180] sm:$0xff]  ;;  %2457 = vst [vmem:[%s11693_s5 + $0x1058] sm:$0xff] %v2456_v11 }
 0x21e   : > { %2459 = vst [vmem:[%s11693_s5 + $0x1060] sm:$0xff] %v2458_v12  ;;  %v2460_v13 = vld [vmem:[%s11685_s30 + $0x41a0] sm:$0xff] }
 0x21f   : > { %v2462_v14 = vld [vmem:[%s11685_s30 + $0x41c0] sm:$0xff]  ;;  %2461 = vst [vmem:[%s11693_s5 + $0x1068] sm:$0xff] %v2460_v13 }
 0x220   : > { %v2464_v15 = vld [vmem:[%s11685_s30 + $0x41e0] sm:$0xff]  ;;  %2463 = vst [vmem:[%s11693_s5 + $0x1070] sm:$0xff] %v2462_v14 }
 0x221   : > { %2465 = vst [vmem:[%s11693_s5 + $0x1078] sm:$0xff] %v2464_v15  ;;  %v2466_v16 = vld [vmem:[%s11685_s30 + $0x4200] sm:$0xff] }
 0x222   : > { %v2468_v17 = vld [vmem:[%s11685_s30 + $0x4220] sm:$0xff]  ;;  %2467 = vst [vmem:[%s11693_s5 + $0x1080] sm:$0xff] %v2466_v16 }
 0x223   : > { %v2470_v18 = vld [vmem:[%s11685_s30 + $0x4240] sm:$0xff]  ;;  %2469 = vst [vmem:[%s11693_s5 + $0x1088] sm:$0xff] %v2468_v17 }
 0x224   : > { %2471 = vst [vmem:[%s11693_s5 + $0x1090] sm:$0xff] %v2470_v18  ;;  %v2472_v19 = vld [vmem:[%s11685_s30 + $0x4260] sm:$0xff] }
 0x225   : > { %v2474_v20 = vld [vmem:[%s11685_s30 + $0x4280] sm:$0xff]  ;;  %2473 = vst [vmem:[%s11693_s5 + $0x1098] sm:$0xff] %v2472_v19 }
 0x226   : > { %v2476_v21 = vld [vmem:[%s11685_s30 + $0x42a0] sm:$0xff]  ;;  %2475 = vst [vmem:[%s11693_s5 + $0x10a0] sm:$0xff] %v2474_v20 }
 0x227   : > { %2477 = vst [vmem:[%s11693_s5 + $0x10a8] sm:$0xff] %v2476_v21  ;;  %v2478_v22 = vld [vmem:[%s11685_s30 + $0x42c0] sm:$0xff] }
 0x228   : > { %v2480_v23 = vld [vmem:[%s11685_s30 + $0x42e0] sm:$0xff]  ;;  %2479 = vst [vmem:[%s11693_s5 + $0x10b0] sm:$0xff] %v2478_v22 }
 0x229   : > { %v2482_v24 = vld [vmem:[%s11685_s30 + $0x4300] sm:$0xff]  ;;  %2481 = vst [vmem:[%s11693_s5 + $0x10b8] sm:$0xff] %v2480_v23 }
 0x22a   : > { %2483 = vst [vmem:[%s11693_s5 + $0x10c0] sm:$0xff] %v2482_v24  ;;  %v2484_v25 = vld [vmem:[%s11685_s30 + $0x4320] sm:$0xff] }
 0x22b   : > { %v2486_v26 = vld [vmem:[%s11685_s30 + $0x4340] sm:$0xff]  ;;  %2485 = vst [vmem:[%s11693_s5 + $0x10c8] sm:$0xff] %v2484_v25 }
 0x22c   : > { %v2488_v27 = vld [vmem:[%s11685_s30 + $0x4360] sm:$0xff]  ;;  %2487 = vst [vmem:[%s11693_s5 + $0x10d0] sm:$0xff] %v2486_v26 }
 0x22d   : > { %2489 = vst [vmem:[%s11693_s5 + $0x10d8] sm:$0xff] %v2488_v27  ;;  %v2490_v28 = vld [vmem:[%s11685_s30 + $0x4380] sm:$0xff] }
 0x22e   : > { %v2492_v29 = vld [vmem:[%s11685_s30 + $0x43a0] sm:$0xff]  ;;  %2491 = vst [vmem:[%s11693_s5 + $0x10e0] sm:$0xff] %v2490_v28 }
 0x22f   : > { %v2494_v30 = vld [vmem:[%s11685_s30 + $0x43c0] sm:$0xff]  ;;  %2493 = vst [vmem:[%s11693_s5 + $0x10e8] sm:$0xff] %v2492_v29 }
 0x230   : > { %2495 = vst [vmem:[%s11693_s5 + $0x10f0] sm:$0xff] %v2494_v30  ;;  %v2496_v31 = vld [vmem:[%s11685_s30 + $0x43e0] sm:$0xff] }
 0x231   : > { %v2498_v32 = vld [vmem:[%s11685_s30 + $0x4400] sm:$0xff]  ;;  %2497 = vst [vmem:[%s11693_s5 + $0x10f8] sm:$0xff] %v2496_v31 }
 0x232   : > { %v2500_v33 = vld [vmem:[%s11685_s30 + $0x4420] sm:$0xff]  ;;  %2499 = vst [vmem:[%s11693_s5 + $0x1100] sm:$0xff] %v2498_v32 }
 0x233   : > { %2501 = vst [vmem:[%s11693_s5 + $0x1108] sm:$0xff] %v2500_v33  ;;  %v2502_v34 = vld [vmem:[%s11685_s30 + $0x4440] sm:$0xff] }
 0x234   : > { %v2504_v35 = vld [vmem:[%s11685_s30 + $0x4460] sm:$0xff]  ;;  %2503 = vst [vmem:[%s11693_s5 + $0x1110] sm:$0xff] %v2502_v34 }
 0x235   : > { %v2506_v36 = vld [vmem:[%s11685_s30 + $0x4480] sm:$0xff]  ;;  %2505 = vst [vmem:[%s11693_s5 + $0x1118] sm:$0xff] %v2504_v35 }
 0x236   : > { %2507 = vst [vmem:[%s11693_s5 + $0x1120] sm:$0xff] %v2506_v36  ;;  %v2508_v37 = vld [vmem:[%s11685_s30 + $0x44a0] sm:$0xff] }
 0x237   : > { %v2510_v38 = vld [vmem:[%s11685_s30 + $0x44c0] sm:$0xff]  ;;  %2509 = vst [vmem:[%s11693_s5 + $0x1128] sm:$0xff] %v2508_v37 }
 0x238   : > { %v2512_v39 = vld [vmem:[%s11685_s30 + $0x44e0] sm:$0xff]  ;;  %2511 = vst [vmem:[%s11693_s5 + $0x1130] sm:$0xff] %v2510_v38 }
 0x239   : > { %2513 = vst [vmem:[%s11693_s5 + $0x1138] sm:$0xff] %v2512_v39  ;;  %v2514_v40 = vld [vmem:[%s11685_s30 + $0x4500] sm:$0xff] }
 0x23a   : > { %v2516_v41 = vld [vmem:[%s11685_s30 + $0x4520] sm:$0xff]  ;;  %2515 = vst [vmem:[%s11693_s5 + $0x1140] sm:$0xff] %v2514_v40 }
 0x23b   : > { %v2518_v42 = vld [vmem:[%s11685_s30 + $0x4540] sm:$0xff]  ;;  %2517 = vst [vmem:[%s11693_s5 + $0x1148] sm:$0xff] %v2516_v41 }
 0x23c   : > { %2519 = vst [vmem:[%s11693_s5 + $0x1150] sm:$0xff] %v2518_v42  ;;  %v2520_v43 = vld [vmem:[%s11685_s30 + $0x4560] sm:$0xff] }
 0x23d   : > { %v2522_v44 = vld [vmem:[%s11685_s30 + $0x4580] sm:$0xff]  ;;  %2521 = vst [vmem:[%s11693_s5 + $0x1158] sm:$0xff] %v2520_v43 }
 0x23e   : > { %v2524_v45 = vld [vmem:[%s11685_s30 + $0x45a0] sm:$0xff]  ;;  %2523 = vst [vmem:[%s11693_s5 + $0x1160] sm:$0xff] %v2522_v44 }
 0x23f   : > { %2525 = vst [vmem:[%s11693_s5 + $0x1168] sm:$0xff] %v2524_v45  ;;  %v2526_v46 = vld [vmem:[%s11685_s30 + $0x45c0] sm:$0xff] }
 0x240   : > { %v2528_v47 = vld [vmem:[%s11685_s30 + $0x45e0] sm:$0xff]  ;;  %2527 = vst [vmem:[%s11693_s5 + $0x1170] sm:$0xff] %v2526_v46 }
 0x241   : > { %v2530_v48 = vld [vmem:[%s11685_s30 + $0x4600] sm:$0xff]  ;;  %2529 = vst [vmem:[%s11693_s5 + $0x1178] sm:$0xff] %v2528_v47 }
 0x242   : > { %2531 = vst [vmem:[%s11693_s5 + $0x1180] sm:$0xff] %v2530_v48  ;;  %v2532_v49 = vld [vmem:[%s11685_s30 + $0x4620] sm:$0xff] }
 0x243   : > { %v2534_v50 = vld [vmem:[%s11685_s30 + $0x4640] sm:$0xff]  ;;  %2533 = vst [vmem:[%s11693_s5 + $0x1188] sm:$0xff] %v2532_v49 }
 0x244   : > { %v2536_v51 = vld [vmem:[%s11685_s30 + $0x4660] sm:$0xff]  ;;  %2535 = vst [vmem:[%s11693_s5 + $0x1190] sm:$0xff] %v2534_v50 }
 0x245   : > { %2537 = vst [vmem:[%s11693_s5 + $0x1198] sm:$0xff] %v2536_v51  ;;  %v2538_v52 = vld [vmem:[%s11685_s30 + $0x4680] sm:$0xff] }
 0x246   : > { %v2540_v53 = vld [vmem:[%s11685_s30 + $0x46a0] sm:$0xff]  ;;  %2539 = vst [vmem:[%s11693_s5 + $0x11a0] sm:$0xff] %v2538_v52 }
 0x247   : > { %v2542_v54 = vld [vmem:[%s11685_s30 + $0x46c0] sm:$0xff]  ;;  %2541 = vst [vmem:[%s11693_s5 + $0x11a8] sm:$0xff] %v2540_v53 }
 0x248   : > { %2543 = vst [vmem:[%s11693_s5 + $0x11b0] sm:$0xff] %v2542_v54  ;;  %v2544_v55 = vld [vmem:[%s11685_s30 + $0x46e0] sm:$0xff] }
 0x249   : > { %v2546_v56 = vld [vmem:[%s11685_s30 + $0x4700] sm:$0xff]  ;;  %2545 = vst [vmem:[%s11693_s5 + $0x11b8] sm:$0xff] %v2544_v55 }
 0x24a   : > { %v2548_v57 = vld [vmem:[%s11685_s30 + $0x4720] sm:$0xff]  ;;  %2547 = vst [vmem:[%s11693_s5 + $0x11c0] sm:$0xff] %v2546_v56 }
 0x24b   : > { %2549 = vst [vmem:[%s11693_s5 + $0x11c8] sm:$0xff] %v2548_v57  ;;  %v2550_v58 = vld [vmem:[%s11685_s30 + $0x4740] sm:$0xff] }
 0x24c   : > { %v2552_v59 = vld [vmem:[%s11685_s30 + $0x4760] sm:$0xff]  ;;  %2551 = vst [vmem:[%s11693_s5 + $0x11d0] sm:$0xff] %v2550_v58 }
 0x24d   : > { %v2554_v60 = vld [vmem:[%s11685_s30 + $0x4780] sm:$0xff]  ;;  %2553 = vst [vmem:[%s11693_s5 + $0x11d8] sm:$0xff] %v2552_v59 }
 0x24e   : > { %2555 = vst [vmem:[%s11693_s5 + $0x11e0] sm:$0xff] %v2554_v60  ;;  %v2556_v61 = vld [vmem:[%s11685_s30 + $0x47a0] sm:$0xff] }
 0x24f   : > { %v2558_v62 = vld [vmem:[%s11685_s30 + $0x47c0] sm:$0xff]  ;;  %2557 = vst [vmem:[%s11693_s5 + $0x11e8] sm:$0xff] %v2556_v61 }
 0x250   : > { %v2560_v63 = vld [vmem:[%s11685_s30 + $0x47e0] sm:$0xff]  ;;  %2559 = vst [vmem:[%s11693_s5 + $0x11f0] sm:$0xff] %v2558_v62 }
 0x251   : > { %2561 = vst [vmem:[%s11693_s5 + $0x11f8] sm:$0xff] %v2560_v63  ;;  %v2562_v0 = vld [vmem:[%s11685_s30 + $0x4800] sm:$0xff] }
 0x252   : > { %v2564_v1 = vld [vmem:[%s11685_s30 + $0x4820] sm:$0xff]  ;;  %2563 = vst [vmem:[%s11693_s5 + $0x1200] sm:$0xff] %v2562_v0 }
 0x253   : > { %v2566_v2 = vld [vmem:[%s11685_s30 + $0x4840] sm:$0xff]  ;;  %2565 = vst [vmem:[%s11693_s5 + $0x1208] sm:$0xff] %v2564_v1 }
 0x254   : > { %2567 = vst [vmem:[%s11693_s5 + $0x1210] sm:$0xff] %v2566_v2  ;;  %v2568_v3 = vld [vmem:[%s11685_s30 + $0x4860] sm:$0xff] }
 0x255   : > { %v2570_v4 = vld [vmem:[%s11685_s30 + $0x4880] sm:$0xff]  ;;  %2569 = vst [vmem:[%s11693_s5 + $0x1218] sm:$0xff] %v2568_v3 }
 0x256   : > { %v2572_v5 = vld [vmem:[%s11685_s30 + $0x48a0] sm:$0xff]  ;;  %2571 = vst [vmem:[%s11693_s5 + $0x1220] sm:$0xff] %v2570_v4 }
 0x257   : > { %2573 = vst [vmem:[%s11693_s5 + $0x1228] sm:$0xff] %v2572_v5  ;;  %v2574_v6 = vld [vmem:[%s11685_s30 + $0x48c0] sm:$0xff] }
 0x258   : > { %v2576_v7 = vld [vmem:[%s11685_s30 + $0x48e0] sm:$0xff]  ;;  %2575 = vst [vmem:[%s11693_s5 + $0x1230] sm:$0xff] %v2574_v6 }
 0x259   : > { %v2578_v8 = vld [vmem:[%s11685_s30 + $0x4900] sm:$0xff]  ;;  %2577 = vst [vmem:[%s11693_s5 + $0x1238] sm:$0xff] %v2576_v7 }
 0x25a   : > { %2579 = vst [vmem:[%s11693_s5 + $0x1240] sm:$0xff] %v2578_v8  ;;  %v2580_v9 = vld [vmem:[%s11685_s30 + $0x4920] sm:$0xff] }
 0x25b   : > { %v2582_v10 = vld [vmem:[%s11685_s30 + $0x4940] sm:$0xff]  ;;  %2581 = vst [vmem:[%s11693_s5 + $0x1248] sm:$0xff] %v2580_v9 }
 0x25c   : > { %v2584_v11 = vld [vmem:[%s11685_s30 + $0x4960] sm:$0xff]  ;;  %2583 = vst [vmem:[%s11693_s5 + $0x1250] sm:$0xff] %v2582_v10 }
 0x25d   : > { %2585 = vst [vmem:[%s11693_s5 + $0x1258] sm:$0xff] %v2584_v11  ;;  %v2586_v12 = vld [vmem:[%s11685_s30 + $0x4980] sm:$0xff] }
 0x25e   : > { %v2588_v13 = vld [vmem:[%s11685_s30 + $0x49a0] sm:$0xff]  ;;  %2587 = vst [vmem:[%s11693_s5 + $0x1260] sm:$0xff] %v2586_v12 }
 0x25f   : > { %v2590_v14 = vld [vmem:[%s11685_s30 + $0x49c0] sm:$0xff]  ;;  %2589 = vst [vmem:[%s11693_s5 + $0x1268] sm:$0xff] %v2588_v13 }
 0x260   : > { %2591 = vst [vmem:[%s11693_s5 + $0x1270] sm:$0xff] %v2590_v14  ;;  %v2592_v15 = vld [vmem:[%s11685_s30 + $0x49e0] sm:$0xff] }
 0x261   : > { %2593 = vst [vmem:[%s11693_s5 + $0x1278] sm:$0xff] %v2592_v15 }
 0x262 PF: > { %5003 = sbr.rel (!%p11667_p3) target bundleno = 617 (0x269), region = 80  ;;  %s5005_s6 = sand.u32 (%p11667_p3), 1, %s11596_s16  }
 0x263   : > { %s10519_s7 = sshll.u32 (%p11667_p3), %s11604_s18, 3  ;;  %s9875_s8 = sshll.u32 (%p11667_p3), %s5005_s6, 4 }
 0x264   : > { %s5010_s11 = scalar_lea.vmem (%p11667_p3), %s13669_s3, %s10519_s7  ;;  %s5007_s12 = scalar_lea.vmem (%p11667_p3), [#allocation3], %s9875_s8 }
 0x265   : > { %v5040_v16 = vld [vmem:[%s5010_s11] sm:$0xff] (%p11667_p3) }
 0x266   : > { %v5042_v17 = vld [vmem:[%s5010_s11 + $0x20] sm:$0xff] (%p11667_p3)  ;;  %5041 = vst [vmem:[%s5007_s12] sm:$0xff] (%p11667_p3), %v5040_v16 }
 0x267   : > { %5043 = vst [vmem:[%s5007_s12 + $0x8] sm:$0xff] (%p11667_p3), %v5042_v17 }
 0x269 PF: > { %p9878_p6 = scmp.ge.s32.totalorder %s11608_s19, 1  ;;  %p5048_p7 = scmp.lt.s32.totalorder %s11608_s19, 5 }
 0x26b   : > { %p5049_p8 = pnand %p9878_p6, %p5048_p7 }
 0x26c   : > { %s5055_s13 = sand.u32 (!%p5049_p8), 1, %s11592_s15   ;;  %v11610_v18 = vmov (!%p5049_p8), 0   ;;  %v12887_v19 = vld [vmem:[%s13666_s0 + $0x48] sm:$0xff] (!%p5049_p8)  ;;  %vm5752_vm0 = vcmask (!%p5049_p8), 1044480   ;;  %v12894_v21 = vld [vmem:[%s13666_s0] sm:$0xff] (!%p5049_p8)  ;;  %vm5748_vm1 = vcmask (!%p5049_p8), 80896  }
 0x26d   : > { %5052 = sbr.rel (%p5049_p8) target bundleno = 1502 (0x5de), region = 118  ;;  %s9879_s21 = sshll.u32 (!%p5049_p8), %s5055_s13, 4  ;;  %5791 = vmatprep.mubr.bf16.mxu1 (!%p5049_p8), %v11610_v18  ;;  %v9905_v20 = vcombine.high (!%p5049_p8), %v12887_v19, %v12887_v19  ;;  %v5737_v25 = vld [vmem:[%s13668_s2] sm:$0xf] (!%p5049_p8)  ;;  %v9887_v30 = vcombine.high (!%p5049_p8), %v12894_v21, %v12894_v21 }
 0x26e   : > { %s10596_s14 = smul.u32 (!%p5049_p8), 4736, %s5055_s13  ;;  %s5064_s25 = scalar_lea.vmem (!%p5049_p8), [#allocation3], %s9879_s21 }
 0x26f   : > { %v10638_v22 = vld [vmem:[%s5064_s25 + $0x4] ss:$8 sps:$4 sm:$0x1f] (!%p5049_p8)   ;;  %v10640_v23 = vld [vmem:[%s5064_s25] ss:$8 sps:$4 sm:$0x1f] (!%p5049_p8)   ;;  %9291 = vmatprep.mubr.bf16.mxu0 (!%p5049_p8), %v9905_v20 }
 0x270   : > { %s12896_s15 = scalar_lea.vmem (!%p5049_p8), [#allocation2], %s10596_s14  ;;  %9884 = vmatprep.subr.msk.bf16.mxu1 (!%p5049_p8), %vm5752_vm0, %v10638_v22  ;;  %v5754_v26 = vsel (!%p5049_p8), %vm5752_vm0, %v10640_v23, 0 }
 0x271   : > { %v10641_v24 = vld [vmem:[%s12896_s15 + $0x904] ss:$8 sps:$4 sm:$0xff] (!%p5049_p8)   ;;  %v10643_v27 = vld [vmem:[%s12896_s15 + $0x900] ss:$8 sps:$4 sm:$0xff] (!%p5049_p8)   ;;  %5760 = vmatpush1.bf16.msra.mxu1 (!%p5049_p8), %v5754_v26  ;;  %v10647_v31 = vld [vmem:[%s12896_s15 + $0x914] ss:$8 sps:$4 sm:$0xff] (!%p5049_p8)  }
 0x272   : > { %9259 = vmatprep.subr.bf16.mxu0 (!%p5049_p8), %v10641_v24  ;;  %v10644_v28 = vld [vmem:[%s12896_s15] ss:$8 sps:$4 sm:$0xff] (!%p5049_p8)   ;;  %v10646_v29 = vld [vmem:[%s12896_s15 + $0x4] ss:$8 sps:$4 sm:$0xff] (!%p5049_p8)   ;;  %v10649_v32 = vld [vmem:[%s12896_s15 + $0x910] ss:$8 sps:$4 sm:$0xff] (!%p5049_p8)  }
 0x273   : > { %9260 = vmatpush1.bf16.msra.mxu0 (!%p5049_p8), %v10643_v27  ;;  %8890 = vmatprep.subr.bf16.mxu1 (!%p5049_p8), %v10646_v29  ;;  %v10652_v33 = vld [vmem:[%s12896_s15 + $0x14] ss:$8 sps:$4 sm:$0xff] (!%p5049_p8)   ;;  %v10650_v34 = vld [vmem:[%s12896_s15 + $0x10] ss:$8 sps:$4 sm:$0xff] (!%p5049_p8)   ;;  %v10653_v35 = vld [vmem:[%s12896_s15 + $0x924] ss:$8 sps:$4 sm:$0xff] (!%p5049_p8)  }
 0x274   : > { %9885 = vmatmul.mubr.msk.bf16.vlgmr.msra.gmra.mrb[0].mxu1 %vm5748_vm1, %v5737_v25  ;;  %9261 = vmatprep.subr.bf16.mxu0 %v10647_v31  ;;  %v10655_v36 = vld [vmem:[%s12896_s15 + $0x920] ss:$8 sps:$4 sm:$0xff]   ;;  %v10658_v37 = vld [vmem:[%s12896_s15 + $0x24] ss:$8 sps:$4 sm:$0xff]   ;;  %v10659_v38 = vld [vmem:[%s12896_s15 + $0x934] ss:$8 sps:$4 sm:$0xff]   ;;  %v9904_v31 = vcombine.low %v12887_v19, %v12887_v19 }
 0x275   : > { %8891 = vmatpush1.bf16.msra.mxu1 %v10644_v28  ;;  %8922 = vmatprep.mubr.bf16.mxu1 %v9887_v30  ;;  %v10656_v39 = vld [vmem:[%s12896_s15 + $0x20] ss:$8 sps:$4 sm:$0xff]   ;;  %v10661_v40 = vld [vmem:[%s12896_s15 + $0x930] ss:$8 sps:$4 sm:$0xff]   ;;  %v10664_v41 = vld [vmem:[%s12896_s15 + $0x34] ss:$8 sps:$4 sm:$0xff]  }
 0x276   : > { %8892 = vmatprep.subr.bf16.mxu1 %v10652_v33  ;;  %v10665_v42 = vld [vmem:[%s12896_s15 + $0x944] ss:$8 sps:$4 sm:$0xff]   ;;  %v10662_v43 = vld [vmem:[%s12896_s15 + $0x30] ss:$8 sps:$4 sm:$0xff]   ;;  %v10667_v44 = vld [vmem:[%s12896_s15 + $0x940] ss:$8 sps:$4 sm:$0xff]  }
 0x277   : > { %9262 = vmatpush1.bf16.msra.mxu0 %v10649_v32  ;;  %v10670_v45 = vld [vmem:[%s12896_s15 + $0x44] ss:$8 sps:$4 sm:$0xff]   ;;  %v10671_v46 = vld [vmem:[%s12896_s15 + $0x954] ss:$8 sps:$4 sm:$0xff]   ;;  %v10668_v47 = vld [vmem:[%s12896_s15 + $0x40] ss:$8 sps:$4 sm:$0xff]  }
 0x278   : > { %9263 = vmatprep.subr.bf16.mxu0 %v10653_v35  ;;  %v10673_v48 = vld [vmem:[%s12896_s15 + $0x950] ss:$8 sps:$4 sm:$0xff]   ;;  %v10676_v49 = vld [vmem:[%s12896_s15 + $0x54] ss:$8 sps:$4 sm:$0xff]   ;;  %v10677_v50 = vld [vmem:[%s12896_s15 + $0x964] ss:$8 sps:$4 sm:$0xff]   ;;  %v9886_v35 = vcombine.low %v12894_v21, %v12894_v21 }
 0x279   : > { %8893 = vmatpush1.bf16.msra.mxu1 %v10650_v34  ;;  %v10674_v51 = vld [vmem:[%s12896_s15 + $0x50] ss:$8 sps:$4 sm:$0xff]   ;;  %v10679_v52 = vld [vmem:[%s12896_s15 + $0x960] ss:$8 sps:$4 sm:$0xff]   ;;  %v10682_v53 = vld [vmem:[%s12896_s15 + $0x64] ss:$8 sps:$4 sm:$0xff]  }
 0x27a   : > { %8894 = vmatprep.subr.bf16.mxu1 %v10658_v37  ;;  %v10683_v54 = vld [vmem:[%s12896_s15 + $0x974] ss:$8 sps:$4 sm:$0xff]   ;;  %v10680_v55 = vld [vmem:[%s12896_s15 + $0x60] ss:$8 sps:$4 sm:$0xff]   ;;  %v10685_v56 = vld [vmem:[%s12896_s15 + $0x970] ss:$8 sps:$4 sm:$0xff]  }
 0x27b   : > { %9264 = vmatpush1.bf16.msra.mxu0 %v10655_v36  ;;  %v10688_v57 = vld [vmem:[%s12896_s15 + $0x74] ss:$8 sps:$4 sm:$0xff]   ;;  %v10689_v58 = vld [vmem:[%s12896_s15 + $0x984] ss:$8 sps:$4 sm:$0xff]   ;;  %v10686_v59 = vld [vmem:[%s12896_s15 + $0x70] ss:$8 sps:$4 sm:$0xff]  }
 0x27c   : > { %9265 = vmatprep.subr.bf16.mxu0 %v10659_v38  ;;  %v10691_v60 = vld [vmem:[%s12896_s15 + $0x980] ss:$8 sps:$4 sm:$0xff]   ;;  %v10694_v61 = vld [vmem:[%s12896_s15 + $0x84] ss:$8 sps:$4 sm:$0xff]   ;;  %v10695_v62 = vld [vmem:[%s12896_s15 + $0x994] ss:$8 sps:$4 sm:$0xff]  }
 0x27d   : > { %8895 = vmatpush1.bf16.msra.mxu1 %v10656_v39  ;;  %v10692_v63 = vld [vmem:[%s12896_s15 + $0x80] ss:$8 sps:$4 sm:$0xff]   ;;  %v10697_v0 = vld [vmem:[%s12896_s15 + $0x990] ss:$8 sps:$4 sm:$0xff]   ;;  %v10700_v1 = vld [vmem:[%s12896_s15 + $0x94] ss:$8 sps:$4 sm:$0xff]  }
 0x27e   : > { %8896 = vmatprep.subr.bf16.mxu1 %v10664_v41  ;;  %v10701_v2 = vld [vmem:[%s12896_s15 + $0x9a4] ss:$8 sps:$4 sm:$0xff]   ;;  %v10698_v3 = vld [vmem:[%s12896_s15 + $0x90] ss:$8 sps:$4 sm:$0xff]   ;;  %v10703_v4 = vld [vmem:[%s12896_s15 + $0x9a0] ss:$8 sps:$4 sm:$0xff]  }
 0x27f   : > { %9266 = vmatpush1.bf16.msra.mxu0 %v10661_v40  ;;  %v10706_v5 = vld [vmem:[%s12896_s15 + $0xa4] ss:$8 sps:$4 sm:$0xff]   ;;  %v10707_v6 = vld [vmem:[%s12896_s15 + $0x9b4] ss:$8 sps:$4 sm:$0xff]   ;;  %v10704_v7 = vld [vmem:[%s12896_s15 + $0xa0] ss:$8 sps:$4 sm:$0xff]  }
 0x280   : > { %9267 = vmatprep.subr.bf16.mxu0 %v10665_v42  ;;  %v10709_v8 = vld [vmem:[%s12896_s15 + $0x9b0] ss:$8 sps:$4 sm:$0xff]   ;;  %v10712_v9 = vld [vmem:[%s12896_s15 + $0xb4] ss:$8 sps:$4 sm:$0xff]   ;;  %v10713_v10 = vld [vmem:[%s12896_s15 + $0x9c4] ss:$8 sps:$4 sm:$0xff]  }
 0x281   : > { %8897 = vmatpush1.bf16.msra.mxu1 %v10662_v43  ;;  %v10710_v11 = vld [vmem:[%s12896_s15 + $0xb0] ss:$8 sps:$4 sm:$0xff]   ;;  %v10715_v12 = vld [vmem:[%s12896_s15 + $0x9c0] ss:$8 sps:$4 sm:$0xff]   ;;  %v10718_v13 = vld [vmem:[%s12896_s15 + $0xc4] ss:$8 sps:$4 sm:$0xff]  }
 0x282   : > { %8898 = vmatprep.subr.bf16.mxu1 %v10670_v45  ;;  %v10719_v14 = vld [vmem:[%s12896_s15 + $0x9d4] ss:$8 sps:$4 sm:$0xff]   ;;  %v10716_v15 = vld [vmem:[%s12896_s15 + $0xc0] ss:$8 sps:$4 sm:$0xff]   ;;  %v10721_v16 = vld [vmem:[%s12896_s15 + $0x9d0] ss:$8 sps:$4 sm:$0xff]  }
 0x283   : > { %9268 = vmatpush1.bf16.msra.mxu0 %v10667_v44  ;;  %v10724_v17 = vld [vmem:[%s12896_s15 + $0xd4] ss:$8 sps:$4 sm:$0xff]   ;;  %v10725_v20 = vld [vmem:[%s12896_s15 + $0x9e4] ss:$8 sps:$4 sm:$0xff]   ;;  %v10722_v22 = vld [vmem:[%s12896_s15 + $0xd0] ss:$8 sps:$4 sm:$0xff]  }
 0x284   : > { %9269 = vmatprep.subr.bf16.mxu0 %v10671_v46  ;;  %v10727_v23 = vld [vmem:[%s12896_s15 + $0x9e0] ss:$8 sps:$4 sm:$0xff]   ;;  %v10730_v24 = vld [vmem:[%s12896_s15 + $0xe4] ss:$8 sps:$4 sm:$0xff]   ;;  %v10731_v25 = vld [vmem:[%s12896_s15 + $0x9f4] ss:$8 sps:$4 sm:$0xff]  }
 0x285   : > { %8899 = vmatpush1.bf16.msra.mxu1 %v10668_v47  ;;  %v10728_v26 = vld [vmem:[%s12896_s15 + $0xe0] ss:$8 sps:$4 sm:$0xff]   ;;  %v10733_v27 = vld [vmem:[%s12896_s15 + $0x9f0] ss:$8 sps:$4 sm:$0xff]   ;;  %v10736_v28 = vld [vmem:[%s12896_s15 + $0xf4] ss:$8 sps:$4 sm:$0xff]  }
 0x286   : > { %8900 = vmatprep.subr.bf16.mxu1 %v10676_v49  ;;  %v10741_v29 = vld [vmem:[%s12896_s15 + $0xa04] ss:$8 sps:$4 sm:$0xff]   ;;  %v10734_v30 = vld [vmem:[%s12896_s15 + $0xf0] ss:$8 sps:$4 sm:$0xff]   ;;  %v10739_v32 = vld [vmem:[%s12896_s15 + $0xa00] ss:$8 sps:$4 sm:$0xff]  }
 0x287   : > { %9270 = vmatpush1.bf16.msra.mxu0 %v10673_v48  ;;  %v10746_v33 = vld [vmem:[%s12896_s15 + $0x104] ss:$8 sps:$4 sm:$0xff]   ;;  %v10749_v34 = vld [vmem:[%s12896_s15 + $0xa14] ss:$8 sps:$4 sm:$0xff]   ;;  %v10744_v36 = vld [vmem:[%s12896_s15 + $0x100] ss:$8 sps:$4 sm:$0xff]  }
 0x288   : > { %9271 = vmatprep.subr.bf16.mxu0 %v10677_v50  ;;  %v10747_v19 = vld [vmem:[%s12896_s15 + $0xa10] ss:$8 sps:$4 sm:$0xff]   ;;  %v10752_v37 = vld [vmem:[%s12896_s15 + $0x114] ss:$8 sps:$4 sm:$0xff]   ;;  %v10755_v38 = vld [vmem:[%s12896_s15 + $0xa24] ss:$8 sps:$4 sm:$0xff]  }
 0x289   : > { %8901 = vmatpush1.bf16.msra.mxu1 %v10674_v51  ;;  %v10750_v39 = vld [vmem:[%s12896_s15 + $0x110] ss:$8 sps:$4 sm:$0xff]   ;;  %v10753_v21 = vld [vmem:[%s12896_s15 + $0xa20] ss:$8 sps:$4 sm:$0xff]   ;;  %v10758_v40 = vld [vmem:[%s12896_s15 + $0x124] ss:$8 sps:$4 sm:$0xff]  }
 0x28a   : > { %8902 = vmatprep.subr.bf16.mxu1 %v10682_v53  ;;  %v10761_v41 = vld [vmem:[%s12896_s15 + $0xa34] ss:$8 sps:$4 sm:$0xff]   ;;  %v10756_v42 = vld [vmem:[%s12896_s15 + $0x120] ss:$8 sps:$4 sm:$0xff]   ;;  %v10759_v43 = vld [vmem:[%s12896_s15 + $0xa30] ss:$8 sps:$4 sm:$0xff]  }
 0x28b   : > { %9272 = vmatpush1.bf16.msra.mxu0 %v10679_v52  ;;  %v10764_v44 = vld [vmem:[%s12896_s15 + $0x134] ss:$8 sps:$4 sm:$0xff]   ;;  %v10767_v45 = vld [vmem:[%s12896_s15 + $0xa44] ss:$8 sps:$4 sm:$0xff]   ;;  %v10762_v46 = vld [vmem:[%s12896_s15 + $0x130] ss:$8 sps:$4 sm:$0xff]  }
 0x28c   : > { %9273 = vmatprep.subr.bf16.mxu0 %v10683_v54  ;;  %v10765_v47 = vld [vmem:[%s12896_s15 + $0xa40] ss:$8 sps:$4 sm:$0xff]   ;;  %v10770_v48 = vld [vmem:[%s12896_s15 + $0x144] ss:$8 sps:$4 sm:$0xff]   ;;  %v10773_v49 = vld [vmem:[%s12896_s15 + $0xa54] ss:$8 sps:$4 sm:$0xff]  }
 0x28d   : > { %8903 = vmatpush1.bf16.msra.mxu1 %v10680_v55  ;;  %v10768_v50 = vld [vmem:[%s12896_s15 + $0x140] ss:$8 sps:$4 sm:$0xff]   ;;  %v10771_v51 = vld [vmem:[%s12896_s15 + $0xa50] ss:$8 sps:$4 sm:$0xff]   ;;  %v10776_v52 = vld [vmem:[%s12896_s15 + $0x154] ss:$8 sps:$4 sm:$0xff]  }
 0x28e   : > { %8904 = vmatprep.subr.bf16.mxu1 %v10688_v57  ;;  %v10779_v53 = vld [vmem:[%s12896_s15 + $0xa64] ss:$8 sps:$4 sm:$0xff]   ;;  %v10774_v54 = vld [vmem:[%s12896_s15 + $0x150] ss:$8 sps:$4 sm:$0xff]  }
 0x28f   : > { %9274 = vmatpush1.bf16.msra.mxu0 %v10685_v56  ;;  %v12999_v55 = vld [vmem:[%s13666_s0 + $0x50] sm:$0xff]  ;;  %v10777_v56 = vld [vmem:[%s12896_s15 + $0xa60] ss:$8 sps:$4 sm:$0xff]   ;;  %v10782_v57 = vld [vmem:[%s12896_s15 + $0x164] ss:$8 sps:$4 sm:$0xff]  }
 0x290   : > { %9275 = vmatprep.subr.bf16.mxu0 %v10689_v58  ;;  %v9907_v58 = vcombine.high %v12999_v55, %v12999_v55 }
 0x291   : > { %8905 = vmatpush1.bf16.msra.mxu1 %v10686_v59  ;;  %v13008_v59 = vld [vmem:[%s13666_s0 + $0x8] sm:$0xff] }
 0x292   : > { %8906 = vmatprep.subr.bf16.mxu1 %v10694_v61  ;;  %v9889_v61 = vcombine.high %v13008_v59, %v13008_v59 }
 0x293   : > { %9276 = vmatpush1.bf16.msra.mxu0 %v10691_v60  ;;  %v10785_v60 = vld [vmem:[%s12896_s15 + $0xa74] ss:$8 sps:$4 sm:$0xff]  }
 0x294   : > { %9277 = vmatprep.subr.bf16.mxu0 %v10695_v62  ;;  %v10780_v62 = vld [vmem:[%s12896_s15 + $0x160] ss:$8 sps:$4 sm:$0xff]  }
 0x295   : > { %8907 = vmatpush1.bf16.msra.mxu1 %v10692_v63  ;;  %v10783_v63 = vld [vmem:[%s12896_s15 + $0xa70] ss:$8 sps:$4 sm:$0xff]  }
 0x296   : > { %8908 = vmatprep.subr.bf16.mxu1 %v10700_v1  ;;  %v10791_v1 = vld [vmem:[%s12896_s15 + $0xa84] ss:$8 sps:$4 sm:$0xff]  }
 0x297   : > { %9278 = vmatpush1.bf16.msra.mxu0 %v10697_v0  ;;  %v10788_v0 = vld [vmem:[%s12896_s15 + $0x174] ss:$8 sps:$4 sm:$0xff]  }
 0x298   : > { %9279 = vmatprep.subr.bf16.mxu0 %v10701_v2  ;;  %v10786_v2 = vld [vmem:[%s12896_s15 + $0x170] ss:$8 sps:$4 sm:$0xff]  }
 0x299   : > { %8909 = vmatpush1.bf16.msra.mxu1 %v10698_v3  ;;  %v10789_v3 = vld [vmem:[%s12896_s15 + $0xa80] ss:$8 sps:$4 sm:$0xff]  }
 0x29a   : > { %8910 = vmatprep.subr.bf16.mxu1 %v10706_v5  ;;  %v10797_v5 = vld [vmem:[%s12896_s15 + $0xa94] ss:$8 sps:$4 sm:$0xff]  }
 0x29b   : > { %9280 = vmatpush1.bf16.msra.mxu0 %v10703_v4  ;;  %v10794_v4 = vld [vmem:[%s12896_s15 + $0x184] ss:$8 sps:$4 sm:$0xff]  }
 0x29c   : > { %9281 = vmatprep.subr.bf16.mxu0 %v10707_v6  ;;  %v10792_v6 = vld [vmem:[%s12896_s15 + $0x180] ss:$8 sps:$4 sm:$0xff]  }
 0x29d   : > { %8911 = vmatpush1.bf16.msra.mxu1 %v10704_v7  ;;  %v10795_v7 = vld [vmem:[%s12896_s15 + $0xa90] ss:$8 sps:$4 sm:$0xff]  }
 0x29e   : > { %8912 = vmatprep.subr.bf16.mxu1 %v10712_v9  ;;  %v10803_v9 = vld [vmem:[%s12896_s15 + $0xaa4] ss:$8 sps:$4 sm:$0xff]  }
 0x29f   : > { %9282 = vmatpush1.bf16.msra.mxu0 %v10709_v8  ;;  %v10800_v8 = vld [vmem:[%s12896_s15 + $0x194] ss:$8 sps:$4 sm:$0xff]  }
 0x2a0   : > { %9283 = vmatprep.subr.bf16.mxu0 %v10713_v10  ;;  %v10798_v10 = vld [vmem:[%s12896_s15 + $0x190] ss:$8 sps:$4 sm:$0xff]  }
 0x2a1   : > { %8913 = vmatpush1.bf16.msra.mxu1 %v10710_v11  ;;  %v10801_v11 = vld [vmem:[%s12896_s15 + $0xaa0] ss:$8 sps:$4 sm:$0xff]  }
 0x2a2   : > { %8914 = vmatprep.subr.bf16.mxu1 %v10718_v13  ;;  %v10809_v13 = vld [vmem:[%s12896_s15 + $0xab4] ss:$8 sps:$4 sm:$0xff]  }
 0x2a3   : > { %9284 = vmatpush1.bf16.msra.mxu0 %v10715_v12  ;;  %v10806_v12 = vld [vmem:[%s12896_s15 + $0x1a4] ss:$8 sps:$4 sm:$0xff]  }
 0x2a4   : > { %9285 = vmatprep.subr.bf16.mxu0 %v10719_v14  ;;  %v10804_v14 = vld [vmem:[%s12896_s15 + $0x1a0] ss:$8 sps:$4 sm:$0xff]  }
 0x2a5   : > { %8915 = vmatpush1.bf16.msra.mxu1 %v10716_v15  ;;  %v10807_v15 = vld [vmem:[%s12896_s15 + $0xab0] ss:$8 sps:$4 sm:$0xff]  }
 0x2a6   : > { %8916 = vmatprep.subr.bf16.mxu1 %v10724_v17  ;;  %v10815_v17 = vld [vmem:[%s12896_s15 + $0xac4] ss:$8 sps:$4 sm:$0xff]  }
 0x2a7   : > { %9286 = vmatpush1.bf16.msra.mxu0 %v10721_v16  ;;  %v10812_v16 = vld [vmem:[%s12896_s15 + $0x1b4] ss:$8 sps:$4 sm:$0xff]  }
 0x2a8   : > { %9287 = vmatprep.subr.bf16.mxu0 %v10725_v20  ;;  %v10810_v20 = vld [vmem:[%s12896_s15 + $0x1b0] ss:$8 sps:$4 sm:$0xff]  }
 0x2a9   : > { %8917 = vmatpush1.bf16.msra.mxu1 %v10722_v22  ;;  %v10813_v22 = vld [vmem:[%s12896_s15 + $0xac0] ss:$8 sps:$4 sm:$0xff]  }
 0x2aa   : > { %8918 = vmatprep.subr.bf16.mxu1 %v10730_v24  ;;  %v10821_v24 = vld [vmem:[%s12896_s15 + $0xad4] ss:$8 sps:$4 sm:$0xff]  }
 0x2ab   : > { %9288 = vmatpush1.bf16.msra.mxu0 %v10727_v23  ;;  %v10818_v23 = vld [vmem:[%s12896_s15 + $0x1c4] ss:$8 sps:$4 sm:$0xff]  }
 0x2ac   : > { %9289 = vmatprep.subr.bf16.mxu0 %v10731_v25  ;;  %v10816_v25 = vld [vmem:[%s12896_s15 + $0x1c0] ss:$8 sps:$4 sm:$0xff]  }
 0x2ad   : > { %8919 = vmatpush1.bf16.msra.mxu1 %v10728_v26  ;;  %v10819_v26 = vld [vmem:[%s12896_s15 + $0xad0] ss:$8 sps:$4 sm:$0xff]  }
 0x2ae   : > { %8920 = vmatprep.subr.bf16.mxu1 %v10736_v28  ;;  %v10827_v28 = vld [vmem:[%s12896_s15 + $0xae4] ss:$8 sps:$4 sm:$0xff]  }
 0x2af   : > { %9290 = vmatpush1.bf16.msra.mxu0 %v10733_v27  ;;  %v10824_v27 = vld [vmem:[%s12896_s15 + $0x1d4] ss:$8 sps:$4 sm:$0xff]  }
 0x2b0   : > { %9300 = vmatprep.subr.bf16.mxu0 %v10741_v29  ;;  %v10822_v29 = vld [vmem:[%s12896_s15 + $0x1d0] ss:$8 sps:$4 sm:$0xff]  }
 0x2b1   : > { %8921 = vmatpush1.bf16.msra.mxu1 %v10734_v30  ;;  %v10825_v30 = vld [vmem:[%s12896_s15 + $0xae0] ss:$8 sps:$4 sm:$0xff]  }
 0x2b2   : > { %9292 = vmatmul.mubr.bf16.vlgmr.msra.gmra.mrb[0].mxu0 %v9904_v31  ;;  %8931 = vmatprep.subr.bf16.mxu1 %v10746_v33  ;;  %v10830_v31 = vld [vmem:[%s12896_s15 + $0x1e4] ss:$8 sps:$4 sm:$0xff]   ;;  %v10828_v33 = vld [vmem:[%s12896_s15 + $0x1e0] ss:$8 sps:$4 sm:$0xff]  }
 0x2b3   : > { %9301 = vmatpush1.bf16.msra.mxu0 %v10739_v32  ;;  %9332 = vmatprep.mubr.bf16.mxu0 %v9907_v58  ;;  %v10833_v32 = vld [vmem:[%s12896_s15 + $0xaf4] ss:$8 sps:$4 sm:$0xff]   ;;  %v10865_v58 = vld [vmem:[%s12896_s15 + $0xb40] ss:$8 sps:$4 sm:$0xff]  }
 0x2b4   : > { %9302 = vmatprep.subr.bf16.mxu0 %v10749_v34  ;;  %8923 = vmatmul.mubr.bf16.vlgmr.msra.gmra.mrb[0].mxu1 %v9886_v35  ;;  %v10831_v34 = vld [vmem:[%s12896_s15 + $0xaf0] ss:$8 sps:$4 sm:$0xff]   ;;  %v10836_v35 = vld [vmem:[%s12896_s15 + $0x1f4] ss:$8 sps:$4 sm:$0xff]  }
 0x2b5   : > { %8932 = vmatpush1.bf16.msra.mxu1 %v10744_v36  ;;  %8963 = vmatprep.mubr.bf16.mxu1 %v9889_v61  ;;  %v10841_v36 = vld [vmem:[%s12896_s15 + $0xb04] ss:$8 sps:$4 sm:$0xff]   ;;  %v10868_v61 = vld [vmem:[%s12896_s15 + $0x240] ss:$8 sps:$4 sm:$0xff]  }
 0x2b6   : > { %8933 = vmatprep.subr.bf16.mxu1 %v10752_v37  ;;  %v9906_v37 = vcombine.low %v12999_v55, %v12999_v55  ;;  %v10864_v55 = vld [vmem:[%s12896_s15 + $0x234] ss:$8 sps:$4 sm:$0xff]  }
 0x2b7   : > { %9303 = vmatpush1.bf16.msra.mxu0 %v10747_v19  ;;  %v10834_v19 = vld [vmem:[%s12896_s15 + $0x1f0] ss:$8 sps:$4 sm:$0xff]  }
 0x2b8   : > { %9304 = vmatprep.subr.bf16.mxu0 %v10755_v38  ;;  %v10839_v38 = vld [vmem:[%s12896_s15 + $0xb00] ss:$8 sps:$4 sm:$0xff]  }
 0x2b9   : > { %8934 = vmatpush1.bf16.msra.mxu1 %v10750_v39  ;;  %v10846_v39 = vld [vmem:[%s12896_s15 + $0x204] ss:$8 sps:$4 sm:$0xff]  }
 0x2ba   : > { %8935 = vmatprep.subr.bf16.mxu1 %v10758_v40  ;;  %v13058_v40 = vld [vmem:[%s13666_s0 + $0x58] sm:$0xff] }
 0x2bb   : > { %9305 = vmatpush1.bf16.msra.mxu0 %v10753_v21  ;;  %v10849_v21 = vld [vmem:[%s12896_s15 + $0xb14] ss:$8 sps:$4 sm:$0xff]  }
 0x2bc   : > { %9306 = vmatprep.subr.bf16.mxu0 %v10761_v41  ;;  %v9888_v41 = vcombine.low %v13008_v59, %v13008_v59  ;;  %v10870_v59 = vld [vmem:[%s12896_s15 + $0x244] ss:$8 sps:$4 sm:$0xff]  }
 0x2bd   : > { %8936 = vmatpush1.bf16.msra.mxu1 %v10756_v42  ;;  %v9909_v42 = vcombine.high %v13058_v40, %v13058_v40 }
 0x2be   : > { %8937 = vmatprep.subr.bf16.mxu1 %v10764_v44  ;;  %v13068_v44 = vld [vmem:[%s13666_s0 + $0x10] sm:$0xff] }
 0x2bf   : > { %9307 = vmatpush1.bf16.msra.mxu0 %v10759_v43  ;;  %v10844_v43 = vld [vmem:[%s12896_s15 + $0x200] ss:$8 sps:$4 sm:$0xff]  }
 0x2c0   : > { %9308 = vmatprep.subr.bf16.mxu0 %v10767_v45  ;;  %v10847_v45 = vld [vmem:[%s12896_s15 + $0xb10] ss:$8 sps:$4 sm:$0xff]  }
 0x2c1   : > { %8938 = vmatpush1.bf16.msra.mxu1 %v10762_v46  ;;  %v10852_v46 = vld [vmem:[%s12896_s15 + $0x214] ss:$8 sps:$4 sm:$0xff]  }
 0x2c2   : > { %8939 = vmatprep.subr.bf16.mxu1 %v10770_v48  ;;  %v10855_v48 = vld [vmem:[%s12896_s15 + $0xb24] ss:$8 sps:$4 sm:$0xff]  }
 0x2c3   : > { %9309 = vmatpush1.bf16.msra.mxu0 %v10765_v47  ;;  %v9891_v47 = vcombine.high %v13068_v44, %v13068_v44 }
 0x2c4   : > { %9310 = vmatprep.subr.bf16.mxu0 %v10773_v49  ;;  %v10850_v49 = vld [vmem:[%s12896_s15 + $0x210] ss:$8 sps:$4 sm:$0xff]  }
 0x2c5   : > { %8940 = vmatpush1.bf16.msra.mxu1 %v10768_v50  ;;  %v10853_v50 = vld [vmem:[%s12896_s15 + $0xb20] ss:$8 sps:$4 sm:$0xff]  }
 0x2c6   : > { %8941 = vmatprep.subr.bf16.mxu1 %v10776_v52  ;;  %v10861_v52 = vld [vmem:[%s12896_s15 + $0xb34] ss:$8 sps:$4 sm:$0xff]  }
 0x2c7   : > { %9311 = vmatpush1.bf16.msra.mxu0 %v10771_v51  ;;  %v10858_v51 = vld [vmem:[%s12896_s15 + $0x224] ss:$8 sps:$4 sm:$0xff]  }
 0x2c8   : > { %9312 = vmatprep.subr.bf16.mxu0 %v10779_v53  ;;  %v10856_v53 = vld [vmem:[%s12896_s15 + $0x220] ss:$8 sps:$4 sm:$0xff]  }
 0x2c9   : > { %8942 = vmatpush1.bf16.msra.mxu1 %v10774_v54  ;;  %v10859_v54 = vld [vmem:[%s12896_s15 + $0xb30] ss:$8 sps:$4 sm:$0xff]  }
 0x2ca   : > { %8943 = vmatprep.subr.bf16.mxu1 %v10782_v57  ;;  %v10862_v57 = vld [vmem:[%s12896_s15 + $0x230] ss:$8 sps:$4 sm:$0xff]  }
 0x2cb   : > { %9313 = vmatpush1.bf16.msra.mxu0 %v10777_v56  ;;  %v10867_v56 = vld [vmem:[%s12896_s15 + $0xb44] ss:$8 sps:$4 sm:$0xff]  }
 0x2cc   : > { %9314 = vmatprep.subr.bf16.mxu0 %v10785_v60  ;;  %v10873_v60 = vld [vmem:[%s12896_s15 + $0xb54] ss:$8 sps:$4 sm:$0xff]  }
 0x2cd   : > { %8944 = vmatpush1.bf16.msra.mxu1 %v10780_v62  ;;  %v10871_v62 = vld [vmem:[%s12896_s15 + $0xb50] ss:$8 sps:$4 sm:$0xff]  }
 0x2ce   : > { %8945 = vmatprep.subr.bf16.mxu1 %v10788_v0  ;;  %v10879_v0 = vld [vmem:[%s12896_s15 + $0xb64] ss:$8 sps:$4 sm:$0xff]  }
 0x2cf   : > { %9315 = vmatpush1.bf16.msra.mxu0 %v10783_v63  ;;  %v10876_v63 = vld [vmem:[%s12896_s15 + $0x254] ss:$8 sps:$4 sm:$0xff]  }
 0x2d0   : > { %9316 = vmatprep.subr.bf16.mxu0 %v10791_v1  ;;  %v10874_v1 = vld [vmem:[%s12896_s15 + $0x250] ss:$8 sps:$4 sm:$0xff]  }
 0x2d1   : > { %8946 = vmatpush1.bf16.msra.mxu1 %v10786_v2  ;;  %v10877_v2 = vld [vmem:[%s12896_s15 + $0xb60] ss:$8 sps:$4 sm:$0xff]  }
 0x2d2   : > { %8947 = vmatprep.subr.bf16.mxu1 %v10794_v4  ;;  %v10885_v4 = vld [vmem:[%s12896_s15 + $0xb74] ss:$8 sps:$4 sm:$0xff]  }
 0x2d3   : > { %9317 = vmatpush1.bf16.msra.mxu0 %v10789_v3  ;;  %v10882_v3 = vld [vmem:[%s12896_s15 + $0x264] ss:$8 sps:$4 sm:$0xff]  }
 0x2d4   : > { %9318 = vmatprep.subr.bf16.mxu0 %v10797_v5  ;;  %v10880_v5 = vld [vmem:[%s12896_s15 + $0x260] ss:$8 sps:$4 sm:$0xff]  }
 0x2d5   : > { %8948 = vmatpush1.bf16.msra.mxu1 %v10792_v6  ;;  %v10883_v6 = vld [vmem:[%s12896_s15 + $0xb70] ss:$8 sps:$4 sm:$0xff]  }
 0x2d6   : > { %8949 = vmatprep.subr.bf16.mxu1 %v10800_v8  ;;  %v10891_v8 = vld [vmem:[%s12896_s15 + $0xb84] ss:$8 sps:$4 sm:$0xff]  }
 0x2d7   : > { %9319 = vmatpush1.bf16.msra.mxu0 %v10795_v7  ;;  %v10888_v7 = vld [vmem:[%s12896_s15 + $0x274] ss:$8 sps:$4 sm:$0xff]  }
 0x2d8   : > { %9320 = vmatprep.subr.bf16.mxu0 %v10803_v9  ;;  %v10886_v9 = vld [vmem:[%s12896_s15 + $0x270] ss:$8 sps:$4 sm:$0xff]  }
 0x2d9   : > { %8950 = vmatpush1.bf16.msra.mxu1 %v10798_v10  ;;  %v10889_v10 = vld [vmem:[%s12896_s15 + $0xb80] ss:$8 sps:$4 sm:$0xff]  }
 0x2da   : > { %8951 = vmatprep.subr.bf16.mxu1 %v10806_v12  ;;  %v10897_v12 = vld [vmem:[%s12896_s15 + $0xb94] ss:$8 sps:$4 sm:$0xff]  }
 0x2db   : > { %9321 = vmatpush1.bf16.msra.mxu0 %v10801_v11  ;;  %v10894_v11 = vld [vmem:[%s12896_s15 + $0x284] ss:$8 sps:$4 sm:$0xff]  }
 0x2dc   : > { %9322 = vmatprep.subr.bf16.mxu0 %v10809_v13  ;;  %v10892_v13 = vld [vmem:[%s12896_s15 + $0x280] ss:$8 sps:$4 sm:$0xff]  }
 0x2dd   : > { %8952 = vmatpush1.bf16.msra.mxu1 %v10804_v14  ;;  %v10895_v14 = vld [vmem:[%s12896_s15 + $0xb90] ss:$8 sps:$4 sm:$0xff]  }
 0x2de   : > { %8953 = vmatprep.subr.bf16.mxu1 %v10812_v16  ;;  %v10903_v16 = vld [vmem:[%s12896_s15 + $0xba4] ss:$8 sps:$4 sm:$0xff]  }
 0x2df   : > { %9323 = vmatpush1.bf16.msra.mxu0 %v10807_v15  ;;  %v10900_v15 = vld [vmem:[%s12896_s15 + $0x294] ss:$8 sps:$4 sm:$0xff]  }
 0x2e0   : > { %9324 = vmatprep.subr.bf16.mxu0 %v10815_v17  ;;  %v10898_v17 = vld [vmem:[%s12896_s15 + $0x290] ss:$8 sps:$4 sm:$0xff]  }
 0x2e1   : > { %8954 = vmatpush1.bf16.msra.mxu1 %v10810_v20  ;;  %v10901_v20 = vld [vmem:[%s12896_s15 + $0xba0] ss:$8 sps:$4 sm:$0xff]  }
 0x2e2   : > { %8955 = vmatprep.subr.bf16.mxu1 %v10818_v23  ;;  %v10909_v23 = vld [vmem:[%s12896_s15 + $0xbb4] ss:$8 sps:$4 sm:$0xff]  }
 0x2e3   : > { %9325 = vmatpush1.bf16.msra.mxu0 %v10813_v22  ;;  %v10906_v22 = vld [vmem:[%s12896_s15 + $0x2a4] ss:$8 sps:$4 sm:$0xff]  }
 0x2e4   : > { %9326 = vmatprep.subr.bf16.mxu0 %v10821_v24  ;;  %v10904_v24 = vld [vmem:[%s12896_s15 + $0x2a0] ss:$8 sps:$4 sm:$0xff]  }
 0x2e5   : > { %8956 = vmatpush1.bf16.msra.mxu1 %v10816_v25  ;;  %v10907_v25 = vld [vmem:[%s12896_s15 + $0xbb0] ss:$8 sps:$4 sm:$0xff]  }
 0x2e6   : > { %8957 = vmatprep.subr.bf16.mxu1 %v10824_v27  ;;  %v10915_v27 = vld [vmem:[%s12896_s15 + $0xbc4] ss:$8 sps:$4 sm:$0xff]  }
 0x2e7   : > { %9327 = vmatpush1.bf16.msra.mxu0 %v10819_v26  ;;  %v10912_v26 = vld [vmem:[%s12896_s15 + $0x2b4] ss:$8 sps:$4 sm:$0xff]  }
 0x2e8   : > { %9328 = vmatprep.subr.bf16.mxu0 %v10827_v28  ;;  %v10910_v28 = vld [vmem:[%s12896_s15 + $0x2b0] ss:$8 sps:$4 sm:$0xff]  }
 0x2e9   : > { %8958 = vmatpush1.bf16.msra.mxu1 %v10822_v29  ;;  %v10913_v29 = vld [vmem:[%s12896_s15 + $0xbc0] ss:$8 sps:$4 sm:$0xff]  }
 0x2ea   : > { %8959 = vmatprep.subr.bf16.mxu1 %v10830_v31  ;;  %v10921_v31 = vld [vmem:[%s12896_s15 + $0xbd4] ss:$8 sps:$4 sm:$0xff]  }
 0x2eb   : > { %9329 = vmatpush1.bf16.msra.mxu0 %v10825_v30  ;;  %v10918_v30 = vld [vmem:[%s12896_s15 + $0x2c4] ss:$8 sps:$4 sm:$0xff]  }
 0x2ec   : > { %9330 = vmatprep.subr.bf16.mxu0 %v10833_v32  ;;  %v10916_v32 = vld [vmem:[%s12896_s15 + $0x2c0] ss:$8 sps:$4 sm:$0xff]  }
 0x2ed   : > { %8960 = vmatpush1.bf16.msra.mxu1 %v10828_v33  ;;  %v10919_v33 = vld [vmem:[%s12896_s15 + $0xbd0] ss:$8 sps:$4 sm:$0xff]  }
 0x2ee   : > { %8961 = vmatprep.subr.bf16.mxu1 %v10836_v35  ;;  %v10927_v35 = vld [vmem:[%s12896_s15 + $0xbe4] ss:$8 sps:$4 sm:$0xff]  }
 0x2ef   : > { %9331 = vmatpush1.bf16.msra.mxu0 %v10831_v34  ;;  %v10924_v34 = vld [vmem:[%s12896_s15 + $0x2d4] ss:$8 sps:$4 sm:$0xff]  }
 0x2f0   : > { %9341 = vmatprep.subr.bf16.mxu0 %v10841_v36  ;;  %v10922_v36 = vld [vmem:[%s12896_s15 + $0x2d0] ss:$8 sps:$4 sm:$0xff]  }
 0x2f1   : > { %8962 = vmatpush1.bf16.msra.mxu1 %v10834_v19  ;;  %v10925_v19 = vld [vmem:[%s12896_s15 + $0xbe0] ss:$8 sps:$4 sm:$0xff]  }
 0x2f2   : > { %9333 = vmatmul.mubr.bf16.vlgmr.msra.gmra.mrb[0].mxu0 %v9906_v37  ;;  %8972 = vmatprep.subr.bf16.mxu1 %v10846_v39  ;;  %v10930_v37 = vld [vmem:[%s12896_s15 + $0x2e4] ss:$8 sps:$4 sm:$0xff]   ;;  %v10928_v39 = vld [vmem:[%s12896_s15 + $0x2e0] ss:$8 sps:$4 sm:$0xff]  }
 0x2f3   : > { %9342 = vmatpush1.bf16.msra.mxu0 %v10839_v38  ;;  %9373 = vmatprep.mubr.bf16.mxu0 %v9909_v42  ;;  %v10933_v38 = vld [vmem:[%s12896_s15 + $0xbf4] ss:$8 sps:$4 sm:$0xff]   ;;  %v10934_v42 = vld [vmem:[%s12896_s15 + $0x2f0] ss:$8 sps:$4 sm:$0xff]  }
 0x2f4   : > { %9343 = vmatprep.subr.bf16.mxu0 %v10849_v21  ;;  %8964 = vmatmul.mubr.bf16.vlgmr.msra.gmra.mrb[0].mxu1 %v9888_v41  ;;  %v10931_v21 = vld [vmem:[%s12896_s15 + $0xbf0] ss:$8 sps:$4 sm:$0xff]   ;;  %v10936_v41 = vld [vmem:[%s12896_s15 + $0x2f4] ss:$8 sps:$4 sm:$0xff]  }
 0x2f5   : > { %8973 = vmatpush1.bf16.msra.mxu1 %v10844_v43  ;;  %9004 = vmatprep.mubr.bf16.mxu1 %v9891_v47  ;;  %v10941_v43 = vld [vmem:[%s12896_s15 + $0xc04] ss:$8 sps:$4 sm:$0xff]   ;;  %v9908_v47 = vcombine.low %v13058_v40, %v13058_v40  ;;  %v9890_v40 = vcombine.low %v13068_v44, %v13068_v44  ;;  %v10950_v44 = vld [vmem:[%s12896_s15 + $0x310] ss:$8 sps:$4 sm:$0xff]  }
 0x2f6   : > { %8974 = vmatprep.subr.bf16.mxu1 %v10852_v46  ;;  %v13136_v46 = vld [vmem:[%s13666_s0 + $0x60] sm:$0xff] }
 0x2f7   : > { %9344 = vmatpush1.bf16.msra.mxu0 %v10847_v45  ;;  %v10939_v45 = vld [vmem:[%s12896_s15 + $0xc00] ss:$8 sps:$4 sm:$0xff]  }
 0x2f8   : > { %9345 = vmatprep.subr.bf16.mxu0 %v10855_v48  ;;  %v10946_v48 = vld [vmem:[%s12896_s15 + $0x304] ss:$8 sps:$4 sm:$0xff]  }
 0x2f9   : > { %8975 = vmatpush1.bf16.msra.mxu1 %v10850_v49  ;;  %v13144_v49 = vld [vmem:[%s13666_s0 + $0x18] sm:$0xff] }
 0x2fa   : > { %8976 = vmatprep.subr.bf16.mxu1 %v10858_v51  ;;  %v9911_v51 = vcombine.high %v13136_v46, %v13136_v46 }
 0x2fb   : > { %9346 = vmatpush1.bf16.msra.mxu0 %v10853_v50  ;;  %v10949_v50 = vld [vmem:[%s12896_s15 + $0xc14] ss:$8 sps:$4 sm:$0xff]  }
 0x2fc   : > { %9347 = vmatprep.subr.bf16.mxu0 %v10861_v52  ;;  %v10944_v52 = vld [vmem:[%s12896_s15 + $0x300] ss:$8 sps:$4 sm:$0xff]  }
 0x2fd   : > { %8977 = vmatpush1.bf16.msra.mxu1 %v10856_v53  ;;  %v10947_v53 = vld [vmem:[%s12896_s15 + $0xc10] ss:$8 sps:$4 sm:$0xff]  }
 0x2fe   : > { %8978 = vmatprep.subr.bf16.mxu1 %v10864_v55  ;;  %v10952_v55 = vld [vmem:[%s12896_s15 + $0x314] ss:$8 sps:$4 sm:$0xff]  }
 0x2ff   : > { %9348 = vmatpush1.bf16.msra.mxu0 %v10859_v54  ;;  %v9893_v54 = vcombine.high %v13144_v49, %v13144_v49 }
 0x300   : > { %9349 = vmatprep.subr.bf16.mxu0 %v10867_v56  ;;  %v10955_v56 = vld [vmem:[%s12896_s15 + $0xc24] ss:$8 sps:$4 sm:$0xff]  }
 0x301   : > { %8979 = vmatpush1.bf16.msra.mxu1 %v10862_v57  ;;  %v10953_v57 = vld [vmem:[%s12896_s15 + $0xc20] ss:$8 sps:$4 sm:$0xff]  }
 0x302   : > { %8980 = vmatprep.subr.bf16.mxu1 %v10870_v59  ;;  %v10961_v59 = vld [vmem:[%s12896_s15 + $0xc34] ss:$8 sps:$4 sm:$0xff]  }
 0x303   : > { %9350 = vmatpush1.bf16.msra.mxu0 %v10865_v58  ;;  %v10958_v58 = vld [vmem:[%s12896_s15 + $0x324] ss:$8 sps:$4 sm:$0xff]  }
 0x304   : > { %9351 = vmatprep.subr.bf16.mxu0 %v10873_v60  ;;  %v10956_v60 = vld [vmem:[%s12896_s15 + $0x320] ss:$8 sps:$4 sm:$0xff]  }
 0x305   : > { %8981 = vmatpush1.bf16.msra.mxu1 %v10868_v61  ;;  %v10959_v61 = vld [vmem:[%s12896_s15 + $0xc30] ss:$8 sps:$4 sm:$0xff]  }
 0x306   : > { %8982 = vmatprep.subr.bf16.mxu1 %v10876_v63  ;;  %v10967_v63 = vld [vmem:[%s12896_s15 + $0xc44] ss:$8 sps:$4 sm:$0xff]  }
 0x307   : > { %9352 = vmatpush1.bf16.msra.mxu0 %v10871_v62  ;;  %v10964_v62 = vld [vmem:[%s12896_s15 + $0x334] ss:$8 sps:$4 sm:$0xff]  }
 0x308   : > { %9353 = vmatprep.subr.bf16.mxu0 %v10879_v0  ;;  %v10962_v0 = vld [vmem:[%s12896_s15 + $0x330] ss:$8 sps:$4 sm:$0xff]  }
 0x309   : > { %8983 = vmatpush1.bf16.msra.mxu1 %v10874_v1  ;;  %v10965_v1 = vld [vmem:[%s12896_s15 + $0xc40] ss:$8 sps:$4 sm:$0xff]  }
 0x30a   : > { %8984 = vmatprep.subr.bf16.mxu1 %v10882_v3  ;;  %v10973_v3 = vld [vmem:[%s12896_s15 + $0xc54] ss:$8 sps:$4 sm:$0xff]  }
 0x30b   : > { %9354 = vmatpush1.bf16.msra.mxu0 %v10877_v2  ;;  %v10970_v2 = vld [vmem:[%s12896_s15 + $0x344] ss:$8 sps:$4 sm:$0xff]  }
 0x30c   : > { %9355 = vmatprep.subr.bf16.mxu0 %v10885_v4  ;;  %v10968_v4 = vld [vmem:[%s12896_s15 + $0x340] ss:$8 sps:$4 sm:$0xff]  }
 0x30d   : > { %8985 = vmatpush1.bf16.msra.mxu1 %v10880_v5  ;;  %v10971_v5 = vld [vmem:[%s12896_s15 + $0xc50] ss:$8 sps:$4 sm:$0xff]  }
 0x30e   : > { %8986 = vmatprep.subr.bf16.mxu1 %v10888_v7  ;;  %v10979_v7 = vld [vmem:[%s12896_s15 + $0xc64] ss:$8 sps:$4 sm:$0xff]  }
 0x30f   : > { %9356 = vmatpush1.bf16.msra.mxu0 %v10883_v6  ;;  %v10976_v6 = vld [vmem:[%s12896_s15 + $0x354] ss:$8 sps:$4 sm:$0xff]  }
 0x310   : > { %9357 = vmatprep.subr.bf16.mxu0 %v10891_v8  ;;  %v10974_v8 = vld [vmem:[%s12896_s15 + $0x350] ss:$8 sps:$4 sm:$0xff]  }
 0x311   : > { %8987 = vmatpush1.bf16.msra.mxu1 %v10886_v9  ;;  %v10977_v9 = vld [vmem:[%s12896_s15 + $0xc60] ss:$8 sps:$4 sm:$0xff]  }
 0x312   : > { %8988 = vmatprep.subr.bf16.mxu1 %v10894_v11  ;;  %v10985_v11 = vld [vmem:[%s12896_s15 + $0xc74] ss:$8 sps:$4 sm:$0xff]  }
 0x313   : > { %9358 = vmatpush1.bf16.msra.mxu0 %v10889_v10  ;;  %v10982_v10 = vld [vmem:[%s12896_s15 + $0x364] ss:$8 sps:$4 sm:$0xff]  }
 0x314   : > { %9359 = vmatprep.subr.bf16.mxu0 %v10897_v12  ;;  %v10980_v12 = vld [vmem:[%s12896_s15 + $0x360] ss:$8 sps:$4 sm:$0xff]  }
 0x315   : > { %8989 = vmatpush1.bf16.msra.mxu1 %v10892_v13  ;;  %v10983_v13 = vld [vmem:[%s12896_s15 + $0xc70] ss:$8 sps:$4 sm:$0xff]  }
 0x316   : > { %8990 = vmatprep.subr.bf16.mxu1 %v10900_v15  ;;  %v10991_v15 = vld [vmem:[%s12896_s15 + $0xc84] ss:$8 sps:$4 sm:$0xff]  }
 0x317   : > { %9360 = vmatpush1.bf16.msra.mxu0 %v10895_v14  ;;  %v10988_v14 = vld [vmem:[%s12896_s15 + $0x374] ss:$8 sps:$4 sm:$0xff]  }
 0x318   : > { %9361 = vmatprep.subr.bf16.mxu0 %v10903_v16  ;;  %v10986_v16 = vld [vmem:[%s12896_s15 + $0x370] ss:$8 sps:$4 sm:$0xff]  }
 0x319   : > { %8991 = vmatpush1.bf16.msra.mxu1 %v10898_v17  ;;  %v10989_v17 = vld [vmem:[%s12896_s15 + $0xc80] ss:$8 sps:$4 sm:$0xff]  }
 0x31a   : > { %8992 = vmatprep.subr.bf16.mxu1 %v10906_v22  ;;  %v10997_v22 = vld [vmem:[%s12896_s15 + $0xc94] ss:$8 sps:$4 sm:$0xff]  }
 0x31b   : > { %9362 = vmatpush1.bf16.msra.mxu0 %v10901_v20  ;;  %v10994_v20 = vld [vmem:[%s12896_s15 + $0x384] ss:$8 sps:$4 sm:$0xff]  }
 0x31c   : > { %9363 = vmatprep.subr.bf16.mxu0 %v10909_v23  ;;  %v10992_v23 = vld [vmem:[%s12896_s15 + $0x380] ss:$8 sps:$4 sm:$0xff]  }
 0x31d   : > { %8993 = vmatpush1.bf16.msra.mxu1 %v10904_v24  ;;  %v10995_v24 = vld [vmem:[%s12896_s15 + $0xc90] ss:$8 sps:$4 sm:$0xff]  }
 0x31e   : > { %8994 = vmatprep.subr.bf16.mxu1 %v10912_v26  ;;  %v11003_v26 = vld [vmem:[%s12896_s15 + $0xca4] ss:$8 sps:$4 sm:$0xff]  }
 0x31f   : > { %9364 = vmatpush1.bf16.msra.mxu0 %v10907_v25  ;;  %v11000_v25 = vld [vmem:[%s12896_s15 + $0x394] ss:$8 sps:$4 sm:$0xff]  }
 0x320   : > { %9365 = vmatprep.subr.bf16.mxu0 %v10915_v27  ;;  %v10998_v27 = vld [vmem:[%s12896_s15 + $0x390] ss:$8 sps:$4 sm:$0xff]  }
 0x321   : > { %8995 = vmatpush1.bf16.msra.mxu1 %v10910_v28  ;;  %v11001_v28 = vld [vmem:[%s12896_s15 + $0xca0] ss:$8 sps:$4 sm:$0xff]  }
 0x322   : > { %8996 = vmatprep.subr.bf16.mxu1 %v10918_v30  ;;  %v11009_v30 = vld [vmem:[%s12896_s15 + $0xcb4] ss:$8 sps:$4 sm:$0xff]  }
 0x323   : > { %9366 = vmatpush1.bf16.msra.mxu0 %v10913_v29  ;;  %v11006_v29 = vld [vmem:[%s12896_s15 + $0x3a4] ss:$8 sps:$4 sm:$0xff]  }
 0x324   : > { %9367 = vmatprep.subr.bf16.mxu0 %v10921_v31  ;;  %v11004_v31 = vld [vmem:[%s12896_s15 + $0x3a0] ss:$8 sps:$4 sm:$0xff]  }
 0x325   : > { %8997 = vmatpush1.bf16.msra.mxu1 %v10916_v32  ;;  %v11007_v32 = vld [vmem:[%s12896_s15 + $0xcb0] ss:$8 sps:$4 sm:$0xff]  }
 0x326   : > { %8998 = vmatprep.subr.bf16.mxu1 %v10924_v34  ;;  %v11015_v34 = vld [vmem:[%s12896_s15 + $0xcc4] ss:$8 sps:$4 sm:$0xff]  }
 0x327   : > { %9368 = vmatpush1.bf16.msra.mxu0 %v10919_v33  ;;  %v11012_v33 = vld [vmem:[%s12896_s15 + $0x3b4] ss:$8 sps:$4 sm:$0xff]  }
 0x328   : > { %9369 = vmatprep.subr.bf16.mxu0 %v10927_v35  ;;  %v11010_v35 = vld [vmem:[%s12896_s15 + $0x3b0] ss:$8 sps:$4 sm:$0xff]  }
 0x329   : > { %8999 = vmatpush1.bf16.msra.mxu1 %v10922_v36  ;;  %v11013_v36 = vld [vmem:[%s12896_s15 + $0xcc0] ss:$8 sps:$4 sm:$0xff]  }
 0x32a   : > { %9000 = vmatprep.subr.bf16.mxu1 %v10930_v37  ;;  %v11021_v37 = vld [vmem:[%s12896_s15 + $0xcd4] ss:$8 sps:$4 sm:$0xff]  }
 0x32b   : > { %9370 = vmatpush1.bf16.msra.mxu0 %v10925_v19  ;;  %v11018_v19 = vld [vmem:[%s12896_s15 + $0x3c4] ss:$8 sps:$4 sm:$0xff]  }
 0x32c   : > { %9371 = vmatprep.subr.bf16.mxu0 %v10933_v38  ;;  %v11016_v38 = vld [vmem:[%s12896_s15 + $0x3c0] ss:$8 sps:$4 sm:$0xff]  }
 0x32d   : > { %9001 = vmatpush1.bf16.msra.mxu1 %v10928_v39  ;;  %v11019_v39 = vld [vmem:[%s12896_s15 + $0xcd0] ss:$8 sps:$4 sm:$0xff]  }
 0x32e   : > { %9002 = vmatprep.subr.bf16.mxu1 %v10936_v41  ;;  %v11027_v41 = vld [vmem:[%s12896_s15 + $0xce4] ss:$8 sps:$4 sm:$0xff]  }
 0x32f   : > { %9372 = vmatpush1.bf16.msra.mxu0 %v10931_v21  ;;  %v11024_v21 = vld [vmem:[%s12896_s15 + $0x3d4] ss:$8 sps:$4 sm:$0xff]  }
 0x330   : > { %9382 = vmatprep.subr.bf16.mxu0 %v10941_v43  ;;  %v11025_v43 = vld [vmem:[%s12896_s15 + $0xce0] ss:$8 sps:$4 sm:$0xff]  }
 0x331   : > { %9003 = vmatpush1.bf16.msra.mxu1 %v10934_v42  ;;  %v11022_v42 = vld [vmem:[%s12896_s15 + $0x3d0] ss:$8 sps:$4 sm:$0xff]  }
 0x332   : > { %9374 = vmatmul.mubr.bf16.vlgmr.msra.gmra.mrb[0].mxu0 %v9908_v47  ;;  %9013 = vmatprep.subr.bf16.mxu1 %v10946_v48  ;;  %v11033_v47 = vld [vmem:[%s12896_s15 + $0xcf4] ss:$8 sps:$4 sm:$0xff]   ;;  %v11028_v48 = vld [vmem:[%s12896_s15 + $0x3e0] ss:$8 sps:$4 sm:$0xff]  }
 0x333   : > { %9383 = vmatpush1.bf16.msra.mxu0 %v10939_v45  ;;  %9414 = vmatprep.mubr.bf16.mxu0 %v9911_v51  ;;  %v11030_v45 = vld [vmem:[%s12896_s15 + $0x3e4] ss:$8 sps:$4 sm:$0xff]   ;;  %v11036_v51 = vld [vmem:[%s12896_s15 + $0x3f4] ss:$8 sps:$4 sm:$0xff]  }
 0x334   : > { %9384 = vmatprep.subr.bf16.mxu0 %v10949_v50  ;;  %9005 = vmatmul.mubr.bf16.vlgmr.msra.gmra.mrb[0].mxu1 %v9890_v40  ;;  %v11031_v50 = vld [vmem:[%s12896_s15 + $0xcf0] ss:$8 sps:$4 sm:$0xff]   ;;  %v11041_v40 = vld [vmem:[%s12896_s15 + $0xd04] ss:$8 sps:$4 sm:$0xff]  }
 0x335   : > { %9014 = vmatpush1.bf16.msra.mxu1 %v10944_v52  ;;  %9045 = vmatprep.mubr.bf16.mxu1 %v9893_v54  ;;  %v13216_v52 = vld [vmem:[%s13666_s0 + $0x68] sm:$0xff]  ;;  %v9910_v54 = vcombine.low %v13136_v46, %v13136_v46  ;;  %v9892_v46 = vcombine.low %v13144_v49, %v13144_v49  ;;  %v11050_v49 = vld [vmem:[%s12896_s15 + $0x410] ss:$8 sps:$4 sm:$0xff]  }
 0x336   : > { %9015 = vmatprep.subr.bf16.mxu1 %v10952_v55  ;;  %v11039_v55 = vld [vmem:[%s12896_s15 + $0xd00] ss:$8 sps:$4 sm:$0xff]  }
 0x337   : > { %9385 = vmatpush1.bf16.msra.mxu0 %v10947_v53  ;;  %v11034_v53 = vld [vmem:[%s12896_s15 + $0x3f0] ss:$8 sps:$4 sm:$0xff]  }
 0x338   : > { %9386 = vmatprep.subr.bf16.mxu0 %v10955_v56  ;;  %v11046_v56 = vld [vmem:[%s12896_s15 + $0x404] ss:$8 sps:$4 sm:$0xff]  }
 0x339   : > { %9016 = vmatpush1.bf16.msra.mxu1 %v10950_v44  ;;  %v13226_v44 = vld [vmem:[%s13666_s0 + $0x20] sm:$0xff] }
 0x33a   : > { %9017 = vmatprep.subr.bf16.mxu1 %v10958_v58  ;;  %v9913_v58 = vcombine.high %v13216_v52, %v13216_v52 }
 0x33b   : > { %9387 = vmatpush1.bf16.msra.mxu0 %v10953_v57  ;;  %v11049_v57 = vld [vmem:[%s12896_s15 + $0xd14] ss:$8 sps:$4 sm:$0xff]  }
 0x33c   : > { %9388 = vmatprep.subr.bf16.mxu0 %v10961_v59  ;;  %v11044_v59 = vld [vmem:[%s12896_s15 + $0x400] ss:$8 sps:$4 sm:$0xff]  }
 0x33d   : > { %9018 = vmatpush1.bf16.msra.mxu1 %v10956_v60  ;;  %v11047_v60 = vld [vmem:[%s12896_s15 + $0xd10] ss:$8 sps:$4 sm:$0xff]  }
 0x33e   : > { %9019 = vmatprep.subr.bf16.mxu1 %v10964_v62  ;;  %v11052_v62 = vld [vmem:[%s12896_s15 + $0x414] ss:$8 sps:$4 sm:$0xff]  }
 0x33f   : > { %9389 = vmatpush1.bf16.msra.mxu0 %v10959_v61  ;;  %v9895_v61 = vcombine.high %v13226_v44, %v13226_v44 }
 0x340   : > { %9390 = vmatprep.subr.bf16.mxu0 %v10967_v63  ;;  %v11055_v63 = vld [vmem:[%s12896_s15 + $0xd24] ss:$8 sps:$4 sm:$0xff]  }
 0x341   : > { %9020 = vmatpush1.bf16.msra.mxu1 %v10962_v0  ;;  %v11053_v0 = vld [vmem:[%s12896_s15 + $0xd20] ss:$8 sps:$4 sm:$0xff]  }
 0x342   : > { %9021 = vmatprep.subr.bf16.mxu1 %v10970_v2  ;;  %v11061_v2 = vld [vmem:[%s12896_s15 + $0xd34] ss:$8 sps:$4 sm:$0xff]  }
 0x343   : > { %9391 = vmatpush1.bf16.msra.mxu0 %v10965_v1  ;;  %v11058_v1 = vld [vmem:[%s12896_s15 + $0x424] ss:$8 sps:$4 sm:$0xff]  }
 0x344   : > { %9392 = vmatprep.subr.bf16.mxu0 %v10973_v3  ;;  %v11056_v3 = vld [vmem:[%s12896_s15 + $0x420] ss:$8 sps:$4 sm:$0xff]  }
 0x345   : > { %9022 = vmatpush1.bf16.msra.mxu1 %v10968_v4  ;;  %v11059_v4 = vld [vmem:[%s12896_s15 + $0xd30] ss:$8 sps:$4 sm:$0xff]  }
 0x346   : > { %9023 = vmatprep.subr.bf16.mxu1 %v10976_v6  ;;  %v11067_v6 = vld [vmem:[%s12896_s15 + $0xd44] ss:$8 sps:$4 sm:$0xff]  }
 0x347   : > { %9393 = vmatpush1.bf16.msra.mxu0 %v10971_v5  ;;  %v11064_v5 = vld [vmem:[%s12896_s15 + $0x434] ss:$8 sps:$4 sm:$0xff]  }
 0x348   : > { %9394 = vmatprep.subr.bf16.mxu0 %v10979_v7  ;;  %v11062_v7 = vld [vmem:[%s12896_s15 + $0x430] ss:$8 sps:$4 sm:$0xff]  }
 0x349   : > { %9024 = vmatpush1.bf16.msra.mxu1 %v10974_v8  ;;  %v11065_v8 = vld [vmem:[%s12896_s15 + $0xd40] ss:$8 sps:$4 sm:$0xff]  }
 0x34a   : > { %9025 = vmatprep.subr.bf16.mxu1 %v10982_v10  ;;  %v11073_v10 = vld [vmem:[%s12896_s15 + $0xd54] ss:$8 sps:$4 sm:$0xff]  }
 0x34b   : > { %9395 = vmatpush1.bf16.msra.mxu0 %v10977_v9  ;;  %v11070_v9 = vld [vmem:[%s12896_s15 + $0x444] ss:$8 sps:$4 sm:$0xff]  }
 0x34c   : > { %9396 = vmatprep.subr.bf16.mxu0 %v10985_v11  ;;  %v11068_v11 = vld [vmem:[%s12896_s15 + $0x440] ss:$8 sps:$4 sm:$0xff]  }
 0x34d   : > { %9026 = vmatpush1.bf16.msra.mxu1 %v10980_v12  ;;  %v11071_v12 = vld [vmem:[%s12896_s15 + $0xd50] ss:$8 sps:$4 sm:$0xff]  }
 0x34e   : > { %9027 = vmatprep.subr.bf16.mxu1 %v10988_v14  ;;  %v11079_v14 = vld [vmem:[%s12896_s15 + $0xd64] ss:$8 sps:$4 sm:$0xff]  }
 0x34f   : > { %9397 = vmatpush1.bf16.msra.mxu0 %v10983_v13  ;;  %v11076_v13 = vld [vmem:[%s12896_s15 + $0x454] ss:$8 sps:$4 sm:$0xff]  }
 0x350   : > { %9398 = vmatprep.subr.bf16.mxu0 %v10991_v15  ;;  %v11074_v15 = vld [vmem:[%s12896_s15 + $0x450] ss:$8 sps:$4 sm:$0xff]  }
 0x351   : > { %9028 = vmatpush1.bf16.msra.mxu1 %v10986_v16  ;;  %v11077_v16 = vld [vmem:[%s12896_s15 + $0xd60] ss:$8 sps:$4 sm:$0xff]  }
 0x352   : > { %9029 = vmatprep.subr.bf16.mxu1 %v10994_v20  ;;  %v11085_v20 = vld [vmem:[%s12896_s15 + $0xd74] ss:$8 sps:$4 sm:$0xff]  }
 0x353   : > { %9399 = vmatpush1.bf16.msra.mxu0 %v10989_v17  ;;  %v11082_v17 = vld [vmem:[%s12896_s15 + $0x464] ss:$8 sps:$4 sm:$0xff]  }
 0x354   : > { %9400 = vmatprep.subr.bf16.mxu0 %v10997_v22  ;;  %v11080_v22 = vld [vmem:[%s12896_s15 + $0x460] ss:$8 sps:$4 sm:$0xff]  }
 0x355   : > { %9030 = vmatpush1.bf16.msra.mxu1 %v10992_v23  ;;  %v11083_v23 = vld [vmem:[%s12896_s15 + $0xd70] ss:$8 sps:$4 sm:$0xff]  }
 0x356   : > { %9031 = vmatprep.subr.bf16.mxu1 %v11000_v25  ;;  %v11091_v25 = vld [vmem:[%s12896_s15 + $0xd84] ss:$8 sps:$4 sm:$0xff]  }
 0x357   : > { %9401 = vmatpush1.bf16.msra.mxu0 %v10995_v24  ;;  %v11088_v24 = vld [vmem:[%s12896_s15 + $0x474] ss:$8 sps:$4 sm:$0xff]  }
 0x358   : > { %9402 = vmatprep.subr.bf16.mxu0 %v11003_v26  ;;  %v11086_v26 = vld [vmem:[%s12896_s15 + $0x470] ss:$8 sps:$4 sm:$0xff]  }
 0x359   : > { %9032 = vmatpush1.bf16.msra.mxu1 %v10998_v27  ;;  %v11089_v27 = vld [vmem:[%s12896_s15 + $0xd80] ss:$8 sps:$4 sm:$0xff]  }
 0x35a   : > { %9033 = vmatprep.subr.bf16.mxu1 %v11006_v29  ;;  %v11097_v29 = vld [vmem:[%s12896_s15 + $0xd94] ss:$8 sps:$4 sm:$0xff]  }
 0x35b   : > { %9403 = vmatpush1.bf16.msra.mxu0 %v11001_v28  ;;  %v11094_v28 = vld [vmem:[%s12896_s15 + $0x484] ss:$8 sps:$4 sm:$0xff]  }
 0x35c   : > { %9404 = vmatprep.subr.bf16.mxu0 %v11009_v30  ;;  %v11092_v30 = vld [vmem:[%s12896_s15 + $0x480] ss:$8 sps:$4 sm:$0xff]  }
 0x35d   : > { %9034 = vmatpush1.bf16.msra.mxu1 %v11004_v31  ;;  %v11095_v31 = vld [vmem:[%s12896_s15 + $0xd90] ss:$8 sps:$4 sm:$0xff]  }
 0x35e   : > { %9035 = vmatprep.subr.bf16.mxu1 %v11012_v33  ;;  %v11103_v33 = vld [vmem:[%s12896_s15 + $0xda4] ss:$8 sps:$4 sm:$0xff]  }
 0x35f   : > { %9405 = vmatpush1.bf16.msra.mxu0 %v11007_v32  ;;  %v11100_v32 = vld [vmem:[%s12896_s15 + $0x494] ss:$8 sps:$4 sm:$0xff]  }
 0x360   : > { %9406 = vmatprep.subr.bf16.mxu0 %v11015_v34  ;;  %v11098_v34 = vld [vmem:[%s12896_s15 + $0x490] ss:$8 sps:$4 sm:$0xff]  }
 0x361   : > { %9036 = vmatpush1.bf16.msra.mxu1 %v11010_v35  ;;  %v11101_v35 = vld [vmem:[%s12896_s15 + $0xda0] ss:$8 sps:$4 sm:$0xff]  }
 0x362   : > { %9037 = vmatprep.subr.bf16.mxu1 %v11018_v19  ;;  %v11109_v19 = vld [vmem:[%s12896_s15 + $0xdb4] ss:$8 sps:$4 sm:$0xff]  }
 0x363   : > { %9407 = vmatpush1.bf16.msra.mxu0 %v11013_v36  ;;  %v11106_v36 = vld [vmem:[%s12896_s15 + $0x4a4] ss:$8 sps:$4 sm:$0xff]  }
 0x364   : > { %9408 = vmatprep.subr.bf16.mxu0 %v11021_v37  ;;  %v11104_v37 = vld [vmem:[%s12896_s15 + $0x4a0] ss:$8 sps:$4 sm:$0xff]  }
 0x365   : > { %9038 = vmatpush1.bf16.msra.mxu1 %v11016_v38  ;;  %v11107_v38 = vld [vmem:[%s12896_s15 + $0xdb0] ss:$8 sps:$4 sm:$0xff]  }
 0x366   : > { %9039 = vmatprep.subr.bf16.mxu1 %v11024_v21  ;;  %v11115_v21 = vld [vmem:[%s12896_s15 + $0xdc4] ss:$8 sps:$4 sm:$0xff]  }
 0x367   : > { %9409 = vmatpush1.bf16.msra.mxu0 %v11019_v39  ;;  %v11112_v39 = vld [vmem:[%s12896_s15 + $0x4b4] ss:$8 sps:$4 sm:$0xff]  }
 0x368   : > { %9410 = vmatprep.subr.bf16.mxu0 %v11027_v41  ;;  %v11110_v41 = vld [vmem:[%s12896_s15 + $0x4b0] ss:$8 sps:$4 sm:$0xff]  }
 0x369   : > { %9040 = vmatpush1.bf16.msra.mxu1 %v11022_v42  ;;  %v11113_v42 = vld [vmem:[%s12896_s15 + $0xdc0] ss:$8 sps:$4 sm:$0xff]  }
 0x36a   : > { %9041 = vmatprep.subr.bf16.mxu1 %v11030_v45  ;;  %v11121_v45 = vld [vmem:[%s12896_s15 + $0xdd4] ss:$8 sps:$4 sm:$0xff]  }
 0x36b   : > { %9411 = vmatpush1.bf16.msra.mxu0 %v11025_v43  ;;  %v11118_v43 = vld [vmem:[%s12896_s15 + $0x4c4] ss:$8 sps:$4 sm:$0xff]  }
 0x36c   : > { %9412 = vmatprep.subr.bf16.mxu0 %v11033_v47  ;;  %v11116_v47 = vld [vmem:[%s12896_s15 + $0x4c0] ss:$8 sps:$4 sm:$0xff]  }
 0x36d   : > { %9042 = vmatpush1.bf16.msra.mxu1 %v11028_v48  ;;  %v11119_v48 = vld [vmem:[%s12896_s15 + $0xdd0] ss:$8 sps:$4 sm:$0xff]  }
 0x36e   : > { %9043 = vmatprep.subr.bf16.mxu1 %v11036_v51  ;;  %v11127_v51 = vld [vmem:[%s12896_s15 + $0xde4] ss:$8 sps:$4 sm:$0xff]  }
 0x36f   : > { %9413 = vmatpush1.bf16.msra.mxu0 %v11031_v50  ;;  %v11124_v50 = vld [vmem:[%s12896_s15 + $0x4d4] ss:$8 sps:$4 sm:$0xff]  }
 0x370   : > { %9423 = vmatprep.subr.bf16.mxu0 %v11041_v40  ;;  %v11122_v40 = vld [vmem:[%s12896_s15 + $0x4d0] ss:$8 sps:$4 sm:$0xff]  }
 0x371   : > { %9044 = vmatpush1.bf16.msra.mxu1 %v11034_v53  ;;  %v11125_v53 = vld [vmem:[%s12896_s15 + $0xde0] ss:$8 sps:$4 sm:$0xff]  }
 0x372   : > { %9415 = vmatmul.mubr.bf16.vlgmr.msra.gmra.mrb[0].mxu0 %v9910_v54  ;;  %9054 = vmatprep.subr.bf16.mxu1 %v11046_v56  ;;  %v11130_v54 = vld [vmem:[%s12896_s15 + $0x4e4] ss:$8 sps:$4 sm:$0xff]   ;;  %v11128_v56 = vld [vmem:[%s12896_s15 + $0x4e0] ss:$8 sps:$4 sm:$0xff]  }
 0x373   : > { %9424 = vmatpush1.bf16.msra.mxu0 %v11039_v55  ;;  %9455 = vmatprep.mubr.bf16.mxu0 %v9913_v58  ;;  %v11133_v55 = vld [vmem:[%s12896_s15 + $0xdf4] ss:$8 sps:$4 sm:$0xff]  }
 0x374   : > { %9425 = vmatprep.subr.bf16.mxu0 %v11049_v57  ;;  %9046 = vmatmul.mubr.bf16.vlgmr.msra.gmra.mrb[0].mxu1 %v9892_v46  ;;  %v11131_v57 = vld [vmem:[%s12896_s15 + $0xdf0] ss:$8 sps:$4 sm:$0xff]   ;;  %v11136_v58 = vld [vmem:[%s12896_s15 + $0x4f4] ss:$8 sps:$4 sm:$0xff]  }
 0x375   : > { %9055 = vmatpush1.bf16.msra.mxu1 %v11044_v59  ;;  %9086 = vmatprep.mubr.bf16.mxu1 %v9895_v61  ;;  %v11134_v46 = vld [vmem:[%s12896_s15 + $0x4f0] ss:$8 sps:$4 sm:$0xff]   ;;  %v11141_v59 = vld [vmem:[%s12896_s15 + $0xe04] ss:$8 sps:$4 sm:$0xff]   ;;  %v9912_v61 = vcombine.low %v13216_v52, %v13216_v52  ;;  %v9894_v52 = vcombine.low %v13226_v44, %v13226_v44 }
 0x376   : > { %9056 = vmatprep.subr.bf16.mxu1 %v11052_v62  ;;  %v11139_v62 = vld [vmem:[%s12896_s15 + $0xe00] ss:$8 sps:$4 sm:$0xff]   ;;  %v11150_v44 = vld [vmem:[%s12896_s15 + $0x510] ss:$8 sps:$4 sm:$0xff]  }
 0x377   : > { %9426 = vmatpush1.bf16.msra.mxu0 %v11047_v60  ;;  %v13299_v60 = vld [vmem:[%s13666_s0 + $0x70] sm:$0xff] }
 0x378   : > { %9427 = vmatprep.subr.bf16.mxu0 %v11055_v63  ;;  %v11146_v63 = vld [vmem:[%s12896_s15 + $0x504] ss:$8 sps:$4 sm:$0xff]  }
 0x379   : > { %9057 = vmatpush1.bf16.msra.mxu1 %v11050_v49  ;;  %v13308_v49 = vld [vmem:[%s13666_s0 + $0x28] sm:$0xff] }
 0x37a   : > { %9058 = vmatprep.subr.bf16.mxu1 %v11058_v1  ;;  %v9915_v1 = vcombine.high %v13299_v60, %v13299_v60 }
 0x37b   : > { %9428 = vmatpush1.bf16.msra.mxu0 %v11053_v0  ;;  %v11149_v0 = vld [vmem:[%s12896_s15 + $0xe14] ss:$8 sps:$4 sm:$0xff]  }
 0x37c   : > { %9429 = vmatprep.subr.bf16.mxu0 %v11061_v2  ;;  %v11144_v2 = vld [vmem:[%s12896_s15 + $0x500] ss:$8 sps:$4 sm:$0xff]  }
 0x37d   : > { %9059 = vmatpush1.bf16.msra.mxu1 %v11056_v3  ;;  %v9897_v3 = vcombine.high %v13308_v49, %v13308_v49 }
 0x37e   : > { %9060 = vmatprep.subr.bf16.mxu1 %v11064_v5  ;;  %v11152_v5 = vld [vmem:[%s12896_s15 + $0x514] ss:$8 sps:$4 sm:$0xff]  }
 0x37f   : > { %9430 = vmatpush1.bf16.msra.mxu0 %v11059_v4  ;;  %v11147_v4 = vld [vmem:[%s12896_s15 + $0xe10] ss:$8 sps:$4 sm:$0xff]  }
 0x380   : > { %9431 = vmatprep.subr.bf16.mxu0 %v11067_v6  ;;  %v11155_v6 = vld [vmem:[%s12896_s15 + $0xe24] ss:$8 sps:$4 sm:$0xff]  }
 0x381   : > { %9061 = vmatpush1.bf16.msra.mxu1 %v11062_v7  ;;  %v11153_v7 = vld [vmem:[%s12896_s15 + $0xe20] ss:$8 sps:$4 sm:$0xff]  }
 0x382   : > { %9062 = vmatprep.subr.bf16.mxu1 %v11070_v9  ;;  %v11161_v9 = vld [vmem:[%s12896_s15 + $0xe34] ss:$8 sps:$4 sm:$0xff]  }
 0x383   : > { %9432 = vmatpush1.bf16.msra.mxu0 %v11065_v8  ;;  %v11158_v8 = vld [vmem:[%s12896_s15 + $0x524] ss:$8 sps:$4 sm:$0xff]  }
 0x384   : > { %9433 = vmatprep.subr.bf16.mxu0 %v11073_v10  ;;  %v11156_v10 = vld [vmem:[%s12896_s15 + $0x520] ss:$8 sps:$4 sm:$0xff]  }
 0x385   : > { %9063 = vmatpush1.bf16.msra.mxu1 %v11068_v11  ;;  %v11159_v11 = vld [vmem:[%s12896_s15 + $0xe30] ss:$8 sps:$4 sm:$0xff]  }
 0x386   : > { %9064 = vmatprep.subr.bf16.mxu1 %v11076_v13  ;;  %v11167_v13 = vld [vmem:[%s12896_s15 + $0xe44] ss:$8 sps:$4 sm:$0xff]  }
 0x387   : > { %9434 = vmatpush1.bf16.msra.mxu0 %v11071_v12  ;;  %v11164_v12 = vld [vmem:[%s12896_s15 + $0x534] ss:$8 sps:$4 sm:$0xff]  }
 0x388   : > { %9435 = vmatprep.subr.bf16.mxu0 %v11079_v14  ;;  %v11162_v14 = vld [vmem:[%s12896_s15 + $0x530] ss:$8 sps:$4 sm:$0xff]  }
 0x389   : > { %9065 = vmatpush1.bf16.msra.mxu1 %v11074_v15  ;;  %v11165_v15 = vld [vmem:[%s12896_s15 + $0xe40] ss:$8 sps:$4 sm:$0xff]  }
 0x38a   : > { %9066 = vmatprep.subr.bf16.mxu1 %v11082_v17  ;;  %v11173_v17 = vld [vmem:[%s12896_s15 + $0xe54] ss:$8 sps:$4 sm:$0xff]  }
 0x38b   : > { %9436 = vmatpush1.bf16.msra.mxu0 %v11077_v16  ;;  %v11170_v16 = vld [vmem:[%s12896_s15 + $0x544] ss:$8 sps:$4 sm:$0xff]  }
 0x38c   : > { %9437 = vmatprep.subr.bf16.mxu0 %v11085_v20  ;;  %v11168_v20 = vld [vmem:[%s12896_s15 + $0x540] ss:$8 sps:$4 sm:$0xff]  }
 0x38d   : > { %9067 = vmatpush1.bf16.msra.mxu1 %v11080_v22  ;;  %v11171_v22 = vld [vmem:[%s12896_s15 + $0xe50] ss:$8 sps:$4 sm:$0xff]  }
 0x38e   : > { %9068 = vmatprep.subr.bf16.mxu1 %v11088_v24  ;;  %v11179_v24 = vld [vmem:[%s12896_s15 + $0xe64] ss:$8 sps:$4 sm:$0xff]  }
 0x38f   : > { %9438 = vmatpush1.bf16.msra.mxu0 %v11083_v23  ;;  %v11176_v23 = vld [vmem:[%s12896_s15 + $0x554] ss:$8 sps:$4 sm:$0xff]  }
 0x390   : > { %9439 = vmatprep.subr.bf16.mxu0 %v11091_v25  ;;  %v11174_v25 = vld [vmem:[%s12896_s15 + $0x550] ss:$8 sps:$4 sm:$0xff]  }
 0x391   : > { %9069 = vmatpush1.bf16.msra.mxu1 %v11086_v26  ;;  %v11177_v26 = vld [vmem:[%s12896_s15 + $0xe60] ss:$8 sps:$4 sm:$0xff]  }
 0x392   : > { %9070 = vmatprep.subr.bf16.mxu1 %v11094_v28  ;;  %v11185_v28 = vld [vmem:[%s12896_s15 + $0xe74] ss:$8 sps:$4 sm:$0xff]  }
 0x393   : > { %9440 = vmatpush1.bf16.msra.mxu0 %v11089_v27  ;;  %v11182_v27 = vld [vmem:[%s12896_s15 + $0x564] ss:$8 sps:$4 sm:$0xff]  }
 0x394   : > { %9441 = vmatprep.subr.bf16.mxu0 %v11097_v29  ;;  %v11180_v29 = vld [vmem:[%s12896_s15 + $0x560] ss:$8 sps:$4 sm:$0xff]  }
 0x395   : > { %9071 = vmatpush1.bf16.msra.mxu1 %v11092_v30  ;;  %v11183_v30 = vld [vmem:[%s12896_s15 + $0xe70] ss:$8 sps:$4 sm:$0xff]  }
 0x396   : > { %9072 = vmatprep.subr.bf16.mxu1 %v11100_v32  ;;  %v11191_v32 = vld [vmem:[%s12896_s15 + $0xe84] ss:$8 sps:$4 sm:$0xff]  }
 0x397   : > { %9442 = vmatpush1.bf16.msra.mxu0 %v11095_v31  ;;  %v11188_v31 = vld [vmem:[%s12896_s15 + $0x574] ss:$8 sps:$4 sm:$0xff]  }
 0x398   : > { %9443 = vmatprep.subr.bf16.mxu0 %v11103_v33  ;;  %v11186_v33 = vld [vmem:[%s12896_s15 + $0x570] ss:$8 sps:$4 sm:$0xff]  }
 0x399   : > { %9073 = vmatpush1.bf16.msra.mxu1 %v11098_v34  ;;  %v11189_v34 = vld [vmem:[%s12896_s15 + $0xe80] ss:$8 sps:$4 sm:$0xff]  }
 0x39a   : > { %9074 = vmatprep.subr.bf16.mxu1 %v11106_v36  ;;  %v11197_v36 = vld [vmem:[%s12896_s15 + $0xe94] ss:$8 sps:$4 sm:$0xff]  }
 0x39b   : > { %9444 = vmatpush1.bf16.msra.mxu0 %v11101_v35  ;;  %v11194_v35 = vld [vmem:[%s12896_s15 + $0x584] ss:$8 sps:$4 sm:$0xff]  }
 0x39c   : > { %9445 = vmatprep.subr.bf16.mxu0 %v11109_v19  ;;  %v11192_v19 = vld [vmem:[%s12896_s15 + $0x580] ss:$8 sps:$4 sm:$0xff]  }
 0x39d   : > { %9075 = vmatpush1.bf16.msra.mxu1 %v11104_v37  ;;  %v11195_v37 = vld [vmem:[%s12896_s15 + $0xe90] ss:$8 sps:$4 sm:$0xff]  }
 0x39e   : > { %9076 = vmatprep.subr.bf16.mxu1 %v11112_v39  ;;  %v11203_v39 = vld [vmem:[%s12896_s15 + $0xea4] ss:$8 sps:$4 sm:$0xff]  }
 0x39f   : > { %9446 = vmatpush1.bf16.msra.mxu0 %v11107_v38  ;;  %v11200_v38 = vld [vmem:[%s12896_s15 + $0x594] ss:$8 sps:$4 sm:$0xff]  }
 0x3a0   : > { %9447 = vmatprep.subr.bf16.mxu0 %v11115_v21  ;;  %v11198_v21 = vld [vmem:[%s12896_s15 + $0x590] ss:$8 sps:$4 sm:$0xff]  }
 0x3a1   : > { %9077 = vmatpush1.bf16.msra.mxu1 %v11110_v41  ;;  %v11201_v41 = vld [vmem:[%s12896_s15 + $0xea0] ss:$8 sps:$4 sm:$0xff]  }
 0x3a2   : > { %9078 = vmatprep.subr.bf16.mxu1 %v11118_v43  ;;  %v11209_v43 = vld [vmem:[%s12896_s15 + $0xeb4] ss:$8 sps:$4 sm:$0xff]  }
 0x3a3   : > { %9448 = vmatpush1.bf16.msra.mxu0 %v11113_v42  ;;  %v11206_v42 = vld [vmem:[%s12896_s15 + $0x5a4] ss:$8 sps:$4 sm:$0xff]  }
 0x3a4   : > { %9449 = vmatprep.subr.bf16.mxu0 %v11121_v45  ;;  %v11204_v45 = vld [vmem:[%s12896_s15 + $0x5a0] ss:$8 sps:$4 sm:$0xff]  }
 0x3a5   : > { %9079 = vmatpush1.bf16.msra.mxu1 %v11116_v47  ;;  %v11207_v47 = vld [vmem:[%s12896_s15 + $0xeb0] ss:$8 sps:$4 sm:$0xff]  }
 0x3a6   : > { %9080 = vmatprep.subr.bf16.mxu1 %v11124_v50  ;;  %v11215_v50 = vld [vmem:[%s12896_s15 + $0xec4] ss:$8 sps:$4 sm:$0xff]  }
 0x3a7   : > { %9450 = vmatpush1.bf16.msra.mxu0 %v11119_v48  ;;  %v11212_v48 = vld [vmem:[%s12896_s15 + $0x5b4] ss:$8 sps:$4 sm:$0xff]  }
 0x3a8   : > { %9451 = vmatprep.subr.bf16.mxu0 %v11127_v51  ;;  %v11210_v51 = vld [vmem:[%s12896_s15 + $0x5b0] ss:$8 sps:$4 sm:$0xff]  }
 0x3a9   : > { %9081 = vmatpush1.bf16.msra.mxu1 %v11122_v40  ;;  %v11213_v40 = vld [vmem:[%s12896_s15 + $0xec0] ss:$8 sps:$4 sm:$0xff]  }
 0x3aa   : > { %9082 = vmatprep.subr.bf16.mxu1 %v11130_v54  ;;  %v11221_v54 = vld [vmem:[%s12896_s15 + $0xed4] ss:$8 sps:$4 sm:$0xff]  }
 0x3ab   : > { %9452 = vmatpush1.bf16.msra.mxu0 %v11125_v53  ;;  %v11218_v53 = vld [vmem:[%s12896_s15 + $0x5c4] ss:$8 sps:$4 sm:$0xff]  }
 0x3ac   : > { %9453 = vmatprep.subr.bf16.mxu0 %v11133_v55  ;;  %v11216_v55 = vld [vmem:[%s12896_s15 + $0x5c0] ss:$8 sps:$4 sm:$0xff]  }
 0x3ad   : > { %9083 = vmatpush1.bf16.msra.mxu1 %v11128_v56  ;;  %v11219_v56 = vld [vmem:[%s12896_s15 + $0xed0] ss:$8 sps:$4 sm:$0xff]  }
 0x3ae   : > { %9084 = vmatprep.subr.bf16.mxu1 %v11136_v58  ;;  %v11227_v58 = vld [vmem:[%s12896_s15 + $0xee4] ss:$8 sps:$4 sm:$0xff]  }
 0x3af   : > { %9454 = vmatpush1.bf16.msra.mxu0 %v11131_v57  ;;  %v11224_v57 = vld [vmem:[%s12896_s15 + $0x5d4] ss:$8 sps:$4 sm:$0xff]  }
 0x3b0   : > { %9464 = vmatprep.subr.bf16.mxu0 %v11141_v59  ;;  %v11225_v59 = vld [vmem:[%s12896_s15 + $0xee0] ss:$8 sps:$4 sm:$0xff]  }
 0x3b1   : > { %9085 = vmatpush1.bf16.msra.mxu1 %v11134_v46  ;;  %v11222_v46 = vld [vmem:[%s12896_s15 + $0x5d0] ss:$8 sps:$4 sm:$0xff]  }
 0x3b2   : > { %9456 = vmatmul.mubr.bf16.vlgmr.msra.gmra.mrb[0].mxu0 %v9912_v61  ;;  %9095 = vmatprep.subr.bf16.mxu1 %v11146_v63  ;;  %v11230_v61 = vld [vmem:[%s12896_s15 + $0x5e4] ss:$8 sps:$4 sm:$0xff]   ;;  %v11228_v63 = vld [vmem:[%s12896_s15 + $0x5e0] ss:$8 sps:$4 sm:$0xff]  }
 0x3b3   : > { %9465 = vmatpush1.bf16.msra.mxu0 %v11139_v62  ;;  %9496 = vmatprep.mubr.bf16.mxu0 %v9915_v1  ;;  %v11233_v62 = vld [vmem:[%s12896_s15 + $0xef4] ss:$8 sps:$4 sm:$0xff]  }
 0x3b4   : > { %9466 = vmatprep.subr.bf16.mxu0 %v11149_v0  ;;  %9087 = vmatmul.mubr.bf16.vlgmr.msra.gmra.mrb[0].mxu1 %v9894_v52  ;;  %v11231_v0 = vld [vmem:[%s12896_s15 + $0xef0] ss:$8 sps:$4 sm:$0xff]   ;;  %v11236_v1 = vld [vmem:[%s12896_s15 + $0x5f4] ss:$8 sps:$4 sm:$0xff]   ;;  %v11241_v52 = vld [vmem:[%s12896_s15 + $0xf04] ss:$8 sps:$4 sm:$0xff]  }
 0x3b5   : > { %9096 = vmatpush1.bf16.msra.mxu1 %v11144_v2  ;;  %9127 = vmatprep.mubr.bf16.mxu1 %v9897_v3  ;;  %v13380_v2 = vld [vmem:[%s13666_s0 + $0x78] sm:$0xff] }
 0x3b6   : > { %9097 = vmatprep.subr.bf16.mxu1 %v11152_v5  ;;  %v11234_v3 = vld [vmem:[%s12896_s15 + $0x5f0] ss:$8 sps:$4 sm:$0xff]   ;;  %v11239_v5 = vld [vmem:[%s12896_s15 + $0xf00] ss:$8 sps:$4 sm:$0xff]  }
 0x3b7   : > { %9467 = vmatpush1.bf16.msra.mxu0 %v11147_v4  ;;  %v9914_v4 = vcombine.low %v13299_v60, %v13299_v60  ;;  %v9896_v60 = vcombine.low %v13308_v49, %v13308_v49  ;;  %v11250_v49 = vld [vmem:[%s12896_s15 + $0x610] ss:$8 sps:$4 sm:$0xff]  }
 0x3b8   : > { %9468 = vmatprep.subr.bf16.mxu0 %v11155_v6  ;;  %v11246_v6 = vld [vmem:[%s12896_s15 + $0x604] ss:$8 sps:$4 sm:$0xff]  }
 0x3b9   : > { %9098 = vmatpush1.bf16.msra.mxu1 %v11150_v44  ;;  %v13390_v44 = vld [vmem:[%s13666_s0 + $0x30] sm:$0xff] }
 0x3ba   : > { %9099 = vmatprep.subr.bf16.mxu1 %v11158_v8  ;;  %v9917_v8 = vcombine.high %v13380_v2, %v13380_v2 }
 0x3bb   : > { %9469 = vmatpush1.bf16.msra.mxu0 %v11153_v7  ;;  %v11249_v7 = vld [vmem:[%s12896_s15 + $0xf14] ss:$8 sps:$4 sm:$0xff]  }
 0x3bc   : > { %9470 = vmatprep.subr.bf16.mxu0 %v11161_v9  ;;  %v11244_v9 = vld [vmem:[%s12896_s15 + $0x600] ss:$8 sps:$4 sm:$0xff]  }
 0x3bd   : > { %9100 = vmatpush1.bf16.msra.mxu1 %v11156_v10  ;;  %v9899_v10 = vcombine.high %v13390_v44, %v13390_v44 }
 0x3be   : > { %9101 = vmatprep.subr.bf16.mxu1 %v11164_v12  ;;  %v11252_v12 = vld [vmem:[%s12896_s15 + $0x614] ss:$8 sps:$4 sm:$0xff]  }
 0x3bf   : > { %9471 = vmatpush1.bf16.msra.mxu0 %v11159_v11  ;;  %v11247_v11 = vld [vmem:[%s12896_s15 + $0xf10] ss:$8 sps:$4 sm:$0xff]  }
 0x3c0   : > { %9472 = vmatprep.subr.bf16.mxu0 %v11167_v13  ;;  %v11255_v13 = vld [vmem:[%s12896_s15 + $0xf24] ss:$8 sps:$4 sm:$0xff]  }
 0x3c1   : > { %9102 = vmatpush1.bf16.msra.mxu1 %v11162_v14  ;;  %v11253_v14 = vld [vmem:[%s12896_s15 + $0xf20] ss:$8 sps:$4 sm:$0xff]  }
 0x3c2   : > { %9103 = vmatprep.subr.bf16.mxu1 %v11170_v16  ;;  %v11261_v16 = vld [vmem:[%s12896_s15 + $0xf34] ss:$8 sps:$4 sm:$0xff]  }
 0x3c3   : > { %9473 = vmatpush1.bf16.msra.mxu0 %v11165_v15  ;;  %v11258_v15 = vld [vmem:[%s12896_s15 + $0x624] ss:$8 sps:$4 sm:$0xff]  }
 0x3c4   : > { %9474 = vmatprep.subr.bf16.mxu0 %v11173_v17  ;;  %v11256_v17 = vld [vmem:[%s12896_s15 + $0x620] ss:$8 sps:$4 sm:$0xff]  }
 0x3c5   : > { %9104 = vmatpush1.bf16.msra.mxu1 %v11168_v20  ;;  %v11259_v20 = vld [vmem:[%s12896_s15 + $0xf30] ss:$8 sps:$4 sm:$0xff]  }
 0x3c6   : > { %9105 = vmatprep.subr.bf16.mxu1 %v11176_v23  ;;  %v11267_v23 = vld [vmem:[%s12896_s15 + $0xf44] ss:$8 sps:$4 sm:$0xff]  }
 0x3c7   : > { %9475 = vmatpush1.bf16.msra.mxu0 %v11171_v22  ;;  %v11264_v22 = vld [vmem:[%s12896_s15 + $0x634] ss:$8 sps:$4 sm:$0xff]  }
 0x3c8   : > { %9476 = vmatprep.subr.bf16.mxu0 %v11179_v24  ;;  %v11262_v24 = vld [vmem:[%s12896_s15 + $0x630] ss:$8 sps:$4 sm:$0xff]  }
 0x3c9   : > { %9106 = vmatpush1.bf16.msra.mxu1 %v11174_v25  ;;  %v11265_v25 = vld [vmem:[%s12896_s15 + $0xf40] ss:$8 sps:$4 sm:$0xff]  }
 0x3ca   : > { %9107 = vmatprep.subr.bf16.mxu1 %v11182_v27  ;;  %v11273_v27 = vld [vmem:[%s12896_s15 + $0xf54] ss:$8 sps:$4 sm:$0xff]  }
 0x3cb   : > { %9477 = vmatpush1.bf16.msra.mxu0 %v11177_v26  ;;  %v11270_v26 = vld [vmem:[%s12896_s15 + $0x644] ss:$8 sps:$4 sm:$0xff]  }
 0x3cc   : > { %9478 = vmatprep.subr.bf16.mxu0 %v11185_v28  ;;  %v11268_v28 = vld [vmem:[%s12896_s15 + $0x640] ss:$8 sps:$4 sm:$0xff]  }
 0x3cd   : > { %9108 = vmatpush1.bf16.msra.mxu1 %v11180_v29  ;;  %v11271_v29 = vld [vmem:[%s12896_s15 + $0xf50] ss:$8 sps:$4 sm:$0xff]  }
 0x3ce   : > { %9109 = vmatprep.subr.bf16.mxu1 %v11188_v31  ;;  %v11279_v31 = vld [vmem:[%s12896_s15 + $0xf64] ss:$8 sps:$4 sm:$0xff]  }
 0x3cf   : > { %9479 = vmatpush1.bf16.msra.mxu0 %v11183_v30  ;;  %v11276_v30 = vld [vmem:[%s12896_s15 + $0x654] ss:$8 sps:$4 sm:$0xff]  }
 0x3d0   : > { %9480 = vmatprep.subr.bf16.mxu0 %v11191_v32  ;;  %v11274_v32 = vld [vmem:[%s12896_s15 + $0x650] ss:$8 sps:$4 sm:$0xff]  }
 0x3d1   : > { %9110 = vmatpush1.bf16.msra.mxu1 %v11186_v33  ;;  %v11277_v33 = vld [vmem:[%s12896_s15 + $0xf60] ss:$8 sps:$4 sm:$0xff]  }
 0x3d2   : > { %9111 = vmatprep.subr.bf16.mxu1 %v11194_v35  ;;  %v11285_v35 = vld [vmem:[%s12896_s15 + $0xf74] ss:$8 sps:$4 sm:$0xff]  }
 0x3d3   : > { %9481 = vmatpush1.bf16.msra.mxu0 %v11189_v34  ;;  %v11282_v34 = vld [vmem:[%s12896_s15 + $0x664] ss:$8 sps:$4 sm:$0xff]  }
 0x3d4   : > { %9482 = vmatprep.subr.bf16.mxu0 %v11197_v36  ;;  %v11280_v36 = vld [vmem:[%s12896_s15 + $0x660] ss:$8 sps:$4 sm:$0xff]  }
 0x3d5   : > { %9112 = vmatpush1.bf16.msra.mxu1 %v11192_v19  ;;  %v11283_v19 = vld [vmem:[%s12896_s15 + $0xf70] ss:$8 sps:$4 sm:$0xff]  }
 0x3d6   : > { %9113 = vmatprep.subr.bf16.mxu1 %v11200_v38  ;;  %v11291_v38 = vld [vmem:[%s12896_s15 + $0xf84] ss:$8 sps:$4 sm:$0xff]  }
 0x3d7   : > { %9483 = vmatpush1.bf16.msra.mxu0 %v11195_v37  ;;  %v11288_v37 = vld [vmem:[%s12896_s15 + $0x674] ss:$8 sps:$4 sm:$0xff]  }
 0x3d8   : > { %9484 = vmatprep.subr.bf16.mxu0 %v11203_v39  ;;  %v11286_v39 = vld [vmem:[%s12896_s15 + $0x670] ss:$8 sps:$4 sm:$0xff]  }
 0x3d9   : > { %9114 = vmatpush1.bf16.msra.mxu1 %v11198_v21  ;;  %v11289_v21 = vld [vmem:[%s12896_s15 + $0xf80] ss:$8 sps:$4 sm:$0xff]  }
 0x3da   : > { %9115 = vmatprep.subr.bf16.mxu1 %v11206_v42  ;;  %v11297_v42 = vld [vmem:[%s12896_s15 + $0xf94] ss:$8 sps:$4 sm:$0xff]  }
 0x3db   : > { %9485 = vmatpush1.bf16.msra.mxu0 %v11201_v41  ;;  %v11294_v41 = vld [vmem:[%s12896_s15 + $0x684] ss:$8 sps:$4 sm:$0xff]  }
 0x3dc   : > { %9486 = vmatprep.subr.bf16.mxu0 %v11209_v43  ;;  %v11292_v43 = vld [vmem:[%s12896_s15 + $0x680] ss:$8 sps:$4 sm:$0xff]  }
 0x3dd   : > { %9116 = vmatpush1.bf16.msra.mxu1 %v11204_v45  ;;  %v11295_v45 = vld [vmem:[%s12896_s15 + $0xf90] ss:$8 sps:$4 sm:$0xff]  }
 0x3de   : > { %9117 = vmatprep.subr.bf16.mxu1 %v11212_v48  ;;  %v11303_v48 = vld [vmem:[%s12896_s15 + $0xfa4] ss:$8 sps:$4 sm:$0xff]  }
 0x3df   : > { %9487 = vmatpush1.bf16.msra.mxu0 %v11207_v47  ;;  %v11300_v47 = vld [vmem:[%s12896_s15 + $0x694] ss:$8 sps:$4 sm:$0xff]  }
 0x3e0   : > { %9488 = vmatprep.subr.bf16.mxu0 %v11215_v50  ;;  %v11298_v50 = vld [vmem:[%s12896_s15 + $0x690] ss:$8 sps:$4 sm:$0xff]  }
 0x3e1   : > { %9118 = vmatpush1.bf16.msra.mxu1 %v11210_v51  ;;  %v11301_v51 = vld [vmem:[%s12896_s15 + $0xfa0] ss:$8 sps:$4 sm:$0xff]  }
 0x3e2   : > { %9119 = vmatprep.subr.bf16.mxu1 %v11218_v53  ;;  %v11309_v53 = vld [vmem:[%s12896_s15 + $0xfb4] ss:$8 sps:$4 sm:$0xff]  }
 0x3e3   : > { %9489 = vmatpush1.bf16.msra.mxu0 %v11213_v40  ;;  %v11306_v40 = vld [vmem:[%s12896_s15 + $0x6a4] ss:$8 sps:$4 sm:$0xff]  }
 0x3e4   : > { %9490 = vmatprep.subr.bf16.mxu0 %v11221_v54  ;;  %v11304_v54 = vld [vmem:[%s12896_s15 + $0x6a0] ss:$8 sps:$4 sm:$0xff]  }
 0x3e5   : > { %9120 = vmatpush1.bf16.msra.mxu1 %v11216_v55  ;;  %v11307_v55 = vld [vmem:[%s12896_s15 + $0xfb0] ss:$8 sps:$4 sm:$0xff]  }
 0x3e6   : > { %9121 = vmatprep.subr.bf16.mxu1 %v11224_v57  ;;  %v11315_v57 = vld [vmem:[%s12896_s15 + $0xfc4] ss:$8 sps:$4 sm:$0xff]  }
 0x3e7   : > { %9491 = vmatpush1.bf16.msra.mxu0 %v11219_v56  ;;  %v11312_v56 = vld [vmem:[%s12896_s15 + $0x6b4] ss:$8 sps:$4 sm:$0xff]  }
 0x3e8   : > { %9492 = vmatprep.subr.bf16.mxu0 %v11227_v58  ;;  %v11310_v58 = vld [vmem:[%s12896_s15 + $0x6b0] ss:$8 sps:$4 sm:$0xff]  }
 0x3e9   : > { %9122 = vmatpush1.bf16.msra.mxu1 %v11222_v46  ;;  %v11313_v46 = vld [vmem:[%s12896_s15 + $0xfc0] ss:$8 sps:$4 sm:$0xff]  }
 0x3ea   : > { %9123 = vmatprep.subr.bf16.mxu1 %v11230_v61  ;;  %v11321_v61 = vld [vmem:[%s12896_s15 + $0xfd4] ss:$8 sps:$4 sm:$0xff]  }
 0x3eb   : > { %9493 = vmatpush1.bf16.msra.mxu0 %v11225_v59  ;;  %v11318_v59 = vld [vmem:[%s12896_s15 + $0x6c4] ss:$8 sps:$4 sm:$0xff]  }
 0x3ec   : > { %9494 = vmatprep.subr.bf16.mxu0 %v11233_v62  ;;  %v11316_v62 = vld [vmem:[%s12896_s15 + $0x6c0] ss:$8 sps:$4 sm:$0xff]  }
 0x3ed   : > { %9124 = vmatpush1.bf16.msra.mxu1 %v11228_v63  ;;  %v11319_v63 = vld [vmem:[%s12896_s15 + $0xfd0] ss:$8 sps:$4 sm:$0xff]  }
 0x3ee   : > { %9125 = vmatprep.subr.bf16.mxu1 %v11236_v1  ;;  %v11327_v1 = vld [vmem:[%s12896_s15 + $0xfe4] ss:$8 sps:$4 sm:$0xff]  }
 0x3ef   : > { %9495 = vmatpush1.bf16.msra.mxu0 %v11231_v0  ;;  %v11324_v0 = vld [vmem:[%s12896_s15 + $0x6d4] ss:$8 sps:$4 sm:$0xff]  }
 0x3f0   : > { %9505 = vmatprep.subr.bf16.mxu0 %v11241_v52  ;;  %v11322_v52 = vld [vmem:[%s12896_s15 + $0x6d0] ss:$8 sps:$4 sm:$0xff]  }
 0x3f1   : > { %9126 = vmatpush1.bf16.msra.mxu1 %v11234_v3  ;;  %v11325_v3 = vld [vmem:[%s12896_s15 + $0xfe0] ss:$8 sps:$4 sm:$0xff]  }
 0x3f2   : > { %9497 = vmatmul.mubr.bf16.vlgmr.msra.gmra.mrb[0].mxu0 %v9914_v4  ;;  %9136 = vmatprep.subr.bf16.mxu1 %v11246_v6  ;;  %v11330_v4 = vld [vmem:[%s12896_s15 + $0x6e4] ss:$8 sps:$4 sm:$0xff]   ;;  %v11328_v6 = vld [vmem:[%s12896_s15 + $0x6e0] ss:$8 sps:$4 sm:$0xff]  }
 0x3f3   : > { %9506 = vmatpush1.bf16.msra.mxu0 %v11239_v5  ;;  %9537 = vmatprep.mubr.bf16.mxu0 %v9917_v8  ;;  %v11333_v5 = vld [vmem:[%s12896_s15 + $0xff4] ss:$8 sps:$4 sm:$0xff]  }
 0x3f4   : > { %9507 = vmatprep.subr.bf16.mxu0 %v11249_v7  ;;  %9128 = vmatmul.mubr.bf16.vlgmr.msra.gmra.mrb[0].mxu1 %v9896_v60  ;;  %v11331_v7 = vld [vmem:[%s12896_s15 + $0xff0] ss:$8 sps:$4 sm:$0xff]   ;;  %v11336_v8 = vld [vmem:[%s12896_s15 + $0x6f4] ss:$8 sps:$4 sm:$0xff]   ;;  %v11341_v60 = vld [vmem:[%s12896_s15 + $0x1004] ss:$8 sps:$4 sm:$0xff]  }
 0x3f5   : > { %9137 = vmatpush1.bf16.msra.mxu1 %v11244_v9  ;;  %9168 = vmatprep.mubr.bf16.mxu1 %v9899_v10  ;;  %v13462_v9 = vld [vmem:[%s13666_s0 + $0x80] sm:$0xff]  ;;  %v11334_v10 = vld [vmem:[%s12896_s15 + $0x6f0] ss:$8 sps:$4 sm:$0xff]  }
 0x3f6   : > { %9138 = vmatprep.subr.bf16.mxu1 %v11252_v12  ;;  %v11339_v12 = vld [vmem:[%s12896_s15 + $0x1000] ss:$8 sps:$4 sm:$0xff]  }
 0x3f7   : > { %9508 = vmatpush1.bf16.msra.mxu0 %v11247_v11  ;;  %v9916_v11 = vcombine.low %v13380_v2, %v13380_v2  ;;  %v9898_v2 = vcombine.low %v13390_v44, %v13390_v44  ;;  %v11350_v44 = vld [vmem:[%s12896_s15 + $0x710] ss:$8 sps:$4 sm:$0xff]  }
 0x3f8   : > { %9509 = vmatprep.subr.bf16.mxu0 %v11255_v13  ;;  %v11346_v13 = vld [vmem:[%s12896_s15 + $0x704] ss:$8 sps:$4 sm:$0xff]  }
 0x3f9   : > { %9139 = vmatpush1.bf16.msra.mxu1 %v11250_v49  ;;  %v13472_v49 = vld [vmem:[%s13666_s0 + $0x38] sm:$0xff] }
 0x3fa   : > { %9140 = vmatprep.subr.bf16.mxu1 %v11258_v15  ;;  %v9919_v15 = vcombine.high %v13462_v9, %v13462_v9 }
 0x3fb   : > { %9510 = vmatpush1.bf16.msra.mxu0 %v11253_v14  ;;  %v11349_v14 = vld [vmem:[%s12896_s15 + $0x1014] ss:$8 sps:$4 sm:$0xff]  }
 0x3fc   : > { %9511 = vmatprep.subr.bf16.mxu0 %v11261_v16  ;;  %v11344_v16 = vld [vmem:[%s12896_s15 + $0x700] ss:$8 sps:$4 sm:$0xff]  }
 0x3fd   : > { %9141 = vmatpush1.bf16.msra.mxu1 %v11256_v17  ;;  %v9901_v17 = vcombine.high %v13472_v49, %v13472_v49 }
 0x3fe   : > { %9142 = vmatprep.subr.bf16.mxu1 %v11264_v22  ;;  %v11352_v22 = vld [vmem:[%s12896_s15 + $0x714] ss:$8 sps:$4 sm:$0xff]  }
 0x3ff   : > { %9512 = vmatpush1.bf16.msra.mxu0 %v11259_v20  ;;  %v11347_v20 = vld [vmem:[%s12896_s15 + $0x1010] ss:$8 sps:$4 sm:$0xff]  }
 0x400   : > { %9513 = vmatprep.subr.bf16.mxu0 %v11267_v23  ;;  %v11355_v23 = vld [vmem:[%s12896_s15 + $0x1024] ss:$8 sps:$4 sm:$0xff]  }
 0x401   : > { %9143 = vmatpush1.bf16.msra.mxu1 %v11262_v24  ;;  %v11353_v24 = vld [vmem:[%s12896_s15 + $0x1020] ss:$8 sps:$4 sm:$0xff]  }
 0x402   : > { %9144 = vmatprep.subr.bf16.mxu1 %v11270_v26  ;;  %v11361_v26 = vld [vmem:[%s12896_s15 + $0x1034] ss:$8 sps:$4 sm:$0xff]  }
 0x403   : > { %9514 = vmatpush1.bf16.msra.mxu0 %v11265_v25  ;;  %v11358_v25 = vld [vmem:[%s12896_s15 + $0x724] ss:$8 sps:$4 sm:$0xff]  }
 0x404   : > { %9515 = vmatprep.subr.bf16.mxu0 %v11273_v27  ;;  %v11356_v27 = vld [vmem:[%s12896_s15 + $0x720] ss:$8 sps:$4 sm:$0xff]  }
 0x405   : > { %9145 = vmatpush1.bf16.msra.mxu1 %v11268_v28  ;;  %v11359_v28 = vld [vmem:[%s12896_s15 + $0x1030] ss:$8 sps:$4 sm:$0xff]  }
 0x406   : > { %9146 = vmatprep.subr.bf16.mxu1 %v11276_v30  ;;  %v11367_v30 = vld [vmem:[%s12896_s15 + $0x1044] ss:$8 sps:$4 sm:$0xff]  }
 0x407   : > { %9516 = vmatpush1.bf16.msra.mxu0 %v11271_v29  ;;  %v11364_v29 = vld [vmem:[%s12896_s15 + $0x734] ss:$8 sps:$4 sm:$0xff]  }
 0x408   : > { %9517 = vmatprep.subr.bf16.mxu0 %v11279_v31  ;;  %v11362_v31 = vld [vmem:[%s12896_s15 + $0x730] ss:$8 sps:$4 sm:$0xff]  }
 0x409   : > { %9147 = vmatpush1.bf16.msra.mxu1 %v11274_v32  ;;  %v11365_v32 = vld [vmem:[%s12896_s15 + $0x1040] ss:$8 sps:$4 sm:$0xff]  }
 0x40a   : > { %9148 = vmatprep.subr.bf16.mxu1 %v11282_v34  ;;  %v11373_v34 = vld [vmem:[%s12896_s15 + $0x1054] ss:$8 sps:$4 sm:$0xff]  }
 0x40b   : > { %9518 = vmatpush1.bf16.msra.mxu0 %v11277_v33  ;;  %v11370_v33 = vld [vmem:[%s12896_s15 + $0x744] ss:$8 sps:$4 sm:$0xff]  }
 0x40c   : > { %9519 = vmatprep.subr.bf16.mxu0 %v11285_v35  ;;  %v11368_v35 = vld [vmem:[%s12896_s15 + $0x740] ss:$8 sps:$4 sm:$0xff]  }
 0x40d   : > { %9149 = vmatpush1.bf16.msra.mxu1 %v11280_v36  ;;  %v11371_v36 = vld [vmem:[%s12896_s15 + $0x1050] ss:$8 sps:$4 sm:$0xff]  }
 0x40e   : > { %9150 = vmatprep.subr.bf16.mxu1 %v11288_v37  ;;  %v11379_v37 = vld [vmem:[%s12896_s15 + $0x1064] ss:$8 sps:$4 sm:$0xff]  }
 0x40f   : > { %9520 = vmatpush1.bf16.msra.mxu0 %v11283_v19  ;;  %v11376_v19 = vld [vmem:[%s12896_s15 + $0x754] ss:$8 sps:$4 sm:$0xff]  }
 0x410   : > { %9521 = vmatprep.subr.bf16.mxu0 %v11291_v38  ;;  %v11374_v38 = vld [vmem:[%s12896_s15 + $0x750] ss:$8 sps:$4 sm:$0xff]  }
 0x411   : > { %9151 = vmatpush1.bf16.msra.mxu1 %v11286_v39  ;;  %v11377_v39 = vld [vmem:[%s12896_s15 + $0x1060] ss:$8 sps:$4 sm:$0xff]  }
 0x412   : > { %9152 = vmatprep.subr.bf16.mxu1 %v11294_v41  ;;  %v11385_v41 = vld [vmem:[%s12896_s15 + $0x1074] ss:$8 sps:$4 sm:$0xff]  }
 0x413   : > { %9522 = vmatpush1.bf16.msra.mxu0 %v11289_v21  ;;  %v11382_v21 = vld [vmem:[%s12896_s15 + $0x764] ss:$8 sps:$4 sm:$0xff]  }
 0x414   : > { %9523 = vmatprep.subr.bf16.mxu0 %v11297_v42  ;;  %v11380_v42 = vld [vmem:[%s12896_s15 + $0x760] ss:$8 sps:$4 sm:$0xff]  }
 0x415   : > { %9153 = vmatpush1.bf16.msra.mxu1 %v11292_v43  ;;  %v11383_v43 = vld [vmem:[%s12896_s15 + $0x1070] ss:$8 sps:$4 sm:$0xff]  }
 0x416   : > { %9154 = vmatprep.subr.bf16.mxu1 %v11300_v47  ;;  %v11391_v47 = vld [vmem:[%s12896_s15 + $0x1084] ss:$8 sps:$4 sm:$0xff]  }
 0x417   : > { %9524 = vmatpush1.bf16.msra.mxu0 %v11295_v45  ;;  %v11388_v45 = vld [vmem:[%s12896_s15 + $0x774] ss:$8 sps:$4 sm:$0xff]  }
 0x418   : > { %9525 = vmatprep.subr.bf16.mxu0 %v11303_v48  ;;  %v11386_v48 = vld [vmem:[%s12896_s15 + $0x770] ss:$8 sps:$4 sm:$0xff]  }
 0x419   : > { %9155 = vmatpush1.bf16.msra.mxu1 %v11298_v50  ;;  %v11389_v50 = vld [vmem:[%s12896_s15 + $0x1080] ss:$8 sps:$4 sm:$0xff]  }
 0x41a   : > { %9156 = vmatprep.subr.bf16.mxu1 %v11306_v40  ;;  %v11397_v40 = vld [vmem:[%s12896_s15 + $0x1094] ss:$8 sps:$4 sm:$0xff]  }
 0x41b   : > { %9526 = vmatpush1.bf16.msra.mxu0 %v11301_v51  ;;  %v11394_v51 = vld [vmem:[%s12896_s15 + $0x784] ss:$8 sps:$4 sm:$0xff]  }
 0x41c   : > { %9527 = vmatprep.subr.bf16.mxu0 %v11309_v53  ;;  %v11392_v53 = vld [vmem:[%s12896_s15 + $0x780] ss:$8 sps:$4 sm:$0xff]  }
 0x41d   : > { %9157 = vmatpush1.bf16.msra.mxu1 %v11304_v54  ;;  %v11395_v54 = vld [vmem:[%s12896_s15 + $0x1090] ss:$8 sps:$4 sm:$0xff]  }
 0x41e   : > { %9158 = vmatprep.subr.bf16.mxu1 %v11312_v56  ;;  %v11403_v56 = vld [vmem:[%s12896_s15 + $0x10a4] ss:$8 sps:$4 sm:$0xff]  }
 0x41f   : > { %9528 = vmatpush1.bf16.msra.mxu0 %v11307_v55  ;;  %v11400_v55 = vld [vmem:[%s12896_s15 + $0x794] ss:$8 sps:$4 sm:$0xff]  }
 0x420   : > { %9529 = vmatprep.subr.bf16.mxu0 %v11315_v57  ;;  %v11398_v57 = vld [vmem:[%s12896_s15 + $0x790] ss:$8 sps:$4 sm:$0xff]  }
 0x421   : > { %9159 = vmatpush1.bf16.msra.mxu1 %v11310_v58  ;;  %v11401_v58 = vld [vmem:[%s12896_s15 + $0x10a0] ss:$8 sps:$4 sm:$0xff]  }
 0x422   : > { %9160 = vmatprep.subr.bf16.mxu1 %v11318_v59  ;;  %v11409_v59 = vld [vmem:[%s12896_s15 + $0x10b4] ss:$8 sps:$4 sm:$0xff]  }
 0x423   : > { %9530 = vmatpush1.bf16.msra.mxu0 %v11313_v46  ;;  %v11406_v46 = vld [vmem:[%s12896_s15 + $0x7a4] ss:$8 sps:$4 sm:$0xff]  }
 0x424   : > { %9531 = vmatprep.subr.bf16.mxu0 %v11321_v61  ;;  %v11404_v61 = vld [vmem:[%s12896_s15 + $0x7a0] ss:$8 sps:$4 sm:$0xff]  }
 0x425   : > { %9161 = vmatpush1.bf16.msra.mxu1 %v11316_v62  ;;  %v11407_v62 = vld [vmem:[%s12896_s15 + $0x10b0] ss:$8 sps:$4 sm:$0xff]  }
 0x426   : > { %9162 = vmatprep.subr.bf16.mxu1 %v11324_v0  ;;  %v11415_v0 = vld [vmem:[%s12896_s15 + $0x10c4] ss:$8 sps:$4 sm:$0xff]  }
 0x427   : > { %9532 = vmatpush1.bf16.msra.mxu0 %v11319_v63  ;;  %v11412_v63 = vld [vmem:[%s12896_s15 + $0x7b4] ss:$8 sps:$4 sm:$0xff]  }
 0x428   : > { %9533 = vmatprep.subr.bf16.mxu0 %v11327_v1  ;;  %v11410_v1 = vld [vmem:[%s12896_s15 + $0x7b0] ss:$8 sps:$4 sm:$0xff]  }
 0x429   : > { %9163 = vmatpush1.bf16.msra.mxu1 %v11322_v52  ;;  %v11413_v52 = vld [vmem:[%s12896_s15 + $0x10c0] ss:$8 sps:$4 sm:$0xff]  }
 0x42a   : > { %9164 = vmatprep.subr.bf16.mxu1 %v11330_v4  ;;  %v11421_v4 = vld [vmem:[%s12896_s15 + $0x10d4] ss:$8 sps:$4 sm:$0xff]  }
 0x42b   : > { %9534 = vmatpush1.bf16.msra.mxu0 %v11325_v3  ;;  %v11418_v3 = vld [vmem:[%s12896_s15 + $0x7c4] ss:$8 sps:$4 sm:$0xff]  }
 0x42c   : > { %9535 = vmatprep.subr.bf16.mxu0 %v11333_v5  ;;  %v11416_v5 = vld [vmem:[%s12896_s15 + $0x7c0] ss:$8 sps:$4 sm:$0xff]  }
 0x42d   : > { %9165 = vmatpush1.bf16.msra.mxu1 %v11328_v6  ;;  %v11419_v6 = vld [vmem:[%s12896_s15 + $0x10d0] ss:$8 sps:$4 sm:$0xff]  }
 0x42e   : > { %9166 = vmatprep.subr.bf16.mxu1 %v11336_v8  ;;  %v11427_v8 = vld [vmem:[%s12896_s15 + $0x10e4] ss:$8 sps:$4 sm:$0xff]  }
 0x42f   : > { %9536 = vmatpush1.bf16.msra.mxu0 %v11331_v7  ;;  %v11424_v7 = vld [vmem:[%s12896_s15 + $0x7d4] ss:$8 sps:$4 sm:$0xff]  }
 0x430   : > { %9546 = vmatprep.subr.bf16.mxu0 %v11341_v60  ;;  %v11422_v60 = vld [vmem:[%s12896_s15 + $0x7d0] ss:$8 sps:$4 sm:$0xff]  }
 0x431   : > { %9167 = vmatpush1.bf16.msra.mxu1 %v11334_v10  ;;  %v11425_v10 = vld [vmem:[%s12896_s15 + $0x10e0] ss:$8 sps:$4 sm:$0xff]  }
 0x432   : > { %9538 = vmatmul.mubr.bf16.vlgmr.msra.gmra.mrb[0].mxu0 %v9916_v11  ;;  %9177 = vmatprep.subr.bf16.mxu1 %v11346_v13  ;;  %v11430_v11 = vld [vmem:[%s12896_s15 + $0x7e4] ss:$8 sps:$4 sm:$0xff]   ;;  %v11428_v13 = vld [vmem:[%s12896_s15 + $0x7e0] ss:$8 sps:$4 sm:$0xff]  }
 0x433   : > { %9547 = vmatpush1.bf16.msra.mxu0 %v11339_v12  ;;  %9578 = vmatprep.mubr.bf16.mxu0 %v9919_v15  ;;  %v11433_v12 = vld [vmem:[%s12896_s15 + $0x10f4] ss:$8 sps:$4 sm:$0xff]  }
 0x434   : > { %9548 = vmatprep.subr.bf16.mxu0 %v11349_v14  ;;  %9169 = vmatmul.mubr.bf16.vlgmr.msra.gmra.mrb[0].mxu1 %v9898_v2  ;;  %v11431_v14 = vld [vmem:[%s12896_s15 + $0x10f0] ss:$8 sps:$4 sm:$0xff]   ;;  %v11436_v15 = vld [vmem:[%s12896_s15 + $0x7f4] ss:$8 sps:$4 sm:$0xff]   ;;  %v11441_v2 = vld [vmem:[%s12896_s15 + $0x1104] ss:$8 sps:$4 sm:$0xff]  }
 0x435   : > { %9178 = vmatpush1.bf16.msra.mxu1 %v11344_v16  ;;  %9209 = vmatprep.mubr.bf16.mxu1 %v9901_v17  ;;  %v13544_v16 = vld [vmem:[%s13666_s0 + $0x88] sm:$0xff]  ;;  %v11434_v17 = vld [vmem:[%s12896_s15 + $0x7f0] ss:$8 sps:$4 sm:$0xff]  }
 0x436   : > { %9179 = vmatprep.subr.bf16.mxu1 %v11352_v22  ;;  %v11439_v22 = vld [vmem:[%s12896_s15 + $0x1100] ss:$8 sps:$4 sm:$0xff]  }
 0x437   : > { %9549 = vmatpush1.bf16.msra.mxu0 %v11347_v20  ;;  %v9918_v20 = vcombine.low %v13462_v9, %v13462_v9  ;;  %v9900_v9 = vcombine.low %v13472_v49, %v13472_v49  ;;  %v11450_v49 = vld [vmem:[%s12896_s15 + $0x810] ss:$8 sps:$4 sm:$0xff]  }
 0x438   : > { %9550 = vmatprep.subr.bf16.mxu0 %v11355_v23  ;;  %v11446_v23 = vld [vmem:[%s12896_s15 + $0x804] ss:$8 sps:$4 sm:$0xff]  }
 0x439   : > { %9180 = vmatpush1.bf16.msra.mxu1 %v11350_v44  ;;  %v13554_v44 = vld [vmem:[%s13666_s0 + $0x40] sm:$0xff] }
 0x43a   : > { %9181 = vmatprep.subr.bf16.mxu1 %v11358_v25  ;;  %v9921_v25 = vcombine.high %v13544_v16, %v13544_v16 }
 0x43b   : > { %9551 = vmatpush1.bf16.msra.mxu0 %v11353_v24  ;;  %v11449_v24 = vld [vmem:[%s12896_s15 + $0x1114] ss:$8 sps:$4 sm:$0xff]  }
 0x43c   : > { %9552 = vmatprep.subr.bf16.mxu0 %v11361_v26  ;;  %v11444_v26 = vld [vmem:[%s12896_s15 + $0x800] ss:$8 sps:$4 sm:$0xff]  }
 0x43d   : > { %9182 = vmatpush1.bf16.msra.mxu1 %v11356_v27  ;;  %v9903_v27 = vcombine.high %v13554_v44, %v13554_v44 }
 0x43e   : > { %9183 = vmatprep.subr.bf16.mxu1 %v11364_v29  ;;  %v11452_v29 = vld [vmem:[%s12896_s15 + $0x814] ss:$8 sps:$4 sm:$0xff]  }
 0x43f   : > { %9553 = vmatpush1.bf16.msra.mxu0 %v11359_v28  ;;  %v11447_v28 = vld [vmem:[%s12896_s15 + $0x1110] ss:$8 sps:$4 sm:$0xff]  }
 0x440   : > { %9554 = vmatprep.subr.bf16.mxu0 %v11367_v30  ;;  %v11455_v30 = vld [vmem:[%s12896_s15 + $0x1124] ss:$8 sps:$4 sm:$0xff]  }
 0x441   : > { %9184 = vmatpush1.bf16.msra.mxu1 %v11362_v31  ;;  %v11453_v31 = vld [vmem:[%s12896_s15 + $0x1120] ss:$8 sps:$4 sm:$0xff]  }
 0x442   : > { %9185 = vmatprep.subr.bf16.mxu1 %v11370_v33  ;;  %v11461_v33 = vld [vmem:[%s12896_s15 + $0x1134] ss:$8 sps:$4 sm:$0xff]  }
 0x443   : > { %9555 = vmatpush1.bf16.msra.mxu0 %v11365_v32  ;;  %v11458_v32 = vld [vmem:[%s12896_s15 + $0x824] ss:$8 sps:$4 sm:$0xff]  }
 0x444   : > { %9556 = vmatprep.subr.bf16.mxu0 %v11373_v34  ;;  %v11456_v34 = vld [vmem:[%s12896_s15 + $0x820] ss:$8 sps:$4 sm:$0xff]  }
 0x445   : > { %9186 = vmatpush1.bf16.msra.mxu1 %v11368_v35  ;;  %v11459_v35 = vld [vmem:[%s12896_s15 + $0x1130] ss:$8 sps:$4 sm:$0xff]  }
 0x446   : > { %9187 = vmatprep.subr.bf16.mxu1 %v11376_v19  ;;  %v11467_v19 = vld [vmem:[%s12896_s15 + $0x1144] ss:$8 sps:$4 sm:$0xff]  }
 0x447   : > { %9557 = vmatpush1.bf16.msra.mxu0 %v11371_v36  ;;  %v11464_v36 = vld [vmem:[%s12896_s15 + $0x834] ss:$8 sps:$4 sm:$0xff]  }
 0x448   : > { %9558 = vmatprep.subr.bf16.mxu0 %v11379_v37  ;;  %v11462_v37 = vld [vmem:[%s12896_s15 + $0x830] ss:$8 sps:$4 sm:$0xff]  }
 0x449   : > { %9188 = vmatpush1.bf16.msra.mxu1 %v11374_v38  ;;  %v11465_v38 = vld [vmem:[%s12896_s15 + $0x1140] ss:$8 sps:$4 sm:$0xff]  }
 0x44a   : > { %9189 = vmatprep.subr.bf16.mxu1 %v11382_v21  ;;  %v11473_v21 = vld [vmem:[%s12896_s15 + $0x1154] ss:$8 sps:$4 sm:$0xff]  }
 0x44b   : > { %9559 = vmatpush1.bf16.msra.mxu0 %v11377_v39  ;;  %v11470_v39 = vld [vmem:[%s12896_s15 + $0x844] ss:$8 sps:$4 sm:$0xff]  }
 0x44c   : > { %9560 = vmatprep.subr.bf16.mxu0 %v11385_v41  ;;  %v11468_v41 = vld [vmem:[%s12896_s15 + $0x840] ss:$8 sps:$4 sm:$0xff]  }
 0x44d   : > { %9190 = vmatpush1.bf16.msra.mxu1 %v11380_v42  ;;  %v11471_v42 = vld [vmem:[%s12896_s15 + $0x1150] ss:$8 sps:$4 sm:$0xff]  }
 0x44e   : > { %9191 = vmatprep.subr.bf16.mxu1 %v11388_v45  ;;  %v11479_v45 = vld [vmem:[%s12896_s15 + $0x1164] ss:$8 sps:$4 sm:$0xff]  }
 0x44f   : > { %9561 = vmatpush1.bf16.msra.mxu0 %v11383_v43  ;;  %v11476_v43 = vld [vmem:[%s12896_s15 + $0x854] ss:$8 sps:$4 sm:$0xff]  }
 0x450   : > { %9562 = vmatprep.subr.bf16.mxu0 %v11391_v47  ;;  %v11474_v47 = vld [vmem:[%s12896_s15 + $0x850] ss:$8 sps:$4 sm:$0xff]  }
 0x451   : > { %9192 = vmatpush1.bf16.msra.mxu1 %v11386_v48  ;;  %v11477_v48 = vld [vmem:[%s12896_s15 + $0x1160] ss:$8 sps:$4 sm:$0xff]  }
 0x452   : > { %9193 = vmatprep.subr.bf16.mxu1 %v11394_v51  ;;  %v11485_v51 = vld [vmem:[%s12896_s15 + $0x1174] ss:$8 sps:$4 sm:$0xff]  }
 0x453   : > { %9563 = vmatpush1.bf16.msra.mxu0 %v11389_v50  ;;  %v11482_v50 = vld [vmem:[%s12896_s15 + $0x864] ss:$8 sps:$4 sm:$0xff]  }
 0x454   : > { %9564 = vmatprep.subr.bf16.mxu0 %v11397_v40  ;;  %v11480_v40 = vld [vmem:[%s12896_s15 + $0x860] ss:$8 sps:$4 sm:$0xff]  }
 0x455   : > { %9194 = vmatpush1.bf16.msra.mxu1 %v11392_v53  ;;  %v11483_v53 = vld [vmem:[%s12896_s15 + $0x1170] ss:$8 sps:$4 sm:$0xff]  }
 0x456   : > { %9195 = vmatprep.subr.bf16.mxu1 %v11400_v55  ;;  %v11491_v55 = vld [vmem:[%s12896_s15 + $0x1184] ss:$8 sps:$4 sm:$0xff]  }
 0x457   : > { %9565 = vmatpush1.bf16.msra.mxu0 %v11395_v54  ;;  %v11488_v54 = vld [vmem:[%s12896_s15 + $0x874] ss:$8 sps:$4 sm:$0xff]  }
 0x458   : > { %9566 = vmatprep.subr.bf16.mxu0 %v11403_v56  ;;  %v11486_v56 = vld [vmem:[%s12896_s15 + $0x870] ss:$8 sps:$4 sm:$0xff]  }
 0x459   : > { %9196 = vmatpush1.bf16.msra.mxu1 %v11398_v57  ;;  %v11489_v57 = vld [vmem:[%s12896_s15 + $0x1180] ss:$8 sps:$4 sm:$0xff]  }
 0x45a   : > { %9197 = vmatprep.subr.bf16.mxu1 %v11406_v46  ;;  %v11497_v46 = vld [vmem:[%s12896_s15 + $0x1194] ss:$8 sps:$4 sm:$0xff]  }
 0x45b   : > { %9567 = vmatpush1.bf16.msra.mxu0 %v11401_v58  ;;  %v11494_v58 = vld [vmem:[%s12896_s15 + $0x884] ss:$8 sps:$4 sm:$0xff]  }
 0x45c   : > { %9568 = vmatprep.subr.bf16.mxu0 %v11409_v59  ;;  %v11492_v59 = vld [vmem:[%s12896_s15 + $0x880] ss:$8 sps:$4 sm:$0xff]  }
 0x45d   : > { %9198 = vmatpush1.bf16.msra.mxu1 %v11404_v61  ;;  %v11495_v61 = vld [vmem:[%s12896_s15 + $0x1190] ss:$8 sps:$4 sm:$0xff]  }
 0x45e   : > { %9199 = vmatprep.subr.bf16.mxu1 %v11412_v63  ;;  %v11503_v63 = vld [vmem:[%s12896_s15 + $0x11a4] ss:$8 sps:$4 sm:$0xff]  }
 0x45f   : > { %9569 = vmatpush1.bf16.msra.mxu0 %v11407_v62  ;;  %v11500_v62 = vld [vmem:[%s12896_s15 + $0x894] ss:$8 sps:$4 sm:$0xff]  }
 0x460   : > { %9570 = vmatprep.subr.bf16.mxu0 %v11415_v0  ;;  %v11498_v0 = vld [vmem:[%s12896_s15 + $0x890] ss:$8 sps:$4 sm:$0xff]  }
 0x461   : > { %9200 = vmatpush1.bf16.msra.mxu1 %v11410_v1  ;;  %v11501_v1 = vld [vmem:[%s12896_s15 + $0x11a0] ss:$8 sps:$4 sm:$0xff]  }
 0x462   : > { %9201 = vmatprep.subr.bf16.mxu1 %v11418_v3  ;;  %v11509_v3 = vld [vmem:[%s12896_s15 + $0x11b4] ss:$8 sps:$4 sm:$0xff]  }
 0x463   : > { %9571 = vmatpush1.bf16.msra.mxu0 %v11413_v52  ;;  %v11506_v52 = vld [vmem:[%s12896_s15 + $0x8a4] ss:$8 sps:$4 sm:$0xff]  }
 0x464   : > { %9572 = vmatprep.subr.bf16.mxu0 %v11421_v4  ;;  %v11504_v4 = vld [vmem:[%s12896_s15 + $0x8a0] ss:$8 sps:$4 sm:$0xff]  }
 0x465   : > { %9202 = vmatpush1.bf16.msra.mxu1 %v11416_v5  ;;  %v11507_v5 = vld [vmem:[%s12896_s15 + $0x11b0] ss:$8 sps:$4 sm:$0xff]  }
 0x466   : > { %9203 = vmatprep.subr.bf16.mxu1 %v11424_v7  ;;  %v11515_v7 = vld [vmem:[%s12896_s15 + $0x11c4] ss:$8 sps:$4 sm:$0xff]  }
 0x467   : > { %9573 = vmatpush1.bf16.msra.mxu0 %v11419_v6  ;;  %v11512_v6 = vld [vmem:[%s12896_s15 + $0x8b4] ss:$8 sps:$4 sm:$0xff]  }
 0x468   : > { %9574 = vmatprep.subr.bf16.mxu0 %v11427_v8  ;;  %v11510_v8 = vld [vmem:[%s12896_s15 + $0x8b0] ss:$8 sps:$4 sm:$0xff]  }
 0x469   : > { %9204 = vmatpush1.bf16.msra.mxu1 %v11422_v60  ;;  %v11513_v60 = vld [vmem:[%s12896_s15 + $0x11c0] ss:$8 sps:$4 sm:$0xff]  }
 0x46a   : > { %9205 = vmatprep.subr.bf16.mxu1 %v11430_v11  ;;  %v11521_v11 = vld [vmem:[%s12896_s15 + $0x11d4] ss:$8 sps:$4 sm:$0xff]  }
 0x46b   : > { %9575 = vmatpush1.bf16.msra.mxu0 %v11425_v10  ;;  %v11518_v10 = vld [vmem:[%s12896_s15 + $0x8c4] ss:$8 sps:$4 sm:$0xff]  }
 0x46c   : > { %9576 = vmatprep.subr.bf16.mxu0 %v11433_v12  ;;  %v11516_v12 = vld [vmem:[%s12896_s15 + $0x8c0] ss:$8 sps:$4 sm:$0xff]  }
 0x46d   : > { %9206 = vmatpush1.bf16.msra.mxu1 %v11428_v13  ;;  %v11519_v13 = vld [vmem:[%s12896_s15 + $0x11d0] ss:$8 sps:$4 sm:$0xff]  }
 0x46e   : > { %9207 = vmatprep.subr.bf16.mxu1 %v11436_v15  ;;  %v11527_v15 = vld [vmem:[%s12896_s15 + $0x11e4] ss:$8 sps:$4 sm:$0xff]  }
 0x46f   : > { %9577 = vmatpush1.bf16.msra.mxu0 %v11431_v14  ;;  %v11524_v14 = vld [vmem:[%s12896_s15 + $0x8d4] ss:$8 sps:$4 sm:$0xff]  }
 0x470   : > { %9587 = vmatprep.subr.bf16.mxu0 %v11441_v2  ;;  %v11522_v2 = vld [vmem:[%s12896_s15 + $0x8d0] ss:$8 sps:$4 sm:$0xff]  }
 0x471   : > { %9208 = vmatpush1.bf16.msra.mxu1 %v11434_v17  ;;  %v11525_v17 = vld [vmem:[%s12896_s15 + $0x11e0] ss:$8 sps:$4 sm:$0xff]  }
 0x472   : > { %9579 = vmatmul.mubr.bf16.vlgmr.msra.gmra.mrb[0].mxu0 %v9918_v20  ;;  %9218 = vmatprep.subr.bf16.mxu1 %v11446_v23  ;;  %v11530_v20 = vld [vmem:[%s12896_s15 + $0x8e4] ss:$8 sps:$4 sm:$0xff]   ;;  %v11528_v23 = vld [vmem:[%s12896_s15 + $0x8e0] ss:$8 sps:$4 sm:$0xff]  }
 0x473   : > { %9588 = vmatpush1.bf16.msra.mxu0 %v11439_v22  ;;  %9619 = vmatprep.mubr.bf16.mxu0 %v9921_v25  ;;  %v11533_v22 = vld [vmem:[%s12896_s15 + $0x11f4] ss:$8 sps:$4 sm:$0xff]  }
 0x474   : > { %9589 = vmatprep.subr.bf16.mxu0 %v11449_v24  ;;  %9210 = vmatmul.mubr.bf16.vlgmr.msra.gmra.mrb[0].mxu1 %v9900_v9  ;;  %v11531_v24 = vld [vmem:[%s12896_s15 + $0x11f0] ss:$8 sps:$4 sm:$0xff]   ;;  %v11536_v25 = vld [vmem:[%s12896_s15 + $0x8f4] ss:$8 sps:$4 sm:$0xff]   ;;  %v11541_v9 = vld [vmem:[%s12896_s15 + $0x1204] ss:$8 sps:$4 sm:$0xff]  }
 0x475   : > { %9219 = vmatpush1.bf16.msra.mxu1 %v11444_v26  ;;  %9250 = vmatprep.mubr.bf16.mxu1 %v9903_v27  ;;  %v11534_v26 = vld [vmem:[%s12896_s15 + $0x8f0] ss:$8 sps:$4 sm:$0xff]   ;;  %v9920_v27 = vcombine.low %v13544_v16, %v13544_v16  ;;  %v11549_v16 = vld [vmem:[%s12896_s15 + $0x1224] ss:$8 sps:$4 sm:$0xff]  }
 0x476   : > { %9220 = vmatprep.subr.bf16.mxu1 %v11452_v29  ;;  %v11546_v29 = vld [vmem:[%s12896_s15 + $0x1214] ss:$8 sps:$4 sm:$0xff]  }
 0x477   : > { %9590 = vmatpush1.bf16.msra.mxu0 %v11447_v28  ;;  %v11539_v28 = vld [vmem:[%s12896_s15 + $0x1200] ss:$8 sps:$4 sm:$0xff]  }
 0x478   : > { %9591 = vmatprep.subr.bf16.mxu0 %v11455_v30  ;;  %v9902_v30 = vcombine.low %v13554_v44, %v13554_v44  ;;  %v11550_v44 = vld [vmem:[%s12896_s15 + $0x1230] ss:$8 sps:$4 sm:$0xff]  }
 0x479   : > { %9221 = vmatpush1.bf16.msra.mxu1 %v11450_v49  ;;  %v11544_v49 = vld [vmem:[%s12896_s15 + $0x1210] ss:$8 sps:$4 sm:$0xff]  }
 0x47a   : > { %9222 = vmatprep.subr.bf16.mxu1 %v11458_v32  ;;  %v11552_v32 = vld [vmem:[%s12896_s15 + $0x1234] ss:$8 sps:$4 sm:$0xff]  }
 0x47b   : > { %9592 = vmatpush1.bf16.msra.mxu0 %v11453_v31  ;;  %v11547_v31 = vld [vmem:[%s12896_s15 + $0x1220] ss:$8 sps:$4 sm:$0xff]  }
 0x47c   : > { %9593 = vmatprep.subr.bf16.mxu0 %v11461_v33  ;;  %v11555_v33 = vld [vmem:[%s12896_s15 + $0x1244] ss:$8 sps:$4 sm:$0xff]  }
 0x47d   : > { %9223 = vmatpush1.bf16.msra.mxu1 %v11456_v34  ;;  %v11553_v34 = vld [vmem:[%s12896_s15 + $0x1240] ss:$8 sps:$4 sm:$0xff]  }
 0x47e   : > { %9224 = vmatprep.subr.bf16.mxu1 %v11464_v36  ;;  %v11561_v36 = vld [vmem:[%s12896_s15 + $0x1264] ss:$8 sps:$4 sm:$0xff]  }
 0x47f   : > { %9594 = vmatpush1.bf16.msra.mxu0 %v11459_v35  ;;  %v11556_v35 = vld [vmem:[%s12896_s15 + $0x1250] ss:$8 sps:$4 sm:$0xff]  }
 0x480   : > { %9595 = vmatprep.subr.bf16.mxu0 %v11467_v19  ;;  %v11559_v19 = vld [vmem:[%s12896_s15 + $0x1260] ss:$8 sps:$4 sm:$0xff]  }
 0x481   : > { %9225 = vmatpush1.bf16.msra.mxu1 %v11462_v37  ;;  %v11564_v37 = vld [vmem:[%s12896_s15 + $0x1274] ss:$8 sps:$4 sm:$0xff]  }
 0x482   : > { %9226 = vmatprep.subr.bf16.mxu1 %v11470_v39  ;;  %v11565_v39 = vld [vmem:[%s13666_s0 + $0x90] ss:$0 sps:$4 sm:$0xff]  }
 0x483   : > { %9596 = vmatpush1.bf16.msra.mxu0 %v11465_v38  ;;  %v11562_v38 = vld [vmem:[%s12896_s15 + $0x1270] ss:$8 sps:$4 sm:$0xff]  }
 0x484   : > { %9597 = vmatprep.subr.bf16.mxu0 %v11473_v21 }
 0x485   : > { %9227 = vmatpush1.bf16.msra.mxu1 %v11468_v41 }
 0x486   : > { %9228 = vmatprep.subr.bf16.mxu1 %v11476_v43 }
 0x487   : > { %9598 = vmatpush1.bf16.msra.mxu0 %v11471_v42 }
 0x488   : > { %9599 = vmatprep.subr.bf16.mxu0 %v11479_v45 }
 0x489   : > { %9229 = vmatpush1.bf16.msra.mxu1 %v11474_v47 }
 0x48a   : > { %9230 = vmatprep.subr.bf16.mxu1 %v11482_v50 }
 0x48b   : > { %9600 = vmatpush1.bf16.msra.mxu0 %v11477_v48 }
 0x48c   : > { %9601 = vmatprep.subr.bf16.mxu0 %v11485_v51 }
 0x48d   : > { %9231 = vmatpush1.bf16.msra.mxu1 %v11480_v40 }
 0x48e   : > { %9232 = vmatprep.subr.bf16.mxu1 %v11488_v54 }
 0x48f   : > { %9602 = vmatpush1.bf16.msra.mxu0 %v11483_v53 }
 0x490   : > { %9603 = vmatprep.subr.bf16.mxu0 %v11491_v55 }
 0x491   : > { %9233 = vmatpush1.bf16.msra.mxu1 %v11486_v56 }
 0x492   : > { %9234 = vmatprep.subr.bf16.mxu1 %v11494_v58 }
 0x493   : > { %9604 = vmatpush1.bf16.msra.mxu0 %v11489_v57 }
 0x494   : > { %9605 = vmatprep.subr.bf16.mxu0 %v11497_v46 }
 0x495   : > { %9235 = vmatpush1.bf16.msra.mxu1 %v11492_v59 }
 0x496   : > { %9236 = vmatprep.subr.bf16.mxu1 %v11500_v62 }
 0x497   : > { %9606 = vmatpush1.bf16.msra.mxu0 %v11495_v61 }
 0x498   : > { %9607 = vmatprep.subr.bf16.mxu0 %v11503_v63 }
 0x499   : > { %9237 = vmatpush1.bf16.msra.mxu1 %v11498_v0 }
 0x49a   : > { %9238 = vmatprep.subr.bf16.mxu1 %v11506_v52 }
 0x49b   : > { %9608 = vmatpush1.bf16.msra.mxu0 %v11501_v1 }
 0x49c   : > { %9609 = vmatprep.subr.bf16.mxu0 %v11509_v3 }
 0x49d   : > { %9239 = vmatpush1.bf16.msra.mxu1 %v11504_v4 }
 0x49e   : > { %9240 = vmatprep.subr.bf16.mxu1 %v11512_v6 }
 0x49f   : > { %9610 = vmatpush1.bf16.msra.mxu0 %v11507_v5 }
 0x4a0   : > { %9611 = vmatprep.subr.bf16.mxu0 %v11515_v7 }
 0x4a1   : > { %9241 = vmatpush1.bf16.msra.mxu1 %v11510_v8 }
 0x4a2   : > { %9242 = vmatprep.subr.bf16.mxu1 %v11518_v10 }
 0x4a3   : > { %9612 = vmatpush1.bf16.msra.mxu0 %v11513_v60 }
 0x4a4   : > { %9613 = vmatprep.subr.bf16.mxu0 %v11521_v11 }
 0x4a5   : > { %9243 = vmatpush1.bf16.msra.mxu1 %v11516_v12 }
 0x4a6   : > { %9244 = vmatprep.subr.bf16.mxu1 %v11524_v14 }
 0x4a7   : > { %9614 = vmatpush1.bf16.msra.mxu0 %v11519_v13 }
 0x4a8   : > { %9615 = vmatprep.subr.bf16.mxu0 %v11527_v15 }
 0x4a9   : > { %9245 = vmatpush1.bf16.msra.mxu1 %v11522_v2 }
 0x4aa   : > { %9246 = vmatprep.subr.bf16.mxu1 %v11530_v20 }
 0x4ab   : > { %9616 = vmatpush1.bf16.msra.mxu0 %v11525_v17 }
 0x4ac   : > { %9617 = vmatprep.subr.bf16.mxu0 %v11533_v22 }
 0x4ad   : > { %9247 = vmatpush1.bf16.msra.mxu1 %v11528_v23 }
 0x4ae   : > { %9248 = vmatprep.subr.bf16.mxu1 %v11536_v25 }
 0x4af   : > { %9618 = vmatpush1.bf16.msra.mxu0 %v11531_v24 }
 0x4b0   : > { %9628 = vmatprep.subr.bf16.mxu0 %v11541_v9 }
 0x4b1   : > { %9249 = vmatpush1.bf16.msra.mxu1 %v11534_v26 }
 0x4b2   : > { %9620 = vmatmul.mubr.bf16.vlgmr.msra.gmra.mrb[0].mxu0 %v9920_v27 }
 0x4b3   : > { %9629 = vmatpush1.bf16.msra.mxu0 %v11539_v28  ;;  %9660 = vmatprep.mubr.bf16.mxu0 %v11610_v18  ;;  %v11558_v18 = vld [vmem:[%s12896_s15 + $0x1254] ss:$8 sps:$4 sm:$0xff]   ;;  %s9880_s15 = sshll.u32 %s11600_s17, 1 }
 0x4b4   : > { %9630 = vmatprep.subr.bf16.mxu0 %v11546_v29  ;;  %9251 = vmatmul.mubr.bf16.vlgmr.msra.gmra.mrb[0].mxu1 %v9902_v30  ;;  %p5118_p9 = scmp.lt.s32.totalorder %s9880_s15, 7 }
 0x4b6   : > { %s13679_s15 = smov (!%p5118_p9, %s9880_s15), 7 }
 0x4b7   : > { %9631 = vmatpush1.bf16.msra.mxu0 %v11544_v49  ;;  %s9881_s26 = sshll.u32 %s13679_s15, 2 }
 0x4b8   : > { %9632 = vmatprep.subr.bf16.mxu0 %v11549_v16  ;;  %s5123_s29 = scalar_lea.vmem %s13670_s4, %s9881_s26 }
 0x4bb   : > { %9633 = vmatpush1.bf16.msra.mxu0 %v11547_v31 }
 0x4bc   : > { %9634 = vmatprep.subr.bf16.mxu0 %v11552_v32 }
 0x4bf   : > { %9635 = vmatpush1.bf16.msra.mxu0 %v11550_v44 }
 0x4c0   : > { %9636 = vmatprep.subr.bf16.mxu0 %v11555_v33 }
 0x4c3   : > { %9637 = vmatpush1.bf16.msra.mxu0 %v11553_v34 }
 0x4c4   : > { %9638 = vmatprep.subr.bf16.mxu0 %v11558_v18 }
 0x4c7   : > { %9639 = vmatpush1.bf16.msra.mxu0 %v11556_v35 }
 0x4c8   : > { %9640 = vmatprep.subr.bf16.mxu0 %v11561_v36 }
 0x4cb   : > { %9641 = vmatpush1.bf16.msra.mxu0 %v11559_v19 }
 0x4cc   : > { %9642 = vmatprep.subr.bf16.mxu0 %v11564_v37 }
 0x4cf   : > { %9643 = vmatpush1.bf16.msra.mxu0 %v11562_v38 }
 0x4d2   : > { %9661 = vmatmul.mubr.bf16.vlgmr.msra.gmra.mrb[0].mxu0 %v11565_v39 }
 0x587   : > { %v9252_v21 = vpop.f32.mrb[0].mxu1 }
 0x588   : > { %v9254_v41 = vpop.f32.mrb[1].mxu1 }
 0x589   : > { %v9256_v42 = vpop.f32.mrb[2].mxu1 }
 0x58a   : > { %v9257_v43 = vpop.f32.mrb[3].mxu1 }
 0x5a5   : > { %v9662_v45 = vpop.f32.mrb[0].mxu0 }
 0x5a6   : > { %v10521_v47 = vadd.f32 %v9662_v45, %v9252_v21  ;;  %v9664_v48 = vpop.f32.mrb[1].mxu0 }
 0x5a7   : > { %v10522_v50 = vadd.f32 %v9664_v48, %v9254_v41  ;;  %v9666_v51 = vpop.f32.mrb[2].mxu0 }
 0x5a8   : > { %v9669_v40 = vrot.slane %v10521_v47, 4  ;;  %v9667_v53 = vpop.f32.mrb[3].mxu0 }
 0x5a9   : > { %v9675_v54 = vrot.slane %v10522_v50, 4 }
 0x5aa   : > { %v9670_v55 = vadd.f32 %v10521_v47, %v9669_v40 }
 0x5ab   : > { %v9676_v56 = vadd.f32 %v10522_v50, %v9675_v54 }
 0x5ac   : > { %v9671_v57 = vrot.slane %v9670_v55, 2 }
 0x5ad   : > { %v9677_v58 = vrot.slane %v9676_v56, 2 }
 0x5ae   : > { %v9672_v46 = vadd.f32 %v9671_v57, %v9670_v55 }
 0x5af   : > { %v9678_v59 = vadd.f32 %v9677_v58, %v9676_v56 }
 0x5b0   : > { %v9673_v61 = vrot.slane %v9672_v46, 1 }
 0x5b1   : > { %v9679_v62 = vrot.slane %v9678_v59, 1 }
 0x5b2   : > { %v9674_v63 = vadd.f32 %v9673_v61, %v9672_v46 }
 0x5b3   : > { %v9680_v0 = vadd.f32 %v9679_v62, %v9678_v59 }
 0x5b4   : > { %v9682_v1 = vmul.f32 0.125, %v9674_v63 }
 0x5b5   : > { %v9683_v52 = vmul.f32 0.125, %v9680_v0 }
 0x5b6   : > { %v9684_v3 = vsub.f32 %v10521_v47, %v9682_v1 }
 0x5b7   : > { %v9685_v4 = vsub.f32 %v10522_v50, %v9683_v52 }
 0x5b8   : > { %v9686_v5 = vmul.f32 %v9684_v3, %v9684_v3 }
 0x5b9   : > { %v9687_v6 = vmul.f32 %v9685_v4, %v9685_v4 }
 0x5ba   : > { %v9688_v7 = vrot.slane %v9686_v5, 4 }
 0x5bb   : > { %v9694_v8 = vrot.slane %v9687_v6, 4 }
 0x5bc   : > { %v9689_v60 = vadd.f32 %v9688_v7, %v9686_v5 }
 0x5bd   : > { %v9695_v10 = vadd.f32 %v9694_v8, %v9687_v6 }
 0x5be   : > { %v9690_v11 = vrot.slane %v9689_v60, 2 }
 0x5bf   : > { %v9696_v12 = vrot.slane %v9695_v10, 2 }
 0x5c0   : > { %v9691_v13 = vadd.f32 %v9690_v11, %v9689_v60 }
 0x5c1   : > { %v9697_v14 = vadd.f32 %v9696_v12, %v9695_v10 }
 0x5c2   : > { %v9692_v15 = vrot.slane %v9691_v13, 1 }
 0x5c3   : > { %v9698_v2 = vrot.slane %v9697_v14, 1 }
 0x5c4   : > { %v9693_v17 = vadd.f32 %v9692_v15, %v9691_v13 }
 0x5c5   : > { %v9699_v20 = vadd.f32 %v9698_v2, %v9697_v14 }
 0x5c6   : > { %v9700_v22 = vmul.f32 0.125, %v9693_v17 }
 0x5c7   : > { %v9701_v23 = vmul.f32 0.125, %v9699_v20 }
 0x5c8   : > { %v9702_v24 = vadd.f32 1e-05, %v9700_v22 }
 0x5c9   : > { %v9703_v25 = vadd.f32 1e-05, %v9701_v23 }
 0x5ca   : > { %11566 = vrsqrt.f32 %v9702_v24 }
 0x5cb   : > { %11568 = vrsqrt.f32 %v9703_v25 }
 0x5d4   : > { %v11567_v9 = vpop.eup %11566 }
 0x5d5   : > { %v11569_v26 = vpop.eup %11568  ;;  %v9706_v27 = vmul.f32 %v11567_v9, %v9684_v3 }
 0x5d6   : > { %v9707_v28 = vmul.f32 %v11569_v26, %v9685_v4 }
 0x5d7   : > { %vm9708_vm2 = vcmp.gt.f32.partialorder %v9706_v27, 0.0  ;;  %v9710_v29 = vmul.f32 0.2, %v9706_v27 }
 0x5d8   : > { %vm9709_vm3 = vcmp.gt.f32.partialorder %v9707_v28, 0.0  ;;  %v9711_v30 = vmul.f32 0.2, %v9707_v28 }
 0x5d9   : > { %v9712_v49 = vsel %vm9708_vm2, %v9706_v27, %v9710_v29 }
 0x5da   : > { %v9713_v16 = vsel %vm9709_vm3, %v9707_v28, %v9711_v30 }
 0x5db   : > { %v10520_v31 = vpack.c.bf16 %v9713_v16, %v9712_v49 }
 0x5dd   : > { %9722 = vst [vmem:[%s5123_s29] sm:$0xff] %v10520_v31 }
 0x5de PF: > { %s14_s19 = sadd.s32 1, %s11608_s19   ;;  %s13672_s15 = smov %s11596_s16 }
 0x5df   : > { %p11_p10 = scmp.ge.s32.totalorder %s14_s19, 6   ;;  %s13673_s16 = smov %s11675_s24 }
 0x5e0   : > { %s13674_s17 = smov %s11604_s18  ;;  %s13675_s18 = smov %s13677_s20 }
 0x5e1   :  { %13 = sbr.rel (!%p11_p10) target bundleno = 3 (0x3), region = 181 }

// kernel: discriminator_forward.7
= control target key start
LH: loop header
LB: loop body
LE: loop exit
PB: predicated region body
PF: predicated region fallthrough
CT: control target
= control target key end

     0   :  { %v1054_v0 = vmov 0.0   ;;  %vm167_vm0 = vcmask 1044480   ;;  %vm1055_vm1 = vmmov 0   ;;  %vm163_vm2 = vcmask 80896   ;;  %s1302_s1 = inlined_call_operand.vmem [shape: bf16[1024,1], index: 1, kind: input, shape index: {}]   ;;  %s1303_s3 = inlined_call_operand.vmem [shape: bf16[10,1], index: 3, kind: input, shape index: {}]   ;;  %s1304_s2 = inlined_call_operand.vmem [shape: bf16[8,10], index: 2, kind: input, shape index: {}]   ;;  %s1305_s0 = inlined_call_operand.vmem [shape: bf16[8,1024], index: 0, kind: input, shape index: {}]   ;;  %s1306_s4 = inlined_call_operand.<no memory space> [shape: f32[1,1], index: 4, kind: input, shape index: {}]   ;;  %s1307_s5 = inlined_call_operand.vmem [shape: f32[8,1], index: 5, kind: output, shape index: {}]  }
   0x1   :  { %969 = vmatprep.subr.bf16.mxu0 %v1054_v0  ;;  %v977_v1 = vld [vmem:[%s1302_s1 + $0x40] sm:$0xff]   ;;  %971 = vmatprep.mubr.msk.bf16.mxu0 %vm1055_vm1, %v1054_v0  ;;  %v980_v6 = vld [vmem:[%s1302_s1 + $0x48] sm:$0xff]   ;;  %v984_v10 = vld [vmem:[%s1302_s1 + $0x50] sm:$0xff]   ;;  %vm797_vm3 = vcmask 7168  }
   0x2   :  { %v978_v2 = vld [vmem:[%s1303_s3] sm:$0x1f]   ;;  %881 = vmatprep.subr.bf16.mxu1 %v977_v1  ;;  %v982_v8 = vld [vmem:[%s1302_s1 + $0x8] sm:$0xff]   ;;  %v986_v12 = vld [vmem:[%s1302_s1 + $0x10] sm:$0xff]  }
   0x3   :  { %v979_v3 = vld [vmem:[%s1302_s1] sm:$0xff]   ;;  %v169_v4 = vsel %vm167_vm0, %v978_v2, 0  ;;  %v985_v11 = vld [vmem:[%s1302_s1 + $0xc8] sm:$0xff]   ;;  %v988_v14 = vld [vmem:[%s1302_s1 + $0x58] sm:$0xff]  }
   0x4   :  { %v155_v5 = vld [vmem:[%s1304_s2] sm:$0xf]  ;;  %970 = vmatpush3.bf16.msra.mxu0 %v169_v4  ;;  %882 = vmatpush3.bf16.msra.mxu1 %v979_v3  ;;  %v987_v13 = vld [vmem:[%s1302_s1 + $0x88] sm:$0xff]   ;;  %v989_v15 = vld [vmem:[%s1302_s1 + $0xd0] sm:$0xff]  }
   0x5   :  { %883 = vmatprep.subr.bf16.mxu1 %v980_v6  ;;  %v981_v7 = vld [vmem:[%s1302_s1 + $0xc0] sm:$0xff]   ;;  %v990_v16 = vld [vmem:[%s1302_s1 + $0x18] sm:$0xff]   ;;  %v991_v17 = vld [vmem:[%s1302_s1 + $0x90] sm:$0xff]  }
   0x6   :  { %903 = vmatprep.subr.bf16.mxu0 %v981_v7  ;;  %v983_v9 = vld [vmem:[%s1302_s1 + $0x80] sm:$0xff]   ;;  %v993_v19 = vld [vmem:[%s1302_s1 + $0xd8] sm:$0xff]   ;;  %v996_v22 = vld [vmem:[%s1302_s1 + $0x68] sm:$0xff]  }
   0x7   :  { %972 = vmatmul.mubr.msk.bf16.vlgmr.msra.gmra.mrb[0].mxu0 %vm163_vm2, %v155_v5  ;;  %v992_v18 = vld [vmem:[%s1302_s1 + $0x60] sm:$0xff]   ;;  %v995_v21 = vld [vmem:[%s1302_s1 + $0x98] sm:$0xff]   ;;  %v998_v24 = vld [vmem:[%s1302_s1 + $0x28] sm:$0xff]  }
   0x8   :  { %884 = vmatpush3.bf16.msra.mxu1 %v982_v8  ;;  %904 = vmatpush3.bf16.msra.mxu0 %v983_v9  ;;  %v994_v20 = vld [vmem:[%s1302_s1 + $0x20] sm:$0xff]   ;;  %v1000_v26 = vld [vmem:[%s1302_s1 + $0x70] sm:$0xff]   ;;  %v1001_v27 = vld [vmem:[%s1302_s1 + $0xe8] sm:$0xff]  }
   0x9   :  { %885 = vmatprep.subr.bf16.mxu1 %v984_v10  ;;  %905 = vmatprep.subr.bf16.mxu0 %v985_v11  ;;  %v997_v23 = vld [vmem:[%s1302_s1 + $0xe0] sm:$0xff]   ;;  %v1002_v28 = vld [vmem:[%s1302_s1 + $0x30] sm:$0xff]   ;;  %v1003_v29 = vld [vmem:[%s1302_s1 + $0xa8] sm:$0xff]  }
   0xa   :  { %v999_v25 = vld [vmem:[%s1302_s1 + $0xa0] sm:$0xff]   ;;  %v1004_v30 = vld [vmem:[%s1302_s1 + $0x78] sm:$0xff]   ;;  %v1005_v31 = vld [vmem:[%s1302_s1 + $0xf0] sm:$0xff]  }
   0xb   :  { %v1006_v32 = vld [vmem:[%s1302_s1 + $0x38] sm:$0xff]   ;;  %v1007_v33 = vld [vmem:[%s1302_s1 + $0xb0] sm:$0xff]   ;;  %v23_v34 = vld [vmem:[%s1305_s0] sm:$0xff] }
   0xc   :  { %886 = vmatpush3.bf16.msra.mxu1 %v986_v12  ;;  %906 = vmatpush3.bf16.msra.mxu0 %v987_v13  ;;  %v805_v35 = vcombine.low %v23_v34, %v23_v34  ;;  %v806_v36 = vcombine.high %v23_v34, %v23_v34  ;;  %v1010_v37 = vld [vmem:[%s1302_s1 + $0xf8] sm:$0xff]   ;;  %v1011_v38 = vld [vmem:[%s1302_s1 + $0x140] sm:$0xff]   ;;  %v24_v41 = vld [vmem:[%s1305_s0 + $0x8] sm:$0xff] }
   0xd   :  { %887 = vmatprep.subr.bf16.mxu1 %v988_v14  ;;  %907 = vmatprep.subr.bf16.mxu0 %v989_v15  ;;  %v1012_v39 = vld [vmem:[%s1302_s1 + $0xb8] sm:$0xff]   ;;  %v1013_v40 = vld [vmem:[%s1302_s1 + $0x100] sm:$0xff]   ;;  %v807_v42 = vcombine.low %v24_v41, %v24_v41  ;;  %v808_v43 = vcombine.high %v24_v41, %v24_v41  ;;  %v1016_v44 = vld [vmem:[%s1302_s1 + $0x148] sm:$0xff]  }
   0xe   :  { %655 = vmatprep.mubr.bf16.mxu1 %v806_v36  ;;  %v1017_v45 = vld [vmem:[%s1302_s1 + $0x1c0] sm:$0xff]   ;;  %v1018_v46 = vld [vmem:[%s1302_s1 + $0x108] sm:$0xff]   ;;  %v1020_v48 = vld [vmem:[%s1302_s1 + $0x150] sm:$0xff]  }
   0xf   :  { %695 = vmatprep.mubr.bf16.mxu0 %v808_v43  ;;  %v1019_v47 = vld [vmem:[%s1302_s1 + $0x180] sm:$0xff]   ;;  %v1021_v49 = vld [vmem:[%s1302_s1 + $0x1c8] sm:$0xff]   ;;  %v1022_v50 = vld [vmem:[%s1302_s1 + $0x110] sm:$0xff]  }
  0x10   :  { %888 = vmatpush3.bf16.msra.mxu1 %v990_v16  ;;  %908 = vmatpush3.bf16.msra.mxu0 %v991_v17  ;;  %v1023_v51 = vld [vmem:[%s1302_s1 + $0x188] sm:$0xff]   ;;  %v1024_v52 = vld [vmem:[%s1302_s1 + $0x158] sm:$0xff]   ;;  %v1025_v53 = vld [vmem:[%s1302_s1 + $0x1d0] sm:$0xff]   ;;  %v10_v16 = vstv %s1306_s4 }
  0x11   :  { %889 = vmatprep.subr.bf16.mxu1 %v992_v18  ;;  %909 = vmatprep.subr.bf16.mxu0 %v993_v19  ;;  %v1026_v54 = vld [vmem:[%s1302_s1 + $0x118] sm:$0xff]   ;;  %v1027_v55 = vld [vmem:[%s1302_s1 + $0x190] sm:$0xff]   ;;  %v1028_v56 = vld [vmem:[%s1302_s1 + $0x160] sm:$0xff]   ;;  %11 = vst [vmem:[#allocation2] sm:$0x1] %v10_v16 }
  0x12   :  { %v1029_v57 = vld [vmem:[%s1302_s1 + $0x1d8] sm:$0xff]   ;;  %v1030_v58 = vld [vmem:[%s1302_s1 + $0x120] sm:$0xff]   ;;  %v1032_v60 = vld [vmem:[%s1302_s1 + $0x168] sm:$0xff]  }
  0x13   :  { %v1031_v59 = vld [vmem:[%s1302_s1 + $0x198] sm:$0xff]   ;;  %v1033_v61 = vld [vmem:[%s1302_s1 + $0x1e0] sm:$0xff]   ;;  %v1034_v62 = vld [vmem:[%s1302_s1 + $0x128] sm:$0xff]  }
  0x14   :  { %890 = vmatpush3.bf16.msra.mxu1 %v994_v20  ;;  %910 = vmatpush3.bf16.msra.mxu0 %v995_v21  ;;  %v1035_v63 = vld [vmem:[%s1302_s1 + $0x1a0] sm:$0xff]   ;;  %v1036_v0 = vld [vmem:[%s1302_s1 + $0x170] sm:$0xff]   ;;  %v1037_v1 = vld [vmem:[%s1302_s1 + $0x1e8] sm:$0xff]  }
  0x15   :  { %891 = vmatprep.subr.bf16.mxu1 %v996_v22  ;;  %911 = vmatprep.subr.bf16.mxu0 %v997_v23  ;;  %v1038_v2 = vld [vmem:[%s1302_s1 + $0x130] sm:$0xff]   ;;  %v1039_v3 = vld [vmem:[%s1302_s1 + $0x1a8] sm:$0xff]   ;;  %v1040_v4 = vld [vmem:[%s1302_s1 + $0x178] sm:$0xff]  }
  0x16   :  { %v1041_v5 = vld [vmem:[%s1302_s1 + $0x1f0] sm:$0xff]   ;;  %v1042_v6 = vld [vmem:[%s1302_s1 + $0x138] sm:$0xff]  }
  0x17   :  { %v1043_v7 = vld [vmem:[%s1302_s1 + $0x1b0] sm:$0xff]   ;;  %v1046_v11 = vld [vmem:[%s1302_s1 + $0x1f8] sm:$0xff]  }
  0x18   :  { %892 = vmatpush3.bf16.msra.mxu1 %v998_v24  ;;  %912 = vmatpush3.bf16.msra.mxu0 %v999_v25  ;;  %v25_v8 = vld [vmem:[%s1305_s0 + $0x10] sm:$0xff]  ;;  %v1047_v12 = vld [vmem:[%s1302_s1 + $0x1b8] sm:$0xff]   ;;  %v877_v43 = vld [vmem:[#allocation2] ss:$0 sm:$0xff] }
  0x19   :  { %893 = vmatprep.subr.bf16.mxu1 %v1000_v26  ;;  %913 = vmatprep.subr.bf16.mxu0 %v1001_v27  ;;  %v809_v9 = vcombine.low %v25_v8, %v25_v8  ;;  %v810_v10 = vcombine.high %v25_v8, %v25_v8  ;;  %v26_v13 = vld [vmem:[%s1305_s0 + $0x18] sm:$0xff] }
  0x1a   :  { %v812_v14 = vcombine.high %v26_v13, %v26_v13  ;;  %v811_v15 = vcombine.low %v26_v13, %v26_v13 }
  0x1c   :  { %894 = vmatpush3.bf16.msra.mxu1 %v1002_v28  ;;  %914 = vmatpush3.bf16.msra.mxu0 %v1003_v29 }
  0x1d   :  { %895 = vmatprep.subr.bf16.mxu1 %v1004_v30  ;;  %915 = vmatprep.subr.bf16.mxu0 %v1005_v31 }
  0x20   :  { %896 = vmatpush3.bf16.msra.mxu1 %v1006_v32  ;;  %916 = vmatpush3.bf16.msra.mxu0 %v1007_v33 }
  0x21   :  { %917 = vmatprep.subr.bf16.mxu0 %v1010_v37  ;;  %925 = vmatprep.subr.bf16.mxu1 %v1011_v38 }
  0x23   :  { %656 = vmatmul.mubr.bf16.vlgmr.msra.gmra.mrb[0].mxu1 %v805_v35 }
  0x24   :  { %918 = vmatpush3.bf16.msra.mxu0 %v1012_v39  ;;  %926 = vmatpush3.bf16.msra.mxu1 %v1013_v40 }
  0x25   :  { %927 = vmatprep.subr.bf16.mxu1 %v1016_v44  ;;  %947 = vmatprep.subr.bf16.mxu0 %v1017_v45 }
  0x26   :  { %735 = vmatprep.mubr.bf16.mxu1 %v810_v10 }
  0x27   :  { %696 = vmatmul.mubr.bf16.vlgmr.msra.gmra.mrb[4].mxu0 %v807_v42 }
  0x28   :  { %928 = vmatpush3.bf16.msra.mxu1 %v1018_v46  ;;  %948 = vmatpush3.bf16.msra.mxu0 %v1019_v47 }
  0x29   :  { %929 = vmatprep.subr.bf16.mxu1 %v1020_v48  ;;  %949 = vmatprep.subr.bf16.mxu0 %v1021_v49 }
  0x2a   :  { %775 = vmatprep.mubr.bf16.mxu0 %v812_v14 }
  0x2c   :  { %930 = vmatpush3.bf16.msra.mxu1 %v1022_v50  ;;  %950 = vmatpush3.bf16.msra.mxu0 %v1023_v51 }
  0x2d   :  { %931 = vmatprep.subr.bf16.mxu1 %v1024_v52  ;;  %951 = vmatprep.subr.bf16.mxu0 %v1025_v53 }
  0x30   :  { %932 = vmatpush3.bf16.msra.mxu1 %v1026_v54  ;;  %952 = vmatpush3.bf16.msra.mxu0 %v1027_v55 }
  0x31   :  { %933 = vmatprep.subr.bf16.mxu1 %v1028_v56  ;;  %953 = vmatprep.subr.bf16.mxu0 %v1029_v57 }
  0x34   :  { %934 = vmatpush3.bf16.msra.mxu1 %v1030_v58  ;;  %954 = vmatpush3.bf16.msra.mxu0 %v1031_v59 }
  0x35   :  { %935 = vmatprep.subr.bf16.mxu1 %v1032_v60  ;;  %955 = vmatprep.subr.bf16.mxu0 %v1033_v61 }
  0x38   :  { %936 = vmatpush3.bf16.msra.mxu1 %v1034_v62  ;;  %956 = vmatpush3.bf16.msra.mxu0 %v1035_v63 }
  0x39   :  { %937 = vmatprep.subr.bf16.mxu1 %v1036_v0  ;;  %957 = vmatprep.subr.bf16.mxu0 %v1037_v1 }
  0x3c   :  { %938 = vmatpush3.bf16.msra.mxu1 %v1038_v2  ;;  %958 = vmatpush3.bf16.msra.mxu0 %v1039_v3 }
  0x3d   :  { %939 = vmatprep.subr.bf16.mxu1 %v1040_v4  ;;  %959 = vmatprep.subr.bf16.mxu0 %v1041_v5 }
  0x40   :  { %940 = vmatpush3.bf16.msra.mxu1 %v1042_v6  ;;  %960 = vmatpush3.bf16.msra.mxu0 %v1043_v7 }
  0x41   :  { %961 = vmatprep.subr.bf16.mxu0 %v1046_v11 }
  0x43   :  { %736 = vmatmul.mubr.bf16.vlgmr.msra.gmra.mrb[4].mxu1 %v809_v9 }
  0x44   :  { %962 = vmatpush3.bf16.msra.mxu0 %v1047_v12 }
  0x47   :  { %776 = vmatmul.mubr.bf16.vlgmr.msra.gmra.mrb[8].mxu0 %v811_v15 }
  0xda   :  { %v205_v17 = vpop.f32.mrb[0].mxu0 }
  0xdb   :  { %v973_v18 = vpop.f32.mrb[1].mxu0 }
  0xdc   :  { %v208_v19 = vpop.f32.mrb[2].mxu0 }
  0xdd   :  { %v974_v20 = vpop.f32.mrb[3].mxu0 }
  0xf6   :  { %v897_v21 = vpop.f32.mrb[0].mxu1 }
  0xf7   :  { %v898_v22 = vpop.f32.mrb[1].mxu1 }
  0xf8   :  { %v899_v23 = vadd.f32 %v898_v22, %v897_v21  ;;  %v900_v24 = vpop.f32.mrb[2].mxu1 }
  0xf9   :  { %v901_v25 = vpop.f32.mrb[3].mxu1 }
  0xfa   :  { %v658_v26 = vadd.f32 %v899_v23, %v205_v17  ;;  %v919_v27 = vpop.f32.mrb[4].mxu0 }
  0xfb   :  { %v920_v28 = vpop.f32.mrb[5].mxu0 }
  0xfc   :  { %v921_v29 = vadd.f32 %v920_v28, %v919_v27  ;;  %v922_v30 = vpop.f32.mrb[6].mxu0 }
  0xfd   :  { %v923_v31 = vpop.f32.mrb[7].mxu0 }
  0xfe   :  { %v698_v32 = vadd.f32 %v921_v29, %v658_v26 }
 0x116   :  { %v941_v33 = vpop.f32.mrb[4].mxu1 }
 0x117   :  { %v942_v34 = vpop.f32.mrb[5].mxu1 }
 0x118   :  { %v943_v35 = vadd.f32 %v942_v34, %v941_v33  ;;  %v944_v36 = vpop.f32.mrb[6].mxu1 }
 0x119   :  { %v945_v37 = vpop.f32.mrb[7].mxu1 }
 0x11a   :  { %v738_v38 = vadd.f32 %v943_v35, %v698_v32  ;;  %v963_v39 = vpop.f32.mrb[8].mxu0 }
 0x11b   :  { %v964_v40 = vpop.f32.mrb[9].mxu0 }
 0x11c   :  { %v965_v41 = vadd.f32 %v964_v40, %v963_v39  ;;  %v966_v42 = vpop.f32.mrb[10].mxu0 }
 0x11d   :  { %v967_v44 = vpop.f32.mrb[11].mxu0 }
 0x11e   :  { %v778_v45 = vadd.f32 %v965_v41, %v738_v38 }
 0x120   :  { %v790_v46 = vadd.f32 %v877_v43, %v778_v45 }
 0x122   :  { %v878_v47 = vmul.f32 -1.442695, %v790_v46 }
 0x124   :  { %1050 = vpow2.f32 %v878_v47 }
 0x12e   :  { %v1051_v48 = vpop.eup %1050 }
 0x12f   :  { %v794_v49 = vadd.f32 1.0, %v1051_v48 }
 0x131   :  { %1052 = vrcp.f32 %v794_v49 }
 0x13b   :  { %v1053_v50 = vpop.eup %1052 }
 0x13c   :  { %798 = vst.msk [vmem:[%s1307_s5] sm:$0xff] %vm797_vm3, %v1053_v50 }

</bundles_post_ra>
